<compile_context>
chip_gen: v5e
topology: v5e:2x2
jax: 0.10.0
libtpu: 0.0.40
codegen_flags: <defaults>
</compile_context>

<pallas_src>
import functools

import jax
import jax.numpy as jnp
from jax.experimental import pallas as pl
from jax.experimental.pallas import tpu as pltpu

_F32_MIN = float(jnp.finfo(jnp.float32).min)


# ---------------------------------------------------------------------------
# in-kernel building blocks (operate on VMEM-resident values + weight refs)
# ---------------------------------------------------------------------------
def _lane_roll(x, shift):
    """out[:, l] = x[:, (l - shift) mod L]  (static shift, unambiguous slice+concat)."""
    n = x.shape[-1]
    s = shift % n
    if s == 0:
        return x
    return jnp.concatenate([x[:, n - s:], x[:, :n - s]], axis=1)


def _apply_resblock(x, p):
    """Pre-activation bottleneck residual block on a (d, h*w*C) slab (BN folded into weights)."""
    a = jnp.maximum(x * p["s1"][...] + p["t1"][...], 0.0)                        # BN1 + ReLU
    h1 = jnp.dot(a, p["w1"][...], preferred_element_type=jnp.float32) + p["b1"][...]
    h1 = jnp.maximum(h1, 0.0)                                                    # 1x1x1 + BN2 + ReLU

    # 3x3x3 conv (zero padded) = sum_kd  S_kd @ h1 @ Band_kd
    acc = None
    for kd in range(3):
        shd = jnp.dot(p["sd"][kd], h1, preferred_element_type=jnp.float32)       # d-shift (left)
        term = jnp.dot(shd, p["band"][kd], preferred_element_type=jnp.float32)   # (h,w,c) band (right)
        acc = term if acc is None else acc + term
    h2 = jnp.maximum(acc + p["b2"][...], 0.0)                                    # BN3 + ReLU

    return jnp.dot(h2, p["w3"][...], preferred_element_type=jnp.float32) + x     # 1x1x1 + identity


def _apply_maxpool(x, p, d, h, w, c):
    """MaxPool3d(kernel=3, stride=2, padding=1) on a (d, h*w*C) slab -> (d//2, (h//2)*(w//2)*C)."""
    hwc = h * w * c
    wc = w * c
    h_idx = p["h_idx"][...]
    w_idx = p["w_idx"][...]

    # w direction: max over (w-1, w, w+1), -inf padding at the boundary
    wm = jnp.where(w_idx == 0, _F32_MIN, _lane_roll(x, c))
    wp = jnp.where(w_idx == w - 1, _F32_MIN, _lane_roll(x, -c))
    m = jnp.maximum(jnp.maximum(wm, x), wp)
    # h direction
    hm = jnp.where(h_idx == 0, _F32_MIN, _lane_roll(m, wc))
    hp = jnp.where(h_idx == h - 1, _F32_MIN, _lane_roll(m, -wc))
    m = jnp.maximum(jnp.maximum(hm, m), hp)
    # d direction (sublane axis)
    neg = jnp.full((1, hwc), _F32_MIN, x.dtype)
    dm = jnp.concatenate([neg, m[:-1, :]], axis=0)
    dp = jnp.concatenate([m[1:, :], neg], axis=0)
    m = jnp.maximum(jnp.maximum(dm, m), dp)

    # stride-2 subsample: even d rows / even (h, w) lanes via 0/1-selection matmuls
    m = jnp.dot(p["row_sel"][...], m, preferred_element_type=jnp.float32)
    return jnp.dot(m, p["lane_sel"][...], preferred_element_type=jnp.float32)


def _make_fused_kernel(meta, treedef, n_params):
    c = meta["C"]
    d0, h0, w0 = meta["D"], meta["H"], meta["W"]

    def kernel(*refs):
        x_ref = refs[0]
        prm = jax.tree_util.tree_unflatten(treedef, refs[1:1 + n_params])
        o_ref = refs[1 + n_params]

        x = x_ref[...]                                            # (D, H*W*C) f32

        # trunk branch: residual_block_t applied twice (shared weights)
        trunk = _apply_resblock(x, prm["t"])
        trunk = _apply_resblock(trunk, prm["t"])

        # mask branch
        m = _apply_resblock(x, prm["first_p"])                    # residual_block_first_p
        m = _apply_maxpool(m, prm["pool"], d0, h0, w0, c)         # mpool1
        m = _apply_resblock(m, prm["first_r"])                    # residual_block_first_r
        # TODO(synk): encoder_depth > 1 (encode / encode_r / decode_r + skip adds) is not fused;
        #             only the module's default encoder_depth == 1 path is implemented.
        m = _apply_resblock(m, prm["last_r"])                     # residual_block_last_r

        # trilinear x2 upsample (align_corners=True) as two static interpolation matmuls
        m = jnp.dot(prm["up"]["row"][...], m, preferred_element_type=jnp.float32)
        m = jnp.dot(m, prm["up"]["lane"][...], preferred_element_type=jnp.float32)

        # out_mask_conv (1x1 conv -> 1x1 conv -> sigmoid), then (1 + mask) * trunk
        g = prm["gate"]
        z = jnp.dot(m, g["w1"][...], preferred_element_type=jnp.float32) + g["b1"][...]
        z = jnp.dot(z, g["w2"][...], preferred_element_type=jnp.float32) + g["b2"][...]
        sig = 1.0 / (1.0 + jnp.exp(-z))                           # exact sigmoid
        out = (sig + 1.0) * trunk

        out = _apply_resblock(out, prm["last_p"])                 # residual_block_last_p
        o_ref[...] = out

    return kernel


# ---------------------------------------------------------------------------
# wrapper: one fused pallas_call for the whole forward
# ---------------------------------------------------------------------------
def attention_block_fwd(x, prep, meta):
    c, d, h, w = meta["C"], meta["D"], meta["H"], meta["W"]
    n = x.shape[0]
    hwc = h * w * c

    # NCDHW -> (N, D, H*W*C): rows = d, lanes = (h, w, c)  (lane width >= 128)
    x3 = jnp.transpose(x, (0, 2, 3, 4, 1)).reshape(n, d, hwc)

    flat, treedef = jax.tree_util.tree_flatten(prep)
    kernel = _make_fused_kernel(meta, treedef, len(flat))

    in_specs = [pl.BlockSpec((None, d, hwc), lambda i: (i, 0, 0))]
    for leaf in flat:
        in_specs.append(pl.BlockSpec(leaf.shape, lambda i, nd=leaf.ndim: (0,) * nd))

    out3 = pl.pallas_call(
        kernel,
        out_shape=jax.ShapeDtypeStruct((n, d, hwc), jnp.float32),
        grid=(n,),
        in_specs=in_specs,
        out_specs=pl.BlockSpec((None, d, hwc), lambda i: (i, 0, 0)),
        compiler_params=pltpu.CompilerParams(
            dimension_semantics=("parallel",),               # v7x: 2 TCs split the batch
            vmem_limit_bytes=32 * 1024 * 1024),
    )(x3, *flat)

    out5 = out3.reshape(n, d, h, w, c)
    return jnp.transpose(out5, (0, 4, 1, 2, 3))               # back to NCDHW


# ---------------------------------------------------------------------------
# parameters: raw init + folding / expansion for the fused lane-dense layout
# ---------------------------------------------------------------------------
def init_residual_block(key, c):
    """Pre-activation bottleneck residual block params (BN in eval mode, default stats)."""
    cm = max(c // 4, 1)
    k1, k2, k3 = jax.random.split(key, 3)
    eps = 1e-5
    bn_scale = lambda ch: jnp.full((ch,), 1.0 / jnp.sqrt(1.0 + eps), jnp.float32)
    return {
        "bn1_s": bn_scale(c),  "bn1_t": jnp.zeros((c,),  jnp.float32),
        "bn2_s": bn_scale(cm), "bn2_t": jnp.zeros((cm,), jnp.float32),
        "bn3_s": bn_scale(cm), "bn3_t": jnp.zeros((cm,), jnp.float32),
        "w1": jax.random.normal(k1, (c, cm), jnp.float32) * 0.2,            # 1x1x1, C -> Cm
        "w2": jax.random.normal(k2, (3, 3, 3, cm, cm), jnp.float32) * 0.1,  # 3x3x3, Cm -> Cm
        "w3": jax.random.normal(k3, (cm, c), jnp.float32) * 0.2,            # 1x1x1, Cm -> C
    }


def _prepare_resblock(p, c, d, h, w):
    """Fold BN into the convs and expand weights for the (d, h*w*C) layout."""
    cm = p["w1"].shape[1]
    hw = h * w
    cmp_ = max(cm, -(-128 // hw))            # zero-pad mid channels so lane width >= 128
    hwc, hwcm = hw * c, hw * cmp_
    eye_hw = jnp.eye(hw, dtype=jnp.float32)

    s1 = jnp.tile(p["bn1_s"], hw).reshape(1, hwc)
    t1 = jnp.tile(p["bn1_t"], hw).reshape(1, hwc)

    w1p = jnp.zeros((c, cmp_), jnp.float32).at[:, :cm].set(p["w1"] * p["bn2_s"][None, :])
    w1 = jnp.kron(eye_hw, w1p)                                             # (hwc, hwcm)
    b1 = jnp.tile(jnp.pad(p["bn2_t"], (0, cmp_ - cm)), hw).reshape(1, hwcm)

    # d-direction shift matrices (zero boundary): out row i <- input row i + (kd - 1)
    sd = jnp.stack([jnp.eye(d, k=kd - 1, dtype=jnp.float32) for kd in range(3)])   # (3, d, d)

    # banded (h, w, channel) matrices per kd tap; BN3 scale folded into output channels
    w2 = p["w2"] * p["bn3_s"][None, None, None, None, :]
    w2p = jnp.zeros((3, 3, 3, cmp_, cmp_), jnp.float32).at[:, :, :, :cm, :cm].set(w2)
    bands = []
    for kd in range(3):
        bt = jnp.zeros((hwcm, hwcm), jnp.float32)
        for kh in range(3):
            for kw in range(3):
                bt = bt + jnp.kron(jnp.eye(h, k=1 - kh, dtype=jnp.float32),
                                   jnp.kron(jnp.eye(w, k=1 - kw, dtype=jnp.float32),
                                            w2p[kd, kh, kw]))
        bands.append(bt)
    band = jnp.stack(bands)                                                # (3, hwcm, hwcm)
    b2 = jnp.tile(jnp.pad(p["bn3_t"], (0, cmp_ - cm)), hw).reshape(1, hwcm)

    w3p = jnp.zeros((cmp_, c), jnp.float32).at[:cm, :].set(p["w3"])
    w3 = jnp.kron(eye_hw, w3p)                                             # (hwcm, hwc)
    return {"s1": s1, "t1": t1, "w1": w1, "b1": b1, "sd": sd,
            "band": band, "b2": b2, "w3": w3}


def _prepare_maxpool(c, d, h, w):
    hwc = h * w * c
    lane = jnp.arange(hwc, dtype=jnp.int32).reshape(1, hwc)
    h_idx = lane // (w * c)
    w_idx = (lane // c) % w
    row_sel = jnp.eye(d, dtype=jnp.float32)[::2, :]                        # (d//2, d)
    eh = jnp.eye(h, dtype=jnp.float32)[:, ::2]                             # (h, h//2)
    ew = jnp.eye(w, dtype=jnp.float32)[:, ::2]
    lane_sel = jnp.kron(eh, jnp.kron(ew, jnp.eye(c, dtype=jnp.float32)))   # (hwc, hwc//4)
    return {"h_idx": h_idx, "w_idx": w_idx, "row_sel": row_sel, "lane_sel": lane_sel}


def _interp_matrix(n_in):
    """x2 linear interpolation matrix, align_corners=True (PyTorch trilinear, per axis)."""
    n_out = 2 * n_in
    i = jnp.arange(n_out, dtype=jnp.float32)
    src = i * ((n_in - 1) / (n_out - 1))
    i0 = jnp.floor(src).astype(jnp.int32)
    i1 = jnp.minimum(i0 + 1, n_in - 1)
    wt = src - i0.astype(jnp.float32)
    m = jnp.zeros((n_out, n_in), jnp.float32)
    m = m.at[jnp.arange(n_out), i0].add(1.0 - wt)
    m = m.at[jnp.arange(n_out), i1].add(wt)
    return m


def _prepare_upsample(c, dl, hl, wl):
    row = _interp_matrix(dl)                                               # (2*dl, dl)
    lane = jnp.kron(_interp_matrix(hl).T,
                    jnp.kron(_interp_matrix(wl).T, jnp.eye(c, dtype=jnp.float32)))
    return {"row": row, "lane": lane}                                      # (hl*wl*c, 4*hl*wl*c)


def _prepare_gate(params, c, h, w):
    hw = h * w
    eye_hw = jnp.eye(hw, dtype=jnp.float32)
    return {"w1": jnp.kron(eye_hw, params["om_w1"]),
            "b1": jnp.tile(params["om_b1"], hw).reshape(1, hw * c),
            "w2": jnp.kron(eye_hw, params["om_w2"]),
            "b2": jnp.tile(params["om_b2"], hw).reshape(1, hw * c)}


def prepare_attention_params(params, c, d, h, w, encoder_depth=1):
    if encoder_depth != 1:
        raise NotImplementedError("fused kernel covers the module default encoder_depth=1")
    dl, hl, wl = d // 2, h // 2, w // 2
    return {
        "first_p": _prepare_resblock(params["first_p"], c, d, h, w),
        "t":       _prepare_resblock(params["t"],       c, d, h, w),
        "last_p":  _prepare_resblock(params["last_p"],  c, d, h, w),
        "first_r": _prepare_resblock(params["first_r"], c, dl, hl, wl),
        "last_r":  _prepare_resblock(params["last_r"],  c, dl, hl, wl),
        "pool":    _prepare_maxpool(c, d, h, w),
        "up":      _prepare_upsample(c, dl, hl, wl),
        "gate":    _prepare_gate(params, c, h, w),
    }


if __name__ == "__main__":
    key = jax.random.PRNGKey(0)
    N, C, D, H, W = 2, 8, 8, 8, 8          # input_channels == output_channels == 8
    keys = jax.random.split(key, 13)

    params = {
        "first_p": init_residual_block(keys[0], C),
        "t":       init_residual_block(keys[1], C),
        "first_r": init_residual_block(keys[2], C),
        "last_r":  init_residual_block(keys[6], C),
        "last_p":  init_residual_block(keys[7], C),
        "om_w1": jax.random.normal(keys[8], (C, C), jnp.float32) * 0.2,
        "om_b1": jax.random.normal(keys[9], (C,), jnp.float32) * 0.1,
        "om_w2": jax.random.normal(keys[10], (C, C), jnp.float32) * 0.2,
        "om_b2": jax.random.normal(keys[11], (C,), jnp.float32) * 0.1,
    }

    meta = {"C": C, "D": D, "H": H, "W": W, "encoder_depth": 1}
    prep = prepare_attention_params(params, C, D, H, W, encoder_depth=1)

    x = jax.random.normal(keys[12], (N, C, D, H, W), jnp.float32)

    fwd = jax.jit(functools.partial(attention_block_fwd, meta=meta))
    out = jax.block_until_ready(fwd(x, prep))

    assert out.shape == (N, C, D, H, W), out.shape
    assert bool(jnp.all(jnp.isfinite(out)))
    print("KERNEL_OK")
</pallas_src>

<mosaic_0001>
module attributes {stable_mosaic.version = 11 : i64} {
  func.func @kernel(%arg0: i32, %arg1: memref<1x8x512xf32, #tpu.memory_space<vmem>>, %arg2: memref<1x128xf32, #tpu.memory_space<vmem>>, %arg3: memref<1x128xf32, #tpu.memory_space<vmem>>, %arg4: memref<3x128x128xf32, #tpu.memory_space<vmem>>, %arg5: memref<1x512xf32, #tpu.memory_space<vmem>>, %arg6: memref<3x8x8xf32, #tpu.memory_space<vmem>>, %arg7: memref<1x512xf32, #tpu.memory_space<vmem>>, %arg8: memref<512x128xf32, #tpu.memory_space<vmem>>, %arg9: memref<128x512xf32, #tpu.memory_space<vmem>>, %arg10: memref<1x128xf32, #tpu.memory_space<vmem>>, %arg11: memref<1x128xf32, #tpu.memory_space<vmem>>, %arg12: memref<3x128x128xf32, #tpu.memory_space<vmem>>, %arg13: memref<1x128xf32, #tpu.memory_space<vmem>>, %arg14: memref<3x4x4xf32, #tpu.memory_space<vmem>>, %arg15: memref<1x128xf32, #tpu.memory_space<vmem>>, %arg16: memref<128x128xf32, #tpu.memory_space<vmem>>, %arg17: memref<128x128xf32, #tpu.memory_space<vmem>>, %arg18: memref<1x512xf32, #tpu.memory_space<vmem>>, %arg19: memref<1x512xf32, #tpu.memory_space<vmem>>, %arg20: memref<512x512xf32, #tpu.memory_space<vmem>>, %arg21: memref<512x512xf32, #tpu.memory_space<vmem>>, %arg22: memref<1x128xf32, #tpu.memory_space<vmem>>, %arg23: memref<1x128xf32, #tpu.memory_space<vmem>>, %arg24: memref<3x128x128xf32, #tpu.memory_space<vmem>>, %arg25: memref<1x512xf32, #tpu.memory_space<vmem>>, %arg26: memref<3x8x8xf32, #tpu.memory_space<vmem>>, %arg27: memref<1x512xf32, #tpu.memory_space<vmem>>, %arg28: memref<512x128xf32, #tpu.memory_space<vmem>>, %arg29: memref<128x512xf32, #tpu.memory_space<vmem>>, %arg30: memref<1x128xf32, #tpu.memory_space<vmem>>, %arg31: memref<1x128xf32, #tpu.memory_space<vmem>>, %arg32: memref<3x128x128xf32, #tpu.memory_space<vmem>>, %arg33: memref<1x128xf32, #tpu.memory_space<vmem>>, %arg34: memref<3x4x4xf32, #tpu.memory_space<vmem>>, %arg35: memref<1x128xf32, #tpu.memory_space<vmem>>, %arg36: memref<128x128xf32, #tpu.memory_space<vmem>>, %arg37: memref<128x128xf32, #tpu.memory_space<vmem>>, %arg38: memref<1x512xi32, #tpu.memory_space<vmem>>, %arg39: memref<512x128xf32, #tpu.memory_space<vmem>>, %arg40: memref<4x8xf32, #tpu.memory_space<vmem>>, %arg41: memref<1x512xi32, #tpu.memory_space<vmem>>, %arg42: memref<1x128xf32, #tpu.memory_space<vmem>>, %arg43: memref<1x128xf32, #tpu.memory_space<vmem>>, %arg44: memref<3x128x128xf32, #tpu.memory_space<vmem>>, %arg45: memref<1x512xf32, #tpu.memory_space<vmem>>, %arg46: memref<3x8x8xf32, #tpu.memory_space<vmem>>, %arg47: memref<1x512xf32, #tpu.memory_space<vmem>>, %arg48: memref<512x128xf32, #tpu.memory_space<vmem>>, %arg49: memref<128x512xf32, #tpu.memory_space<vmem>>, %arg50: memref<128x512xf32, #tpu.memory_space<vmem>>, %arg51: memref<8x4xf32, #tpu.memory_space<vmem>>, %arg52: memref<1x8x512xf32, #tpu.memory_space<vmem>>) attributes {dimension_semantics = [#tpu.dimension_semantics<parallel>], iteration_bounds = array<i64: 2>, scalar_prefetch = 0 : i64, scratch_operands = 0 : i64, tpu.core_type = #tpu.core_type<tc>, window_params = [{transform_indices = @transform_0, window_bounds = array<i64: 1, 8, 512>}, {pipeline_mode = #tpu.pipeline_mode<synchronous>, transform_indices = @transform_1, window_bounds = array<i64: 1, 128>}, {pipeline_mode = #tpu.pipeline_mode<synchronous>, transform_indices = @transform_2, window_bounds = array<i64: 1, 128>}, {pipeline_mode = #tpu.pipeline_mode<synchronous>, transform_indices = @transform_3, window_bounds = array<i64: 3, 128, 128>}, {pipeline_mode = #tpu.pipeline_mode<synchronous>, transform_indices = @transform_4, window_bounds = array<i64: 1, 512>}, {pipeline_mode = #tpu.pipeline_mode<synchronous>, transform_indices = @transform_5, window_bounds = array<i64: 3, 8, 8>}, {pipeline_mode = #tpu.pipeline_mode<synchronous>, transform_indices = @transform_6, window_bounds = array<i64: 1, 512>}, {pipeline_mode = #tpu.pipeline_mode<synchronous>, transform_indices = @transform_7, window_bounds = array<i64: 512, 128>}, {pipeline_mode = #tpu.pipeline_mode<synchronous>, transform_indices = @transform_8, window_bounds = array<i64: 128, 512>}, {pipeline_mode = #tpu.pipeline_mode<synchronous>, transform_indices = @transform_9, window_bounds = array<i64: 1, 128>}, {pipeline_mode = #tpu.pipeline_mode<synchronous>, transform_indices = @transform_10, window_bounds = array<i64: 1, 128>}, {pipeline_mode = #tpu.pipeline_mode<synchronous>, transform_indices = @transform_11, window_bounds = array<i64: 3, 128, 128>}, {pipeline_mode = #tpu.pipeline_mode<synchronous>, transform_indices = @transform_12, window_bounds = array<i64: 1, 128>}, {pipeline_mode = #tpu.pipeline_mode<synchronous>, transform_indices = @transform_13, window_bounds = array<i64: 3, 4, 4>}, {pipeline_mode = #tpu.pipeline_mode<synchronous>, transform_indices = @transform_14, window_bounds = array<i64: 1, 128>}, {pipeline_mode = #tpu.pipeline_mode<synchronous>, transform_indices = @transform_15, window_bounds = array<i64: 128, 128>}, {pipeline_mode = #tpu.pipeline_mode<synchronous>, transform_indices = @transform_16, window_bounds = array<i64: 128, 128>}, {pipeline_mode = #tpu.pipeline_mode<synchronous>, transform_indices = @transform_17, window_bounds = array<i64: 1, 512>}, {pipeline_mode = #tpu.pipeline_mode<synchronous>, transform_indices = @transform_18, window_bounds = array<i64: 1, 512>}, {pipeline_mode = #tpu.pipeline_mode<synchronous>, transform_indices = @transform_19, window_bounds = array<i64: 512, 512>}, {pipeline_mode = #tpu.pipeline_mode<synchronous>, transform_indices = @transform_20, window_bounds = array<i64: 512, 512>}, {pipeline_mode = #tpu.pipeline_mode<synchronous>, transform_indices = @transform_21, window_bounds = array<i64: 1, 128>}, {pipeline_mode = #tpu.pipeline_mode<synchronous>, transform_indices = @transform_22, window_bounds = array<i64: 1, 128>}, {pipeline_mode = #tpu.pipeline_mode<synchronous>, transform_indices = @transform_23, window_bounds = array<i64: 3, 128, 128>}, {pipeline_mode = #tpu.pipeline_mode<synchronous>, transform_indices = @transform_24, window_bounds = array<i64: 1, 512>}, {pipeline_mode = #tpu.pipeline_mode<synchronous>, transform_indices = @transform_25, window_bounds = array<i64: 3, 8, 8>}, {pipeline_mode = #tpu.pipeline_mode<synchronous>, transform_indices = @transform_26, window_bounds = array<i64: 1, 512>}, {pipeline_mode = #tpu.pipeline_mode<synchronous>, transform_indices = @transform_27, window_bounds = array<i64: 512, 128>}, {pipeline_mode = #tpu.pipeline_mode<synchronous>, transform_indices = @transform_28, window_bounds = array<i64: 128, 512>}, {pipeline_mode = #tpu.pipeline_mode<synchronous>, transform_indices = @transform_29, window_bounds = array<i64: 1, 128>}, {pipeline_mode = #tpu.pipeline_mode<synchronous>, transform_indices = @transform_30, window_bounds = array<i64: 1, 128>}, {pipeline_mode = #tpu.pipeline_mode<synchronous>, transform_indices = @transform_31, window_bounds = array<i64: 3, 128, 128>}, {pipeline_mode = #tpu.pipeline_mode<synchronous>, transform_indices = @transform_32, window_bounds = array<i64: 1, 128>}, {pipeline_mode = #tpu.pipeline_mode<synchronous>, transform_indices = @transform_33, window_bounds = array<i64: 3, 4, 4>}, {pipeline_mode = #tpu.pipeline_mode<synchronous>, transform_indices = @transform_34, window_bounds = array<i64: 1, 128>}, {pipeline_mode = #tpu.pipeline_mode<synchronous>, transform_indices = @transform_35, window_bounds = array<i64: 128, 128>}, {pipeline_mode = #tpu.pipeline_mode<synchronous>, transform_indices = @transform_36, window_bounds = array<i64: 128, 128>}, {pipeline_mode = #tpu.pipeline_mode<synchronous>, transform_indices = @transform_37, window_bounds = array<i64: 1, 512>}, {pipeline_mode = #tpu.pipeline_mode<synchronous>, transform_indices = @transform_38, window_bounds = array<i64: 512, 128>}, {pipeline_mode = #tpu.pipeline_mode<synchronous>, transform_indices = @transform_39, window_bounds = array<i64: 4, 8>}, {pipeline_mode = #tpu.pipeline_mode<synchronous>, transform_indices = @transform_40, window_bounds = array<i64: 1, 512>}, {pipeline_mode = #tpu.pipeline_mode<synchronous>, transform_indices = @transform_41, window_bounds = array<i64: 1, 128>}, {pipeline_mode = #tpu.pipeline_mode<synchronous>, transform_indices = @transform_42, window_bounds = array<i64: 1, 128>}, {pipeline_mode = #tpu.pipeline_mode<synchronous>, transform_indices = @transform_43, window_bounds = array<i64: 3, 128, 128>}, {pipeline_mode = #tpu.pipeline_mode<synchronous>, transform_indices = @transform_44, window_bounds = array<i64: 1, 512>}, {pipeline_mode = #tpu.pipeline_mode<synchronous>, transform_indices = @transform_45, window_bounds = array<i64: 3, 8, 8>}, {pipeline_mode = #tpu.pipeline_mode<synchronous>, transform_indices = @transform_46, window_bounds = array<i64: 1, 512>}, {pipeline_mode = #tpu.pipeline_mode<synchronous>, transform_indices = @transform_47, window_bounds = array<i64: 512, 128>}, {pipeline_mode = #tpu.pipeline_mode<synchronous>, transform_indices = @transform_48, window_bounds = array<i64: 128, 512>}, {pipeline_mode = #tpu.pipeline_mode<synchronous>, transform_indices = @transform_49, window_bounds = array<i64: 128, 512>}, {pipeline_mode = #tpu.pipeline_mode<synchronous>, transform_indices = @transform_50, window_bounds = array<i64: 8, 4>}, {transform_indices = @transform_51, window_bounds = array<i64: 1, 8, 512>}]} {
    %c0 = arith.constant 0 : index
    %c0_0 = arith.constant 0 : index
    %c0_1 = arith.constant 0 : index
    %0 = vector.load %arg1[%c0, %c0_0, %c0_1] : memref<1x8x512xf32, #tpu.memory_space<vmem>>, vector<1x8x512xf32>
    %1 = vector.shape_cast %0 : vector<1x8x512xf32> to vector<8x512xf32>
    %c0_2 = arith.constant 0 : index
    %c0_3 = arith.constant 0 : index
    %2 = vector.load %arg45[%c0_2, %c0_3] : memref<1x512xf32, #tpu.memory_space<vmem>>, vector<1x512xf32>
    %3 = vector.broadcast %2 : vector<1x512xf32> to vector<8x512xf32>
    %4 = arith.mulf %1, %3 : vector<8x512xf32>
    %c0_4 = arith.constant 0 : index
    %c0_5 = arith.constant 0 : index
    %5 = vector.load %arg47[%c0_4, %c0_5] : memref<1x512xf32, #tpu.memory_space<vmem>>, vector<1x512xf32>
    %6 = vector.broadcast %5 : vector<1x512xf32> to vector<8x512xf32>
    %7 = arith.addf %4, %6 : vector<8x512xf32>
    %cst = arith.constant 0.000000e+00 : f32
    %8 = vector.broadcast %cst : f32 to vector<8x512xf32>
    %9 = arith.maximumf %7, %8 : vector<8x512xf32>
    %c0_6 = arith.constant 0 : index
    %c0_7 = arith.constant 0 : index
    %10 = vector.load %arg48[%c0_6, %c0_7] : memref<512x128xf32, #tpu.memory_space<vmem>>, vector<512x128xf32>
    %cst_8 = arith.constant dense<0.000000e+00> : vector<8x128xf32>
    %11 = tpu.matmul %9, %10, %cst_8 {dimension_numbers = #tpu.dot_dimension_numbers<[1], [0], [0], [1], [0, 0, 1, 1], [], []>} : vector<8x512xf32>, vector<512x128xf32>, vector<8x128xf32> -> vector<8x128xf32>
    %c0_9 = arith.constant 0 : index
    %c0_10 = arith.constant 0 : index
    %12 = vector.load %arg42[%c0_9, %c0_10] : memref<1x128xf32, #tpu.memory_space<vmem>>, vector<1x128xf32>
    %13 = vector.broadcast %12 : vector<1x128xf32> to vector<8x128xf32>
    %14 = arith.addf %11, %13 : vector<8x128xf32>
    %cst_11 = arith.constant 0.000000e+00 : f32
    %15 = vector.broadcast %cst_11 : f32 to vector<8x128xf32>
    %16 = arith.maximumf %14, %15 : vector<8x128xf32>
    %c0_12 = arith.constant 0 : index
    %c0_13 = arith.constant 0 : index
    %c0_14 = arith.constant 0 : index
    %17 = vector.load %arg46[%c0_12, %c0_13, %c0_14] : memref<3x8x8xf32, #tpu.memory_space<vmem>>, vector<1x8x8xf32>
    %18 = vector.shape_cast %17 : vector<1x8x8xf32> to vector<8x8xf32>
    %cst_15 = arith.constant dense<0.000000e+00> : vector<8x128xf32>
    %19 = tpu.matmul %18, %16, %cst_15 {dimension_numbers = #tpu.dot_dimension_numbers<[1], [0], [0], [1], [0, 0, 1, 1], [], []>} : vector<8x8xf32>, vector<8x128xf32>, vector<8x128xf32> -> vector<8x128xf32>
    %c0_16 = arith.constant 0 : index
    %c0_17 = arith.constant 0 : index
    %c0_18 = arith.constant 0 : index
    %20 = vector.load %arg44[%c0_16, %c0_17, %c0_18] : memref<3x128x128xf32, #tpu.memory_space<vmem>>, vector<1x128x128xf32>
    %21 = vector.shape_cast %20 : vector<1x128x128xf32> to vector<128x128xf32>
    %cst_19 = arith.constant dense<0.000000e+00> : vector<8x128xf32>
    %22 = tpu.matmul %19, %21, %cst_19 {dimension_numbers = #tpu.dot_dimension_numbers<[1], [0], [0], [1], [0, 0, 1, 1], [], []>} : vector<8x128xf32>, vector<128x128xf32>, vector<8x128xf32> -> vector<8x128xf32>
    %c1 = arith.constant 1 : index
    %c0_20 = arith.constant 0 : index
    %c0_21 = arith.constant 0 : index
    %23 = vector.load %arg46[%c1, %c0_20, %c0_21] : memref<3x8x8xf32, #tpu.memory_space<vmem>>, vector<1x8x8xf32>
    %24 = vector.shape_cast %23 : vector<1x8x8xf32> to vector<8x8xf32>
    %cst_22 = arith.constant dense<0.000000e+00> : vector<8x128xf32>
    %25 = tpu.matmul %24, %16, %cst_22 {dimension_numbers = #tpu.dot_dimension_numbers<[1], [0], [0], [1], [0, 0, 1, 1], [], []>} : vector<8x8xf32>, vector<8x128xf32>, vector<8x128xf32> -> vector<8x128xf32>
    %c1_23 = arith.constant 1 : index
    %c0_24 = arith.constant 0 : index
    %c0_25 = arith.constant 0 : index
    %26 = vector.load %arg44[%c1_23, %c0_24, %c0_25] : memref<3x128x128xf32, #tpu.memory_space<vmem>>, vector<1x128x128xf32>
    %27 = vector.shape_cast %26 : vector<1x128x128xf32> to vector<128x128xf32>
    %cst_26 = arith.constant dense<0.000000e+00> : vector<8x128xf32>
    %28 = tpu.matmul %25, %27, %cst_26 {dimension_numbers = #tpu.dot_dimension_numbers<[1], [0], [0], [1], [0, 0, 1, 1], [], []>} : vector<8x128xf32>, vector<128x128xf32>, vector<8x128xf32> -> vector<8x128xf32>
    %29 = arith.addf %22, %28 : vector<8x128xf32>
    %c2 = arith.constant 2 : index
    %c0_27 = arith.constant 0 : index
    %c0_28 = arith.constant 0 : index
    %30 = vector.load %arg46[%c2, %c0_27, %c0_28] : memref<3x8x8xf32, #tpu.memory_space<vmem>>, vector<1x8x8xf32>
    %31 = vector.shape_cast %30 : vector<1x8x8xf32> to vector<8x8xf32>
    %cst_29 = arith.constant dense<0.000000e+00> : vector<8x128xf32>
    %32 = tpu.matmul %31, %16, %cst_29 {dimension_numbers = #tpu.dot_dimension_numbers<[1], [0], [0], [1], [0, 0, 1, 1], [], []>} : vector<8x8xf32>, vector<8x128xf32>, vector<8x128xf32> -> vector<8x128xf32>
    %c2_30 = arith.constant 2 : index
    %c0_31 = arith.constant 0 : index
    %c0_32 = arith.constant 0 : index
    %33 = vector.load %arg44[%c2_30, %c0_31, %c0_32] : memref<3x128x128xf32, #tpu.memory_space<vmem>>, vector<1x128x128xf32>
    %34 = vector.shape_cast %33 : vector<1x128x128xf32> to vector<128x128xf32>
    %cst_33 = arith.constant dense<0.000000e+00> : vector<8x128xf32>
    %35 = tpu.matmul %32, %34, %cst_33 {dimension_numbers = #tpu.dot_dimension_numbers<[1], [0], [0], [1], [0, 0, 1, 1], [], []>} : vector<8x128xf32>, vector<128x128xf32>, vector<8x128xf32> -> vector<8x128xf32>
    %36 = arith.addf %29, %35 : vector<8x128xf32>
    %c0_34 = arith.constant 0 : index
    %c0_35 = arith.constant 0 : index
    %37 = vector.load %arg43[%c0_34, %c0_35] : memref<1x128xf32, #tpu.memory_space<vmem>>, vector<1x128xf32>
    %38 = vector.broadcast %37 : vector<1x128xf32> to vector<8x128xf32>
    %39 = arith.addf %36, %38 : vector<8x128xf32>
    %cst_36 = arith.constant 0.000000e+00 : f32
    %40 = vector.broadcast %cst_36 : f32 to vector<8x128xf32>
    %41 = arith.maximumf %39, %40 : vector<8x128xf32>
    %c0_37 = arith.constant 0 : index
    %c0_38 = arith.constant 0 : index
    %42 = vector.load %arg49[%c0_37, %c0_38] : memref<128x512xf32, #tpu.memory_space<vmem>>, vector<128x512xf32>
    %cst_39 = arith.constant dense<0.000000e+00> : vector<8x512xf32>
    %43 = tpu.matmul %41, %42, %cst_39 {dimension_numbers = #tpu.dot_dimension_numbers<[1], [0], [0], [1], [0, 0, 1, 1], [], []>} : vector<8x128xf32>, vector<128x512xf32>, vector<8x512xf32> -> vector<8x512xf32>
    %44 = arith.addf %43, %1 : vector<8x512xf32>
    %c0_40 = arith.constant 0 : index
    %c0_41 = arith.constant 0 : index
    %45 = vector.load %arg45[%c0_40, %c0_41] : memref<1x512xf32, #tpu.memory_space<vmem>>, vector<1x512xf32>
    %46 = vector.broadcast %45 : vector<1x512xf32> to vector<8x512xf32>
    %47 = arith.mulf %44, %46 : vector<8x512xf32>
    %c0_42 = arith.constant 0 : index
    %c0_43 = arith.constant 0 : index
    %48 = vector.load %arg47[%c0_42, %c0_43] : memref<1x512xf32, #tpu.memory_space<vmem>>, vector<1x512xf32>
    %49 = vector.broadcast %48 : vector<1x512xf32> to vector<8x512xf32>
    %50 = arith.addf %47, %49 : vector<8x512xf32>
    %cst_44 = arith.constant 0.000000e+00 : f32
    %51 = vector.broadcast %cst_44 : f32 to vector<8x512xf32>
    %52 = arith.maximumf %50, %51 : vector<8x512xf32>
    %c0_45 = arith.constant 0 : index
    %c0_46 = arith.constant 0 : index
    %53 = vector.load %arg48[%c0_45, %c0_46] : memref<512x128xf32, #tpu.memory_space<vmem>>, vector<512x128xf32>
    %cst_47 = arith.constant dense<0.000000e+00> : vector<8x128xf32>
    %54 = tpu.matmul %52, %53, %cst_47 {dimension_numbers = #tpu.dot_dimension_numbers<[1], [0], [0], [1], [0, 0, 1, 1], [], []>} : vector<8x512xf32>, vector<512x128xf32>, vector<8x128xf32> -> vector<8x128xf32>
    %c0_48 = arith.constant 0 : index
    %c0_49 = arith.constant 0 : index
    %55 = vector.load %arg42[%c0_48, %c0_49] : memref<1x128xf32, #tpu.memory_space<vmem>>, vector<1x128xf32>
    %56 = vector.broadcast %55 : vector<1x128xf32> to vector<8x128xf32>
    %57 = arith.addf %54, %56 : vector<8x128xf32>
    %cst_50 = arith.constant 0.000000e+00 : f32
    %58 = vector.broadcast %cst_50 : f32 to vector<8x128xf32>
    %59 = arith.maximumf %57, %58 : vector<8x128xf32>
    %c0_51 = arith.constant 0 : index
    %c0_52 = arith.constant 0 : index
    %c0_53 = arith.constant 0 : index
    %60 = vector.load %arg46[%c0_51, %c0_52, %c0_53] : memref<3x8x8xf32, #tpu.memory_space<vmem>>, vector<1x8x8xf32>
    %61 = vector.shape_cast %60 : vector<1x8x8xf32> to vector<8x8xf32>
    %cst_54 = arith.constant dense<0.000000e+00> : vector<8x128xf32>
    %62 = tpu.matmul %61, %59, %cst_54 {dimension_numbers = #tpu.dot_dimension_numbers<[1], [0], [0], [1], [0, 0, 1, 1], [], []>} : vector<8x8xf32>, vector<8x128xf32>, vector<8x128xf32> -> vector<8x128xf32>
    %c0_55 = arith.constant 0 : index
    %c0_56 = arith.constant 0 : index
    %c0_57 = arith.constant 0 : index
    %63 = vector.load %arg44[%c0_55, %c0_56, %c0_57] : memref<3x128x128xf32, #tpu.memory_space<vmem>>, vector<1x128x128xf32>
    %64 = vector.shape_cast %63 : vector<1x128x128xf32> to vector<128x128xf32>
    %cst_58 = arith.constant dense<0.000000e+00> : vector<8x128xf32>
    %65 = tpu.matmul %62, %64, %cst_58 {dimension_numbers = #tpu.dot_dimension_numbers<[1], [0], [0], [1], [0, 0, 1, 1], [], []>} : vector<8x128xf32>, vector<128x128xf32>, vector<8x128xf32> -> vector<8x128xf32>
    %c1_59 = arith.constant 1 : index
    %c0_60 = arith.constant 0 : index
    %c0_61 = arith.constant 0 : index
    %66 = vector.load %arg46[%c1_59, %c0_60, %c0_61] : memref<3x8x8xf32, #tpu.memory_space<vmem>>, vector<1x8x8xf32>
    %67 = vector.shape_cast %66 : vector<1x8x8xf32> to vector<8x8xf32>
    %cst_62 = arith.constant dense<0.000000e+00> : vector<8x128xf32>
    %68 = tpu.matmul %67, %59, %cst_62 {dimension_numbers = #tpu.dot_dimension_numbers<[1], [0], [0], [1], [0, 0, 1, 1], [], []>} : vector<8x8xf32>, vector<8x128xf32>, vector<8x128xf32> -> vector<8x128xf32>
    %c1_63 = arith.constant 1 : index
    %c0_64 = arith.constant 0 : index
    %c0_65 = arith.constant 0 : index
    %69 = vector.load %arg44[%c1_63, %c0_64, %c0_65] : memref<3x128x128xf32, #tpu.memory_space<vmem>>, vector<1x128x128xf32>
    %70 = vector.shape_cast %69 : vector<1x128x128xf32> to vector<128x128xf32>
    %cst_66 = arith.constant dense<0.000000e+00> : vector<8x128xf32>
    %71 = tpu.matmul %68, %70, %cst_66 {dimension_numbers = #tpu.dot_dimension_numbers<[1], [0], [0], [1], [0, 0, 1, 1], [], []>} : vector<8x128xf32>, vector<128x128xf32>, vector<8x128xf32> -> vector<8x128xf32>
    %72 = arith.addf %65, %71 : vector<8x128xf32>
    %c2_67 = arith.constant 2 : index
    %c0_68 = arith.constant 0 : index
    %c0_69 = arith.constant 0 : index
    %73 = vector.load %arg46[%c2_67, %c0_68, %c0_69] : memref<3x8x8xf32, #tpu.memory_space<vmem>>, vector<1x8x8xf32>
    %74 = vector.shape_cast %73 : vector<1x8x8xf32> to vector<8x8xf32>
    %cst_70 = arith.constant dense<0.000000e+00> : vector<8x128xf32>
    %75 = tpu.matmul %74, %59, %cst_70 {dimension_numbers = #tpu.dot_dimension_numbers<[1], [0], [0], [1], [0, 0, 1, 1], [], []>} : vector<8x8xf32>, vector<8x128xf32>, vector<8x128xf32> -> vector<8x128xf32>
    %c2_71 = arith.constant 2 : index
    %c0_72 = arith.constant 0 : index
    %c0_73 = arith.constant 0 : index
    %76 = vector.load %arg44[%c2_71, %c0_72, %c0_73] : memref<3x128x128xf32, #tpu.memory_space<vmem>>, vector<1x128x128xf32>
    %77 = vector.shape_cast %76 : vector<1x128x128xf32> to vector<128x128xf32>
    %cst_74 = arith.constant dense<0.000000e+00> : vector<8x128xf32>
    %78 = tpu.matmul %75, %77, %cst_74 {dimension_numbers = #tpu.dot_dimension_numbers<[1], [0], [0], [1], [0, 0, 1, 1], [], []>} : vector<8x128xf32>, vector<128x128xf32>, vector<8x128xf32> -> vector<8x128xf32>
    %79 = arith.addf %72, %78 : vector<8x128xf32>
    %c0_75 = arith.constant 0 : index
    %c0_76 = arith.constant 0 : index
    %80 = vector.load %arg43[%c0_75, %c0_76] : memref<1x128xf32, #tpu.memory_space<vmem>>, vector<1x128xf32>
    %81 = vector.broadcast %80 : vector<1x128xf32> to vector<8x128xf32>
    %82 = arith.addf %79, %81 : vector<8x128xf32>
    %cst_77 = arith.constant 0.000000e+00 : f32
    %83 = vector.broadcast %cst_77 : f32 to vector<8x128xf32>
    %84 = arith.maximumf %82, %83 : vector<8x128xf32>
    %c0_78 = arith.constant 0 : index
    %c0_79 = arith.constant 0 : index
    %85 = vector.load %arg49[%c0_78, %c0_79] : memref<128x512xf32, #tpu.memory_space<vmem>>, vector<128x512xf32>
    %cst_80 = arith.constant dense<0.000000e+00> : vector<8x512xf32>
    %86 = tpu.matmul %84, %85, %cst_80 {dimension_numbers = #tpu.dot_dimension_numbers<[1], [0], [0], [1], [0, 0, 1, 1], [], []>} : vector<8x128xf32>, vector<128x512xf32>, vector<8x512xf32> -> vector<8x512xf32>
    %87 = arith.addf %86, %44 : vector<8x512xf32>
    %c0_81 = arith.constant 0 : index
    %c0_82 = arith.constant 0 : index
    %88 = vector.load %arg5[%c0_81, %c0_82] : memref<1x512xf32, #tpu.memory_space<vmem>>, vector<1x512xf32>
    %89 = vector.broadcast %88 : vector<1x512xf32> to vector<8x512xf32>
    %90 = arith.mulf %1, %89 : vector<8x512xf32>
    %c0_83 = arith.constant 0 : index
    %c0_84 = arith.constant 0 : index
    %91 = vector.load %arg7[%c0_83, %c0_84] : memref<1x512xf32, #tpu.memory_space<vmem>>, vector<1x512xf32>
    %92 = vector.broadcast %91 : vector<1x512xf32> to vector<8x512xf32>
    %93 = arith.addf %90, %92 : vector<8x512xf32>
    %cst_85 = arith.constant 0.000000e+00 : f32
    %94 = vector.broadcast %cst_85 : f32 to vector<8x512xf32>
    %95 = arith.maximumf %93, %94 : vector<8x512xf32>
    %c0_86 = arith.constant 0 : index
    %c0_87 = arith.constant 0 : index
    %96 = vector.load %arg8[%c0_86, %c0_87] : memref<512x128xf32, #tpu.memory_space<vmem>>, vector<512x128xf32>
    %cst_88 = arith.constant dense<0.000000e+00> : vector<8x128xf32>
    %97 = tpu.matmul %95, %96, %cst_88 {dimension_numbers = #tpu.dot_dimension_numbers<[1], [0], [0], [1], [0, 0, 1, 1], [], []>} : vector<8x512xf32>, vector<512x128xf32>, vector<8x128xf32> -> vector<8x128xf32>
    %c0_89 = arith.constant 0 : index
    %c0_90 = arith.constant 0 : index
    %98 = vector.load %arg2[%c0_89, %c0_90] : memref<1x128xf32, #tpu.memory_space<vmem>>, vector<1x128xf32>
    %99 = vector.broadcast %98 : vector<1x128xf32> to vector<8x128xf32>
    %100 = arith.addf %97, %99 : vector<8x128xf32>
    %cst_91 = arith.constant 0.000000e+00 : f32
    %101 = vector.broadcast %cst_91 : f32 to vector<8x128xf32>
    %102 = arith.maximumf %100, %101 : vector<8x128xf32>
    %c0_92 = arith.constant 0 : index
    %c0_93 = arith.constant 0 : index
    %c0_94 = arith.constant 0 : index
    %103 = vector.load %arg6[%c0_92, %c0_93, %c0_94] : memref<3x8x8xf32, #tpu.memory_space<vmem>>, vector<1x8x8xf32>
    %104 = vector.shape_cast %103 : vector<1x8x8xf32> to vector<8x8xf32>
    %cst_95 = arith.constant dense<0.000000e+00> : vector<8x128xf32>
    %105 = tpu.matmul %104, %102, %cst_95 {dimension_numbers = #tpu.dot_dimension_numbers<[1], [0], [0], [1], [0, 0, 1, 1], [], []>} : vector<8x8xf32>, vector<8x128xf32>, vector<8x128xf32> -> vector<8x128xf32>
    %c0_96 = arith.constant 0 : index
    %c0_97 = arith.constant 0 : index
    %c0_98 = arith.constant 0 : index
    %106 = vector.load %arg4[%c0_96, %c0_97, %c0_98] : memref<3x128x128xf32, #tpu.memory_space<vmem>>, vector<1x128x128xf32>
    %107 = vector.shape_cast %106 : vector<1x128x128xf32> to vector<128x128xf32>
    %cst_99 = arith.constant dense<0.000000e+00> : vector<8x128xf32>
    %108 = tpu.matmul %105, %107, %cst_99 {dimension_numbers = #tpu.dot_dimension_numbers<[1], [0], [0], [1], [0, 0, 1, 1], [], []>} : vector<8x128xf32>, vector<128x128xf32>, vector<8x128xf32> -> vector<8x128xf32>
    %c1_100 = arith.constant 1 : index
    %c0_101 = arith.constant 0 : index
    %c0_102 = arith.constant 0 : index
    %109 = vector.load %arg6[%c1_100, %c0_101, %c0_102] : memref<3x8x8xf32, #tpu.memory_space<vmem>>, vector<1x8x8xf32>
    %110 = vector.shape_cast %109 : vector<1x8x8xf32> to vector<8x8xf32>
    %cst_103 = arith.constant dense<0.000000e+00> : vector<8x128xf32>
    %111 = tpu.matmul %110, %102, %cst_103 {dimension_numbers = #tpu.dot_dimension_numbers<[1], [0], [0], [1], [0, 0, 1, 1], [], []>} : vector<8x8xf32>, vector<8x128xf32>, vector<8x128xf32> -> vector<8x128xf32>
    %c1_104 = arith.constant 1 : index
    %c0_105 = arith.constant 0 : index
    %c0_106 = arith.constant 0 : index
    %112 = vector.load %arg4[%c1_104, %c0_105, %c0_106] : memref<3x128x128xf32, #tpu.memory_space<vmem>>, vector<1x128x128xf32>
    %113 = vector.shape_cast %112 : vector<1x128x128xf32> to vector<128x128xf32>
    %cst_107 = arith.constant dense<0.000000e+00> : vector<8x128xf32>
    %114 = tpu.matmul %111, %113, %cst_107 {dimension_numbers = #tpu.dot_dimension_numbers<[1], [0], [0], [1], [0, 0, 1, 1], [], []>} : vector<8x128xf32>, vector<128x128xf32>, vector<8x128xf32> -> vector<8x128xf32>
    %115 = arith.addf %108, %114 : vector<8x128xf32>
    %c2_108 = arith.constant 2 : index
    %c0_109 = arith.constant 0 : index
    %c0_110 = arith.constant 0 : index
    %116 = vector.load %arg6[%c2_108, %c0_109, %c0_110] : memref<3x8x8xf32, #tpu.memory_space<vmem>>, vector<1x8x8xf32>
    %117 = vector.shape_cast %116 : vector<1x8x8xf32> to vector<8x8xf32>
    %cst_111 = arith.constant dense<0.000000e+00> : vector<8x128xf32>
    %118 = tpu.matmul %117, %102, %cst_111 {dimension_numbers = #tpu.dot_dimension_numbers<[1], [0], [0], [1], [0, 0, 1, 1], [], []>} : vector<8x8xf32>, vector<8x128xf32>, vector<8x128xf32> -> vector<8x128xf32>
    %c2_112 = arith.constant 2 : index
    %c0_113 = arith.constant 0 : index
    %c0_114 = arith.constant 0 : index
    %119 = vector.load %arg4[%c2_112, %c0_113, %c0_114] : memref<3x128x128xf32, #tpu.memory_space<vmem>>, vector<1x128x128xf32>
    %120 = vector.shape_cast %119 : vector<1x128x128xf32> to vector<128x128xf32>
    %cst_115 = arith.constant dense<0.000000e+00> : vector<8x128xf32>
    %121 = tpu.matmul %118, %120, %cst_115 {dimension_numbers = #tpu.dot_dimension_numbers<[1], [0], [0], [1], [0, 0, 1, 1], [], []>} : vector<8x128xf32>, vector<128x128xf32>, vector<8x128xf32> -> vector<8x128xf32>
    %122 = arith.addf %115, %121 : vector<8x128xf32>
    %c0_116 = arith.constant 0 : index
    %c0_117 = arith.constant 0 : index
    %123 = vector.load %arg3[%c0_116, %c0_117] : memref<1x128xf32, #tpu.memory_space<vmem>>, vector<1x128xf32>
    %124 = vector.broadcast %123 : vector<1x128xf32> to vector<8x128xf32>
    %125 = arith.addf %122, %124 : vector<8x128xf32>
    %cst_118 = arith.constant 0.000000e+00 : f32
    %126 = vector.broadcast %cst_118 : f32 to vector<8x128xf32>
    %127 = arith.maximumf %125, %126 : vector<8x128xf32>
    %c0_119 = arith.constant 0 : index
    %c0_120 = arith.constant 0 : index
    %128 = vector.load %arg9[%c0_119, %c0_120] : memref<128x512xf32, #tpu.memory_space<vmem>>, vector<128x512xf32>
    %cst_121 = arith.constant dense<0.000000e+00> : vector<8x512xf32>
    %129 = tpu.matmul %127, %128, %cst_121 {dimension_numbers = #tpu.dot_dimension_numbers<[1], [0], [0], [1], [0, 0, 1, 1], [], []>} : vector<8x128xf32>, vector<128x512xf32>, vector<8x512xf32> -> vector<8x512xf32>
    %130 = arith.addf %129, %1 : vector<8x512xf32>
    %c0_122 = arith.constant 0 : index
    %c0_123 = arith.constant 0 : index
    %131 = vector.load %arg38[%c0_122, %c0_123] : memref<1x512xi32, #tpu.memory_space<vmem>>, vector<1x512xi32>
    %c0_124 = arith.constant 0 : index
    %c0_125 = arith.constant 0 : index
    %132 = vector.load %arg41[%c0_124, %c0_125] : memref<1x512xi32, #tpu.memory_space<vmem>>, vector<1x512xi32>
    %c0_i32 = arith.constant 0 : i32
    %133 = vector.broadcast %c0_i32 : i32 to vector<1x512xi32>
    %134 = arith.cmpi eq, %132, %133 : vector<1x512xi32>
    %135 = vector.extract_strided_slice %130 {offsets = [0, 504], sizes = [8, 8], strides = [1, 1]} : vector<8x512xf32> to vector<8x8xf32>
    %136 = vector.extract_strided_slice %130 {offsets = [0, 0], sizes = [8, 504], strides = [1, 1]} : vector<8x512xf32> to vector<8x504xf32>
    %137 = tpu.concatenate %135, %136 in 1 : vector<8x8xf32>, vector<8x504xf32> -> vector<8x512xf32>
    %cst_126 = arith.constant -3.40282347E+38 : f32
    %138 = vector.shape_cast %134 : vector<1x512xi1> to vector<1x512xi1>
    %139 = vector.broadcast %138 : vector<1x512xi1> to vector<8x512xi1>
    %140 = vector.broadcast %cst_126 : f32 to vector<8x512xf32>
    %141 = arith.select %139, %140, %137 : vector<8x512xi1>, vector<8x512xf32>
    %c7_i32 = arith.constant 7 : i32
    %142 = vector.broadcast %c7_i32 : i32 to vector<1x512xi32>
    %143 = arith.cmpi eq, %132, %142 : vector<1x512xi32>
    %144 = vector.extract_strided_slice %130 {offsets = [0, 8], sizes = [8, 504], strides = [1, 1]} : vector<8x512xf32> to vector<8x504xf32>
    %145 = vector.extract_strided_slice %130 {offsets = [0, 0], sizes = [8, 8], strides = [1, 1]} : vector<8x512xf32> to vector<8x8xf32>
    %146 = tpu.concatenate %144, %145 in 1 : vector<8x504xf32>, vector<8x8xf32> -> vector<8x512xf32>
    %cst_127 = arith.constant -3.40282347E+38 : f32
    %147 = vector.shape_cast %143 : vector<1x512xi1> to vector<1x512xi1>
    %148 = vector.broadcast %147 : vector<1x512xi1> to vector<8x512xi1>
    %149 = vector.broadcast %cst_127 : f32 to vector<8x512xf32>
    %150 = arith.select %148, %149, %146 : vector<8x512xi1>, vector<8x512xf32>
    %151 = arith.maximumf %141, %130 : vector<8x512xf32>
    %152 = arith.maximumf %151, %150 : vector<8x512xf32>
    %c0_i32_128 = arith.constant 0 : i32
    %153 = vector.broadcast %c0_i32_128 : i32 to vector<1x512xi32>
    %154 = arith.cmpi eq, %131, %153 : vector<1x512xi32>
    %155 = vector.extract_strided_slice %152 {offsets = [0, 448], sizes = [8, 64], strides = [1, 1]} : vector<8x512xf32> to vector<8x64xf32>
    %156 = vector.extract_strided_slice %152 {offsets = [0, 0], sizes = [8, 448], strides = [1, 1]} : vector<8x512xf32> to vector<8x448xf32>
    %157 = tpu.concatenate %155, %156 in 1 : vector<8x64xf32>, vector<8x448xf32> -> vector<8x512xf32>
    %cst_129 = arith.constant -3.40282347E+38 : f32
    %158 = vector.shape_cast %154 : vector<1x512xi1> to vector<1x512xi1>
    %159 = vector.broadcast %158 : vector<1x512xi1> to vector<8x512xi1>
    %160 = vector.broadcast %cst_129 : f32 to vector<8x512xf32>
    %161 = arith.select %159, %160, %157 : vector<8x512xi1>, vector<8x512xf32>
    %c7_i32_130 = arith.constant 7 : i32
    %162 = vector.broadcast %c7_i32_130 : i32 to vector<1x512xi32>
    %163 = arith.cmpi eq, %131, %162 : vector<1x512xi32>
    %164 = vector.extract_strided_slice %152 {offsets = [0, 64], sizes = [8, 448], strides = [1, 1]} : vector<8x512xf32> to vector<8x448xf32>
    %165 = vector.extract_strided_slice %152 {offsets = [0, 0], sizes = [8, 64], strides = [1, 1]} : vector<8x512xf32> to vector<8x64xf32>
    %166 = tpu.concatenate %164, %165 in 1 : vector<8x448xf32>, vector<8x64xf32> -> vector<8x512xf32>
    %cst_131 = arith.constant -3.40282347E+38 : f32
    %167 = vector.shape_cast %163 : vector<1x512xi1> to vector<1x512xi1>
    %168 = vector.broadcast %167 : vector<1x512xi1> to vector<8x512xi1>
    %169 = vector.broadcast %cst_131 : f32 to vector<8x512xf32>
    %170 = arith.select %168, %169, %166 : vector<8x512xi1>, vector<8x512xf32>
    %171 = arith.maximumf %161, %152 : vector<8x512xf32>
    %172 = arith.maximumf %171, %170 : vector<8x512xf32>
    %cst_132 = arith.constant -3.40282347E+38 : f32
    %173 = vector.broadcast %cst_132 : f32 to vector<1x512xf32>
    %174 = vector.extract_strided_slice %172 {offsets = [0, 0], sizes = [7, 512], strides = [1, 1]} : vector<8x512xf32> to vector<7x512xf32>
    %175 = tpu.concatenate %173, %174 in 0 : vector<1x512xf32>, vector<7x512xf32> -> vector<8x512xf32>
    %176 = vector.extract_strided_slice %172 {offsets = [1, 0], sizes = [7, 512], strides = [1, 1]} : vector<8x512xf32> to vector<7x512xf32>
    %177 = tpu.concatenate %176, %173 in 0 : vector<7x512xf32>, vector<1x512xf32> -> vector<8x512xf32>
    %178 = arith.maximumf %175, %172 : vector<8x512xf32>
    %179 = arith.maximumf %178, %177 : vector<8x512xf32>
    %c0_133 = arith.constant 0 : index
    %c0_134 = arith.constant 0 : index
    %180 = vector.load %arg40[%c0_133, %c0_134] : memref<4x8xf32, #tpu.memory_space<vmem>>, vector<4x8xf32>
    %cst_135 = arith.constant dense<0.000000e+00> : vector<4x512xf32>
    %181 = tpu.matmul %180, %179, %cst_135 {dimension_numbers = #tpu.dot_dimension_numbers<[1], [0], [0], [1], [0, 0, 1, 1], [], []>} : vector<4x8xf32>, vector<8x512xf32>, vector<4x512xf32> -> vector<4x512xf32>
    %c0_136 = arith.constant 0 : index
    %c0_137 = arith.constant 0 : index
    %182 = vector.load %arg39[%c0_136, %c0_137] : memref<512x128xf32, #tpu.memory_space<vmem>>, vector<512x128xf32>
    %cst_138 = arith.constant dense<0.000000e+00> : vector<4x128xf32>
    %183 = tpu.matmul %181, %182, %cst_138 {dimension_numbers = #tpu.dot_dimension_numbers<[1], [0], [0], [1], [0, 0, 1, 1], [], []>} : vector<4x512xf32>, vector<512x128xf32>, vector<4x128xf32> -> vector<4x128xf32>
    %c0_139 = arith.constant 0 : index
    %c0_140 = arith.constant 0 : index
    %184 = vector.load %arg13[%c0_139, %c0_140] : memref<1x128xf32, #tpu.memory_space<vmem>>, vector<1x128xf32>
    %185 = vector.broadcast %184 : vector<1x128xf32> to vector<4x128xf32>
    %186 = arith.mulf %183, %185 : vector<4x128xf32>
    %c0_141 = arith.constant 0 : index
    %c0_142 = arith.constant 0 : index
    %187 = vector.load %arg15[%c0_141, %c0_142] : memref<1x128xf32, #tpu.memory_space<vmem>>, vector<1x128xf32>
    %188 = vector.broadcast %187 : vector<1x128xf32> to vector<4x128xf32>
    %189 = arith.addf %186, %188 : vector<4x128xf32>
    %cst_143 = arith.constant 0.000000e+00 : f32
    %190 = vector.broadcast %cst_143 : f32 to vector<4x128xf32>
    %191 = arith.maximumf %189, %190 : vector<4x128xf32>
    %c0_144 = arith.constant 0 : index
    %c0_145 = arith.constant 0 : index
    %192 = vector.load %arg16[%c0_144, %c0_145] : memref<128x128xf32, #tpu.memory_space<vmem>>, vector<128x128xf32>
    %cst_146 = arith.constant dense<0.000000e+00> : vector<4x128xf32>
    %193 = tpu.matmul %191, %192, %cst_146 {dimension_numbers = #tpu.dot_dimension_numbers<[1], [0], [0], [1], [0, 0, 1, 1], [], []>} : vector<4x128xf32>, vector<128x128xf32>, vector<4x128xf32> -> vector<4x128xf32>
    %c0_147 = arith.constant 0 : index
    %c0_148 = arith.constant 0 : index
    %194 = vector.load %arg10[%c0_147, %c0_148] : memref<1x128xf32, #tpu.memory_space<vmem>>, vector<1x128xf32>
    %195 = vector.broadcast %194 : vector<1x128xf32> to vector<4x128xf32>
    %196 = arith.addf %193, %195 : vector<4x128xf32>
    %cst_149 = arith.constant 0.000000e+00 : f32
    %197 = vector.broadcast %cst_149 : f32 to vector<4x128xf32>
    %198 = arith.maximumf %196, %197 : vector<4x128xf32>
    %c0_150 = arith.constant 0 : index
    %c0_151 = arith.constant 0 : index
    %c0_152 = arith.constant 0 : index
    %199 = vector.load %arg14[%c0_150, %c0_151, %c0_152] : memref<3x4x4xf32, #tpu.memory_space<vmem>>, vector<1x4x4xf32>
    %200 = vector.shape_cast %199 : vector<1x4x4xf32> to vector<4x4xf32>
    %cst_153 = arith.constant dense<0.000000e+00> : vector<4x128xf32>
    %201 = tpu.matmul %200, %198, %cst_153 {dimension_numbers = #tpu.dot_dimension_numbers<[1], [0], [0], [1], [0, 0, 1, 1], [], []>} : vector<4x4xf32>, vector<4x128xf32>, vector<4x128xf32> -> vector<4x128xf32>
    %c0_154 = arith.constant 0 : index
    %c0_155 = arith.constant 0 : index
    %c0_156 = arith.constant 0 : index
    %202 = vector.load %arg12[%c0_154, %c0_155, %c0_156] : memref<3x128x128xf32, #tpu.memory_space<vmem>>, vector<1x128x128xf32>
    %203 = vector.shape_cast %202 : vector<1x128x128xf32> to vector<128x128xf32>
    %cst_157 = arith.constant dense<0.000000e+00> : vector<4x128xf32>
    %204 = tpu.matmul %201, %203, %cst_157 {dimension_numbers = #tpu.dot_dimension_numbers<[1], [0], [0], [1], [0, 0, 1, 1], [], []>} : vector<4x128xf32>, vector<128x128xf32>, vector<4x128xf32> -> vector<4x128xf32>
    %c1_158 = arith.constant 1 : index
    %c0_159 = arith.constant 0 : index
    %c0_160 = arith.constant 0 : index
    %205 = vector.load %arg14[%c1_158, %c0_159, %c0_160] : memref<3x4x4xf32, #tpu.memory_space<vmem>>, vector<1x4x4xf32>
    %206 = vector.shape_cast %205 : vector<1x4x4xf32> to vector<4x4xf32>
    %cst_161 = arith.constant dense<0.000000e+00> : vector<4x128xf32>
    %207 = tpu.matmul %206, %198, %cst_161 {dimension_numbers = #tpu.dot_dimension_numbers<[1], [0], [0], [1], [0, 0, 1, 1], [], []>} : vector<4x4xf32>, vector<4x128xf32>, vector<4x128xf32> -> vector<4x128xf32>
    %c1_162 = arith.constant 1 : index
    %c0_163 = arith.constant 0 : index
    %c0_164 = arith.constant 0 : index
    %208 = vector.load %arg12[%c1_162, %c0_163, %c0_164] : memref<3x128x128xf32, #tpu.memory_space<vmem>>, vector<1x128x128xf32>
    %209 = vector.shape_cast %208 : vector<1x128x128xf32> to vector<128x128xf32>
    %cst_165 = arith.constant dense<0.000000e+00> : vector<4x128xf32>
    %210 = tpu.matmul %207, %209, %cst_165 {dimension_numbers = #tpu.dot_dimension_numbers<[1], [0], [0], [1], [0, 0, 1, 1], [], []>} : vector<4x128xf32>, vector<128x128xf32>, vector<4x128xf32> -> vector<4x128xf32>
    %211 = arith.addf %204, %210 : vector<4x128xf32>
    %c2_166 = arith.constant 2 : index
    %c0_167 = arith.constant 0 : index
    %c0_168 = arith.constant 0 : index
    %212 = vector.load %arg14[%c2_166, %c0_167, %c0_168] : memref<3x4x4xf32, #tpu.memory_space<vmem>>, vector<1x4x4xf32>
    %213 = vector.shape_cast %212 : vector<1x4x4xf32> to vector<4x4xf32>
    %cst_169 = arith.constant dense<0.000000e+00> : vector<4x128xf32>
    %214 = tpu.matmul %213, %198, %cst_169 {dimension_numbers = #tpu.dot_dimension_numbers<[1], [0], [0], [1], [0, 0, 1, 1], [], []>} : vector<4x4xf32>, vector<4x128xf32>, vector<4x128xf32> -> vector<4x128xf32>
    %c2_170 = arith.constant 2 : index
    %c0_171 = arith.constant 0 : index
    %c0_172 = arith.constant 0 : index
    %215 = vector.load %arg12[%c2_170, %c0_171, %c0_172] : memref<3x128x128xf32, #tpu.memory_space<vmem>>, vector<1x128x128xf32>
    %216 = vector.shape_cast %215 : vector<1x128x128xf32> to vector<128x128xf32>
    %cst_173 = arith.constant dense<0.000000e+00> : vector<4x128xf32>
    %217 = tpu.matmul %214, %216, %cst_173 {dimension_numbers = #tpu.dot_dimension_numbers<[1], [0], [0], [1], [0, 0, 1, 1], [], []>} : vector<4x128xf32>, vector<128x128xf32>, vector<4x128xf32> -> vector<4x128xf32>
    %218 = arith.addf %211, %217 : vector<4x128xf32>
    %c0_174 = arith.constant 0 : index
    %c0_175 = arith.constant 0 : index
    %219 = vector.load %arg11[%c0_174, %c0_175] : memref<1x128xf32, #tpu.memory_space<vmem>>, vector<1x128xf32>
    %220 = vector.broadcast %219 : vector<1x128xf32> to vector<4x128xf32>
    %221 = arith.addf %218, %220 : vector<4x128xf32>
    %cst_176 = arith.constant 0.000000e+00 : f32
    %222 = vector.broadcast %cst_176 : f32 to vector<4x128xf32>
    %223 = arith.maximumf %221, %222 : vector<4x128xf32>
    %c0_177 = arith.constant 0 : index
    %c0_178 = arith.constant 0 : index
    %224 = vector.load %arg17[%c0_177, %c0_178] : memref<128x128xf32, #tpu.memory_space<vmem>>, vector<128x128xf32>
    %cst_179 = arith.constant dense<0.000000e+00> : vector<4x128xf32>
    %225 = tpu.matmul %223, %224, %cst_179 {dimension_numbers = #tpu.dot_dimension_numbers<[1], [0], [0], [1], [0, 0, 1, 1], [], []>} : vector<4x128xf32>, vector<128x128xf32>, vector<4x128xf32> -> vector<4x128xf32>
    %226 = arith.addf %225, %183 : vector<4x128xf32>
    %c0_180 = arith.constant 0 : index
    %c0_181 = arith.constant 0 : index
    %227 = vector.load %arg33[%c0_180, %c0_181] : memref<1x128xf32, #tpu.memory_space<vmem>>, vector<1x128xf32>
    %228 = vector.broadcast %227 : vector<1x128xf32> to vector<4x128xf32>
    %229 = arith.mulf %226, %228 : vector<4x128xf32>
    %c0_182 = arith.constant 0 : index
    %c0_183 = arith.constant 0 : index
    %230 = vector.load %arg35[%c0_182, %c0_183] : memref<1x128xf32, #tpu.memory_space<vmem>>, vector<1x128xf32>
    %231 = vector.broadcast %230 : vector<1x128xf32> to vector<4x128xf32>
    %232 = arith.addf %229, %231 : vector<4x128xf32>
    %cst_184 = arith.constant 0.000000e+00 : f32
    %233 = vector.broadcast %cst_184 : f32 to vector<4x128xf32>
    %234 = arith.maximumf %232, %233 : vector<4x128xf32>
    %c0_185 = arith.constant 0 : index
    %c0_186 = arith.constant 0 : index
    %235 = vector.load %arg36[%c0_185, %c0_186] : memref<128x128xf32, #tpu.memory_space<vmem>>, vector<128x128xf32>
    %cst_187 = arith.constant dense<0.000000e+00> : vector<4x128xf32>
    %236 = tpu.matmul %234, %235, %cst_187 {dimension_numbers = #tpu.dot_dimension_numbers<[1], [0], [0], [1], [0, 0, 1, 1], [], []>} : vector<4x128xf32>, vector<128x128xf32>, vector<4x128xf32> -> vector<4x128xf32>
    %c0_188 = arith.constant 0 : index
    %c0_189 = arith.constant 0 : index
    %237 = vector.load %arg30[%c0_188, %c0_189] : memref<1x128xf32, #tpu.memory_space<vmem>>, vector<1x128xf32>
    %238 = vector.broadcast %237 : vector<1x128xf32> to vector<4x128xf32>
    %239 = arith.addf %236, %238 : vector<4x128xf32>
    %cst_190 = arith.constant 0.000000e+00 : f32
    %240 = vector.broadcast %cst_190 : f32 to vector<4x128xf32>
    %241 = arith.maximumf %239, %240 : vector<4x128xf32>
    %c0_191 = arith.constant 0 : index
    %c0_192 = arith.constant 0 : index
    %c0_193 = arith.constant 0 : index
    %242 = vector.load %arg34[%c0_191, %c0_192, %c0_193] : memref<3x4x4xf32, #tpu.memory_space<vmem>>, vector<1x4x4xf32>
    %243 = vector.shape_cast %242 : vector<1x4x4xf32> to vector<4x4xf32>
    %cst_194 = arith.constant dense<0.000000e+00> : vector<4x128xf32>
    %244 = tpu.matmul %243, %241, %cst_194 {dimension_numbers = #tpu.dot_dimension_numbers<[1], [0], [0], [1], [0, 0, 1, 1], [], []>} : vector<4x4xf32>, vector<4x128xf32>, vector<4x128xf32> -> vector<4x128xf32>
    %c0_195 = arith.constant 0 : index
    %c0_196 = arith.constant 0 : index
    %c0_197 = arith.constant 0 : index
    %245 = vector.load %arg32[%c0_195, %c0_196, %c0_197] : memref<3x128x128xf32, #tpu.memory_space<vmem>>, vector<1x128x128xf32>
    %246 = vector.shape_cast %245 : vector<1x128x128xf32> to vector<128x128xf32>
    %cst_198 = arith.constant dense<0.000000e+00> : vector<4x128xf32>
    %247 = tpu.matmul %244, %246, %cst_198 {dimension_numbers = #tpu.dot_dimension_numbers<[1], [0], [0], [1], [0, 0, 1, 1], [], []>} : vector<4x128xf32>, vector<128x128xf32>, vector<4x128xf32> -> vector<4x128xf32>
    %c1_199 = arith.constant 1 : index
    %c0_200 = arith.constant 0 : index
    %c0_201 = arith.constant 0 : index
    %248 = vector.load %arg34[%c1_199, %c0_200, %c0_201] : memref<3x4x4xf32, #tpu.memory_space<vmem>>, vector<1x4x4xf32>
    %249 = vector.shape_cast %248 : vector<1x4x4xf32> to vector<4x4xf32>
    %cst_202 = arith.constant dense<0.000000e+00> : vector<4x128xf32>
    %250 = tpu.matmul %249, %241, %cst_202 {dimension_numbers = #tpu.dot_dimension_numbers<[1], [0], [0], [1], [0, 0, 1, 1], [], []>} : vector<4x4xf32>, vector<4x128xf32>, vector<4x128xf32> -> vector<4x128xf32>
    %c1_203 = arith.constant 1 : index
    %c0_204 = arith.constant 0 : index
    %c0_205 = arith.constant 0 : index
    %251 = vector.load %arg32[%c1_203, %c0_204, %c0_205] : memref<3x128x128xf32, #tpu.memory_space<vmem>>, vector<1x128x128xf32>
    %252 = vector.shape_cast %251 : vector<1x128x128xf32> to vector<128x128xf32>
    %cst_206 = arith.constant dense<0.000000e+00> : vector<4x128xf32>
    %253 = tpu.matmul %250, %252, %cst_206 {dimension_numbers = #tpu.dot_dimension_numbers<[1], [0], [0], [1], [0, 0, 1, 1], [], []>} : vector<4x128xf32>, vector<128x128xf32>, vector<4x128xf32> -> vector<4x128xf32>
    %254 = arith.addf %247, %253 : vector<4x128xf32>
    %c2_207 = arith.constant 2 : index
    %c0_208 = arith.constant 0 : index
    %c0_209 = arith.constant 0 : index
    %255 = vector.load %arg34[%c2_207, %c0_208, %c0_209] : memref<3x4x4xf32, #tpu.memory_space<vmem>>, vector<1x4x4xf32>
    %256 = vector.shape_cast %255 : vector<1x4x4xf32> to vector<4x4xf32>
    %cst_210 = arith.constant dense<0.000000e+00> : vector<4x128xf32>
    %257 = tpu.matmul %256, %241, %cst_210 {dimension_numbers = #tpu.dot_dimension_numbers<[1], [0], [0], [1], [0, 0, 1, 1], [], []>} : vector<4x4xf32>, vector<4x128xf32>, vector<4x128xf32> -> vector<4x128xf32>
    %c2_211 = arith.constant 2 : index
    %c0_212 = arith.constant 0 : index
    %c0_213 = arith.constant 0 : index
    %258 = vector.load %arg32[%c2_211, %c0_212, %c0_213] : memref<3x128x128xf32, #tpu.memory_space<vmem>>, vector<1x128x128xf32>
    %259 = vector.shape_cast %258 : vector<1x128x128xf32> to vector<128x128xf32>
    %cst_214 = arith.constant dense<0.000000e+00> : vector<4x128xf32>
    %260 = tpu.matmul %257, %259, %cst_214 {dimension_numbers = #tpu.dot_dimension_numbers<[1], [0], [0], [1], [0, 0, 1, 1], [], []>} : vector<4x128xf32>, vector<128x128xf32>, vector<4x128xf32> -> vector<4x128xf32>
    %261 = arith.addf %254, %260 : vector<4x128xf32>
    %c0_215 = arith.constant 0 : index
    %c0_216 = arith.constant 0 : index
    %262 = vector.load %arg31[%c0_215, %c0_216] : memref<1x128xf32, #tpu.memory_space<vmem>>, vector<1x128xf32>
    %263 = vector.broadcast %262 : vector<1x128xf32> to vector<4x128xf32>
    %264 = arith.addf %261, %263 : vector<4x128xf32>
    %cst_217 = arith.constant 0.000000e+00 : f32
    %265 = vector.broadcast %cst_217 : f32 to vector<4x128xf32>
    %266 = arith.maximumf %264, %265 : vector<4x128xf32>
    %c0_218 = arith.constant 0 : index
    %c0_219 = arith.constant 0 : index
    %267 = vector.load %arg37[%c0_218, %c0_219] : memref<128x128xf32, #tpu.memory_space<vmem>>, vector<128x128xf32>
    %cst_220 = arith.constant dense<0.000000e+00> : vector<4x128xf32>
    %268 = tpu.matmul %266, %267, %cst_220 {dimension_numbers = #tpu.dot_dimension_numbers<[1], [0], [0], [1], [0, 0, 1, 1], [], []>} : vector<4x128xf32>, vector<128x128xf32>, vector<4x128xf32> -> vector<4x128xf32>
    %269 = arith.addf %268, %226 : vector<4x128xf32>
    %c0_221 = arith.constant 0 : index
    %c0_222 = arith.constant 0 : index
    %270 = vector.load %arg51[%c0_221, %c0_222] : memref<8x4xf32, #tpu.memory_space<vmem>>, vector<8x4xf32>
    %cst_223 = arith.constant dense<0.000000e+00> : vector<8x128xf32>
    %271 = tpu.matmul %270, %269, %cst_223 {dimension_numbers = #tpu.dot_dimension_numbers<[1], [0], [0], [1], [0, 0, 1, 1], [], []>} : vector<8x4xf32>, vector<4x128xf32>, vector<8x128xf32> -> vector<8x128xf32>
    %c0_224 = arith.constant 0 : index
    %c0_225 = arith.constant 0 : index
    %272 = vector.load %arg50[%c0_224, %c0_225] : memref<128x512xf32, #tpu.memory_space<vmem>>, vector<128x512xf32>
    %cst_226 = arith.constant dense<0.000000e+00> : vector<8x512xf32>
    %273 = tpu.matmul %271, %272, %cst_226 {dimension_numbers = #tpu.dot_dimension_numbers<[1], [0], [0], [1], [0, 0, 1, 1], [], []>} : vector<8x128xf32>, vector<128x512xf32>, vector<8x512xf32> -> vector<8x512xf32>
    %c0_227 = arith.constant 0 : index
    %c0_228 = arith.constant 0 : index
    %274 = vector.load %arg20[%c0_227, %c0_228] : memref<512x512xf32, #tpu.memory_space<vmem>>, vector<512x512xf32>
    %cst_229 = arith.constant dense<0.000000e+00> : vector<8x512xf32>
    %275 = tpu.matmul %273, %274, %cst_229 {dimension_numbers = #tpu.dot_dimension_numbers<[1], [0], [0], [1], [0, 0, 1, 1], [], []>} : vector<8x512xf32>, vector<512x512xf32>, vector<8x512xf32> -> vector<8x512xf32>
    %c0_230 = arith.constant 0 : index
    %c0_231 = arith.constant 0 : index
    %276 = vector.load %arg18[%c0_230, %c0_231] : memref<1x512xf32, #tpu.memory_space<vmem>>, vector<1x512xf32>
    %277 = vector.broadcast %276 : vector<1x512xf32> to vector<8x512xf32>
    %278 = arith.addf %275, %277 : vector<8x512xf32>
    %c0_232 = arith.constant 0 : index
    %c0_233 = arith.constant 0 : index
    %279 = vector.load %arg21[%c0_232, %c0_233] : memref<512x512xf32, #tpu.memory_space<vmem>>, vector<512x512xf32>
    %cst_234 = arith.constant dense<0.000000e+00> : vector<8x512xf32>
    %280 = tpu.matmul %278, %279, %cst_234 {dimension_numbers = #tpu.dot_dimension_numbers<[1], [0], [0], [1], [0, 0, 1, 1], [], []>} : vector<8x512xf32>, vector<512x512xf32>, vector<8x512xf32> -> vector<8x512xf32>
    %c0_235 = arith.constant 0 : index
    %c0_236 = arith.constant 0 : index
    %281 = vector.load %arg19[%c0_235, %c0_236] : memref<1x512xf32, #tpu.memory_space<vmem>>, vector<1x512xf32>
    %282 = vector.broadcast %281 : vector<1x512xf32> to vector<8x512xf32>
    %283 = arith.addf %280, %282 : vector<8x512xf32>
    %cst_237 = arith.constant 0.000000e+00 : f32
    %284 = vector.broadcast %cst_237 : f32 to vector<8x512xf32>
    %285 = arith.subf %284, %283 : vector<8x512xf32>
    %286 = math.exp %285 : vector<8x512xf32>
    %cst_238 = arith.constant 1.000000e+00 : f32
    %287 = vector.broadcast %cst_238 : f32 to vector<8x512xf32>
    %288 = arith.addf %287, %286 : vector<8x512xf32>
    %cst_239 = arith.constant 1.000000e+00 : f32
    %289 = vector.broadcast %cst_239 : f32 to vector<8x512xf32>
    %290 = arith.divf %289, %288 : vector<8x512xf32>
    %cst_240 = arith.constant 1.000000e+00 : f32
    %291 = vector.broadcast %cst_240 : f32 to vector<8x512xf32>
    %292 = arith.addf %290, %291 : vector<8x512xf32>
    %293 = arith.mulf %292, %87 : vector<8x512xf32>
    %c0_241 = arith.constant 0 : index
    %c0_242 = arith.constant 0 : index
    %294 = vector.load %arg25[%c0_241, %c0_242] : memref<1x512xf32, #tpu.memory_space<vmem>>, vector<1x512xf32>
    %295 = vector.broadcast %294 : vector<1x512xf32> to vector<8x512xf32>
    %296 = arith.mulf %293, %295 : vector<8x512xf32>
    %c0_243 = arith.constant 0 : index
    %c0_244 = arith.constant 0 : index
    %297 = vector.load %arg27[%c0_243, %c0_244] : memref<1x512xf32, #tpu.memory_space<vmem>>, vector<1x512xf32>
    %298 = vector.broadcast %297 : vector<1x512xf32> to vector<8x512xf32>
    %299 = arith.addf %296, %298 : vector<8x512xf32>
    %cst_245 = arith.constant 0.000000e+00 : f32
    %300 = vector.broadcast %cst_245 : f32 to vector<8x512xf32>
    %301 = arith.maximumf %299, %300 : vector<8x512xf32>
    %c0_246 = arith.constant 0 : index
    %c0_247 = arith.constant 0 : index
    %302 = vector.load %arg28[%c0_246, %c0_247] : memref<512x128xf32, #tpu.memory_space<vmem>>, vector<512x128xf32>
    %cst_248 = arith.constant dense<0.000000e+00> : vector<8x128xf32>
    %303 = tpu.matmul %301, %302, %cst_248 {dimension_numbers = #tpu.dot_dimension_numbers<[1], [0], [0], [1], [0, 0, 1, 1], [], []>} : vector<8x512xf32>, vector<512x128xf32>, vector<8x128xf32> -> vector<8x128xf32>
    %c0_249 = arith.constant 0 : index
    %c0_250 = arith.constant 0 : index
    %304 = vector.load %arg22[%c0_249, %c0_250] : memref<1x128xf32, #tpu.memory_space<vmem>>, vector<1x128xf32>
    %305 = vector.broadcast %304 : vector<1x128xf32> to vector<8x128xf32>
    %306 = arith.addf %303, %305 : vector<8x128xf32>
    %cst_251 = arith.constant 0.000000e+00 : f32
    %307 = vector.broadcast %cst_251 : f32 to vector<8x128xf32>
    %308 = arith.maximumf %306, %307 : vector<8x128xf32>
    %c0_252 = arith.constant 0 : index
    %c0_253 = arith.constant 0 : index
    %c0_254 = arith.constant 0 : index
    %309 = vector.load %arg26[%c0_252, %c0_253, %c0_254] : memref<3x8x8xf32, #tpu.memory_space<vmem>>, vector<1x8x8xf32>
    %310 = vector.shape_cast %309 : vector<1x8x8xf32> to vector<8x8xf32>
    %cst_255 = arith.constant dense<0.000000e+00> : vector<8x128xf32>
    %311 = tpu.matmul %310, %308, %cst_255 {dimension_numbers = #tpu.dot_dimension_numbers<[1], [0], [0], [1], [0, 0, 1, 1], [], []>} : vector<8x8xf32>, vector<8x128xf32>, vector<8x128xf32> -> vector<8x128xf32>
    %c0_256 = arith.constant 0 : index
    %c0_257 = arith.constant 0 : index
    %c0_258 = arith.constant 0 : index
    %312 = vector.load %arg24[%c0_256, %c0_257, %c0_258] : memref<3x128x128xf32, #tpu.memory_space<vmem>>, vector<1x128x128xf32>
    %313 = vector.shape_cast %312 : vector<1x128x128xf32> to vector<128x128xf32>
    %cst_259 = arith.constant dense<0.000000e+00> : vector<8x128xf32>
    %314 = tpu.matmul %311, %313, %cst_259 {dimension_numbers = #tpu.dot_dimension_numbers<[1], [0], [0], [1], [0, 0, 1, 1], [], []>} : vector<8x128xf32>, vector<128x128xf32>, vector<8x128xf32> -> vector<8x128xf32>
    %c1_260 = arith.constant 1 : index
    %c0_261 = arith.constant 0 : index
    %c0_262 = arith.constant 0 : index
    %315 = vector.load %arg26[%c1_260, %c0_261, %c0_262] : memref<3x8x8xf32, #tpu.memory_space<vmem>>, vector<1x8x8xf32>
    %316 = vector.shape_cast %315 : vector<1x8x8xf32> to vector<8x8xf32>
    %cst_263 = arith.constant dense<0.000000e+00> : vector<8x128xf32>
    %317 = tpu.matmul %316, %308, %cst_263 {dimension_numbers = #tpu.dot_dimension_numbers<[1], [0], [0], [1], [0, 0, 1, 1], [], []>} : vector<8x8xf32>, vector<8x128xf32>, vector<8x128xf32> -> vector<8x128xf32>
    %c1_264 = arith.constant 1 : index
    %c0_265 = arith.constant 0 : index
    %c0_266 = arith.constant 0 : index
    %318 = vector.load %arg24[%c1_264, %c0_265, %c0_266] : memref<3x128x128xf32, #tpu.memory_space<vmem>>, vector<1x128x128xf32>
    %319 = vector.shape_cast %318 : vector<1x128x128xf32> to vector<128x128xf32>
    %cst_267 = arith.constant dense<0.000000e+00> : vector<8x128xf32>
    %320 = tpu.matmul %317, %319, %cst_267 {dimension_numbers = #tpu.dot_dimension_numbers<[1], [0], [0], [1], [0, 0, 1, 1], [], []>} : vector<8x128xf32>, vector<128x128xf32>, vector<8x128xf32> -> vector<8x128xf32>
    %321 = arith.addf %314, %320 : vector<8x128xf32>
    %c2_268 = arith.constant 2 : index
    %c0_269 = arith.constant 0 : index
    %c0_270 = arith.constant 0 : index
    %322 = vector.load %arg26[%c2_268, %c0_269, %c0_270] : memref<3x8x8xf32, #tpu.memory_space<vmem>>, vector<1x8x8xf32>
    %323 = vector.shape_cast %322 : vector<1x8x8xf32> to vector<8x8xf32>
    %cst_271 = arith.constant dense<0.000000e+00> : vector<8x128xf32>
    %324 = tpu.matmul %323, %308, %cst_271 {dimension_numbers = #tpu.dot_dimension_numbers<[1], [0], [0], [1], [0, 0, 1, 1], [], []>} : vector<8x8xf32>, vector<8x128xf32>, vector<8x128xf32> -> vector<8x128xf32>
    %c2_272 = arith.constant 2 : index
    %c0_273 = arith.constant 0 : index
    %c0_274 = arith.constant 0 : index
    %325 = vector.load %arg24[%c2_272, %c0_273, %c0_274] : memref<3x128x128xf32, #tpu.memory_space<vmem>>, vector<1x128x128xf32>
    %326 = vector.shape_cast %325 : vector<1x128x128xf32> to vector<128x128xf32>
    %cst_275 = arith.constant dense<0.000000e+00> : vector<8x128xf32>
    %327 = tpu.matmul %324, %326, %cst_275 {dimension_numbers = #tpu.dot_dimension_numbers<[1], [0], [0], [1], [0, 0, 1, 1], [], []>} : vector<8x128xf32>, vector<128x128xf32>, vector<8x128xf32> -> vector<8x128xf32>
    %328 = arith.addf %321, %327 : vector<8x128xf32>
    %c0_276 = arith.constant 0 : index
    %c0_277 = arith.constant 0 : index
    %329 = vector.load %arg23[%c0_276, %c0_277] : memref<1x128xf32, #tpu.memory_space<vmem>>, vector<1x128xf32>
    %330 = vector.broadcast %329 : vector<1x128xf32> to vector<8x128xf32>
    %331 = arith.addf %328, %330 : vector<8x128xf32>
    %cst_278 = arith.constant 0.000000e+00 : f32
    %332 = vector.broadcast %cst_278 : f32 to vector<8x128xf32>
    %333 = arith.maximumf %331, %332 : vector<8x128xf32>
    %c0_279 = arith.constant 0 : index
    %c0_280 = arith.constant 0 : index
    %334 = vector.load %arg29[%c0_279, %c0_280] : memref<128x512xf32, #tpu.memory_space<vmem>>, vector<128x512xf32>
    %cst_281 = arith.constant dense<0.000000e+00> : vector<8x512xf32>
    %335 = tpu.matmul %333, %334, %cst_281 {dimension_numbers = #tpu.dot_dimension_numbers<[1], [0], [0], [1], [0, 0, 1, 1], [], []>} : vector<8x128xf32>, vector<128x512xf32>, vector<8x512xf32> -> vector<8x512xf32>
    %336 = arith.addf %335, %293 : vector<8x512xf32>
    %c0_282 = arith.constant 0 : index
    %c0_283 = arith.constant 0 : index
    %c0_284 = arith.constant 0 : index
    %337 = vector.load %arg52[%c0_282, %c0_283, %c0_284] : memref<1x8x512xf32, #tpu.memory_space<vmem>>, vector<1x8x512xf32>
    %338 = vector.shape_cast %337 : vector<1x8x512xf32> to vector<8x512xf32>
    %339 = vector.shape_cast %336 : vector<8x512xf32> to vector<1x8x512xf32>
    tpu.vector_store %arg52[%c0_282, %c0_283, %c0_284], %339 {strides = array<i32>} : memref<1x8x512xf32, #tpu.memory_space<vmem>>, vector<1x8x512xf32>,
    return
  }
  func.func @transform_0(%arg0: i32) -> (i32, i32, i32) {
    %c0_i32 = arith.constant 0 : i32
    %c0_i32_0 = arith.constant 0 : i32
    %c0_i32_1 = arith.constant 0 : i32
    return %arg0, %c0_i32, %c0_i32_0 : i32, i32, i32
  }
  func.func @transform_1(%arg0: i32) -> (i32, i32) {
    %c0_i32 = arith.constant 0 : i32
    %c0_i32_0 = arith.constant 0 : i32
    %c0_i32_1 = arith.constant 0 : i32
    return %c0_i32, %c0_i32_0 : i32, i32
  }
  func.func @transform_2(%arg0: i32) -> (i32, i32) {
    %c0_i32 = arith.constant 0 : i32
    %c0_i32_0 = arith.constant 0 : i32
    %c0_i32_1 = arith.constant 0 : i32
    return %c0_i32, %c0_i32_0 : i32, i32
  }
  func.func @transform_3(%arg0: i32) -> (i32, i32, i32) {
    %c0_i32 = arith.constant 0 : i32
    %c0_i32_0 = arith.constant 0 : i32
    %c0_i32_1 = arith.constant 0 : i32
    %c0_i32_2 = arith.constant 0 : i32
    return %c0_i32, %c0_i32_0, %c0_i32_1 : i32, i32, i32
  }
  func.func @transform_4(%arg0: i32) -> (i32, i32) {
    %c0_i32 = arith.constant 0 : i32
    %c0_i32_0 = arith.constant 0 : i32
    %c0_i32_1 = arith.constant 0 : i32
    return %c0_i32, %c0_i32_0 : i32, i32
  }
  func.func @transform_5(%arg0: i32) -> (i32, i32, i32) {
    %c0_i32 = arith.constant 0 : i32
    %c0_i32_0 = arith.constant 0 : i32
    %c0_i32_1 = arith.constant 0 : i32
    %c0_i32_2 = arith.constant 0 : i32
    return %c0_i32, %c0_i32_0, %c0_i32_1 : i32, i32, i32
  }
  func.func @transform_6(%arg0: i32) -> (i32, i32) {
    %c0_i32 = arith.constant 0 : i32
    %c0_i32_0 = arith.constant 0 : i32
    %c0_i32_1 = arith.constant 0 : i32
    return %c0_i32, %c0_i32_0 : i32, i32
  }
  func.func @transform_7(%arg0: i32) -> (i32, i32) {
    %c0_i32 = arith.constant 0 : i32
    %c0_i32_0 = arith.constant 0 : i32
    %c0_i32_1 = arith.constant 0 : i32
    return %c0_i32, %c0_i32_0 : i32, i32
  }
  func.func @transform_8(%arg0: i32) -> (i32, i32) {
    %c0_i32 = arith.constant 0 : i32
    %c0_i32_0 = arith.constant 0 : i32
    %c0_i32_1 = arith.constant 0 : i32
    return %c0_i32, %c0_i32_0 : i32, i32
  }
  func.func @transform_9(%arg0: i32) -> (i32, i32) {
    %c0_i32 = arith.constant 0 : i32
    %c0_i32_0 = arith.constant 0 : i32
    %c0_i32_1 = arith.constant 0 : i32
    return %c0_i32, %c0_i32_0 : i32, i32
  }
  func.func @transform_10(%arg0: i32) -> (i32, i32) {
    %c0_i32 = arith.constant 0 : i32
    %c0_i32_0 = arith.constant 0 : i32
    %c0_i32_1 = arith.constant 0 : i32
    return %c0_i32, %c0_i32_0 : i32, i32
  }
  func.func @transform_11(%arg0: i32) -> (i32, i32, i32) {
    %c0_i32 = arith.constant 0 : i32
    %c0_i32_0 = arith.constant 0 : i32
    %c0_i32_1 = arith.constant 0 : i32
    %c0_i32_2 = arith.constant 0 : i32
    return %c0_i32, %c0_i32_0, %c0_i32_1 : i32, i32, i32
  }
  func.func @transform_12(%arg0: i32) -> (i32, i32) {
    %c0_i32 = arith.constant 0 : i32
    %c0_i32_0 = arith.constant 0 : i32
    %c0_i32_1 = arith.constant 0 : i32
    return %c0_i32, %c0_i32_0 : i32, i32
  }
  func.func @transform_13(%arg0: i32) -> (i32, i32, i32) {
    %c0_i32 = arith.constant 0 : i32
    %c0_i32_0 = arith.constant 0 : i32
    %c0_i32_1 = arith.constant 0 : i32
    %c0_i32_2 = arith.constant 0 : i32
    return %c0_i32, %c0_i32_0, %c0_i32_1 : i32, i32, i32
  }
  func.func @transform_14(%arg0: i32) -> (i32, i32) {
    %c0_i32 = arith.constant 0 : i32
    %c0_i32_0 = arith.constant 0 : i32
    %c0_i32_1 = arith.constant 0 : i32
    return %c0_i32, %c0_i32_0 : i32, i32
  }
  func.func @transform_15(%arg0: i32) -> (i32, i32) {
    %c0_i32 = arith.constant 0 : i32
    %c0_i32_0 = arith.constant 0 : i32
    %c0_i32_1 = arith.constant 0 : i32
    return %c0_i32, %c0_i32_0 : i32, i32
  }
  func.func @transform_16(%arg0: i32) -> (i32, i32) {
    %c0_i32 = arith.constant 0 : i32
    %c0_i32_0 = arith.constant 0 : i32
    %c0_i32_1 = arith.constant 0 : i32
    return %c0_i32, %c0_i32_0 : i32, i32
  }
  func.func @transform_17(%arg0: i32) -> (i32, i32) {
    %c0_i32 = arith.constant 0 : i32
    %c0_i32_0 = arith.constant 0 : i32
    %c0_i32_1 = arith.constant 0 : i32
    return %c0_i32, %c0_i32_0 : i32, i32
  }
  func.func @transform_18(%arg0: i32) -> (i32, i32) {
    %c0_i32 = arith.constant 0 : i32
    %c0_i32_0 = arith.constant 0 : i32
    %c0_i32_1 = arith.constant 0 : i32
    return %c0_i32, %c0_i32_0 : i32, i32
  }
  func.func @transform_19(%arg0: i32) -> (i32, i32) {
    %c0_i32 = arith.constant 0 : i32
    %c0_i32_0 = arith.constant 0 : i32
    %c0_i32_1 = arith.constant 0 : i32
    return %c0_i32, %c0_i32_0 : i32, i32
  }
  func.func @transform_20(%arg0: i32) -> (i32, i32) {
    %c0_i32 = arith.constant 0 : i32
    %c0_i32_0 = arith.constant 0 : i32
    %c0_i32_1 = arith.constant 0 : i32
    return %c0_i32, %c0_i32_0 : i32, i32
  }
  func.func @transform_21(%arg0: i32) -> (i32, i32) {
    %c0_i32 = arith.constant 0 : i32
    %c0_i32_0 = arith.constant 0 : i32
    %c0_i32_1 = arith.constant 0 : i32
    return %c0_i32, %c0_i32_0 : i32, i32
  }
  func.func @transform_22(%arg0: i32) -> (i32, i32) {
    %c0_i32 = arith.constant 0 : i32
    %c0_i32_0 = arith.constant 0 : i32
    %c0_i32_1 = arith.constant 0 : i32
    return %c0_i32, %c0_i32_0 : i32, i32
  }
  func.func @transform_23(%arg0: i32) -> (i32, i32, i32) {
    %c0_i32 = arith.constant 0 : i32
    %c0_i32_0 = arith.constant 0 : i32
    %c0_i32_1 = arith.constant 0 : i32
    %c0_i32_2 = arith.constant 0 : i32
    return %c0_i32, %c0_i32_0, %c0_i32_1 : i32, i32, i32
  }
  func.func @transform_24(%arg0: i32) -> (i32, i32) {
    %c0_i32 = arith.constant 0 : i32
    %c0_i32_0 = arith.constant 0 : i32
    %c0_i32_1 = arith.constant 0 : i32
    return %c0_i32, %c0_i32_0 : i32, i32
  }
  func.func @transform_25(%arg0: i32) -> (i32, i32, i32) {
    %c0_i32 = arith.constant 0 : i32
    %c0_i32_0 = arith.constant 0 : i32
    %c0_i32_1 = arith.constant 0 : i32
    %c0_i32_2 = arith.constant 0 : i32
    return %c0_i32, %c0_i32_0, %c0_i32_1 : i32, i32, i32
  }
  func.func @transform_26(%arg0: i32) -> (i32, i32) {
    %c0_i32 = arith.constant 0 : i32
    %c0_i32_0 = arith.constant 0 : i32
    %c0_i32_1 = arith.constant 0 : i32
    return %c0_i32, %c0_i32_0 : i32, i32
  }
  func.func @transform_27(%arg0: i32) -> (i32, i32) {
    %c0_i32 = arith.constant 0 : i32
    %c0_i32_0 = arith.constant 0 : i32
    %c0_i32_1 = arith.constant 0 : i32
    return %c0_i32, %c0_i32_0 : i32, i32
  }
  func.func @transform_28(%arg0: i32) -> (i32, i32) {
    %c0_i32 = arith.constant 0 : i32
    %c0_i32_0 = arith.constant 0 : i32
    %c0_i32_1 = arith.constant 0 : i32
    return %c0_i32, %c0_i32_0 : i32, i32
  }
  func.func @transform_29(%arg0: i32) -> (i32, i32) {
    %c0_i32 = arith.constant 0 : i32
    %c0_i32_0 = arith.constant 0 : i32
    %c0_i32_1 = arith.constant 0 : i32
    return %c0_i32, %c0_i32_0 : i32, i32
  }
  func.func @transform_30(%arg0: i32) -> (i32, i32) {
    %c0_i32 = arith.constant 0 : i32
    %c0_i32_0 = arith.constant 0 : i32
    %c0_i32_1 = arith.constant 0 : i32
    return %c0_i32, %c0_i32_0 : i32, i32
  }
  func.func @transform_31(%arg0: i32) -> (i32, i32, i32) {
    %c0_i32 = arith.constant 0 : i32
    %c0_i32_0 = arith.constant 0 : i32
    %c0_i32_1 = arith.constant 0 : i32
    %c0_i32_2 = arith.constant 0 : i32
    return %c0_i32, %c0_i32_0, %c0_i32_1 : i32, i32, i32
  }
  func.func @transform_32(%arg0: i32) -> (i32, i32) {
    %c0_i32 = arith.constant 0 : i32
    %c0_i32_0 = arith.constant 0 : i32
    %c0_i32_1 = arith.constant 0 : i32
    return %c0_i32, %c0_i32_0 : i32, i32
  }
  func.func @transform_33(%arg0: i32) -> (i32, i32, i32) {
    %c0_i32 = arith.constant 0 : i32
    %c0_i32_0 = arith.constant 0 : i32
    %c0_i32_1 = arith.constant 0 : i32
    %c0_i32_2 = arith.constant 0 : i32
    return %c0_i32, %c0_i32_0, %c0_i32_1 : i32, i32, i32
  }
  func.func @transform_34(%arg0: i32) -> (i32, i32) {
    %c0_i32 = arith.constant 0 : i32
    %c0_i32_0 = arith.constant 0 : i32
    %c0_i32_1 = arith.constant 0 : i32
    return %c0_i32, %c0_i32_0 : i32, i32
  }
  func.func @transform_35(%arg0: i32) -> (i32, i32) {
    %c0_i32 = arith.constant 0 : i32
    %c0_i32_0 = arith.constant 0 : i32
    %c0_i32_1 = arith.constant 0 : i32
    return %c0_i32, %c0_i32_0 : i32, i32
  }
  func.func @transform_36(%arg0: i32) -> (i32, i32) {
    %c0_i32 = arith.constant 0 : i32
    %c0_i32_0 = arith.constant 0 : i32
    %c0_i32_1 = arith.constant 0 : i32
    return %c0_i32, %c0_i32_0 : i32, i32
  }
  func.func @transform_37(%arg0: i32) -> (i32, i32) {
    %c0_i32 = arith.constant 0 : i32
    %c0_i32_0 = arith.constant 0 : i32
    %c0_i32_1 = arith.constant 0 : i32
    return %c0_i32, %c0_i32_0 : i32, i32
  }
  func.func @transform_38(%arg0: i32) -> (i32, i32) {
    %c0_i32 = arith.constant 0 : i32
    %c0_i32_0 = arith.constant 0 : i32
    %c0_i32_1 = arith.constant 0 : i32
    return %c0_i32, %c0_i32_0 : i32, i32
  }
  func.func @transform_39(%arg0: i32) -> (i32, i32) {
    %c0_i32 = arith.constant 0 : i32
    %c0_i32_0 = arith.constant 0 : i32
    %c0_i32_1 = arith.constant 0 : i32
    return %c0_i32, %c0_i32_0 : i32, i32
  }
  func.func @transform_40(%arg0: i32) -> (i32, i32) {
    %c0_i32 = arith.constant 0 : i32
    %c0_i32_0 = arith.constant 0 : i32
    %c0_i32_1 = arith.constant 0 : i32
    return %c0_i32, %c0_i32_0 : i32, i32
  }
  func.func @transform_41(%arg0: i32) -> (i32, i32) {
    %c0_i32 = arith.constant 0 : i32
    %c0_i32_0 = arith.constant 0 : i32
    %c0_i32_1 = arith.constant 0 : i32
    return %c0_i32, %c0_i32_0 : i32, i32
  }
  func.func @transform_42(%arg0: i32) -> (i32, i32) {
    %c0_i32 = arith.constant 0 : i32
    %c0_i32_0 = arith.constant 0 : i32
    %c0_i32_1 = arith.constant 0 : i32
    return %c0_i32, %c0_i32_0 : i32, i32
  }
  func.func @transform_43(%arg0: i32) -> (i32, i32, i32) {
    %c0_i32 = arith.constant 0 : i32
    %c0_i32_0 = arith.constant 0 : i32
    %c0_i32_1 = arith.constant 0 : i32
    %c0_i32_2 = arith.constant 0 : i32
    return %c0_i32, %c0_i32_0, %c0_i32_1 : i32, i32, i32
  }
  func.func @transform_44(%arg0: i32) -> (i32, i32) {
    %c0_i32 = arith.constant 0 : i32
    %c0_i32_0 = arith.constant 0 : i32
    %c0_i32_1 = arith.constant 0 : i32
    return %c0_i32, %c0_i32_0 : i32, i32
  }
  func.func @transform_45(%arg0: i32) -> (i32, i32, i32) {
    %c0_i32 = arith.constant 0 : i32
    %c0_i32_0 = arith.constant 0 : i32
    %c0_i32_1 = arith.constant 0 : i32
    %c0_i32_2 = arith.constant 0 : i32
    return %c0_i32, %c0_i32_0, %c0_i32_1 : i32, i32, i32
  }
  func.func @transform_46(%arg0: i32) -> (i32, i32) {
    %c0_i32 = arith.constant 0 : i32
    %c0_i32_0 = arith.constant 0 : i32
    %c0_i32_1 = arith.constant 0 : i32
    return %c0_i32, %c0_i32_0 : i32, i32
  }
  func.func @transform_47(%arg0: i32) -> (i32, i32) {
    %c0_i32 = arith.constant 0 : i32
    %c0_i32_0 = arith.constant 0 : i32
    %c0_i32_1 = arith.constant 0 : i32
    return %c0_i32, %c0_i32_0 : i32, i32
  }
  func.func @transform_48(%arg0: i32) -> (i32, i32) {
    %c0_i32 = arith.constant 0 : i32
    %c0_i32_0 = arith.constant 0 : i32
    %c0_i32_1 = arith.constant 0 : i32
    return %c0_i32, %c0_i32_0 : i32, i32
  }
  func.func @transform_49(%arg0: i32) -> (i32, i32) {
    %c0_i32 = arith.constant 0 : i32
    %c0_i32_0 = arith.constant 0 : i32
    %c0_i32_1 = arith.constant 0 : i32
    return %c0_i32, %c0_i32_0 : i32, i32
  }
  func.func @transform_50(%arg0: i32) -> (i32, i32) {
    %c0_i32 = arith.constant 0 : i32
    %c0_i32_0 = arith.constant 0 : i32
    %c0_i32_1 = arith.constant 0 : i32
    return %c0_i32, %c0_i32_0 : i32, i32
  }
  func.func @transform_51(%arg0: i32) -> (i32, i32, i32) {
    %c0_i32 = arith.constant 0 : i32
    %c0_i32_0 = arith.constant 0 : i32
    %c0_i32_1 = arith.constant 0 : i32
    return %arg0, %c0_i32, %c0_i32_0 : i32, i32, i32
  }
}

</mosaic_0001>

<bundles_post_ra>
// kernel: attention_block_fwd.1
= control target key start
LH: loop header
LB: loop body
LE: loop exit
PB: predicated region body
PF: predicated region fallthrough
CT: control target
= control target key end

     0   :  { %s8621_s6 = smov 1   ;;  %s8622_s10 = smov 2   ;;  %s11050_s0 = inlined_call_operand.smem [shape: u32[52], index: -1, kind: input, shape index: {}] }
   0x1   :  { %s8730_s5 = sld [smem:[%s11050_s0]]   ;;  %s8623_s14 = smov 3  }
   0x2   :  { %s8735_s9 = sld [smem:[%s11050_s0 + %s8621_s6]]   ;;  %s8624_s18 = smov 4  }
   0x3   :  { %s8740_s13 = sld [smem:[%s11050_s0 + %s8622_s10]]   ;;  %s8625_s22 = smov 5  }
   0x4   :  { %s8745_s17 = sld [smem:[%s11050_s0 + %s8623_s14]]   ;;  %s8626_s26 = smov 6  }
   0x5   :  { %s8750_s21 = sld [smem:[%s11050_s0 + %s8624_s18]]   ;;  %s8627_s30 = smov 7  }
   0x6   :  { %s8755_s25 = sld [smem:[%s11050_s0 + %s8625_s22]]   ;;  %s8628_s4 = smov 8  }
   0x7   :  { %11242 = sst [smem:[#allocation84_spill]] %s8730_s5  ;;  %s8629_s10 = smov 9  }
   0x8   :  { %11243 = sst [smem:[#allocation85_spill]] %s8735_s9  ;;  %s8630_s15 = smov 10  }
   0x9   :  { %11244 = sst [smem:[#allocation86_spill]] %s8740_s13  ;;  %s8631_s20 = smov 11  }
   0xa   :  { %11245 = sst [smem:[#allocation87_spill]] %s8745_s17  ;;  %s8633_s1 = smov 13  }
   0xb   :  { %11246 = sst [smem:[#allocation88_spill]] %s8750_s21  ;;  %s8634_s7 = smov 14  }
   0xc   :  { %11247 = sst [smem:[#allocation89_spill]] %s8755_s25  ;;  %s8636_s22 = smov 16  }
   0xd   :  { %s8760_s29 = sld [smem:[%s11050_s0 + %s8626_s26]]   ;;  %s8632_s26 = smov 12  }
   0xe   :  { %s8765_s3 = sld [smem:[%s11050_s0 + %s8627_s30]]   ;;  %s8637_s28 = smov 17  }
   0xf   :  { %s8770_s8 = sld [smem:[%s11050_s0 + %s8628_s4]]  }
  0x10   :  { %s8775_s14 = sld [smem:[%s11050_s0 + %s8629_s10]]  }
  0x11   :  { %s8780_s19 = sld [smem:[%s11050_s0 + %s8630_s15]]   ;;  %s8635_s15 = smov 15  }
  0x12   :  { %s8785_s24 = sld [smem:[%s11050_s0 + %s8631_s20]]  }
  0x13   :  { %s8790_s30 = sld [smem:[%s11050_s0 + %s8632_s26]]  }
  0x14   :  { %11248 = sst [smem:[#allocation90_spill]] %s8765_s3 }
  0x15   :  { %11249 = sst [smem:[#allocation91_spill]] %s8770_s8 }
  0x16   :  { %11250 = sst [smem:[#allocation92_spill]] %s8775_s14 }
  0x17   :  { %11251 = sst [smem:[#allocation93_spill]] %s8780_s19 }
  0x18   :  { %11252 = sst [smem:[#allocation94_spill]] %s8785_s24 }
  0x19   :  { %s8795_s6 = sld [smem:[%s11050_s0 + %s8633_s1]]  }
  0x1a   :  { %s8800_s12 = sld [smem:[%s11050_s0 + %s8634_s7]]   ;;  %s8638_s7 = smov 18  }
  0x1b   :  { %s8805_s20 = sld [smem:[%s11050_s0 + %s8635_s15]]   ;;  %s8639_s15 = smov 19  }
  0x1c   :  { %s8810_s27 = sld [smem:[%s11050_s0 + %s8636_s22]]   ;;  %s8640_s22 = smov 20  }
  0x1d   :  { %s8815_s4 = sld [smem:[%s11050_s0 + %s8637_s28]]   ;;  %s8641_s28 = smov 21  }
  0x1e   :  { %s8820_s8 = sld [smem:[%s11050_s0 + %s8638_s7]]   ;;  %s8642_s7 = smov 22  }
  0x1f   :  { %11253 = sst [smem:[#allocation95_spill]] %s8795_s6 }
  0x20   :  { %11254 = sst [smem:[#allocation96_spill]] %s8800_s12 }
  0x21   :  { %11255 = sst [smem:[#allocation97_spill]] %s8805_s20 }
  0x22   :  { %s8825_s25 = sld [smem:[%s11050_s0 + %s8639_s15]]   ;;  %s8643_s15 = smov 23  }
  0x23   :  { %11256 = sst [smem:[#allocation98_spill]] %s8815_s4 }
  0x24   :  { %11257 = sst [smem:[#allocation99_spill]] %s8820_s8 }
  0x25   :  { %s8830_s21 = sld [smem:[%s11050_s0 + %s8640_s22]]   ;;  %s8644_s22 = smov 24  }
  0x26   :  { %s8835_s3 = sld [smem:[%s11050_s0 + %s8641_s28]]   ;;  %s8645_s28 = smov 25  }
  0x27   :  { %s8840_s5 = sld [smem:[%s11050_s0 + %s8642_s7]]   ;;  %s8646_s7 = smov 26  }
  0x28   :  { %11258 = sst [smem:[#allocation100_spill]] %s8825_s25 }
  0x29   :  { %s8845_s25 = sld [smem:[%s11050_s0 + %s8643_s15]]   ;;  %s8647_s15 = smov 27  }
  0x2a   :  { %s8855_s4 = sld [smem:[%s11050_s0 + %s8645_s28]]   ;;  %s8649_s28 = smov 29  }
  0x2b   :  { %11259 = sst [smem:[#allocation101_spill]] %s8830_s21 }
  0x2c   :  { %11260 = sst [smem:[#allocation102_spill]] %s8835_s3 }
  0x2d   :  { %11261 = sst [smem:[#allocation103_spill]] %s8840_s5 }
  0x2e   :  { %s8850_s21 = sld [smem:[%s11050_s0 + %s8644_s22]]   ;;  %s8648_s22 = smov 28  }
  0x2f   :  { %s8860_s5 = sld [smem:[%s11050_s0 + %s8646_s7]]   ;;  %s8650_s7 = smov 30  }
  0x30   :  { %11263 = sst [smem:[#allocation105_spill]] %s8855_s4 }
  0x31   :  { %s8865_s20 = sld [smem:[%s11050_s0 + %s8647_s15]]   ;;  %s8651_s15 = smov 31  }
  0x32   :  { %s8875_s4 = sld [smem:[%s11050_s0 + %s8649_s28]]   ;;  %s8653_s28 = smov 33  }
  0x33   :  { %s8885_s6 = sld [smem:[%s11050_s0 + %s8651_s15]]   ;;  %s8655_s15 = smov 35  }
  0x34   :  { %11262 = sst [smem:[#allocation104_spill]] %s8850_s21 }
  0x35   :  { %11264 = sst [smem:[#allocation106_spill]] %s8860_s5 }
  0x36   :  { %s8870_s21 = sld [smem:[%s11050_s0 + %s8648_s22]]   ;;  %s8652_s22 = smov 32  }
  0x37   :  { %s8880_s5 = sld [smem:[%s11050_s0 + %s8650_s7]]   ;;  %s8654_s7 = smov 34  }
  0x38   :  { %11266 = sst [smem:[#allocation108_spill]] %s8875_s4 }
  0x39   :  { %11268 = sst [smem:[#allocation110_spill]] %s8885_s6 }
  0x3a   :  { %s8895_s24 = sld [smem:[%s11050_s0 + %s8653_s28]]   ;;  %s8657_s28 = smov 37  }
  0x3b   :  { %s8905_s14 = sld [smem:[%s11050_s0 + %s8655_s15]]   ;;  %s8659_s15 = smov 39  }
  0x3c   :  { %11265 = sst [smem:[#allocation107_spill]] %s8870_s21 }
  0x3d   :  { %11267 = sst [smem:[#allocation109_spill]] %s8880_s5 }
  0x3e   :  { %s8890_s21 = sld [smem:[%s11050_s0 + %s8652_s22]]   ;;  %s8656_s22 = smov 36  }
  0x3f   :  { %s8900_s5 = sld [smem:[%s11050_s0 + %s8654_s7]]   ;;  %s8658_s7 = smov 38  }
  0x40   :  { %11270 = sst [smem:[#allocation112_spill]] %s8895_s24 }
  0x41   :  { %11272 = sst [smem:[#allocation114_spill]] %s8905_s14 }
  0x42   :  { %s8915_s24 = sld [smem:[%s11050_s0 + %s8657_s28]]   ;;  %s8661_s28 = smov 41  }
  0x43   :  { %s8920_s17 = sld [smem:[%s11050_s0 + %s8658_s7]]   ;;  %s8662_s7 = smov 42  }
  0x44   :  { %11269 = sst [smem:[#allocation111_spill]] %s8890_s21 }
  0x45   :  { %11271 = sst [smem:[#allocation113_spill]] %s8900_s5 }
  0x46   :  { %s8910_s21 = sld [smem:[%s11050_s0 + %s8656_s22]]   ;;  %s8660_s22 = smov 40  }
  0x47   :  { %s8925_s14 = sld [smem:[%s11050_s0 + %s8659_s15]]   ;;  %s8663_s15 = smov 43  }
  0x48   :  { %11273 = sst [smem:[#allocation115_spill]] %s8915_s24 }
  0x49   :  { %11274 = sst [smem:[#allocation116_spill]] %s8920_s17 }
  0x4a   :  { %s8930_s9 = sld [smem:[%s11050_s0 + %s8660_s22]]   ;;  %s8664_s22 = smov 44  }
  0x4b   :  { %s8935_s24 = sld [smem:[%s11050_s0 + %s8661_s28]]   ;;  %s8665_s28 = smov 45  }
  0x4c   :  { %s8940_s17 = sld [smem:[%s11050_s0 + %s8662_s7]]   ;;  %s8666_s7 = smov 46  }
  0x4d   :  { %11275 = sst [smem:[#allocation117_spill]] %s8925_s14 }
  0x4e   :  { %s8945_s14 = sld [smem:[%s11050_s0 + %s8663_s15]]   ;;  %s8667_s15 = smov 47  }
  0x50   :  { %11276 = sst [smem:[#allocation118_spill]] %s8930_s9 }
  0x51   :  { %11277 = sst [smem:[#allocation119_spill]] %s8935_s24 }
  0x52   :  { %11278 = sst [smem:[#allocation120_spill]] %s8940_s17 }
  0x53   :  { %s8950_s9 = sld [smem:[%s11050_s0 + %s8664_s22]]   ;;  %s8668_s22 = smov 48  }
  0x54   :  { %11279 = sst [smem:[#allocation121_spill]] %s8945_s14 }
  0x55   :  { %s8955_s24 = sld [smem:[%s11050_s0 + %s8665_s28]]   ;;  %s8669_s28 = smov 49  }
  0x56   :  { %s8960_s17 = sld [smem:[%s11050_s0 + %s8666_s7]]   ;;  %s8670_s7 = smov 50  }
  0x57   :  { %s8965_s14 = sld [smem:[%s11050_s0 + %s8667_s15]]   ;;  %s8671_s15 = smov 51  }
  0x59   :  { %11280 = sst [smem:[#allocation122_spill]] %s8950_s9 }
  0x5a   :  { %s8970_s9 = sld [smem:[%s11050_s0 + %s8668_s22]]  }
  0x5b   :  { %11281 = sst [smem:[#allocation123_spill]] %s8955_s24 }
  0x5c   :  { %11282 = sst [smem:[#allocation124_spill]] %s8960_s17 }
  0x5d   :  { %11283 = sst [smem:[#allocation125_spill]] %s8965_s14 }
  0x5e   :  { %s8975_s24 = sld [smem:[%s11050_s0 + %s8669_s28]]  }
  0x5f   :  { %s8980_s17 = sld [smem:[%s11050_s0 + %s8670_s7]]  }
  0x60   :  { %s8985_s14 = sld [smem:[%s11050_s0 + %s8671_s15]]  }
  0x61   :  { %108 = vsyncpa [#allocation3], 0 }
  0x62   :  { %109 = vsyncpa [#allocation5], 0 }
  0x63   :  { %110 = vsyncpa [#allocation8], 0 }
  0x64   :  { %111 = vsyncpa [#allocation11], 0 }
  0x65   :  { %112 = vsyncpa [#allocation14], 0 }
  0x66   :  { %113 = vsyncpa [#allocation17], 0 }
  0x67   :  { %114 = vsyncpa [#allocation20], 0 }
  0x68   :  { %115 = vsyncpa [#allocation23], 0 }
  0x69   :  { %116 = vsyncpa [#allocation26], 0 }
  0x6a   :  { %117 = vsyncpa [#allocation29], 0 }
  0x6b   :  { %118 = vsyncpa [#allocation32], 0 }
  0x6c   :  { %119 = vsyncpa [#allocation35], 0 }
  0x6d   :  { %120 = vsyncpa [#allocation38], 0 }
  0x6e   :  { %121 = vsyncpa [#allocation41], 0 }
  0x6f   :  { %122 = vsyncpa [#allocation44], 0 }
  0x70   :  { %123 = vsyncpa [#allocation47], 0 }
  0x71   :  { %124 = vsyncpa [#allocation50], 0 }
  0x72   :  { %125 = vsyncpa [#allocation53], 0 }
  0x73   :  { %126 = vsyncpa [#allocation56], 0 }
  0x74   :  { %127 = vsyncpa [#allocation59], 0 }
  0x75   :  { %128 = vsyncpa [#allocation62], 0  ;;  %s8987_s0 = smov 0  }
  0x76 LB: > { %s11284_s19 = sld [smem:[#allocation93_spill]]  ;;  %s8993_s22 = sadd.s32 4294967295, %s8619_s0   ;;  %s8619_s0 = sphi %s8987_s0, %s134_s0  }
  0x77   : > { %s11285_s13 = sld [smem:[#allocation86_spill]]  ;;  %p6872_p0 = scmp.ge.s32.totalorder %s8619_s0, 1 }
  0x78   : > { %s11286_s8 = sld [smem:[#allocation99_spill]]  ;;  %p1241_p1 = scmp.lt.s32.totalorder %s8619_s0, 3 }
  0x79   : > { %s11287_s6 = sld [smem:[#allocation110_spill]] }
  0x7a   : > { %s11288_s5 = sld [smem:[#allocation113_spill]]  ;;  %p8997_p2 = pnand %p6872_p0, %p1241_p1 }
  0x7b   : > { %s11289_s4 = sld [smem:[#allocation108_spill]]  ;;  %p7161_p3 = scmp.eq.s32.totalorder (!%p8997_p2), %s8993_s22, 0 }
  0x7c   : > { %s11290_s3 = sld [smem:[#allocation102_spill]]  ;;  %1245 = sbr.rel (%p8997_p2) target bundleno = 652 (0x28c), region = 12 }
  0x7d   : > { %s11291_s12 = sld [smem:[#allocation96_spill]]  ;;  %s1265_s26 = sshll.u32 (!%p8997_p2), %s11285_s13, 4  ;;  %s1266_s26 = int_to_ptr.hbm [resolvable:$true] %s1265_s26 }
  0x7e   : > { %s8672_s28 = smov (!%p8997_p2), [#allocation4]   ;;  %s1297_s2 = sshll.u32 (!%p8997_p2), %s8760_s29, 4  ;;  %s9006_s2 = int_to_ptr.hbm [resolvable:$true] %s1297_s2 }
  0x7f   : > { %s1267_s1 = sshll.u32 (!%p8997_p2), %s8672_s28, 4  ;;  %s7409_s7 = sshra.s32 (!%p8997_p2), %s1266_s26, 4  ;;  %s1268_s1 = int_to_ptr.vmem [resolvable:$true] %s1267_s1  ;;  %s7410_s7 = int_to_ptr.hbm [resolvable:$true] %s7409_s7 }
  0x80   : > { %s7411_s10 = scalar_lea.hbm (!%p8997_p2), %s7410_s7, 1  ;;  %s7415_s11 = scalar_lea.hbm (!%p8997_p2), %s11285_s13, 1 }
  0x81   : > { %p7412_p4 = scmp.ne.s32.totalorder %s7410_s7, %s7411_s10  ;;  %p7416_p7 = scmp.lt.s32.totalorder %s7410_s7, %s11285_s13 }
  0x82   : > { %p7417_p8 = scmp.lt.s32.totalorder %s7415_s11, %s7411_s10 }
  0x83   : > { %p7413_p5 = pnand %p7412_p4, %p7161_p3 }
  0x84   : > { %p7418_p9 = por %p7417_p8, %p7416_p7 }
  0x85   : > { %p7414_p6 = pneg %p7413_p5 }
  0x87   : > { %p7419_p10 = pnand %p7418_p9, %p7414_p6 }
  0x89   : > { %7422 = shalt.err (!%p7419_p10)
}
  0x8a   : > { %7004 = dma.hbm_to_vmem [thread:$0]  (%p7161_p3), %s1266_s26, 16, %s1268_s1, [#allocation5]  }
  0x8b   : > { %s1327_s15 = sshll.u32 %s11284_s19, 4  ;;  %s8673_s16 = smov [#allocation7]   ;;  %s9015_s15 = int_to_ptr.hbm [resolvable:$true] %s1327_s15 }
  0x8c   : > { %s1299_s18 = sshll.u32 %s8673_s16, 4  ;;  %s7437_s28 = sshra.s32 %s9006_s2, 4  ;;  %s1300_s18 = int_to_ptr.vmem [resolvable:$true] %s1299_s18  ;;  %s7438_s28 = int_to_ptr.hbm [resolvable:$true] %s7437_s28 }
  0x8d   : > { %s7439_s7 = scalar_lea.hbm %s7438_s28, 4  ;;  %s7443_s10 = scalar_lea.hbm %s8760_s29, 4 }
  0x8e   : > { %p7440_p11 = scmp.ne.s32.totalorder %s7438_s28, %s7439_s7  ;;  %p7444_p0 = scmp.lt.s32.totalorder %s7438_s28, %s8760_s29 }
  0x8f   : > { %p7445_p1 = scmp.lt.s32.totalorder %s7443_s10, %s7439_s7 }
  0x90   : > { %p7441_p12 = pnand %p7440_p11, %p7161_p3 }
  0x91   : > { %p7446_p4 = por %p7445_p1, %p7444_p0 }
  0x92   : > { %p7442_p13 = pneg %p7441_p12 }
  0x94   : > { %p7447_p5 = pnand %p7446_p4, %p7442_p13 }
  0x96   : > { %7450 = shalt.err (!%p7447_p5)
}
  0x97   : > { %7008 = dma.hbm_to_vmem [thread:$0]  (%p7161_p3), %s9006_s2, 64, %s1300_s18, [#allocation8]  }
  0x98   : > { %s8674_s26 = smov [#allocation10]   ;;  %s1353_s11 = sshll.u32 %s8790_s30, 4  ;;  %s9026_s11 = int_to_ptr.hbm [resolvable:$true] %s1353_s11 }
  0x99   : > { %s1329_s1 = sshll.u32 %s8674_s26, 4  ;;  %s7465_s16 = sshra.s32 %s9015_s15, 4  ;;  %s1330_s1 = int_to_ptr.vmem [resolvable:$true] %s1329_s1  ;;  %s7466_s16 = int_to_ptr.hbm [resolvable:$true] %s7465_s16 }
  0x9a   : > { %s7467_s28 = scalar_lea.hbm %s7466_s16, 1  ;;  %s7471_s7 = scalar_lea.hbm %s11284_s19, 1 }
  0x9b   : > { %p7468_p6 = scmp.ne.s32.totalorder %s7466_s16, %s7467_s28  ;;  %p7472_p9 = scmp.lt.s32.totalorder %s7466_s16, %s11284_s19 }
  0x9c   : > { %p7473_p10 = scmp.lt.s32.totalorder %s7471_s7, %s7467_s28 }
  0x9d   : > { %p7469_p7 = pnand %p7468_p6, %p7161_p3 }
  0x9e   : > { %p7474_p11 = por %p7473_p10, %p7472_p9 }
  0x9f   : > { %p7470_p8 = pneg %p7469_p7 }
  0xa1   : > { %p7475_p12 = pnand %p7474_p11, %p7470_p8 }
  0xa3   : > { %7478 = shalt.err (!%p7475_p12)
}
  0xa4   : > { %7012 = dma.hbm_to_vmem [thread:$0]  (%p7161_p3), %s9015_s15, 16, %s1330_s1, [#allocation11]  }
  0xa5   : > { %s1379_s2 = sshll.u32 %s11291_s12, 4  ;;  %s8675_s18 = smov [#allocation13]   ;;  %s9037_s2 = int_to_ptr.hbm [resolvable:$true] %s1379_s2 }
  0xa6   : > { %s1355_s10 = sshll.u32 %s8675_s18, 4  ;;  %s7493_s26 = sshra.s32 %s9026_s11, 4  ;;  %s1356_s10 = int_to_ptr.vmem [resolvable:$true] %s1355_s10  ;;  %s7494_s26 = int_to_ptr.hbm [resolvable:$true] %s7493_s26 }
  0xa7   : > { %s7495_s16 = scalar_lea.hbm %s7494_s26, 1  ;;  %s7499_s28 = scalar_lea.hbm %s8790_s30, 1 }
  0xa8   : > { %p7496_p13 = scmp.ne.s32.totalorder %s7494_s26, %s7495_s16  ;;  %p7500_p4 = scmp.lt.s32.totalorder %s7494_s26, %s8790_s30 }
  0xa9   : > { %p7501_p5 = scmp.lt.s32.totalorder %s7499_s28, %s7495_s16 }
  0xaa   : > { %p7497_p0 = pnand %p7496_p13, %p7161_p3 }
  0xab   : > { %p7502_p6 = por %p7501_p5, %p7500_p4 }
  0xac   : > { %p7498_p1 = pneg %p7497_p0 }
  0xae   : > { %p7503_p7 = pnand %p7502_p6, %p7498_p1 }
  0xb0   : > { %7506 = shalt.err (!%p7503_p7)
}
  0xb1   : > { %7016 = dma.hbm_to_vmem [thread:$0]  (%p7161_p3), %s9026_s11, 16, %s1356_s10, [#allocation14]  }
  0xb2   : > { %s8676_s15 = smov [#allocation16]   ;;  %s7521_s7 = sshra.s32 %s9037_s2, 4  ;;  %s7522_s7 = int_to_ptr.hbm [resolvable:$true] %s7521_s7 }
  0xb3   : > { %s1381_s1 = sshll.u32 %s8676_s15, 4  ;;  %s7523_s18 = scalar_lea.hbm %s7522_s7, 1  ;;  %s1382_s1 = int_to_ptr.vmem [resolvable:$true] %s1381_s1 }
  0xb4   : > { %p7524_p8 = scmp.ne.s32.totalorder %s7522_s7, %s7523_s18  ;;  %s7527_s26 = scalar_lea.hbm %s11291_s12, 1 }
  0xb5   : > { %p7528_p11 = scmp.lt.s32.totalorder %s7522_s7, %s11291_s12  ;;  %p7529_p12 = scmp.lt.s32.totalorder %s7527_s26, %s7523_s18 }
  0xb6   : > { %p7525_p9 = pnand %p7524_p8, %p7161_p3 }
  0xb7   : > { %p7530_p13 = por %p7529_p12, %p7528_p11 }
  0xb8   : > { %p7526_p10 = pneg %p7525_p9 }
  0xba   : > { %p7531_p0 = pnand %p7530_p13, %p7526_p10 }
  0xbc   : > { %7534 = shalt.err (!%p7531_p0)
}
  0xbd   : > { %7020 = dma.hbm_to_vmem [thread:$0]  (%p7161_p3), %s9037_s2, 16, %s1382_s1, [#allocation17]  }
  0xbe   : > { %s1404_s11 = sshll.u32 %s8810_s27, 4  ;;  %s8677_s10 = smov [#allocation19]   ;;  %s1405_s11 = int_to_ptr.hbm [resolvable:$true] %s1404_s11 }
  0xbf   : > { %s1406_s16 = sshll.u32 %s8677_s10, 4  ;;  %s1431_s28 = sshll.u32 %s11286_s8, 4  ;;  %s1407_s16 = int_to_ptr.vmem [resolvable:$true] %s1406_s16  ;;  %s1432_s28 = int_to_ptr.hbm [resolvable:$true] %s1431_s28 }
  0xc0   : > { %s7549_s15 = sshra.s32 %s1405_s11, 4  ;;  %s7555_s18 = scalar_lea.hbm %s8810_s27, 128  ;;  %s7550_s15 = int_to_ptr.hbm [resolvable:$true] %s7549_s15 }
  0xc1   : > { %s7551_s7 = scalar_lea.hbm %s7550_s15, 128  ;;  %p7556_p6 = scmp.lt.s32.totalorder %s7550_s15, %s8810_s27 }
  0xc2   : > { %p7552_p1 = scmp.ne.s32.totalorder %s7550_s15, %s7551_s7  ;;  %p7557_p7 = scmp.lt.s32.totalorder %s7555_s18, %s7551_s7 }
  0xc4   : > { %p7553_p4 = pnand %p7552_p1, %p7161_p3  ;;  %p7558_p8 = por %p7557_p7, %p7556_p6 }
  0xc6   : > { %p7554_p5 = pneg %p7553_p4 }
  0xc8   : > { %p7559_p9 = pnand %p7558_p8, %p7554_p5 }
  0xca   : > { %7562 = shalt.err (!%p7559_p9)
}
  0xcb   : > { %s11083_s2 = smov 128   ;;  %s11085_s1 = smov 8  }
  0xcc   : > { %7024 = dma.hbm_to_vmem [thread:$0]  (%p7161_p3), %s1405_s11, 2048, %s1407_s16, [#allocation20], %s11083_s2, %s11083_s2, %s11085_s1  }
  0xcd   : > { %s8680_s26 = smov [#allocation22]   ;;  %s1460_s15 = sshll.u32 %s11290_s3, 4  ;;  %s9067_s15 = int_to_ptr.hbm [resolvable:$true] %s1460_s15 }
  0xce   : > { %s1433_s10 = sshll.u32 %s8680_s26, 4  ;;  %s7577_s7 = sshra.s32 %s1432_s28, 4  ;;  %s1434_s10 = int_to_ptr.vmem [resolvable:$true] %s1433_s10  ;;  %s7578_s7 = int_to_ptr.hbm [resolvable:$true] %s7577_s7 }
  0xcf   : > { %s7579_s18 = scalar_lea.hbm %s7578_s7, 4  ;;  %s7583_s12 = scalar_lea.hbm %s11286_s8, 4 }
  0xd0   : > { %p7580_p10 = scmp.ne.s32.totalorder %s7578_s7, %s7579_s18  ;;  %p7584_p13 = scmp.lt.s32.totalorder %s7578_s7, %s11286_s8 }
  0xd1   : > { %p7585_p0 = scmp.lt.s32.totalorder %s7583_s12, %s7579_s18 }
  0xd2   : > { %p7581_p11 = pnand %p7580_p10, %p7161_p3 }
  0xd3   : > { %p7586_p1 = por %p7585_p0, %p7584_p13 }
  0xd4   : > { %p7582_p12 = pneg %p7581_p11 }
  0xd6   : > { %p7587_p4 = pnand %p7586_p1, %p7582_p12 }
  0xd8   : > { %7590 = shalt.err (!%p7587_p4)
}
  0xd9   : > { %7028 = dma.hbm_to_vmem [thread:$0]  (%p7161_p3), %s1432_s28, 64, %s1434_s10, [#allocation23]  }
  0xda   : > { %s1483_s11 = sshll.u32 %s8845_s25, 4  ;;  %s8681_s16 = smov [#allocation25]   ;;  %s9076_s11 = int_to_ptr.hbm [resolvable:$true] %s1483_s11 }
  0xdb   : > { %s1462_s26 = sshll.u32 %s8681_s16, 4  ;;  %s7605_s2 = sshra.s32 %s9067_s15, 4  ;;  %s1463_s26 = int_to_ptr.vmem [resolvable:$true] %s1462_s26  ;;  %s7606_s2 = int_to_ptr.hbm [resolvable:$true] %s7605_s2 }
  0xdc   : > { %s7607_s12 = scalar_lea.hbm %s7606_s2, 1  ;;  %s7611_s7 = scalar_lea.hbm %s11290_s3, 1 }
  0xdd   : > { %p7608_p5 = scmp.ne.s32.totalorder %s7606_s2, %s7607_s12  ;;  %p7612_p8 = scmp.lt.s32.totalorder %s7606_s2, %s11290_s3 }
  0xde   : > { %p7613_p9 = scmp.lt.s32.totalorder %s7611_s7, %s7607_s12 }
  0xdf   : > { %p7609_p6 = pnand %p7608_p5, %p7161_p3 }
  0xe0   : > { %p7614_p10 = por %p7613_p9, %p7612_p8 }
  0xe1   : > { %p7610_p7 = pneg %p7609_p6 }
  0xe3   : > { %p7615_p11 = pnand %p7614_p10, %p7610_p7 }
  0xe5   : > { %7618 = shalt.err (!%p7615_p11)
}
  0xe6   : > { %7032 = dma.hbm_to_vmem [thread:$0]  (%p7161_p3), %s9067_s15, 16, %s1463_s26, [#allocation26]  }
  0xe7   : > { %s8682_s28 = smov [#allocation28]   ;;  %s1515_s18 = sshll.u32 %s8865_s20, 4  ;;  %s9087_s18 = int_to_ptr.hbm [resolvable:$true] %s1515_s18 }
  0xe8   : > { %s1485_s10 = sshll.u32 %s8682_s28, 4  ;;  %s7633_s2 = sshra.s32 %s9076_s11, 4  ;;  %s1486_s10 = int_to_ptr.vmem [resolvable:$true] %s1485_s10  ;;  %s7634_s2 = int_to_ptr.hbm [resolvable:$true] %s7633_s2 }
  0xe9   : > { %s7635_s16 = scalar_lea.hbm %s7634_s2, 384  ;;  %s7639_s12 = scalar_lea.hbm %s8845_s25, 384 }
  0xea   : > { %p7636_p12 = scmp.ne.s32.totalorder %s7634_s2, %s7635_s16  ;;  %p7640_p1 = scmp.lt.s32.totalorder %s7634_s2, %s8845_s25 }
  0xeb   : > { %p7641_p4 = scmp.lt.s32.totalorder %s7639_s12, %s7635_s16 }
  0xec   : > { %p7637_p13 = pnand %p7636_p12, %p7161_p3 }
  0xed   : > { %p7642_p5 = por %p7641_p4, %p7640_p1 }
  0xee   : > { %p7638_p0 = pneg %p7637_p13 }
  0xf0   : > { %p7643_p6 = pnand %p7642_p5, %p7638_p0 }
  0xf2   : > { %7646 = shalt.err (!%p7643_p6)
}
  0xf3   : > { %s11293_s15 = smov 128   ;;  %s1544_s26 = sshll.u32 %s11289_s4, 4  ;;  %s9101_s26 = int_to_ptr.hbm [resolvable:$true] %s1544_s26 }
  0xf4   : > { %7036 = dma.hbm_to_vmem [thread:$0]  (%p7161_p3), %s9076_s11, 6144, %s1486_s10, [#allocation29], %s11293_s15, %s11293_s15, %s11085_s1  }
  0xf5   : > { %s8683_s7 = smov [#allocation31]   ;;  %s7661_s2 = sshra.s32 %s9087_s18, 4  ;;  %s7662_s2 = int_to_ptr.hbm [resolvable:$true] %s7661_s2 }
  0xf6   : > { %s1517_s28 = sshll.u32 %s8683_s7, 4  ;;  %s7663_s16 = scalar_lea.hbm %s7662_s2, 512  ;;  %s1518_s28 = int_to_ptr.vmem [resolvable:$true] %s1517_s28 }
  0xf7   : > { %p7664_p7 = scmp.ne.s32.totalorder %s7662_s2, %s7663_s16  ;;  %s7667_s12 = scalar_lea.hbm %s8865_s20, 512 }
  0xf8   : > { %p7668_p10 = scmp.lt.s32.totalorder %s7662_s2, %s8865_s20  ;;  %p7669_p11 = scmp.lt.s32.totalorder %s7667_s12, %s7663_s16 }
  0xf9   : > { %p7665_p8 = pnand %p7664_p7, %p7161_p3 }
  0xfa   : > { %p7670_p12 = por %p7669_p11, %p7668_p10 }
  0xfb   : > { %p7666_p9 = pneg %p7665_p8 }
  0xfd   : > { %p7671_p13 = pnand %p7670_p12, %p7666_p9 }
  0xff   : > { %7674 = shalt.err (!%p7671_p13)
}
 0x100   : > { %7040 = dma.hbm_to_vmem [thread:$0]  (%p7161_p3), %s9087_s18, 8192, %s1518_s28, [#allocation32], %s11293_s15, %s11293_s15, %s11085_s1  }
 0x101   : > { %s8684_s11 = smov [#allocation34]   ;;  %s1567_s7 = sshll.u32 %s11287_s6, 4  ;;  %s9115_s7 = int_to_ptr.hbm [resolvable:$true] %s1567_s7 }
 0x102   : > { %s1546_s10 = sshll.u32 %s8684_s11, 4  ;;  %s7689_s2 = sshra.s32 %s9101_s26, 4  ;;  %s1547_s10 = int_to_ptr.vmem [resolvable:$true] %s1546_s10  ;;  %s7690_s2 = int_to_ptr.hbm [resolvable:$true] %s7689_s2 }
 0x103   : > { %s7691_s16 = scalar_lea.hbm %s7690_s2, 1  ;;  %s7695_s12 = scalar_lea.hbm %s11289_s4, 1 }
 0x104   : > { %p7692_p0 = scmp.ne.s32.totalorder %s7690_s2, %s7691_s16  ;;  %p7696_p5 = scmp.lt.s32.totalorder %s7690_s2, %s11289_s4 }
 0x105   : > { %p7697_p6 = scmp.lt.s32.totalorder %s7695_s12, %s7691_s16 }
 0x106   : > { %p7693_p1 = pnand %p7692_p0, %p7161_p3 }
 0x107   : > { %p7698_p7 = por %p7697_p6, %p7696_p5 }
 0x108   : > { %p7694_p4 = pneg %p7693_p1 }
 0x10a   : > { %p7699_p8 = pnand %p7698_p7, %p7694_p4 }
 0x10c   : > { %7702 = shalt.err (!%p7699_p8)
}
 0x10d   : > { %7044 = dma.hbm_to_vmem [thread:$0]  (%p7161_p3), %s9101_s26, 16, %s1547_s10, [#allocation35]  }
 0x10e   : > { %s1597_s18 = sshll.u32 %s11288_s5, 4  ;;  %s8685_s28 = smov [#allocation37]   ;;  %s9126_s18 = int_to_ptr.hbm [resolvable:$true] %s1597_s18 }
 0x10f   : > { %s1569_s11 = sshll.u32 %s8685_s28, 4  ;;  %s7717_s2 = sshra.s32 %s9115_s7, 4  ;;  %s1570_s11 = int_to_ptr.vmem [resolvable:$true] %s1569_s11  ;;  %s7718_s2 = int_to_ptr.hbm [resolvable:$true] %s7717_s2 }
 0x110   : > { %s7719_s16 = scalar_lea.hbm %s7718_s2, 384  ;;  %s7723_s12 = scalar_lea.hbm %s11287_s6, 384 }
 0x111   : > { %p7720_p9 = scmp.ne.s32.totalorder %s7718_s2, %s7719_s16  ;;  %p7724_p12 = scmp.lt.s32.totalorder %s7718_s2, %s11287_s6 }
 0x112   : > { %p7725_p13 = scmp.lt.s32.totalorder %s7723_s12, %s7719_s16 }
 0x113   : > { %p7721_p10 = pnand %p7720_p9, %p7161_p3 }
 0x114   : > { %p7726_p0 = por %p7725_p13, %p7724_p12 }
 0x115   : > { %p7722_p11 = pneg %p7721_p10 }
 0x117   : > { %p7727_p1 = pnand %p7726_p0, %p7722_p11 }
 0x119   : > { %7730 = shalt.err (!%p7727_p1)
}
 0x11a   : > { %7048 = dma.hbm_to_vmem [thread:$0]  (%p7161_p3), %s9115_s7, 6144, %s1570_s11, [#allocation38], %s11293_s15, %s11293_s15, %s11085_s1  }
 0x11b   : > { %s8686_s26 = smov [#allocation40]   ;;  %s1622_s28 = sshll.u32 %s8910_s21, 4  ;;  %s9140_s28 = int_to_ptr.hbm [resolvable:$true] %s1622_s28 }
 0x11c   : > { %s1599_s10 = sshll.u32 %s8686_s26, 4  ;;  %s7745_s2 = sshra.s32 %s9126_s18, 4  ;;  %s1600_s10 = int_to_ptr.vmem [resolvable:$true] %s1599_s10  ;;  %s7746_s2 = int_to_ptr.hbm [resolvable:$true] %s7745_s2 }
 0x11d   : > { %s7747_s16 = scalar_lea.hbm %s7746_s2, 1  ;;  %s7751_s12 = scalar_lea.hbm %s11288_s5, 1 }
 0x11e   : > { %p7748_p4 = scmp.ne.s32.totalorder %s7746_s2, %s7747_s16  ;;  %p7752_p7 = scmp.lt.s32.totalorder %s7746_s2, %s11288_s5 }
 0x11f   : > { %p7753_p8 = scmp.lt.s32.totalorder %s7751_s12, %s7747_s16 }
 0x120   : > { %p7749_p5 = pnand %p7748_p4, %p7161_p3 }
 0x121   : > { %p7754_p9 = por %p7753_p8, %p7752_p7 }
 0x122   : > { %p7750_p6 = pneg %p7749_p5 }
 0x124   : > { %p7755_p10 = pnand %p7754_p9, %p7750_p6 }
 0x126   : > { %7758 = shalt.err (!%p7755_p10)
}
 0x127   : > { %s11294_s7 = sld [smem:[#allocation116_spill]]  ;;  %s8687_s26 = smov [#allocation43]  }
 0x128   : > { %7052 = dma.hbm_to_vmem [thread:$0]  (%p7161_p3), %s9126_s18, 16, %s1600_s10, [#allocation41]  }
 0x129   : > { %s1624_s1 = sshll.u32 %s8687_s26, 4  ;;  %s7773_s2 = sshra.s32 %s9140_s28, 4  ;;  %s1625_s1 = int_to_ptr.vmem [resolvable:$true] %s1624_s1  ;;  %s7774_s2 = int_to_ptr.hbm [resolvable:$true] %s7773_s2 }
 0x12a   : > { %s7775_s16 = scalar_lea.hbm %s7774_s2, 128  ;;  %s7779_s12 = scalar_lea.hbm %s8910_s21, 128 }
 0x12b   : > { %p7776_p11 = scmp.ne.s32.totalorder %s7774_s2, %s7775_s16  ;;  %p7780_p0 = scmp.lt.s32.totalorder %s7774_s2, %s8910_s21 }
 0x12c   : > { %p7781_p1 = scmp.lt.s32.totalorder %s7779_s12, %s7775_s16 }
 0x12d   : > { %s1648_s11 = sshll.u32 %s11294_s7, 4  ;;  %p7777_p12 = pnand %p7776_p11, %p7161_p3  ;;  %s9151_s11 = int_to_ptr.hbm [resolvable:$true] %s1648_s11 }
 0x12e   : > { %p7782_p4 = por %p7781_p1, %p7780_p0 }
 0x12f   : > { %p7778_p13 = pneg %p7777_p12 }
 0x131   : > { %p7783_p5 = pnand %p7782_p4, %p7778_p13 }
 0x133   : > { %7786 = shalt.err (!%p7783_p5)
}
 0x134   : > { %s11295_s18 = smov 8   ;;  %s11296_s10 = sld [smem:[#allocation118_spill]] }
 0x135   : > { %7056 = dma.hbm_to_vmem [thread:$0]  (%p7161_p3), %s9140_s28, 2048, %s1625_s1, [#allocation44], %s11293_s15, %s11293_s15, %s11295_s18  }
 0x136   : > { %s8688_s26 = smov [#allocation46]   ;;  %s7801_s2 = sshra.s32 %s9151_s11, 4  ;;  %s7802_s2 = int_to_ptr.hbm [resolvable:$true] %s7801_s2 }
 0x137   : > { %s1650_s3 = sshll.u32 %s8688_s26, 4  ;;  %s7803_s16 = scalar_lea.hbm %s7802_s2, 512  ;;  %s1651_s3 = int_to_ptr.vmem [resolvable:$true] %s1650_s3 }
 0x138   : > { %p7804_p6 = scmp.ne.s32.totalorder %s7802_s2, %s7803_s16  ;;  %s7807_s12 = scalar_lea.hbm %s11294_s7, 512 }
 0x139   : > { %p7808_p9 = scmp.lt.s32.totalorder %s7802_s2, %s11294_s7  ;;  %p7809_p10 = scmp.lt.s32.totalorder %s7807_s12, %s7803_s16 }
 0x13a   : > { %s1675_s4 = sshll.u32 %s11296_s10, 4  ;;  %p7805_p7 = pnand %p7804_p6, %p7161_p3  ;;  %s9165_s4 = int_to_ptr.hbm [resolvable:$true] %s1675_s4 }
 0x13b   : > { %p7810_p11 = por %p7809_p10, %p7808_p9 }
 0x13c   : > { %p7806_p8 = pneg %p7805_p7 }
 0x13e   : > { %p7811_p12 = pnand %p7810_p11, %p7806_p8 }
 0x140   : > { %7814 = shalt.err (!%p7811_p12)
}
 0x141   : > { %s11297_s1 = sld [smem:[#allocation120_spill]]  ;;  %s8689_s26 = smov [#allocation49]  }
 0x142   : > { %7060 = dma.hbm_to_vmem [thread:$0]  (%p7161_p3), %s9151_s11, 8192, %s1651_s3, [#allocation47], %s11293_s15, %s11293_s15, %s11295_s18  }
 0x143   : > { %s1677_s5 = sshll.u32 %s8689_s26, 4  ;;  %s7829_s2 = sshra.s32 %s9165_s4, 4  ;;  %s1678_s5 = int_to_ptr.vmem [resolvable:$true] %s1677_s5  ;;  %s7830_s2 = int_to_ptr.hbm [resolvable:$true] %s7829_s2 }
 0x144   : > { %s7831_s16 = scalar_lea.hbm %s7830_s2, 4  ;;  %s7835_s12 = scalar_lea.hbm %s11296_s10, 4 }
 0x145   : > { %p7832_p13 = scmp.ne.s32.totalorder %s7830_s2, %s7831_s16  ;;  %p7836_p4 = scmp.lt.s32.totalorder %s7830_s2, %s11296_s10 }
 0x146   : > { %p7837_p5 = scmp.lt.s32.totalorder %s7835_s12, %s7831_s16 }
 0x147   : > { %s1699_s28 = sshll.u32 %s11297_s1, 4  ;;  %p7833_p0 = pnand %p7832_p13, %p7161_p3  ;;  %s9179_s28 = int_to_ptr.hbm [resolvable:$true] %s1699_s28 }
 0x148   : > { %p7838_p6 = por %p7837_p5, %p7836_p4 }
 0x149   : > { %p7834_p1 = pneg %p7833_p0 }
 0x14b   : > { %p7839_p7 = pnand %p7838_p6, %p7834_p1 }
 0x14d   : > { %7842 = shalt.err (!%p7839_p7)
}
 0x14e   : > { %s11298_s3 = sld [smem:[#allocation122_spill]]  ;;  %s8690_s11 = smov [#allocation52]  }
 0x14f   : > { %7064 = dma.hbm_to_vmem [thread:$0]  (%p7161_p3), %s9165_s4, 64, %s1678_s5, [#allocation50]  }
 0x150   : > { %s1701_s26 = sshll.u32 %s8690_s11, 4  ;;  %s7857_s2 = sshra.s32 %s9179_s28, 4  ;;  %s1702_s26 = int_to_ptr.vmem [resolvable:$true] %s1701_s26  ;;  %s7858_s2 = int_to_ptr.hbm [resolvable:$true] %s7857_s2 }
 0x151   : > { %s7859_s16 = scalar_lea.hbm %s7858_s2, 1  ;;  %s7863_s12 = scalar_lea.hbm %s11297_s1, 1 }
 0x152   : > { %p7860_p8 = scmp.ne.s32.totalorder %s7858_s2, %s7859_s16  ;;  %p7864_p11 = scmp.lt.s32.totalorder %s7858_s2, %s11297_s1 }
 0x153   : > { %p7865_p12 = scmp.lt.s32.totalorder %s7863_s12, %s7859_s16 }
 0x154   : > { %s1725_s6 = sshll.u32 %s11298_s3, 4  ;;  %p7861_p9 = pnand %p7860_p8, %p7161_p3  ;;  %s9190_s6 = int_to_ptr.hbm [resolvable:$true] %s1725_s6 }
 0x155   : > { %p7866_p13 = por %p7865_p12, %p7864_p11 }
 0x156   : > { %p7862_p10 = pneg %p7861_p9 }
 0x158   : > { %p7867_p0 = pnand %p7866_p13, %p7862_p10 }
 0x15a   : > { %7870 = shalt.err (!%p7867_p0)
}
 0x15b   : > { %s11299_s5 = sld [smem:[#allocation125_spill]]  ;;  %s8691_s11 = smov [#allocation55]  }
 0x15c   : > { %7068 = dma.hbm_to_vmem [thread:$0]  (%p7161_p3), %s9179_s28, 16, %s1702_s26, [#allocation53]  }
 0x15d   : > { %s1727_s7 = sshll.u32 %s8691_s11, 4  ;;  %s7885_s2 = sshra.s32 %s9190_s6, 4  ;;  %s1728_s7 = int_to_ptr.vmem [resolvable:$true] %s1727_s7  ;;  %s7886_s2 = int_to_ptr.hbm [resolvable:$true] %s7885_s2 }
 0x15e   : > { %s7887_s16 = scalar_lea.hbm %s7886_s2, 4  ;;  %s7891_s12 = scalar_lea.hbm %s11298_s3, 4 }
 0x15f   : > { %p7888_p1 = scmp.ne.s32.totalorder %s7886_s2, %s7887_s16  ;;  %p7892_p6 = scmp.lt.s32.totalorder %s7886_s2, %s11298_s3 }
 0x160   : > { %p7893_p7 = scmp.lt.s32.totalorder %s7891_s12, %s7887_s16 }
 0x161   : > { %s1751_s4 = sshll.u32 %s11299_s5, 4  ;;  %p7889_p4 = pnand %p7888_p1, %p7161_p3  ;;  %s9201_s4 = int_to_ptr.hbm [resolvable:$true] %s1751_s4 }
 0x162   : > { %p7894_p8 = por %p7893_p7, %p7892_p6 }
 0x163   : > { %p7890_p5 = pneg %p7889_p4 }
 0x165   : > { %p7895_p9 = pnand %p7894_p8, %p7890_p5 }
 0x167   : > { %7898 = shalt.err (!%p7895_p9)
}
 0x168   : > { %s11300_s28 = sld [smem:[#allocation85_spill]]  ;;  %s8692_s26 = smov [#allocation58]  }
 0x169   : > { %7072 = dma.hbm_to_vmem [thread:$0]  (%p7161_p3), %s9190_s6, 64, %s1728_s7, [#allocation56]  }
 0x16a   : > { %s1753_s11 = sshll.u32 %s8692_s26, 4  ;;  %s7913_s8 = sshra.s32 %s9201_s4, 4  ;;  %s1754_s11 = int_to_ptr.vmem [resolvable:$true] %s1753_s11  ;;  %s7914_s8 = int_to_ptr.hbm [resolvable:$true] %s7913_s8 }
 0x16b   : > { %s7915_s2 = scalar_lea.hbm %s7914_s8, 512  ;;  %s7919_s16 = scalar_lea.hbm %s11299_s5, 512 }
 0x16c   : > { %p7916_p10 = scmp.ne.s32.totalorder %s7914_s8, %s7915_s2  ;;  %p7920_p13 = scmp.lt.s32.totalorder %s7914_s8, %s11299_s5 }
 0x16d   : > { %p7921_p0 = scmp.lt.s32.totalorder %s7919_s16, %s7915_s2 }
 0x16e   : > { %s1253_s1 = sshll.u32 %s11300_s28, 4  ;;  %p7917_p11 = pnand %p7916_p10, %p7161_p3  ;;  %s1254_s1 = int_to_ptr.hbm [resolvable:$true] %s1253_s1 }
 0x16f   : > { %p7922_p1 = por %p7921_p0, %p7920_p13 }
 0x170   : > { %p7918_p12 = pneg %p7917_p11 }
 0x172   : > { %p7923_p4 = pnand %p7922_p1, %p7918_p12 }
 0x174   : > { %7926 = shalt.err (!%p7923_p4)
}
 0x175   : > { %s11301_s6 = sld [smem:[#allocation87_spill]]  ;;  %s8693_s7 = smov [#allocation2]  }
 0x176   : > { %7076 = dma.hbm_to_vmem [thread:$0]  (%p7161_p3), %s9201_s4, 8192, %s1754_s11, [#allocation59], %s11293_s15, %s11293_s15, %s11295_s18  }
 0x177   : > { %s1255_s12 = sshll.u32 %s8693_s7, 4  ;;  %s7941_s8 = sshra.s32 %s1254_s1, 4  ;;  %s1256_s12 = int_to_ptr.vmem [resolvable:$true] %s1255_s12  ;;  %s7942_s8 = int_to_ptr.hbm [resolvable:$true] %s7941_s8 }
 0x178   : > { %s7943_s2 = scalar_lea.hbm %s7942_s8, 1  ;;  %s7947_s16 = scalar_lea.hbm %s11300_s28, 1 }
 0x179   : > { %p7944_p5 = scmp.ne.s32.totalorder %s7942_s8, %s7943_s2  ;;  %p7948_p8 = scmp.lt.s32.totalorder %s7942_s8, %s11300_s28 }
 0x17a   : > { %p7949_p9 = scmp.lt.s32.totalorder %s7947_s16, %s7943_s2 }
 0x17b   : > { %s1276_s26 = sshll.u32 %s11301_s6, 4  ;;  %p7945_p6 = pnand %p7944_p5, %p7161_p3  ;;  %s9224_s26 = int_to_ptr.hbm [resolvable:$true] %s1276_s26 }
 0x17c   : > { %p7950_p10 = por %p7949_p9, %p7948_p8 }
 0x17d   : > { %p7946_p7 = pneg %p7945_p6 }
 0x17f   : > { %p7951_p11 = pnand %p7950_p10, %p7946_p7 }
 0x181   : > { %7954 = shalt.err (!%p7951_p11)
}
 0x182   : > { %s11302_s4 = sld [smem:[#allocation92_spill]]  ;;  %s8694_s7 = smov [#allocation6]  }
 0x183   : > { %7002 = dma.hbm_to_vmem [thread:$0]  (%p7161_p3), %s1254_s1, 16, %s1256_s12, [#allocation3]  }
 0x184   : > { %s1278_s3 = sshll.u32 %s8694_s7, 4  ;;  %s7969_s5 = sshra.s32 %s9224_s26, 4  ;;  %s1279_s3 = int_to_ptr.vmem [resolvable:$true] %s1278_s3  ;;  %s7970_s5 = int_to_ptr.hbm [resolvable:$true] %s7969_s5 }
 0x185   : > { %s7971_s8 = scalar_lea.hbm %s7970_s5, 384  ;;  %s7975_s2 = scalar_lea.hbm %s11301_s6, 384 }
 0x186   : > { %p7972_p12 = scmp.ne.s32.totalorder %s7970_s5, %s7971_s8  ;;  %p7976_p1 = scmp.lt.s32.totalorder %s7970_s5, %s11301_s6 }
 0x187   : > { %p7977_p4 = scmp.lt.s32.totalorder %s7975_s2, %s7971_s8 }
 0x188   : > { %s1315_s11 = sshll.u32 %s11302_s4, 4  ;;  %p7973_p13 = pnand %p7972_p12, %p7161_p3  ;;  %s9233_s11 = int_to_ptr.hbm [resolvable:$true] %s1315_s11 }
 0x189   : > { %p7978_p5 = por %p7977_p4, %p7976_p1 }
 0x18a   : > { %p7974_p0 = pneg %p7973_p13 }
 0x18c   : > { %p7979_p6 = pnand %p7978_p5, %p7974_p0 }
 0x18e   : > { %7982 = shalt.err (!%p7979_p6)
}
 0x18f   : > { %s11303_s1 = sld [smem:[#allocation94_spill]]  ;;  %s8695_s12 = smov [#allocation9]  }
 0x190   : > { %7006 = dma.hbm_to_vmem [thread:$0]  (%p7161_p3), %s9224_s26, 6144, %s1279_s3, [#allocation5], %s11293_s15, %s11293_s15, %s11295_s18  }
 0x191   : > { %s1317_s16 = sshll.u32 %s8695_s12, 4  ;;  %s7997_s5 = sshra.s32 %s9233_s11, 4  ;;  %s1318_s16 = int_to_ptr.vmem [resolvable:$true] %s1317_s16  ;;  %s7998_s5 = int_to_ptr.hbm [resolvable:$true] %s7997_s5 }
 0x192   : > { %s7999_s8 = scalar_lea.hbm %s7998_s5, 1  ;;  %s8003_s2 = scalar_lea.hbm %s11302_s4, 1 }
 0x193   : > { %p8000_p7 = scmp.ne.s32.totalorder %s7998_s5, %s7999_s8  ;;  %p8004_p10 = scmp.lt.s32.totalorder %s7998_s5, %s11302_s4 }
 0x194   : > { %p8005_p11 = scmp.lt.s32.totalorder %s8003_s2, %s7999_s8 }
 0x195   : > { %s1338_s7 = sshll.u32 %s11303_s1, 4  ;;  %p8001_p8 = pnand %p8000_p7, %p7161_p3  ;;  %s9247_s7 = int_to_ptr.hbm [resolvable:$true] %s1338_s7 }
 0x196   : > { %p8006_p12 = por %p8005_p11, %p8004_p10 }
 0x197   : > { %p8002_p9 = pneg %p8001_p8 }
 0x199   : > { %p8007_p13 = pnand %p8006_p12, %p8002_p9 }
 0x19b   : > { %8010 = shalt.err (!%p8007_p13)
}
 0x19c   : > { %s11304_s3 = sld [smem:[#allocation95_spill]]  ;;  %s8696_s12 = smov [#allocation12]  }
 0x19d   : > { %7010 = dma.hbm_to_vmem [thread:$0]  (%p7161_p3), %s9233_s11, 16, %s1318_s16, [#allocation8]  }
 0x19e   : > { %s1340_s6 = sshll.u32 %s8696_s12, 4  ;;  %s8025_s5 = sshra.s32 %s9247_s7, 4  ;;  %s1341_s6 = int_to_ptr.vmem [resolvable:$true] %s1340_s6  ;;  %s8026_s5 = int_to_ptr.hbm [resolvable:$true] %s8025_s5 }
 0x19f   : > { %s8027_s8 = scalar_lea.hbm %s8026_s5, 384  ;;  %s8031_s2 = scalar_lea.hbm %s11303_s1, 384 }
 0x1a0   : > { %p8028_p0 = scmp.ne.s32.totalorder %s8026_s5, %s8027_s8  ;;  %p8032_p5 = scmp.lt.s32.totalorder %s8026_s5, %s11303_s1 }
 0x1a1   : > { %p8033_p6 = scmp.lt.s32.totalorder %s8031_s2, %s8027_s8 }
 0x1a2   : > { %s1364_s26 = sshll.u32 %s11304_s3, 4  ;;  %p8029_p1 = pnand %p8028_p0, %p7161_p3  ;;  %s9258_s26 = int_to_ptr.hbm [resolvable:$true] %s1364_s26 }
 0x1a3   : > { %p8034_p7 = por %p8033_p6, %p8032_p5 }
 0x1a4   : > { %p8030_p4 = pneg %p8029_p1 }
 0x1a6   : > { %p8035_p8 = pnand %p8034_p7, %p8030_p4 }
 0x1a8   : > { %8038 = shalt.err (!%p8035_p8)
}
 0x1a9   : > { %7014 = dma.hbm_to_vmem [thread:$0]  (%p7161_p3), %s9247_s7, 6144, %s1341_s6, [#allocation11], %s11293_s15, %s11293_s15, %s11295_s18  }
 0x1aa   : > { %s8697_s11 = smov [#allocation15]   ;;  %s8053_s12 = sshra.s32 %s9258_s26, 4  ;;  %s8054_s12 = int_to_ptr.hbm [resolvable:$true] %s8053_s12 }
 0x1ab   : > { %s1366_s16 = sshll.u32 %s8697_s11, 4  ;;  %s8055_s5 = scalar_lea.hbm %s8054_s12, 12  ;;  %s1367_s16 = int_to_ptr.vmem [resolvable:$true] %s1366_s16 }
 0x1ac   : > { %p8056_p9 = scmp.ne.s32.totalorder %s8054_s12, %s8055_s5  ;;  %s8059_s8 = scalar_lea.hbm %s11304_s3, 12 }
 0x1ad   : > { %p8060_p12 = scmp.lt.s32.totalorder %s8054_s12, %s11304_s3  ;;  %p8061_p13 = scmp.lt.s32.totalorder %s8059_s8, %s8055_s5 }
 0x1ae   : > { %p8057_p10 = pnand %p8056_p9, %p7161_p3 }
 0x1af   : > { %p8062_p0 = por %p8061_p13, %p8060_p12 }
 0x1b0   : > { %p8058_p11 = pneg %p8057_p10 }
 0x1b2   : > { %p8063_p1 = pnand %p8062_p0, %p8058_p11 }
 0x1b4   : > { %8066 = shalt.err (!%p8063_p1)
}
 0x1b5   : > { %s8698_s2 = smov 64   ;;  %s11305_s6 = sld [smem:[#allocation97_spill]] }
 0x1b6   : > { %s11306_s7 = sld [smem:[#allocation98_spill]]  ;;  %s8699_s11 = smov 4  }
 0x1b7   : > { %7018 = dma.hbm_to_vmem [thread:$0]  (%p7161_p3), %s9258_s26, 192, %s1367_s16, [#allocation14], %s8698_s2, %s8698_s2, %s8699_s11  }
 0x1b8   : > { %s8700_s4 = smov [#allocation18]  }
 0x1b9   : > { %s1392_s10 = sshll.u32 %s8700_s4, 4  ;;  %s1393_s10 = int_to_ptr.vmem [resolvable:$true] %s1392_s10 }
 0x1bb   : > { %s1390_s1 = sshll.u32 %s11305_s6, 4  ;;  %s8087_s3 = scalar_lea.hbm %s11305_s6, 128  ;;  %s1391_s1 = int_to_ptr.hbm [resolvable:$true] %s1390_s1 }
 0x1bc   : > { %s1419_s12 = sshll.u32 %s11306_s7, 4  ;;  %s8081_s5 = sshra.s32 %s1391_s1, 4  ;;  %s8082_s5 = int_to_ptr.hbm [resolvable:$true] %s8081_s5  ;;  %s1420_s12 = int_to_ptr.hbm [resolvable:$true] %s1419_s12 }
 0x1bd   : > { %s8083_s8 = scalar_lea.hbm %s8082_s5, 128  ;;  %p8088_p7 = scmp.lt.s32.totalorder %s8082_s5, %s11305_s6 }
 0x1be   : > { %p8084_p4 = scmp.ne.s32.totalorder %s8082_s5, %s8083_s8  ;;  %p8089_p8 = scmp.lt.s32.totalorder %s8087_s3, %s8083_s8 }
 0x1c0   : > { %p8085_p5 = pnand %p8084_p4, %p7161_p3  ;;  %p8090_p9 = por %p8089_p8, %p8088_p7 }
 0x1c2   : > { %p8086_p6 = pneg %p8085_p5 }
 0x1c4   : > { %p8091_p10 = pnand %p8090_p9, %p8086_p6 }
 0x1c6   : > { %8094 = shalt.err (!%p8091_p10)
}
 0x1c7   : > { %s11307_s4 = sld [smem:[#allocation101_spill]]  ;;  %s8701_s26 = smov [#allocation21]  }
 0x1c8   : > { %7022 = dma.hbm_to_vmem [thread:$0]  (%p7161_p3), %s1391_s1, 2048, %s1393_s10, [#allocation17], %s11293_s15, %s11293_s15, %s11295_s18  }
 0x1c9   : > { %s1421_s16 = sshll.u32 %s8701_s26, 4  ;;  %s8109_s3 = sshra.s32 %s1420_s12, 4  ;;  %s1422_s16 = int_to_ptr.vmem [resolvable:$true] %s1421_s16  ;;  %s8110_s3 = int_to_ptr.hbm [resolvable:$true] %s8109_s3 }
 0x1ca   : > { %s8111_s11 = scalar_lea.hbm %s8110_s3, 4  ;;  %s8115_s5 = scalar_lea.hbm %s11306_s7, 4 }
 0x1cb   : > { %p8112_p11 = scmp.ne.s32.totalorder %s8110_s3, %s8111_s11  ;;  %p8116_p0 = scmp.lt.s32.totalorder %s8110_s3, %s11306_s7 }
 0x1cc   : > { %p8117_p1 = scmp.lt.s32.totalorder %s8115_s5, %s8111_s11 }
 0x1cd   : > { %s1445_s2 = sshll.u32 %s11307_s4, 4  ;;  %p8113_p12 = pnand %p8112_p11, %p7161_p3  ;;  %s9291_s2 = int_to_ptr.hbm [resolvable:$true] %s1445_s2 }
 0x1ce   : > { %p8118_p4 = por %p8117_p1, %p8116_p0 }
 0x1cf   : > { %p8114_p13 = pneg %p8113_p12 }
 0x1d1   : > { %p8119_p5 = pnand %p8118_p4, %p8114_p13 }
 0x1d3   : > { %8122 = shalt.err (!%p8119_p5)
}
 0x1d4   : > { %s11308_s10 = sld [smem:[#allocation103_spill]]  ;;  %s8702_s1 = smov [#allocation24]  }
 0x1d5   : > { %7026 = dma.hbm_to_vmem [thread:$0]  (%p7161_p3), %s1420_s12, 64, %s1422_s16, [#allocation20]  }
 0x1d6   : > { %s1447_s8 = sshll.u32 %s8702_s1, 4  ;;  %s8137_s6 = sshra.s32 %s9291_s2, 4  ;;  %s1448_s8 = int_to_ptr.vmem [resolvable:$true] %s1447_s8  ;;  %s8138_s6 = int_to_ptr.hbm [resolvable:$true] %s8137_s6 }
 0x1d7   : > { %s8139_s13 = scalar_lea.hbm %s8138_s6, 2048  ;;  %s8143_s3 = scalar_lea.hbm %s11307_s4, 2048 }
 0x1d8   : > { %p8140_p6 = scmp.ne.s32.totalorder %s8138_s6, %s8139_s13  ;;  %p8144_p9 = scmp.lt.s32.totalorder %s8138_s6, %s11307_s4 }
 0x1d9   : > { %p8145_p10 = scmp.lt.s32.totalorder %s8143_s3, %s8139_s13 }
 0x1da   : > { %s1472_s26 = sshll.u32 %s11308_s10, 4  ;;  %p8141_p7 = pnand %p8140_p6, %p7161_p3  ;;  %s1473_s26 = int_to_ptr.hbm [resolvable:$true] %s1472_s26 }
 0x1db   : > { %p8146_p11 = por %p8145_p10, %p8144_p9 }
 0x1dc   : > { %p8142_p8 = pneg %p8141_p7 }
 0x1de   : > { %p8147_p12 = pnand %p8146_p11, %p8142_p8 }
 0x1e0   : > { %8150 = shalt.err (!%p8147_p12)
}
 0x1e1   : > { %s11104_s11 = smov 512   ;;  %s11309_s12 = sld [smem:[#allocation106_spill]] }
 0x1e2   : > { %s11106_s16 = smov 32   ;;  %s8705_s5 = smov [#allocation27]  }
 0x1e3   : > { %7030 = dma.hbm_to_vmem [thread:$0]  (%p7161_p3), %s9291_s2, 32768, %s1448_s8, [#allocation23], %s11104_s11, %s11104_s11, %s11106_s16  }
 0x1e4   : > { %s1474_s6 = sshll.u32 %s8705_s5, 4  ;;  %s8165_s1 = sshra.s32 %s1473_s26, 4  ;;  %s1475_s6 = int_to_ptr.vmem [resolvable:$true] %s1474_s6  ;;  %s8166_s1 = int_to_ptr.hbm [resolvable:$true] %s8165_s1 }
 0x1e5   : > { %s8167_s3 = scalar_lea.hbm %s8166_s1, 1  ;;  %s8171_s4 = scalar_lea.hbm %s11308_s10, 1 }
 0x1e6   : > { %p8168_p13 = scmp.ne.s32.totalorder %s8166_s1, %s8167_s3  ;;  %p8172_p4 = scmp.lt.s32.totalorder %s8166_s1, %s11308_s10 }
 0x1e7   : > { %s1504_s13 = sshll.u32 %s11309_s12, 4  ;;  %p8173_p5 = scmp.lt.s32.totalorder %s8171_s4, %s8167_s3  ;;  %s9312_s13 = int_to_ptr.hbm [resolvable:$true] %s1504_s13 }
 0x1e8   : > { %p8169_p0 = pnand %p8168_p13, %p7161_p3 }
 0x1e9   : > { %p8174_p6 = por %p8173_p5, %p8172_p4 }
 0x1ea   : > { %p8170_p1 = pneg %p8169_p0 }
 0x1ec   : > { %p8175_p7 = pnand %p8174_p6, %p8170_p1 }
 0x1ee   : > { %8178 = shalt.err (!%p8175_p7)
}
 0x1ef   : > { %s11310_s2 = sld [smem:[#allocation107_spill]]  ;;  %s8706_s5 = smov [#allocation30]  }
 0x1f0   : > { %7034 = dma.hbm_to_vmem [thread:$0]  (%p7161_p3), %s1473_s26, 16, %s1475_s6, [#allocation26]  }
 0x1f1   : > { %s1506_s11 = sshll.u32 %s8706_s5, 4  ;;  %s8193_s16 = sshra.s32 %s9312_s13, 4  ;;  %s1507_s11 = int_to_ptr.vmem [resolvable:$true] %s1506_s11  ;;  %s8194_s16 = int_to_ptr.hbm [resolvable:$true] %s8193_s16 }
 0x1f2   : > { %s8195_s4 = scalar_lea.hbm %s8194_s16, 4  ;;  %s8199_s1 = scalar_lea.hbm %s11309_s12, 4 }
 0x1f3   : > { %p8196_p8 = scmp.ne.s32.totalorder %s8194_s16, %s8195_s4  ;;  %p8200_p11 = scmp.lt.s32.totalorder %s8194_s16, %s11309_s12 }
 0x1f4   : > { %p8201_p12 = scmp.lt.s32.totalorder %s8199_s1, %s8195_s4 }
 0x1f5   : > { %s1529_s8 = sshll.u32 %s11310_s2, 4  ;;  %p8197_p9 = pnand %p8196_p8, %p7161_p3  ;;  %s9321_s8 = int_to_ptr.hbm [resolvable:$true] %s1529_s8 }
 0x1f6   : > { %p8202_p13 = por %p8201_p12, %p8200_p11 }
 0x1f7   : > { %p8198_p10 = pneg %p8197_p9 }
 0x1f9   : > { %p8203_p0 = pnand %p8202_p13, %p8198_p10 }
 0x1fb   : > { %8206 = shalt.err (!%p8203_p0)
}
 0x1fc   : > { %s11311_s26 = sld [smem:[#allocation109_spill]]  ;;  %s8707_s6 = smov [#allocation33]  }
 0x1fd   : > { %7038 = dma.hbm_to_vmem [thread:$0]  (%p7161_p3), %s9312_s13, 64, %s1507_s11, [#allocation29]  }
 0x1fe   : > { %s1531_s3 = sshll.u32 %s8707_s6, 4  ;;  %s8221_s16 = sshra.s32 %s9321_s8, 4  ;;  %s1532_s3 = int_to_ptr.vmem [resolvable:$true] %s1531_s3  ;;  %s8222_s16 = int_to_ptr.hbm [resolvable:$true] %s8221_s16 }
 0x1ff   : > { %s8223_s4 = scalar_lea.hbm %s8222_s16, 512  ;;  %s8227_s1 = scalar_lea.hbm %s11310_s2, 512 }
 0x200   : > { %p8224_p1 = scmp.ne.s32.totalorder %s8222_s16, %s8223_s4  ;;  %p8228_p6 = scmp.lt.s32.totalorder %s8222_s16, %s11310_s2 }
 0x201   : > { %p8229_p7 = scmp.lt.s32.totalorder %s8227_s1, %s8223_s4 }
 0x202   : > { %s1556_s5 = sshll.u32 %s11311_s26, 4  ;;  %p8225_p4 = pnand %p8224_p1, %p7161_p3  ;;  %s9332_s5 = int_to_ptr.hbm [resolvable:$true] %s1556_s5 }
 0x203   : > { %p8230_p8 = por %p8229_p7, %p8228_p6 }
 0x204   : > { %p8226_p5 = pneg %p8225_p4 }
 0x206   : > { %p8231_p9 = pnand %p8230_p8, %p8226_p5 }
 0x208   : > { %8234 = shalt.err (!%p8231_p9)
}
 0x209   : > { %s11312_s11 = smov 32   ;;  %s11313_s13 = smov 512  }
 0x20a   : > { %s11314_s6 = sld [smem:[#allocation111_spill]]  ;;  %s8708_s10 = smov [#allocation36]  }
 0x20b   : > { %7042 = dma.hbm_to_vmem [thread:$0]  (%p7161_p3), %s9321_s8, 8192, %s1532_s3, [#allocation32], %s11313_s13, %s11313_s13, %s11312_s11  }
 0x20c   : > { %s1558_s12 = sshll.u32 %s8708_s10, 4  ;;  %s8249_s16 = sshra.s32 %s9332_s5, 4  ;;  %s1559_s12 = int_to_ptr.vmem [resolvable:$true] %s1558_s12  ;;  %s8250_s16 = int_to_ptr.hbm [resolvable:$true] %s8249_s16 }
 0x20d   : > { %s8251_s4 = scalar_lea.hbm %s8250_s16, 1  ;;  %s8255_s1 = scalar_lea.hbm %s11311_s26, 1 }
 0x20e   : > { %p8252_p10 = scmp.ne.s32.totalorder %s8250_s16, %s8251_s4  ;;  %p8256_p13 = scmp.lt.s32.totalorder %s8250_s16, %s11311_s26 }
 0x20f   : > { %p8257_p0 = scmp.lt.s32.totalorder %s8255_s1, %s8251_s4 }
 0x210   : > { %s1582_s7 = sshll.u32 %s11314_s6, 4  ;;  %p8253_p11 = pnand %p8252_p10, %p7161_p3  ;;  %s9346_s7 = int_to_ptr.hbm [resolvable:$true] %s1582_s7 }
 0x211   : > { %p8258_p1 = por %p8257_p0, %p8256_p13 }
 0x212   : > { %p8254_p12 = pneg %p8253_p11 }
 0x214   : > { %p8259_p4 = pnand %p8258_p1, %p8254_p12 }
 0x216   : > { %8262 = shalt.err (!%p8259_p4)
}
 0x217   : > { %s11315_s10 = sld [smem:[#allocation114_spill]]  ;;  %s8709_s8 = smov [#allocation39]  }
 0x218   : > { %7046 = dma.hbm_to_vmem [thread:$0]  (%p7161_p3), %s9332_s5, 16, %s1559_s12, [#allocation35]  }
 0x219   : > { %s1584_s3 = sshll.u32 %s8709_s8, 4  ;;  %s8277_s16 = sshra.s32 %s9346_s7, 4  ;;  %s1585_s3 = int_to_ptr.vmem [resolvable:$true] %s1584_s3  ;;  %s8278_s16 = int_to_ptr.hbm [resolvable:$true] %s8277_s16 }
 0x21a   : > { %s8279_s4 = scalar_lea.hbm %s8278_s16, 1  ;;  %s8283_s1 = scalar_lea.hbm %s11314_s6, 1 }
 0x21b   : > { %p8280_p5 = scmp.ne.s32.totalorder %s8278_s16, %s8279_s4  ;;  %p8284_p8 = scmp.lt.s32.totalorder %s8278_s16, %s11314_s6 }
 0x21c   : > { %p8285_p9 = scmp.lt.s32.totalorder %s8283_s1, %s8279_s4 }
 0x21d   : > { %s1608_s2 = sshll.u32 %s11315_s10, 4  ;;  %p8281_p6 = pnand %p8280_p5, %p7161_p3  ;;  %s9357_s2 = int_to_ptr.hbm [resolvable:$true] %s1608_s2 }
 0x21e   : > { %p8286_p10 = por %p8285_p9, %p8284_p8 }
 0x21f   : > { %p8282_p7 = pneg %p8281_p6 }
 0x221   : > { %p8287_p11 = pnand %p8286_p10, %p8282_p7 }
 0x223   : > { %8290 = shalt.err (!%p8287_p11)
}
 0x224   : > { %s11316_s12 = sld [smem:[#allocation115_spill]]  ;;  %s8710_s8 = smov [#allocation42]  }
 0x225   : > { %7050 = dma.hbm_to_vmem [thread:$0]  (%p7161_p3), %s9346_s7, 16, %s1585_s3, [#allocation38]  }
 0x226   : > { %s1610_s19 = sshll.u32 %s8710_s8, 4  ;;  %s8305_s16 = sshra.s32 %s9357_s2, 4  ;;  %s1611_s19 = int_to_ptr.vmem [resolvable:$true] %s1610_s19  ;;  %s8306_s16 = int_to_ptr.hbm [resolvable:$true] %s8305_s16 }
 0x227   : > { %s8307_s4 = scalar_lea.hbm %s8306_s16, 128  ;;  %s8311_s1 = scalar_lea.hbm %s11315_s10, 128 }
 0x228   : > { %p8308_p12 = scmp.ne.s32.totalorder %s8306_s16, %s8307_s4  ;;  %p8312_p1 = scmp.lt.s32.totalorder %s8306_s16, %s11315_s10 }
 0x229   : > { %p8313_p4 = scmp.lt.s32.totalorder %s8311_s1, %s8307_s4 }
 0x22a   : > { %s1637_s5 = sshll.u32 %s11316_s12, 4  ;;  %p8309_p13 = pnand %p8308_p12, %p7161_p3  ;;  %s9368_s5 = int_to_ptr.hbm [resolvable:$true] %s1637_s5 }
 0x22b   : > { %p8314_p5 = por %p8313_p4, %p8312_p1 }
 0x22c   : > { %p8310_p0 = pneg %p8309_p13 }
 0x22e   : > { %p8315_p6 = pnand %p8314_p5, %p8310_p0 }
 0x230   : > { %8318 = shalt.err (!%p8315_p6)
}
 0x231   : > { %s11317_s7 = sld [smem:[#allocation117_spill]]  ;;  %s8711_s3 = smov [#allocation45]  }
 0x232   : > { %7054 = dma.hbm_to_vmem [thread:$0]  (%p7161_p3), %s9357_s2, 2048, %s1611_s19, [#allocation41], %s11293_s15, %s11293_s15, %s11295_s18  }
 0x233   : > { %s1639_s8 = sshll.u32 %s8711_s3, 4  ;;  %s8333_s16 = sshra.s32 %s9368_s5, 4  ;;  %s1640_s8 = int_to_ptr.vmem [resolvable:$true] %s1639_s8  ;;  %s8334_s16 = int_to_ptr.hbm [resolvable:$true] %s8333_s16 }
 0x234   : > { %s8335_s4 = scalar_lea.hbm %s8334_s16, 4  ;;  %s8339_s1 = scalar_lea.hbm %s11316_s12, 4 }
 0x235   : > { %p8336_p7 = scmp.ne.s32.totalorder %s8334_s16, %s8335_s4  ;;  %p8340_p10 = scmp.lt.s32.totalorder %s8334_s16, %s11316_s12 }
 0x236   : > { %p8341_p11 = scmp.lt.s32.totalorder %s8339_s1, %s8335_s4 }
 0x237   : > { %s1663_s6 = sshll.u32 %s11317_s7, 4  ;;  %p8337_p8 = pnand %p8336_p7, %p7161_p3  ;;  %s9382_s6 = int_to_ptr.hbm [resolvable:$true] %s1663_s6 }
 0x238   : > { %p8342_p12 = por %p8341_p11, %p8340_p10 }
 0x239   : > { %p8338_p9 = pneg %p8337_p8 }
 0x23b   : > { %p8343_p13 = pnand %p8342_p12, %p8338_p9 }
 0x23d   : > { %8346 = shalt.err (!%p8343_p13)
}
 0x23e   : > { %s11318_s19 = sld [smem:[#allocation119_spill]]  ;;  %s8712_s3 = smov [#allocation48]  }
 0x23f   : > { %7058 = dma.hbm_to_vmem [thread:$0]  (%p7161_p3), %s9368_s5, 64, %s1640_s8, [#allocation44]  }
 0x240   : > { %s1665_s10 = sshll.u32 %s8712_s3, 4  ;;  %s8361_s16 = sshra.s32 %s9382_s6, 4  ;;  %s1666_s10 = int_to_ptr.vmem [resolvable:$true] %s1665_s10  ;;  %s8362_s16 = int_to_ptr.hbm [resolvable:$true] %s8361_s16 }
 0x241   : > { %s8363_s4 = scalar_lea.hbm %s8362_s16, 4  ;;  %s8367_s1 = scalar_lea.hbm %s11317_s7, 4 }
 0x242   : > { %p8364_p0 = scmp.ne.s32.totalorder %s8362_s16, %s8363_s4  ;;  %p8368_p5 = scmp.lt.s32.totalorder %s8362_s16, %s11317_s7 }
 0x243   : > { %p8369_p6 = scmp.lt.s32.totalorder %s8367_s1, %s8363_s4 }
 0x244   : > { %s1687_s2 = sshll.u32 %s11318_s19, 4  ;;  %p8365_p1 = pnand %p8364_p0, %p7161_p3  ;;  %s9393_s2 = int_to_ptr.hbm [resolvable:$true] %s1687_s2 }
 0x245   : > { %p8370_p7 = por %p8369_p6, %p8368_p5 }
 0x246   : > { %p8366_p4 = pneg %p8365_p1 }
 0x248   : > { %p8371_p8 = pnand %p8370_p7, %p8366_p4 }
 0x24a   : > { %8374 = shalt.err (!%p8371_p8)
}
 0x24b   : > { %s11319_s5 = sld [smem:[#allocation121_spill]]  ;;  %s8713_s8 = smov [#allocation51]  }
 0x24c   : > { %7062 = dma.hbm_to_vmem [thread:$0]  (%p7161_p3), %s9382_s6, 64, %s1666_s10, [#allocation47]  }
 0x24d   : > { %s1689_s3 = sshll.u32 %s8713_s8, 4  ;;  %s8389_s16 = sshra.s32 %s9393_s2, 4  ;;  %s1690_s3 = int_to_ptr.vmem [resolvable:$true] %s1689_s3  ;;  %s8390_s16 = int_to_ptr.hbm [resolvable:$true] %s8389_s16 }
 0x24e   : > { %s8391_s4 = scalar_lea.hbm %s8390_s16, 1  ;;  %s8395_s1 = scalar_lea.hbm %s11318_s19, 1 }
 0x24f   : > { %p8392_p9 = scmp.ne.s32.totalorder %s8390_s16, %s8391_s4  ;;  %p8396_p12 = scmp.lt.s32.totalorder %s8390_s16, %s11318_s19 }
 0x250   : > { %p8397_p13 = scmp.lt.s32.totalorder %s8395_s1, %s8391_s4 }
 0x251   : > { %s1710_s12 = sshll.u32 %s11319_s5, 4  ;;  %p8393_p10 = pnand %p8392_p9, %p7161_p3  ;;  %s9404_s12 = int_to_ptr.hbm [resolvable:$true] %s1710_s12 }
 0x252   : > { %p8398_p0 = por %p8397_p13, %p8396_p12 }
 0x253   : > { %p8394_p11 = pneg %p8393_p10 }
 0x255   : > { %p8399_p1 = pnand %p8398_p0, %p8394_p11 }
 0x257   : > { %8402 = shalt.err (!%p8399_p1)
}
 0x258   : > { %s11320_s6 = sld [smem:[#allocation124_spill]]  ;;  %s8714_s8 = smov [#allocation54]  }
 0x259   : > { %7066 = dma.hbm_to_vmem [thread:$0]  (%p7161_p3), %s9393_s2, 16, %s1690_s3, [#allocation50]  }
 0x25a   : > { %s1712_s7 = sshll.u32 %s8714_s8, 4  ;;  %s8417_s16 = sshra.s32 %s9404_s12, 4  ;;  %s1713_s7 = int_to_ptr.vmem [resolvable:$true] %s1712_s7  ;;  %s8418_s16 = int_to_ptr.hbm [resolvable:$true] %s8417_s16 }
 0x25b   : > { %s8419_s4 = scalar_lea.hbm %s8418_s16, 384  ;;  %s8423_s1 = scalar_lea.hbm %s11319_s5, 384 }
 0x25c   : > { %p8420_p4 = scmp.ne.s32.totalorder %s8418_s16, %s8419_s4  ;;  %p8424_p7 = scmp.lt.s32.totalorder %s8418_s16, %s11319_s5 }
 0x25d   : > { %p8425_p8 = scmp.lt.s32.totalorder %s8423_s1, %s8419_s4 }
 0x25e   : > { %s1740_s10 = sshll.u32 %s11320_s6, 4  ;;  %p8421_p5 = pnand %p8420_p4, %p7161_p3  ;;  %s9415_s10 = int_to_ptr.hbm [resolvable:$true] %s1740_s10 }
 0x25f   : > { %p8426_p9 = por %p8425_p8, %p8424_p7 }
 0x260   : > { %p8422_p6 = pneg %p8421_p5 }
 0x262   : > { %p8427_p10 = pnand %p8426_p9, %p8422_p6 }
 0x264   : > { %8430 = shalt.err (!%p8427_p10)
}
 0x265   : > { %7070 = dma.hbm_to_vmem [thread:$0]  (%p7161_p3), %s9404_s12, 6144, %s1713_s7, [#allocation53], %s11293_s15, %s11293_s15, %s11295_s18  }
 0x266   : > { %s8715_s2 = smov [#allocation57]   ;;  %s1765_s8 = sshll.u32 %s8970_s9, 4  ;;  %s9429_s8 = int_to_ptr.hbm [resolvable:$true] %s1765_s8 }
 0x267   : > { %s1742_s3 = sshll.u32 %s8715_s2, 4  ;;  %s8445_s16 = sshra.s32 %s9415_s10, 4  ;;  %s1743_s3 = int_to_ptr.vmem [resolvable:$true] %s1742_s3  ;;  %s8446_s16 = int_to_ptr.hbm [resolvable:$true] %s8445_s16 }
 0x268   : > { %s8447_s4 = scalar_lea.hbm %s8446_s16, 4  ;;  %s8451_s1 = scalar_lea.hbm %s11320_s6, 4 }
 0x269   : > { %p8448_p11 = scmp.ne.s32.totalorder %s8446_s16, %s8447_s4  ;;  %p8452_p0 = scmp.lt.s32.totalorder %s8446_s16, %s11320_s6 }
 0x26a   : > { %p8453_p1 = scmp.lt.s32.totalorder %s8451_s1, %s8447_s4 }
 0x26b   : > { %p8449_p12 = pnand %p8448_p11, %p7161_p3 }
 0x26c   : > { %p8454_p4 = por %p8453_p1, %p8452_p0 }
 0x26d   : > { %p8450_p13 = pneg %p8449_p12 }
 0x26f   : > { %p8455_p5 = pnand %p8454_p4, %p8450_p13 }
 0x271   : > { %8458 = shalt.err (!%p8455_p5)
}
 0x272   : > { %7074 = dma.hbm_to_vmem [thread:$0]  (%p7161_p3), %s9415_s10, 64, %s1743_s3, [#allocation56]  }
 0x273   : > { %s1779_s15 = sshll.u32 %s8975_s24, 4  ;;  %s8716_s18 = smov [#allocation60]   ;;  %s9440_s15 = int_to_ptr.hbm [resolvable:$true] %s1779_s15 }
 0x274   : > { %s1767_s12 = sshll.u32 %s8716_s18, 4  ;;  %s8473_s7 = sshra.s32 %s9429_s8, 4  ;;  %s1768_s12 = int_to_ptr.vmem [resolvable:$true] %s1767_s12  ;;  %s8474_s7 = int_to_ptr.hbm [resolvable:$true] %s8473_s7 }
 0x275   : > { %s8475_s2 = scalar_lea.hbm %s8474_s7, 512  ;;  %s8479_s16 = scalar_lea.hbm %s8970_s9, 512 }
 0x276   : > { %p8476_p6 = scmp.ne.s32.totalorder %s8474_s7, %s8475_s2  ;;  %p8480_p9 = scmp.lt.s32.totalorder %s8474_s7, %s8970_s9 }
 0x277   : > { %p8481_p10 = scmp.lt.s32.totalorder %s8479_s16, %s8475_s2 }
 0x278   : > { %p8477_p7 = pnand %p8476_p6, %p7161_p3 }
 0x279   : > { %p8482_p11 = por %p8481_p10, %p8480_p9 }
 0x27a   : > { %p8478_p8 = pneg %p8477_p7 }
 0x27c   : > { %p8483_p12 = pnand %p8482_p11, %p8478_p8 }
 0x27e   : > { %8486 = shalt.err (!%p8483_p12)
}
 0x27f   : > { %7078 = dma.hbm_to_vmem [thread:$0]  (%p7161_p3), %s9429_s8, 8192, %s1768_s12, [#allocation59], %s11313_s13, %s11313_s13, %s11312_s11  }
 0x280   : > { %s8717_s10 = smov [#allocation61]   ;;  %s8501_s4 = sshra.s32 %s9440_s15, 4  ;;  %s8502_s4 = int_to_ptr.hbm [resolvable:$true] %s8501_s4 }
 0x281   : > { %s1781_s3 = sshll.u32 %s8717_s10, 4  ;;  %s8503_s1 = scalar_lea.hbm %s8502_s4, 512  ;;  %s1782_s3 = int_to_ptr.vmem [resolvable:$true] %s1781_s3 }
 0x282   : > { %p8504_p13 = scmp.ne.s32.totalorder %s8502_s4, %s8503_s1  ;;  %s8507_s18 = scalar_lea.hbm %s8975_s24, 512 }
 0x283   : > { %p8508_p4 = scmp.lt.s32.totalorder %s8502_s4, %s8975_s24  ;;  %p8509_p5 = scmp.lt.s32.totalorder %s8507_s18, %s8503_s1 }
 0x284   : > { %p8505_p0 = pnand %p8504_p13, %p7161_p3 }
 0x285   : > { %p8510_p6 = por %p8509_p5, %p8508_p4 }
 0x286   : > { %p8506_p1 = pneg %p8505_p0 }
 0x288   : > { %p8511_p7 = pnand %p8510_p6, %p8506_p1 }
 0x28a   : > { %8514 = shalt.err (!%p8511_p7)
}
 0x28b   : > { %7080 = dma.hbm_to_vmem [thread:$0]  (%p7161_p3), %s9440_s15, 8192, %s1782_s3, [#allocation62], %s11313_s13, %s11313_s13, %s11312_s11  }
 0x28c PF: > { %1808 = sbr.rel (%p8997_p2) target bundleno = 5131 (0x140b), region = 224 }
 0x291   : > { %p7201_p8 = scmp.eq.s32.totalorder %s8993_s22, 0 }
 0x293   : > { %8534 = dma.done.wait (%p7201_p8), [#allocation3], 16  }
 0x294   : > { %8536 = vsyncadd (%p7201_p8), [#allocation3], 4294967280 }
 0x295   : > { %8538 = dma.done.wait (%p7201_p8), [#allocation5], 6160  }
 0x296   : > { %8540 = vsyncadd (%p7201_p8), [#allocation5], 4294961136 }
 0x297   : > { %8542 = dma.done.wait (%p7201_p8), [#allocation8], 80  }
 0x298   : > { %8544 = vsyncadd (%p7201_p8), [#allocation8], 4294967216 }
 0x299   : > { %8546 = dma.done.wait (%p7201_p8), [#allocation11], 6160  }
 0x29a   : > { %8548 = vsyncadd (%p7201_p8), [#allocation11], 4294961136 }
 0x29b   : > { %8550 = dma.done.wait (%p7201_p8), [#allocation14], 208  }
 0x29c   : > { %8552 = vsyncadd (%p7201_p8), [#allocation14], 4294967088 }
 0x29d   : > { %8554 = dma.done.wait (%p7201_p8), [#allocation17], 2064  }
 0x29e   : > { %8556 = vsyncadd (%p7201_p8), [#allocation17], 4294965232 }
 0x29f   : > { %8558 = dma.done.wait (%p7201_p8), [#allocation20], 2112  }
 0x2a0   : > { %8560 = vsyncadd (%p7201_p8), [#allocation20], 4294965184 }
 0x2a1   : > { %8562 = dma.done.wait (%p7201_p8), [#allocation23], 32832  }
 0x2a2   : > { %8564 = vsyncadd (%p7201_p8), [#allocation23], 4294934464 }
 0x2a3   : > { %8566 = dma.done.wait (%p7201_p8), [#allocation26], 32  }
 0x2a4   : > { %8568 = vsyncadd (%p7201_p8), [#allocation26], 4294967264 }
 0x2a5   : > { %8570 = dma.done.wait (%p7201_p8), [#allocation29], 6208  }
 0x2a6   : > { %8572 = vsyncadd (%p7201_p8), [#allocation29], 4294961088 }
 0x2a7   : > { %8574 = dma.done.wait (%p7201_p8), [#allocation32], 16384  }
 0x2a8   : > { %8576 = vsyncadd (%p7201_p8), [#allocation32], 4294950912 }
 0x2a9   : > { %8578 = dma.done.wait (%p7201_p8), [#allocation35], 32  }
 0x2aa   : > { %8580 = vsyncadd (%p7201_p8), [#allocation35], 4294967264 }
 0x2ab   : > { %8582 = dma.done.wait (%p7201_p8), [#allocation38], 6160  }
 0x2ac   : > { %8584 = vsyncadd (%p7201_p8), [#allocation38], 4294961136 }
 0x2ad   : > { %8586 = dma.done.wait (%p7201_p8), [#allocation41], 2064  }
 0x2ae   : > { %8588 = vsyncadd (%p7201_p8), [#allocation41], 4294965232 }
 0x2af   : > { %8590 = dma.done.wait (%p7201_p8), [#allocation44], 2112  }
 0x2b0   : > { %8592 = vsyncadd (%p7201_p8), [#allocation44], 4294965184 }
 0x2b1   : > { %8594 = dma.done.wait (%p7201_p8), [#allocation47], 8256  }
 0x2b2   : > { %8596 = vsyncadd (%p7201_p8), [#allocation47], 4294959040 }
 0x2b3   : > { %8598 = dma.done.wait (%p7201_p8), [#allocation50], 80  }
 0x2b4   : > { %8600 = vsyncadd (%p7201_p8), [#allocation50], 4294967216 }
 0x2b5   : > { %8602 = dma.done.wait (%p7201_p8), [#allocation53], 6160  }
 0x2b6   : > { %8604 = vsyncadd (%p7201_p8), [#allocation53], 4294961136 }
 0x2b7   : > { %8606 = dma.done.wait (%p7201_p8), [#allocation56], 128  }
 0x2b8   : > { %8608 = vsyncadd (%p7201_p8), [#allocation56], 4294967168 }
 0x2b9   : > { %8610 = dma.done.wait (%p7201_p8), [#allocation59], 16384  }
 0x2ba   : > { %8612 = vsyncadd (%p7201_p8), [#allocation59], 4294950912 }
 0x2bb   : > { %8614 = dma.done.wait (%p7201_p8), [#allocation62], 8192  }
 0x2bc   : > { %8616 = vsyncadd (%p7201_p8), [#allocation62], 4294959104  ;;  %v9551_v0 = vld [vmem:[#allocation58 + $0x178] sm:$0xff]  ;;  %v9555_v2 = vld [vmem:[#allocation58 + $0x170] sm:$0xff]  ;;  %p2124_p2 = scmp.lt.s32.totalorder %s8993_s22, 1  ;;  %s11321_s23 = sld [smem:[#allocation84_spill]] }
 0x2bd   : > { %v9553_v1 = vld [vmem:[#allocation58 + $0x78] sm:$0xff]  ;;  %2278 = vmatpush.msra.mxu2 %v9551_v0  ;;  %v9561_v4 = vld [vmem:[#allocation58 + $0x70] sm:$0xff]  ;;  %v9567_v6 = vld [vmem:[#allocation58 + $0x168] sm:$0xff]  ;;  %s11363_s8 = sld [smem:[#allocation123_spill]]  ;;  %vm2320_vm0 = vcmask 64512   ;;  %s8718_s16 = smov 120  }
 0x2be   : > { %2238 = vmatpush.msra.mxu0 %v9553_v1  ;;  %v9559_v3 = vld [vmem:[#allocation58 + $0x1f8] sm:$0xff]  ;;  %v9569_v7 = vld [vmem:[#allocation58 + $0x1f0] sm:$0xff]  ;;  %v9571_v8 = vld [vmem:[#allocation58 + $0x68] sm:$0xff]  ;;  %s11613_s22 = smov (!%p2124_p2, %s8993_s22), 1  ;;  %s11570_s15 = sld [smem:[#allocation90_spill]]  ;;  %vm3513_vm4 = vcmask 982016  }
 0x2bf   : > { %v9563_v5 = vld [vmem:[#allocation58 + $0xf8] sm:$0xff]  ;;  %2298 = vmatpush.msra.mxu3 %v9559_v3  ;;  %2279 = vmatpush.msra.mxu2 %v9555_v2  ;;  %v9575_v9 = vld [vmem:[#allocation58 + $0xf0] sm:$0xff]  ;;  %v9577_v10 = vld [vmem:[#allocation58 + $0x1e8] sm:$0xff]  ;;  %s6999_s11 = sshll.u32 %s11613_s22, 5  ;;  %s11583_s12 = sld [smem:[#allocation88_spill]]  ;;  %vm3558_vm14 = vcmask 523264  }
 0x2c0   : > { %2258 = vmatpush.msra.mxu1 %v9563_v5  ;;  %2239 = vmatpush.msra.mxu0 %v9561_v4  ;;  %v9581_v11 = vld [vmem:[#allocation58 + $0x160] sm:$0xff]  ;;  %v9585_v13 = vld [vmem:[#allocation58 + $0xe8] sm:$0xff]  ;;  %v9595_v16 = vld [vmem:[#allocation58 + $0x158] sm:$0xff]  ;;  %s11584_s7 = sld [smem:[#allocation89_spill]]  ;;  %s8719_s10 = smov 8  }
 0x2c1   : > { %2299 = vmatpush.msra.mxu3 %v9569_v7  ;;  %v9583_v12 = vld [vmem:[#allocation58 + $0x60] sm:$0xff]  ;;  %2280 = vmatpush.msra.mxu2 %v9567_v6  ;;  %v9597_v17 = vld [vmem:[#allocation58 + $0x58] sm:$0xff]  ;;  %v9608_v20 = vld [vmem:[#allocation58 + $0x150] sm:$0xff]  ;;  %s11585_s2 = sld [smem:[#allocation91_spill]]  ;;  %s8721_s3 = smov 64  }
 0x2c2   : > { %2259 = vmatpush.msra.mxu1 %v9575_v9  ;;  %2240 = vmatpush.msra.mxu0 %v9571_v8  ;;  %v9589_v14 = vld [vmem:[#allocation58 + $0x1e0] sm:$0xff]  ;;  %v9602_v18 = vld [vmem:[#allocation58 + $0x1d8] sm:$0xff]  ;;  %v9610_v21 = vld [vmem:[#allocation58 + $0x50] sm:$0xff]  ;;  %s9677_s13 = scalar_lea.vmem %s11321_s23, %s6999_s11  ;;  %s11608_s4 = sld [smem:[#allocation112_spill]] }
 0x2c3   : > { %v9591_v15 = vld [vmem:[#allocation58 + $0xe0] sm:$0xff]  ;;  %2300 = vmatpush.msra.mxu3 %v9577_v10  ;;  %2281 = vmatpush.msra.mxu2 %v9581_v11  ;;  %v9604_v19 = vld [vmem:[#allocation58 + $0xd8] sm:$0xff]  ;;  %v9614_v22 = vld [vmem:[#allocation58 + $0x1d0] sm:$0xff]  ;;  %s11609_s1 = sld [smem:[#allocation100_spill]] }
 0x2c4   : > { %2260 = vmatpush.msra.mxu1 %v9585_v13  ;;  %2241 = vmatpush.msra.mxu0 %v9583_v12  ;;  %v9616_v23 = vld [vmem:[#allocation58 + $0xd0] sm:$0xff]  ;;  %v9620_v24 = vld [vmem:[#allocation58 + $0x148] sm:$0xff]  ;;  %v9637_v28 = vld [vmem:[#allocation58 + $0x140] sm:$0xff]  ;;  %s11610_s18 = sld [smem:[#allocation104_spill]] }
 0x2c5   : > { %2301 = vmatpush.msra.mxu3 %v9589_v14  ;;  %2282 = vmatpush.msra.mxu2 %v9595_v16  ;;  %v9622_v25 = vld [vmem:[#allocation58 + $0x48] sm:$0xff]  ;;  %v9639_v29 = vld [vmem:[#allocation58 + $0x40] sm:$0xff]  ;;  %v9649_v32 = vld [vmem:[#allocation58 + $0x138] sm:$0xff]  ;;  %s11611_s23 = sld [smem:[#allocation105_spill]] }
 0x2c6   : > { %2261 = vmatpush.msra.mxu1 %v9591_v15  ;;  %2242 = vmatpush.msra.mxu0 %v9597_v17  ;;  %v9631_v26 = vld [vmem:[#allocation58 + $0x1c8] sm:$0xff]  ;;  %v9643_v30 = vld [vmem:[#allocation58 + $0x1c0] sm:$0xff]  ;;  %v9651_v33 = vld [vmem:[#allocation58 + $0x38] sm:$0xff] }
 0x2c7   : > { %2302 = vmatpush.msra.mxu3 %v9602_v18  ;;  %2283 = vmatpush.msra.mxu2 %v9608_v20  ;;  %v9633_v27 = vld [vmem:[#allocation58 + $0xc8] sm:$0xff]  ;;  %v9645_v31 = vld [vmem:[#allocation58 + $0xc0] sm:$0xff]  ;;  %v9656_v34 = vld [vmem:[#allocation58 + $0x1b8] sm:$0xff] }
 0x2c8   : > { %2262 = vmatpush.msra.mxu1 %v9604_v19  ;;  %2243 = vmatpush.msra.mxu0 %v9610_v21  ;;  %v9658_v35 = vld [vmem:[#allocation58 + $0xb8] sm:$0xff]  ;;  %v9662_v36 = vld [vmem:[#allocation58 + $0x130] sm:$0xff]  ;;  %v9668_v38 = vld [vmem:[#allocation58 + $0x128] sm:$0xff] }
 0x2c9   : > { %2303 = vmatpush.msra.mxu3 %v9614_v22  ;;  %2284 = vmatpush.msra.mxu2 %v9620_v24  ;;  %11322 = vst [vmem:[#allocation126_spill] sm:$0xff] %v9662_v36  ;;  %v9664_v37 = vld [vmem:[#allocation58 + $0x30] sm:$0xff]  ;;  %v9681_v41 = vld [vmem:[#allocation58 + $0x28] sm:$0xff]  ;;  %v9683_v42 = vld [vmem:[#allocation58 + $0x120] sm:$0xff] }
 0x2ca   : > { %2263 = vmatpush.msra.mxu1 %v9616_v23  ;;  %2244 = vmatpush.msra.mxu0 %v9622_v25  ;;  %11323 = vst [vmem:[#allocation127_spill] sm:$0xff] %v9668_v38  ;;  %v9670_v39 = vld [vmem:[#allocation58 + $0x1b0] sm:$0xff]  ;;  %v9685_v43 = vld [vmem:[#allocation58 + $0x1a8] sm:$0xff]  ;;  %v9689_v44 = vld [vmem:[#allocation58 + $0x20] sm:$0xff] }
 0x2cb   : > { %2304 = vmatpush.msra.mxu3 %v9631_v26  ;;  %2285 = vmatpush.msra.mxu2 %v9637_v28  ;;  %v9672_v40 = vld [vmem:[#allocation58 + $0xb0] sm:$0xff]  ;;  %11324 = vst [vmem:[#allocation128_spill] sm:$0xff] %v9681_v41  ;;  %v9691_v45 = vld [vmem:[#allocation58 + $0xa8] sm:$0xff]  ;;  %v9693_v46 = vld [vmem:[#allocation58 + $0x1a0] sm:$0xff] }
 0x2cc   : > { %2264 = vmatpush.msra.mxu1 %v9633_v27  ;;  %2245 = vmatpush.msra.mxu0 %v9639_v29  ;;  %11325 = vst [vmem:[#allocation129_spill] sm:$0xff] %v9683_v42  ;;  %v9697_v47 = vld [vmem:[#allocation58 + $0x118] sm:$0xff]  ;;  %v9700_v48 = vld [vmem:[%s9677_s13 + $0x10] sm:$0xff]  ;;  %v9719_v57 = vld [vmem:[#allocation58 + $0x110] sm:$0xff] }
 0x2cd   : > { %2305 = vmatpush.msra.mxu3 %v9643_v30  ;;  %2286 = vmatpush.msra.mxu2 %v9649_v32  ;;  %11326 = vst [vmem:[#allocation130_spill] sm:$0xff] %v9685_v43  ;;  %v9702_v49 = vld [vmem:[#allocation55] sm:$0xf]  ;;  %v9704_v50 = vld [vmem:[#allocation57] sm:$0xf]  ;;  %v9710_v52 = vld [vmem:[#allocation58 + $0xa0] sm:$0xff] }
 0x2ce   : > { %2265 = vmatpush.msra.mxu1 %v9645_v31  ;;  %2246 = vmatpush.msra.mxu0 %v9651_v33  ;;  %11327 = vst [vmem:[#allocation131_spill] sm:$0xff] %v9689_v44  ;;  %v9708_v51 = vld [vmem:[#allocation58 + $0x18] sm:$0xff]  ;;  %v11123_v54 = vperm.slane %v9702_v49, 2  ;;  %v9721_v58 = vld [vmem:[#allocation58 + $0x10] sm:$0xff]  ;;  %v9762_v63 = vld [vmem:[#allocation58 + $0x188] sm:$0xff]  ;;  %v11340_v55 = vperm.slane %v9704_v50, 2 }
 0x2cf   : > { %2306 = vmatpush.msra.mxu3 %v9656_v34  ;;  %2287 = vmatpush.msra.mxu2 %v9662_v36  ;;  %11328 = vst [vmem:[#allocation132_spill] sm:$0xff] %v9691_v45  ;;  %v9712_v53 = vld [vmem:[#allocation58 + $0x198] sm:$0xff]  ;;  %v9730_v62 = vld [vmem:[%s9677_s13 + $0x18] sm:$0xff] }
 0x2d0   : > { %2266 = vmatpush.msra.mxu1 %v9658_v35  ;;  %2247 = vmatpush.msra.mxu0 %v9664_v37  ;;  %11329 = vst [vmem:[#allocation133_spill] sm:$0xff] %v9693_v46  ;;  %v9723_v59 = vld [vmem:[#allocation58 + $0x98] sm:$0xff]  ;;  %v9736_v56 = vld [vmem:[#allocation58 + $0x190] sm:$0xff] }
 0x2d1   : > { %2307 = vmatpush.msra.mxu3 %v9670_v39  ;;  %11330 = vst [vmem:[#allocation134_spill] sm:$0xff] %v9697_v47  ;;  %2288 = vmatpush.msra.mxu2 %v9668_v38  ;;  %v9726_v60 = vld [vmem:[%s9677_s13] sm:$0xff]  ;;  %v2150_v38 = vmul.f32 %v11123_v54, %v9700_v48  ;;  %v11339_v54 = vperm.slane %v9702_v49, 3 }
 0x2d2   : > { %2267 = vmatpush.msra.mxu1 %v9672_v40  ;;  %11331 = vst [vmem:[#allocation135_spill] sm:$0xff] %v9700_v48  ;;  %2248 = vmatpush.msra.mxu0 %v9681_v41  ;;  %v9755_v41 = vld [vmem:[#allocation58 + $0x90] sm:$0xff] }
 0x2d3   : > { %11332 = vst [vmem:[#allocation136_spill] sm:$0xff] %v9702_v49  ;;  %2308 = vmatpush.msra.mxu3 %v9685_v43  ;;  %2289 = vmatpush.msra.mxu2 %v9683_v42  ;;  %v9745_v43 = vld [vmem:[%s9677_s13 + $0x8] sm:$0xff]  ;;  %v9751_v42 = vld [vmem:[#allocation58 + $0x108] sm:$0xff]  ;;  %v2164_v48 = vadd.f32 %v11340_v55, %v2150_v38  ;;  %v11345_v55 = vperm.slane %v9704_v50, 1 }
 0x2d4   : > { %11333 = vst [vmem:[#allocation137_spill] sm:$0xff] %v9704_v50  ;;  %2268 = vmatpush.msra.mxu1 %v9691_v45  ;;  %2249 = vmatpush.msra.mxu0 %v9689_v44  ;;  %v11337_v45 = vperm.slane %v9702_v49, 0  ;;  %v9753_v44 = vld [vmem:[#allocation58 + $0x8] sm:$0xff] }
 0x2d5   : > { %11334 = vst [vmem:[#allocation138_spill] sm:$0xff] %v9710_v52  ;;  %2309 = vmatpush.msra.mxu3 %v9693_v46  ;;  %2290 = vmatpush.msra.mxu2 %v9697_v47  ;;  %v11342_v46 = vperm.slane %v9702_v49, 1  ;;  %v9779_v38 = vld [vmem:[#allocation58 + $0x88] sm:$0xff]  ;;  %v9808_v49 = vld [vmem:[#allocation54 + $0x68] sm:$0xff] }
 0x2d6   : > { %11335 = vst [vmem:[#allocation139_spill] sm:$0xff] %v9726_v60  ;;  %v2148_v61 = vmul.f32 %v11337_v45, %v9726_v60  ;;  %2269 = vmatpush.msra.mxu1 %v9710_v52  ;;  %v2151_v45 = vmul.f32 %v11339_v54, %v9730_v62  ;;  %2250 = vmatpush.msra.mxu0 %v9708_v51  ;;  %v11341_v60 = vperm.slane %v9704_v50, 0  ;;  %v9773_v54 = vld [vmem:[#allocation58 + $0x100] sm:$0xff] }
 0x2d7   : > { %11336 = vst [vmem:[#allocation140_spill] sm:$0xff] %v9730_v62  ;;  %v2149_v36 = vmul.f32 %v11342_v46, %v9745_v43  ;;  %2310 = vmatpush.msra.mxu3 %v9712_v53  ;;  %v11344_v62 = vperm.slane %v9704_v50, 3  ;;  %2291 = vmatpush.msra.mxu2 %v9719_v57  ;;  %v2168_v46 = vmax.f32 %v2164_v48, 0.0  ;;  %v9806_v50 = vld [vmem:[#allocation54 + $0xf8] sm:$0xff] }
 0x2d8   : > { %11338 = vst [vmem:[#allocation141_spill] sm:$0xff] %v9745_v43  ;;  %v2162_v52 = vadd.f32 %v11341_v60, %v2148_v61  ;;  %2270 = vmatpush.msra.mxu1 %v9723_v59  ;;  %2251 = vmatpush.msra.mxu0 %v9721_v58  ;;  %v9785_v61 = vld [vmem:[#allocation58] sm:$0xff] }
 0x2d9   : > { %11343 = vst [vmem:[#allocation142_spill] sm:$0xff] %v9773_v54  ;;  %v2165_v47 = vadd.f32 %v11344_v62, %v2151_v45  ;;  %v2163_v60 = vadd.f32 %v11345_v55, %v2149_v36  ;;  %2311 = vmatpush.msra.mxu3 %v9736_v56  ;;  %2292 = vmatpush.msra.mxu2 %v9751_v42  ;;  %v9789_v62 = vld [vmem:[#allocation58 + $0x180] sm:$0xff]  ;;  %v9803_v55 = vld [vmem:[#allocation54 + $0x70] sm:$0xff] }
 0x2da   : > { %2271 = vmatpush.msra.mxu1 %v9755_v41  ;;  %11346 = vst [vmem:[#allocation143_spill] sm:$0xff] %v9785_v61  ;;  %2252 = vmatpush.msra.mxu0 %v9753_v44  ;;  %v2166_v45 = vmax.f32 %v2162_v52, 0.0  ;;  %v9795_v36 = vld [vmem:[#allocation58 + $0x80] sm:$0xff]  ;;  %v9801_v52 = vld [vmem:[#allocation54 + $0x78] sm:$0xff] }
 0x2db   : > { %11347 = vst [vmem:[#allocation144_spill] sm:$0xff] %v9789_v62  ;;  %v2169_v43 = vmax.f32 %v2165_v47, 0.0  ;;  %2312 = vmatpush.msra.mxu3 %v9762_v63  ;;  %2293 = vmatpush.msra.mxu2 %v9773_v54  ;;  %v2167_v48 = vmax.f32 %v2163_v60, 0.0  ;;  %v9799_v47 = vld [vmem:[#allocation51] ss:$0 sm:$0xff]  ;;  %v9811_v60 = vld [vmem:[#allocation54 + $0xf0] sm:$0xff] }
 0x2dc   : > { %2272 = vmatpush.msra.mxu1 %v9779_v38  ;;  %2253 = vmatpush.msra.mxu0 %v9785_v61  ;;  %11348 = vst [vmem:[#allocation145_spill] sm:$0xff] %v9795_v36 }
 0x2dd   : > { %2294 = vmatmul.f32.vlgmr.msra.gmra.mxu2 %v2168_v46  ;;  %2313 = vmatpush.msra.mxu3 %v9789_v62  ;;  %11349 = vst [vmem:[#allocation146_spill] sm:$0xff] %v9799_v47  ;;  %v9814_v46 = vld [vmem:[#allocation54 + $0xe8] sm:$0xff]  ;;  %v9828_v62 = vld [vmem:[#allocation54 + $0x58] sm:$0xff] }
 0x2de   : > { %2254 = vmatmul.f32.vlgmr.msra.gmra.mxu0 %v2166_v45  ;;  %2314 = vmatmul.f32.vlgmr.msra.gmra.mxu3 %v2169_v43  ;;  %11350 = vst [vmem:[#allocation147_spill] sm:$0xff] %v9801_v52 }
 0x2df   : > { %2273 = vmatpush.msra.mxu1 %v9795_v36  ;;  %11351 = vst [vmem:[#allocation148_spill] sm:$0xff] %v9803_v55  ;;  %2422 = vmatpush.msrb.mxu3 %v9801_v52  ;;  %v9820_v52 = vld [vmem:[#allocation54 + $0x178] sm:$0xff]  ;;  %v9823_v36 = vld [vmem:[#allocation54 + $0xe0] sm:$0xff] }
 0x2e0   : > { %2274 = vmatmul.f32.vlgmr.msra.gmra.mxu1 %v2167_v48  ;;  %11352 = vst [vmem:[#allocation149_spill] sm:$0xff] %v9806_v50  ;;  %2402 = vmatpush.msrb.mxu2 %v9806_v50  ;;  %v9817_v48 = vld [vmem:[#allocation54 + $0x60] sm:$0xff]  ;;  %v9826_v50 = vld [vmem:[#allocation54 + $0x170] sm:$0xff] }
 0x2e1   : > { %11353 = vst [vmem:[#allocation150_spill] sm:$0xff] %v9808_v49  ;;  %2423 = vmatpush.msrb.mxu3 %v9803_v55  ;;  %2484 = vmatpush.msrb.mxu1 %v9820_v52 }
 0x2e2   : > { %11354 = vst [vmem:[#allocation151_spill] sm:$0xff] %v9811_v60  ;;  %2403 = vmatpush.msrb.mxu2 %v9811_v60  ;;  %v9834_v60 = vld [vmem:[#allocation54 + $0xd8] sm:$0xff] }
 0x2e3   : > { %11355 = vst [vmem:[#allocation152_spill] sm:$0xff] %v9814_v46  ;;  %2424 = vmatpush.msrb.mxu3 %v9808_v49  ;;  %2485 = vmatpush.msrb.mxu1 %v9826_v50  ;;  %v9837_v49 = vld [vmem:[#allocation54 + $0x50] sm:$0xff] }
 0x2e4   : > { %11356 = vst [vmem:[#allocation153_spill] sm:$0xff] %v9817_v48  ;;  %2404 = vmatpush.msrb.mxu2 %v9814_v46  ;;  %v9843_v46 = vld [vmem:[#allocation54 + $0xd0] sm:$0xff] }
 0x2e5   : > { %11357 = vst [vmem:[#allocation154_spill] sm:$0xff] %v9820_v52  ;;  %2425 = vmatpush.msrb.mxu3 %v9817_v48  ;;  %v9840_v52 = vld [vmem:[#allocation54 + $0x160] sm:$0xff]  ;;  %v9846_v48 = vld [vmem:[#allocation54 + $0x48] sm:$0xff] }
 0x2e6   : > { %11358 = vst [vmem:[#allocation155_spill] sm:$0xff] %v9823_v36  ;;  %2405 = vmatpush.msrb.mxu2 %v9823_v36  ;;  %v9852_v36 = vld [vmem:[#allocation54 + $0xc8] sm:$0xff] }
 0x2e7   : > { %11359 = vst [vmem:[#allocation156_spill] sm:$0xff] %v9826_v50  ;;  %2426 = vmatpush.msrb.mxu3 %v9828_v62  ;;  %v9849_v50 = vld [vmem:[#allocation54 + $0x158] sm:$0xff] }
 0x2e8   : > { %11360 = vst [vmem:[#allocation157_spill] sm:$0xff] %v9828_v62  ;;  %2406 = vmatpush.msrb.mxu2 %v9834_v60  ;;  %v9859_v62 = vld [vmem:[%s11363_s8] sm:$0xff] }
 0x2e9   : > { %11361 = vst [vmem:[#allocation158_spill] sm:$0xff] %v9834_v60  ;;  %2427 = vmatpush.msrb.mxu3 %v9837_v49  ;;  %v9862_v60 = vld [vmem:[#allocation54 + $0xc0] sm:$0xff] }
 0x2ea   : > { %11362 = vst [vmem:[#allocation159_spill] sm:$0xff] %v9837_v49  ;;  %2407 = vmatpush.msrb.mxu2 %v9843_v46  ;;  %v9996_v49 = vld [vmem:[#allocation60 + $0x188] sm:$0xff] }
 0x2eb   : > { %11364 = vst [vmem:[#allocation160_spill] sm:$0xff] %v9843_v46  ;;  %2428 = vmatpush.msrb.mxu3 %v9846_v48  ;;  %v9876_v46 = vld [vmem:[#allocation54 + $0x150] sm:$0xff] }
 0x2ec   : > { %11365 = vst [vmem:[#allocation161_spill] sm:$0xff] %v9846_v48  ;;  %2408 = vmatpush.msrb.mxu2 %v9852_v36  ;;  %v9879_v48 = vld [vmem:[#allocation54 + $0xb0] sm:$0xff] }
 0x2ed   : > { %11366 = vst [vmem:[#allocation162_spill] sm:$0xff] %v9852_v36  ;;  %v9881_v36 = vld [vmem:[#allocation54 + $0x28] sm:$0xff] }
 0x2ee   : > { %11368 = vst [vmem:[#allocation164_spill] sm:$0xff] %v9859_v62  ;;  %2409 = vmatpush.msrb.mxu2 %v9862_v60 }
 0x2ef   : > { %11369 = vst [vmem:[#allocation165_spill] sm:$0xff] %v9862_v60  ;;  %v9888_v60 = vld [vmem:[#allocation54 + $0xa8] sm:$0xff] }
 0x2f0   : > { %11373 = vst [vmem:[#allocation169_spill] sm:$0xff] %v9876_v46 }
 0x2f1   : > { %11374 = vst [vmem:[#allocation170_spill] sm:$0xff] %v9879_v48 }
 0x2f2   : > { %11375 = vst [vmem:[#allocation171_spill] sm:$0xff] %v9881_v36 }
 0x2f3   : > { %11377 = vst [vmem:[#allocation173_spill] sm:$0xff] %v9888_v60 }
 0x2f4   : > { %11412 = vst [vmem:[#allocation208_spill] sm:$0xff] %v9996_v49 }
 0x35b   : > { %v2255_v43 = vpop.f32.mrf.mxu0 }
 0x35c   : > { %v2256_v45 = vadd.f32 %v9799_v47, %v2255_v43  ;;  %v9831_v43 = vld [vmem:[#allocation54 + $0x168] sm:$0xff] }
 0x35d   : > { %v2275_v54 = vpop.f32.mrf.mxu1  ;;  %2486 = vmatpush.msrb.mxu1 %v9831_v43 }
 0x35e   : > { %v2276_v55 = vadd.f32 %v2275_v54, %v2256_v45 }
 0x35f   : > { %2487 = vmatpush.msrb.mxu1 %v9840_v52 }
 0x360   : > { %v2295_v47 = vpop.f32.mrf.mxu2 }
 0x361   : > { %v2296_v54 = vadd.f32 %v2295_v47, %v2276_v55  ;;  %v2315_v45 = vpop.f32.mrf.mxu3  ;;  %v9855_v47 = vld [vmem:[#allocation54 + $0x40] sm:$0xff]  ;;  %2488 = vmatpush.msrb.mxu1 %v9849_v50 }
 0x362   : > { %11367 = vst [vmem:[#allocation163_spill] sm:$0xff] %v9855_v47  ;;  %2429 = vmatpush.msrb.mxu3 %v9855_v47  ;;  %v9884_v47 = vld [vmem:[#allocation54 + $0x148] sm:$0xff] }
 0x363   : > { %v2316_v61 = vadd.f32 %v2315_v45, %v2296_v54  ;;  %v9865_v54 = vld [vmem:[#allocation54 + $0x38] sm:$0xff]  ;;  %11376 = vst [vmem:[#allocation172_spill] sm:$0xff] %v9884_v47  ;;  %2489 = vmatpush.msrb.mxu1 %v9876_v46  ;;  %v9980_v46 = vld [vmem:[#allocation60 + $0x1a0] sm:$0xff] }
 0x364   : > { %11370 = vst [vmem:[#allocation166_spill] sm:$0xff] %v9865_v54  ;;  %v9869_v45 = vld [vmem:[#allocation54 + $0xb8] sm:$0xff]  ;;  %2430 = vmatpush.msrb.mxu3 %v9865_v54  ;;  %v9894_v54 = vld [vmem:[%s11363_s8 + $0x8] sm:$0xff] }
 0x365   : > { %v2318_v55 = vmax.f32 %v2316_v61, 0.0  ;;  %11371 = vst [vmem:[#allocation167_spill] sm:$0xff] %v9869_v45  ;;  %v9873_v61 = vld [vmem:[#allocation54 + $0x30] sm:$0xff]  ;;  %2410 = vmatpush.msrb.mxu2 %v9869_v45  ;;  %2490 = vmatpush.msrb.mxu1 %v9884_v47 }
 0x366   : > { %11372 = vst [vmem:[#allocation168_spill] sm:$0xff] %v9873_v61  ;;  %2431 = vmatpush.msrb.mxu3 %v9873_v61  ;;  %v9904_v45 = vld [vmem:[#allocation54 + $0x10] sm:$0xff]  ;;  %v9935_v61 = vld [vmem:[#allocation54 + $0x88] sm:$0xff] }
 0x367   : > { %2339 = vmatpush.msrb.mxu0 %v2318_v55  ;;  %2411 = vmatpush.msrb.mxu2 %v9879_v48  ;;  %11379 = vst [vmem:[#allocation175_spill] sm:$0xff] %v9894_v54  ;;  %v9907_v48 = vld [vmem:[#allocation54 + $0x8] sm:$0xff]  ;;  %v9972_v47 = vld [vmem:[#allocation60 + $0x1c8] sm:$0xff] }
 0x368   : > { %6959 = vmatmul.msk.f32.vlgmr.msrb.gmra.mxu0 %vm2320_vm0, %v9859_v62  ;;  %v9890_v62 = vld [vmem:[#allocation54 + $0x20] sm:$0xff]  ;;  %2432 = vmatpush.msrb.mxu3 %v9881_v36  ;;  %11381 = vst [vmem:[#allocation177_spill] sm:$0xff] %v9904_v45  ;;  %v9911_v36 = vld [vmem:[%s11363_s8 + $0x10] sm:$0xff] }
 0x369   : > { %2380 = vmatpush.msra.mxu0 %v2318_v55  ;;  %11378 = vst [vmem:[#allocation174_spill] sm:$0xff] %v9890_v62  ;;  %2412 = vmatpush.msrb.mxu2 %v9888_v60  ;;  %v9916_v60 = vld [vmem:[#allocation54 + $0xa0] sm:$0xff] }
 0x36a   : > { %2433 = vmatpush.msrb.mxu3 %v9890_v62  ;;  %11382 = vst [vmem:[#allocation178_spill] sm:$0xff] %v9907_v48  ;;  %v9918_v62 = vld [vmem:[#allocation54] sm:$0xff] }
 0x36b   : > { %2462 = vmatpush.msrb.mxu0 %v2318_v55  ;;  %v9898_v55 = vld [vmem:[#allocation54 + $0x18] sm:$0xff]  ;;  %11383 = vst [vmem:[#allocation179_spill] sm:$0xff] %v9911_v36  ;;  %2413 = vmatpush.msrb.mxu2 %v9916_v60 }
 0x36c   : > { %11380 = vst [vmem:[#allocation176_spill] sm:$0xff] %v9898_v55  ;;  %2434 = vmatpush.msrb.mxu3 %v9898_v55  ;;  %v9924_v55 = vld [vmem:[#allocation54 + $0x98] sm:$0xff] }
 0x36d   : > { %11384 = vst [vmem:[#allocation180_spill] sm:$0xff] %v9916_v60  ;;  %2414 = vmatpush.msrb.mxu2 %v9924_v55  ;;  %v9938_v60 = vld [vmem:[#allocation54 + $0x128] sm:$0xff] }
 0x36e   : > { %2435 = vmatpush.msrb.mxu3 %v9904_v45  ;;  %11385 = vst [vmem:[#allocation181_spill] sm:$0xff] %v9918_v62  ;;  %v9926_v45 = vld [vmem:[#allocation54 + $0x138] sm:$0xff] }
 0x36f   : > { %11387 = vst [vmem:[#allocation183_spill] sm:$0xff] %v9924_v55  ;;  %v9948_v55 = vld [vmem:[#allocation54 + $0x118] sm:$0xff] }
 0x370   : > { %6961 = vmatmul.msk.f32.vlgmr.msra.gmra.mxu0 %vm2320_vm0, %v9894_v54  ;;  %2436 = vmatpush.msrb.mxu3 %v9907_v48  ;;  %v9920_v54 = vld [vmem:[#allocation54 + $0x140] sm:$0xff]  ;;  %11388 = vst [vmem:[#allocation184_spill] sm:$0xff] %v9926_v45  ;;  %v9929_v48 = vld [vmem:[#allocation54 + $0x90] sm:$0xff] }
 0x371   : > { %11386 = vst [vmem:[#allocation182_spill] sm:$0xff] %v9920_v54  ;;  %2491 = vmatpush.msrb.mxu1 %v9920_v54  ;;  %2415 = vmatpush.msrb.mxu2 %v9929_v48  ;;  %v9945_v54 = vld [vmem:[#allocation54 + $0x120] sm:$0xff] }
 0x372   : > { %2437 = vmatpush.msrb.mxu3 %v9918_v62  ;;  %11389 = vst [vmem:[#allocation185_spill] sm:$0xff] %v9929_v48  ;;  %v9943_v62 = vld [vmem:[#allocation54 + $0x80] sm:$0xff]  ;;  %v9954_v48 = vld [vmem:[#allocation54 + $0x108] sm:$0xff] }
 0x373   : > { %2492 = vmatpush.msrb.mxu1 %v9926_v45  ;;  %11391 = vst [vmem:[#allocation187_spill] sm:$0xff] %v9935_v61  ;;  %2416 = vmatpush.msrb.mxu2 %v9935_v61  ;;  %v9951_v45 = vld [vmem:[#allocation54 + $0x110] sm:$0xff]  ;;  %v9958_v61 = vld [vmem:[#allocation54 + $0x100] sm:$0xff] }
 0x374   : > { %11392 = vst [vmem:[#allocation188_spill] sm:$0xff] %v9938_v60 }
 0x375   : > { %11393 = vst [vmem:[#allocation189_spill] sm:$0xff] %v9943_v62  ;;  %2417 = vmatpush.msrb.mxu2 %v9943_v62  ;;  %v9964_v62 = vld [vmem:[#allocation60 + $0x1f0] sm:$0xff] }
 0x376   : > { %11394 = vst [vmem:[#allocation190_spill] sm:$0xff] %v9945_v54  ;;  %2615 = vmatpush.msra.mxu3 %v9964_v62 }
 0x377   : > { %11395 = vst [vmem:[#allocation191_spill] sm:$0xff] %v9948_v55 }
 0x378   : > { %6963 = vmatmul.msk.f32.vlgmr.msrb.gmra.mxu0 %vm2320_vm0, %v9911_v36  ;;  %v9932_v36 = vld [vmem:[#allocation54 + $0x130] sm:$0xff]  ;;  %11396 = vst [vmem:[#allocation192_spill] sm:$0xff] %v9951_v45 }
 0x379   : > { %11390 = vst [vmem:[#allocation186_spill] sm:$0xff] %v9932_v36  ;;  %2493 = vmatpush.msrb.mxu1 %v9932_v36  ;;  %v9962_v36 = vld [vmem:[#allocation60 + $0x1e8] sm:$0xff] }
 0x37a   : > { %11397 = vst [vmem:[#allocation193_spill] sm:$0xff] %v9954_v48  ;;  %2595 = vmatpush.msra.mxu2 %v9962_v36 }
 0x37b   : > { %2494 = vmatpush.msrb.mxu1 %v9938_v60  ;;  %11398 = vst [vmem:[#allocation194_spill] sm:$0xff] %v9958_v61  ;;  %v9960_v60 = vld [vmem:[#allocation60 + $0x1e0] sm:$0xff] }
 0x37c   : > { %11399 = vst [vmem:[#allocation195_spill] sm:$0xff] %v9960_v60  ;;  %2575 = vmatpush.msra.mxu0 %v9960_v60  ;;  %v9984_v60 = vld [vmem:[#allocation60 + $0x1a8] sm:$0xff]  ;;  %2596 = vmatpush.msra.mxu2 %v9972_v47 }
 0x37d   : > { %2495 = vmatpush.msrb.mxu1 %v9945_v54  ;;  %11400 = vst [vmem:[#allocation196_spill] sm:$0xff] %v9962_v36  ;;  %v9968_v54 = vld [vmem:[#allocation60 + $0x1f8] sm:$0xff] }
 0x37e   : > { %11401 = vst [vmem:[#allocation197_spill] sm:$0xff] %v9964_v62  ;;  %v9990_v36 = vld [vmem:[#allocation60 + $0x1b8] sm:$0xff]  ;;  %v9992_v62 = vld [vmem:[#allocation60 + $0x180] sm:$0xff]  ;;  %2597 = vmatpush.msra.mxu2 %v9984_v60 }
 0x37f   : > { %2496 = vmatpush.msrb.mxu1 %v9948_v55  ;;  %11402 = vst [vmem:[#allocation198_spill] sm:$0xff] %v9968_v54  ;;  %v9970_v55 = vld [vmem:[#allocation60 + $0x1c0] sm:$0xff] }
 0x380   : > { %11403 = vst [vmem:[#allocation199_spill] sm:$0xff] %v9970_v55  ;;  %2576 = vmatpush.msra.mxu0 %v9970_v55  ;;  %v10002_v55 = vld [vmem:[#allocation60 + $0x198] sm:$0xff]  ;;  %2598 = vmatpush.msra.mxu2 %v9996_v49  ;;  %v10028_v49 = vld [vmem:[#allocation60 + $0x120] sm:$0xff] }
 0x381   : > { %2497 = vmatpush.msrb.mxu1 %v9951_v45  ;;  %11404 = vst [vmem:[#allocation200_spill] sm:$0xff] %v9972_v47  ;;  %v9978_v45 = vld [vmem:[#allocation60 + $0x1d8] sm:$0xff]  ;;  %v10004_v47 = vld [vmem:[#allocation60 + $0x160] sm:$0xff] }
 0x382   : > { %11406 = vst [vmem:[#allocation202_spill] sm:$0xff] %v9978_v45  ;;  %2577 = vmatpush.msra.mxu0 %v9980_v46 }
 0x383   : > { %2498 = vmatpush.msrb.mxu1 %v9954_v48  ;;  %v9976_v48 = vld [vmem:[#allocation60 + $0x1d0] sm:$0xff]  ;;  %11407 = vst [vmem:[#allocation203_spill] sm:$0xff] %v9980_v46  ;;  %v10014_v46 = vld [vmem:[#allocation60 + $0x178] sm:$0xff] }
 0x384   : > { %11405 = vst [vmem:[#allocation201_spill] sm:$0xff] %v9976_v48  ;;  %2616 = vmatpush.msra.mxu3 %v9976_v48  ;;  %2578 = vmatpush.msra.mxu0 %v9992_v62  ;;  %v10008_v48 = vld [vmem:[#allocation60 + $0x168] sm:$0xff] }
 0x385   : > { %2499 = vmatpush.msrb.mxu1 %v9958_v61  ;;  %11408 = vst [vmem:[#allocation204_spill] sm:$0xff] %v9984_v60  ;;  %v9986_v61 = vld [vmem:[#allocation60 + $0x1b0] sm:$0xff]  ;;  %v10016_v60 = vld [vmem:[#allocation60 + $0x140] sm:$0xff]  ;;  %2599 = vmatpush.msra.mxu2 %v10008_v48 }
 0x386   : > { %11409 = vst [vmem:[#allocation205_spill] sm:$0xff] %v9986_v61  ;;  %2617 = vmatpush.msra.mxu3 %v9986_v61  ;;  %2579 = vmatpush.msra.mxu0 %v10004_v47  ;;  %v10020_v61 = vld [vmem:[#allocation60 + $0x148] sm:$0xff] }
 0x387   : > { %2635 = vmatpush.msra.mxu1 %v9968_v54  ;;  %11410 = vst [vmem:[#allocation206_spill] sm:$0xff] %v9990_v36  ;;  %v9998_v54 = vld [vmem:[#allocation60 + $0x190] sm:$0xff]  ;;  %2600 = vmatpush.msra.mxu2 %v10020_v61 }
 0x388   : > { %11411 = vst [vmem:[#allocation207_spill] sm:$0xff] %v9992_v62  ;;  %2618 = vmatpush.msra.mxu3 %v9998_v54  ;;  %v10026_v62 = vld [vmem:[#allocation60 + $0x158] sm:$0xff]  ;;  %2580 = vmatpush.msra.mxu0 %v10016_v60 }
 0x389   : > { %2636 = vmatpush.msra.mxu1 %v9978_v45  ;;  %11413 = vst [vmem:[#allocation209_spill] sm:$0xff] %v9998_v54  ;;  %v10010_v45 = vld [vmem:[#allocation60 + $0x170] sm:$0xff]  ;;  %v10032_v54 = vld [vmem:[#allocation60 + $0x128] sm:$0xff] }
 0x38a   : > { %11414 = vst [vmem:[#allocation210_spill] sm:$0xff] %v10002_v55  ;;  %2619 = vmatpush.msra.mxu3 %v10010_v45  ;;  %2581 = vmatpush.msra.mxu0 %v10028_v49 }
 0x38b   : > { %11415 = vst [vmem:[#allocation211_spill] sm:$0xff] %v10004_v47  ;;  %2637 = vmatpush.msra.mxu1 %v9990_v36  ;;  %v10022_v36 = vld [vmem:[#allocation60 + $0x150] sm:$0xff]  ;;  %v10038_v47 = vld [vmem:[#allocation60 + $0x138] sm:$0xff]  ;;  %2601 = vmatpush.msra.mxu2 %v10032_v54 }
 0x38c   : > { %11416 = vst [vmem:[#allocation212_spill] sm:$0xff] %v10008_v48  ;;  %2620 = vmatpush.msra.mxu3 %v10022_v36 }
 0x38d   : > { %11417 = vst [vmem:[#allocation213_spill] sm:$0xff] %v10010_v45  ;;  %2638 = vmatpush.msra.mxu1 %v10002_v55  ;;  %v10034_v55 = vld [vmem:[#allocation60 + $0x130] sm:$0xff] }
 0x38e   : > { %11418 = vst [vmem:[#allocation214_spill] sm:$0xff] %v10014_v46  ;;  %2621 = vmatpush.msra.mxu3 %v10034_v55 }
 0x38f   : > { %11419 = vst [vmem:[#allocation215_spill] sm:$0xff] %v10016_v60  ;;  %2639 = vmatpush.msra.mxu1 %v10014_v46  ;;  %v10049_v46 = vld [vmem:[#allocation60 + $0x110] sm:$0xff] }
 0x390   : > { %11420 = vst [vmem:[#allocation216_spill] sm:$0xff] %v10020_v61  ;;  %v10045_v61 = vld [vmem:[#allocation60 + $0x100] sm:$0xff]  ;;  %2622 = vmatpush.msra.mxu3 %v10049_v46 }
 0x391   : > { %11421 = vst [vmem:[#allocation217_spill] sm:$0xff] %v10022_v36  ;;  %2640 = vmatpush.msra.mxu1 %v10026_v62  ;;  %v10047_v36 = vld [vmem:[#allocation60 + $0x108] sm:$0xff]  ;;  %2582 = vmatpush.msra.mxu0 %v10045_v61 }
 0x392   : > { %11422 = vst [vmem:[#allocation218_spill] sm:$0xff] %v10028_v49  ;;  %2602 = vmatpush.msra.mxu2 %v10047_v36  ;;  %v10055_v49 = vld [vmem:[#allocation60 + $0xe0] sm:$0xff] }
 0x393   : > { %11423 = vst [vmem:[#allocation219_spill] sm:$0xff] %v10032_v54  ;;  %2641 = vmatpush.msra.mxu1 %v10038_v47  ;;  %v10053_v54 = vld [vmem:[#allocation60 + $0x118] sm:$0xff]  ;;  %2583 = vmatpush.msra.mxu0 %v10055_v49 }
 0x394   : > { %11424 = vst [vmem:[#allocation220_spill] sm:$0xff] %v10034_v55  ;;  %v10057_v55 = vld [vmem:[#allocation60 + $0xe8] sm:$0xff] }
 0x395   : > { %11425 = vst [vmem:[#allocation221_spill] sm:$0xff] %v10038_v47  ;;  %2642 = vmatpush.msra.mxu1 %v10053_v54  ;;  %2603 = vmatpush.msra.mxu2 %v10057_v55  ;;  %v10073_v47 = vld [vmem:[#allocation60 + $0xd8] sm:$0xff] }
 0x396   : > { %11426 = vst [vmem:[#allocation222_spill] sm:$0xff] %v10045_v61  ;;  %v10071_v61 = vld [vmem:[#allocation60 + $0xd0] sm:$0xff] }
 0x397   : > { %11427 = vst [vmem:[#allocation223_spill] sm:$0xff] %v10047_v36  ;;  %v10069_v36 = vld [vmem:[#allocation60 + $0xc8] sm:$0xff] }
 0x398   : > { %11428 = vst [vmem:[#allocation224_spill] sm:$0xff] %v10049_v46  ;;  %v10077_v46 = vld [vmem:[#allocation60 + $0xa0] sm:$0xff]  ;;  %2604 = vmatpush.msra.mxu2 %v10069_v36 }
 0x399   : > { %11429 = vst [vmem:[#allocation225_spill] sm:$0xff] %v10053_v54  ;;  %v10079_v54 = vld [vmem:[#allocation60 + $0xa8] sm:$0xff] }
 0x39a   : > { %11430 = vst [vmem:[#allocation226_spill] sm:$0xff] %v10055_v49  ;;  %v10083_v49 = vld [vmem:[#allocation60 + $0xb0] sm:$0xff]  ;;  %2605 = vmatpush.msra.mxu2 %v10079_v54 }
 0x39b   : > { %11431 = vst [vmem:[#allocation227_spill] sm:$0xff] %v10057_v55  ;;  %v10085_v55 = vld [vmem:[#allocation60 + $0xb8] sm:$0xff] }
 0x39c   : > { %11434 = vst [vmem:[#allocation230_spill] sm:$0xff] %v10069_v36  ;;  %v10097_v36 = vld [vmem:[#allocation60 + $0x90] sm:$0xff] }
 0x39d   : > { %11435 = vst [vmem:[#allocation231_spill] sm:$0xff] %v10071_v61 }
 0x39e   : > { %11436 = vst [vmem:[#allocation232_spill] sm:$0xff] %v10077_v46 }
 0x39f   : > { %11437 = vst [vmem:[#allocation233_spill] sm:$0xff] %v10079_v54  ;;  %v10105_v54 = vld [vmem:[#allocation60 + $0x60] sm:$0xff] }
 0x3a0   : > { %11438 = vst [vmem:[#allocation234_spill] sm:$0xff] %v10083_v49 }
 0x3a1   : > { %11439 = vst [vmem:[#allocation235_spill] sm:$0xff] %v10085_v55 }
 0x3a2   : > { %11442 = vst [vmem:[#allocation238_spill] sm:$0xff] %v10097_v36 }
 0x3a3   : > { %11444 = vst [vmem:[#allocation240_spill] sm:$0xff] %v10105_v54 }
 0x3e5   : > { %v2341_v48 = vpop.f32.mrf.mxu0 }
 0x3e6   : > { %2438 = vmatmul.f32.vlgmr.msrb.gmra.mxu3 %v2341_v48  ;;  %v10063_v48 = vld [vmem:[#allocation60 + $0xf8] sm:$0xff] }
 0x3e7   : > { %2643 = vmatpush.msra.mxu1 %v10063_v48 }
 0x3e9   : > { %2644 = vmatpush.msra.mxu1 %v10073_v47 }
 0x3eb   : > { %2645 = vmatpush.msra.mxu1 %v10085_v55  ;;  %v10113_v55 = vld [vmem:[#allocation60 + $0x78] sm:$0xff] }
 0x3ec   : > { %11447 = vst [vmem:[#allocation243_spill] sm:$0xff] %v10113_v55 }
 0x3ed   : > { %v2382_v60 = vpop.f32.mrf.mxu0 }
 0x3ee   : > { %2418 = vmatmul.f32.vlgmr.msrb.gmra.mxu2 %v2382_v60  ;;  %v10061_v60 = vld [vmem:[#allocation60 + $0xf0] sm:$0xff] }
 0x3ef   : > { %11432 = vst [vmem:[#allocation228_spill] sm:$0xff] %v10061_v60  ;;  %2623 = vmatpush.msra.mxu3 %v10061_v60  ;;  %v10093_v60 = vld [vmem:[#allocation60 + $0x80] sm:$0xff] }
 0x3f0   : > { %11440 = vst [vmem:[#allocation236_spill] sm:$0xff] %v10093_v60 }
 0x3f1   : > { %2624 = vmatpush.msra.mxu3 %v10071_v61  ;;  %v10101_v61 = vld [vmem:[#allocation60 + $0x98] sm:$0xff] }
 0x3f2   : > { %11443 = vst [vmem:[#allocation239_spill] sm:$0xff] %v10101_v61  ;;  %2646 = vmatpush.msra.mxu1 %v10101_v61  ;;  %v10125_v61 = vld [vmem:[#allocation60 + $0x58] sm:$0xff] }
 0x3f3   : > { %2625 = vmatpush.msra.mxu3 %v10083_v49  ;;  %v10109_v49 = vld [vmem:[#allocation60 + $0x70] sm:$0xff]  ;;  %11451 = vst [vmem:[#allocation247_spill] sm:$0xff] %v10125_v61 }
 0x3f4   : > { %11446 = vst [vmem:[#allocation242_spill] sm:$0xff] %v10109_v49  ;;  %2647 = vmatpush.msra.mxu1 %v10113_v55  ;;  %v10137_v55 = vld [vmem:[#allocation60 + $0x38] sm:$0xff] }
 0x3f5   : > { %v2464_v45 = vpop.f32.mrf.mxu0  ;;  %2626 = vmatpush.msra.mxu3 %v10097_v36  ;;  %v10121_v36 = vld [vmem:[#allocation60 + $0x50] sm:$0xff] }
 0x3f6   : > { %2500 = vmatmul.f32.vlgmr.msrb.gmra.mxu1 %v2464_v45  ;;  %v10065_v45 = vld [vmem:[#allocation60 + $0xc0] sm:$0xff]  ;;  %11450 = vst [vmem:[#allocation246_spill] sm:$0xff] %v10121_v36 }
 0x3f7   : > { %11433 = vst [vmem:[#allocation229_spill] sm:$0xff] %v10065_v45  ;;  %2584 = vmatpush.msra.mxu0 %v10065_v45  ;;  %v10095_v45 = vld [vmem:[#allocation60 + $0x88] sm:$0xff]  ;;  %2627 = vmatpush.msra.mxu3 %v10109_v49  ;;  %v10133_v49 = vld [vmem:[#allocation60 + $0x30] sm:$0xff] }
 0x3f8   : > { %11441 = vst [vmem:[#allocation237_spill] sm:$0xff] %v10095_v45  ;;  %2606 = vmatpush.msra.mxu2 %v10095_v45  ;;  %v10117_v45 = vld [vmem:[#allocation60 + $0x40] sm:$0xff]  ;;  %2648 = vmatpush.msra.mxu1 %v10125_v61  ;;  %v10147_v61 = vld [vmem:[#allocation60 + $0x18] sm:$0xff] }
 0x3f9   : > { %2585 = vmatpush.msra.mxu0 %v10077_v46  ;;  %v10107_v46 = vld [vmem:[#allocation60 + $0x68] sm:$0xff]  ;;  %11448 = vst [vmem:[#allocation244_spill] sm:$0xff] %v10117_v45  ;;  %2628 = vmatpush.msra.mxu3 %v10121_v36  ;;  %v10145_v36 = vld [vmem:[#allocation60 + $0x10] sm:$0xff] }
 0x3fa   : > { %11445 = vst [vmem:[#allocation241_spill] sm:$0xff] %v10107_v46  ;;  %2607 = vmatpush.msra.mxu2 %v10107_v46  ;;  %v10129_v46 = vld [vmem:[#allocation60 + $0x20] sm:$0xff]  ;;  %2649 = vmatpush.msra.mxu1 %v10137_v55 }
 0x3fb   : > { %2586 = vmatpush.msra.mxu0 %v10093_v60  ;;  %v10119_v60 = vld [vmem:[#allocation60 + $0x48] sm:$0xff]  ;;  %2629 = vmatpush.msra.mxu3 %v10133_v49 }
 0x3fc   : > { %11449 = vst [vmem:[#allocation245_spill] sm:$0xff] %v10119_v60  ;;  %2608 = vmatpush.msra.mxu2 %v10119_v60  ;;  %v10141_v60 = vld [vmem:[#allocation60 + $0x8] sm:$0xff]  ;;  %2650 = vmatpush.msra.mxu1 %v10147_v61 }
 0x3fd   : > { %2587 = vmatpush.msra.mxu0 %v10105_v54  ;;  %v10131_v54 = vld [vmem:[#allocation60 + $0x28] sm:$0xff]  ;;  %2630 = vmatpush.msra.mxu3 %v10145_v36 }
 0x3fe   : > { %2609 = vmatpush.msra.mxu2 %v10131_v54  ;;  %2727 = vmatpush.msrb.mxu1 %v9559_v3 }
 0x3ff   : > { %2588 = vmatpush.msra.mxu0 %v10117_v45  ;;  %v10139_v45 = vld [vmem:[#allocation60] sm:$0xff]  ;;  %2707 = vmatpush.msrb.mxu3 %v9551_v0 }
 0x400   : > { %2610 = vmatpush.msra.mxu2 %v10141_v60  ;;  %2728 = vmatpush.msrb.mxu1 %v9569_v7  ;;  %v11452_v0 = vld [vmem:[#allocation126_spill] sm:$0xff] }
 0x401   : > { %2589 = vmatpush.msra.mxu0 %v10129_v46  ;;  %2708 = vmatpush.msrb.mxu3 %v9555_v2  ;;  %v11454_v2 = vld [vmem:[#allocation130_spill] sm:$0xff] }
 0x402   : > { %2687 = vmatpush.msrb.mxu2 %v9563_v5  ;;  %2729 = vmatpush.msrb.mxu1 %v9577_v10  ;;  %v11455_v5 = vld [vmem:[#allocation132_spill] sm:$0xff]  ;;  %v11458_v10 = vld [vmem:[#allocation133_spill] sm:$0xff] }
 0x403   : > { %2590 = vmatpush.msra.mxu0 %v10139_v45  ;;  %2709 = vmatpush.msrb.mxu3 %v9567_v6  ;;  %v11456_v6 = vld [vmem:[#allocation127_spill] sm:$0xff] }
 0x404   : > { %2688 = vmatpush.msrb.mxu2 %v9575_v9  ;;  %2730 = vmatpush.msrb.mxu1 %v9589_v14  ;;  %v11457_v9 = vld [vmem:[#allocation131_spill] sm:$0xff] }
 0x405   : > { %2667 = vmatpush.msrb.mxu0 %v9553_v1  ;;  %2710 = vmatpush.msrb.mxu3 %v9581_v11  ;;  %v11453_v1 = vld [vmem:[#allocation128_spill] sm:$0xff] }
 0x406   : > { %2689 = vmatpush.msrb.mxu2 %v9585_v13  ;;  %2731 = vmatpush.msrb.mxu1 %v9602_v18  ;;  %v11460_v13 = vld [vmem:[#allocation129_spill] sm:$0xff]  ;;  %v11462_v18 = vld [vmem:[#allocation143_spill] sm:$0xff] }
 0x407   : > { %2668 = vmatpush.msrb.mxu0 %v9561_v4  ;;  %2711 = vmatpush.msrb.mxu3 %v9595_v16 }
 0x408   : > { %2690 = vmatpush.msrb.mxu2 %v9591_v15  ;;  %2732 = vmatpush.msrb.mxu1 %v9614_v22  ;;  %v11461_v15 = vld [vmem:[#allocation134_spill] sm:$0xff]  ;;  %v11466_v22 = vld [vmem:[#allocation147_spill] sm:$0xff] }
 0x409   : > { %2669 = vmatpush.msrb.mxu0 %v9571_v8  ;;  %2712 = vmatpush.msrb.mxu3 %v9608_v20  ;;  %v10197_v8 = vld [vmem:[#allocation52] ss:$0 sm:$0xff]  ;;  %v11464_v20 = vld [vmem:[#allocation145_spill] sm:$0xff] }
 0x40a   : > { %2691 = vmatpush.msrb.mxu2 %v9604_v19  ;;  %2733 = vmatpush.msrb.mxu1 %v9631_v26  ;;  %v11463_v19 = vld [vmem:[#allocation144_spill] sm:$0xff]  ;;  %v11470_v26 = vld [vmem:[#allocation150_spill] sm:$0xff] }
 0x40b   : > { %2670 = vmatpush.msrb.mxu0 %v9583_v12  ;;  %2713 = vmatpush.msrb.mxu3 %v9620_v24  ;;  %v11459_v12 = vld [vmem:[#allocation138_spill] sm:$0xff]  ;;  %v11468_v24 = vld [vmem:[#allocation148_spill] sm:$0xff] }
 0x40c   : > { %2692 = vmatpush.msrb.mxu2 %v9616_v23  ;;  %2734 = vmatpush.msrb.mxu1 %v9643_v30  ;;  %v11467_v23 = vld [vmem:[#allocation154_spill] sm:$0xff]  ;;  %v11474_v30 = vld [vmem:[#allocation169_spill] sm:$0xff] }
 0x40d   : > { %2671 = vmatpush.msrb.mxu0 %v9597_v17  ;;  %2714 = vmatpush.msrb.mxu3 %v9637_v28  ;;  %v11472_v28 = vld [vmem:[#allocation157_spill] sm:$0xff] }
 0x40e   : > { %2693 = vmatpush.msrb.mxu2 %v9633_v27  ;;  %2735 = vmatpush.msrb.mxu1 %v9656_v34  ;;  %v11471_v27 = vld [vmem:[#allocation153_spill] sm:$0xff]  ;;  %v11478_v34 = vld [vmem:[#allocation182_spill] sm:$0xff] }
 0x40f   : > { %2672 = vmatpush.msrb.mxu0 %v9610_v21  ;;  %2715 = vmatpush.msrb.mxu3 %v9649_v32  ;;  %v11465_v21 = vld [vmem:[#allocation142_spill] sm:$0xff]  ;;  %v11476_v32 = vld [vmem:[#allocation172_spill] sm:$0xff] }
 0x410   : > { %2694 = vmatpush.msrb.mxu2 %v9645_v31  ;;  %2736 = vmatpush.msrb.mxu1 %v9670_v39  ;;  %v11475_v31 = vld [vmem:[#allocation161_spill] sm:$0xff]  ;;  %v11481_v39 = vld [vmem:[#allocation168_spill] sm:$0xff] }
 0x411   : > { %2673 = vmatpush.msrb.mxu0 %v9622_v25  ;;  %2716 = vmatpush.msrb.mxu3 %v11452_v0  ;;  %v11469_v25 = vld [vmem:[#allocation156_spill] sm:$0xff] }
 0x412   : > { %2695 = vmatpush.msrb.mxu2 %v9658_v35  ;;  %2737 = vmatpush.msrb.mxu1 %v11454_v2  ;;  %v11479_v35 = vld [vmem:[#allocation166_spill] sm:$0xff]  ;;  %v11496_v2 = vld [vmem:[#allocation140_spill] sm:$0xff] }
 0x413   : > { %2674 = vmatpush.msrb.mxu0 %v9639_v29  ;;  %2717 = vmatpush.msrb.mxu3 %v11456_v6  ;;  %v11473_v29 = vld [vmem:[#allocation159_spill] sm:$0xff] }
 0x414   : > { %2696 = vmatpush.msrb.mxu2 %v9672_v40  ;;  %2738 = vmatpush.msrb.mxu1 %v11458_v10  ;;  %v11482_v40 = vld [vmem:[#allocation186_spill] sm:$0xff]  ;;  %v11500_v10 = vld [vmem:[#allocation137_spill] sm:$0xff] }
 0x415   : > { %2675 = vmatpush.msrb.mxu0 %v9651_v33  ;;  %2718 = vmatpush.msrb.mxu3 %v11460_v13  ;;  %v11477_v33 = vld [vmem:[#allocation163_spill] sm:$0xff]  ;;  %v11502_v13 = vperm.slane %v11500_v10, 3 }
 0x416   : > { %2697 = vmatpush.msrb.mxu2 %v11455_v5  ;;  %2739 = vmatpush.msrb.mxu1 %v9712_v53  ;;  %v11488_v53 = vld [vmem:[#allocation191_spill] sm:$0xff] }
 0x417   : > { %2676 = vmatpush.msrb.mxu0 %v9664_v37  ;;  %2719 = vmatpush.msrb.mxu3 %v11461_v15  ;;  %v11480_v37 = vld [vmem:[#allocation184_spill] sm:$0xff] }
 0x418   : > { %2698 = vmatpush.msrb.mxu2 %v11459_v12  ;;  %2740 = vmatpush.msrb.mxu1 %v9736_v56  ;;  %v11489_v56 = vld [vmem:[#allocation177_spill] sm:$0xff] }
 0x419   : > { %2677 = vmatpush.msrb.mxu0 %v11453_v1  ;;  %2720 = vmatpush.msrb.mxu3 %v9719_v57  ;;  %v11490_v57 = vld [vmem:[#allocation192_spill] sm:$0xff] }
 0x41a   : > { %2699 = vmatpush.msrb.mxu2 %v9723_v59  ;;  %2741 = vmatpush.msrb.mxu1 %v9762_v63  ;;  %v11492_v59 = vld [vmem:[#allocation193_spill] sm:$0xff] }
 0x41b   : > { %2678 = vmatpush.msrb.mxu0 %v11457_v9  ;;  %2721 = vmatpush.msrb.mxu3 %v9751_v42  ;;  %v11484_v42 = vld [vmem:[#allocation188_spill] sm:$0xff]  ;;  %v11493_v63 = vld [vmem:[#allocation181_spill] sm:$0xff] }
 0x41c   : > { %2700 = vmatpush.msrb.mxu2 %v9755_v41  ;;  %2742 = vmatpush.msrb.mxu1 %v11463_v19  ;;  %v11483_v41 = vld [vmem:[#allocation171_spill] sm:$0xff] }
 0x41d   : > { %2679 = vmatpush.msrb.mxu0 %v9708_v51  ;;  %2722 = vmatpush.msrb.mxu3 %v11465_v21  ;;  %v11487_v51 = vld [vmem:[#allocation176_spill] sm:$0xff]  ;;  %v11504_v21 = vld [vmem:[#allocation135_spill] sm:$0xff] }
 0x41e   : > { %2701 = vmatpush.msrb.mxu2 %v9779_v38  ;;  %v11494_v38 = vld [vmem:[#allocation194_spill] sm:$0xff] }
 0x41f   : > { %2680 = vmatpush.msrb.mxu0 %v9721_v58  ;;  %v11491_v58 = vld [vmem:[#allocation178_spill] sm:$0xff] }
 0x420   : > { %2702 = vmatpush.msrb.mxu2 %v11464_v20 }
 0x421   : > { %2681 = vmatpush.msrb.mxu0 %v9753_v44  ;;  %v11485_v44 = vld [vmem:[#allocation174_spill] sm:$0xff] }
 0x423   : > { %2682 = vmatpush.msrb.mxu0 %v11462_v18 }
 0x469   : > { %v2439_v3 = vpop.f32.mrf.mxu3 }
 0x471   : > { %v2419_v4 = vpop.f32.mrf.mxu2 }
 0x472   : > { %v2440_v7 = vadd.f32 %v2439_v3, %v2419_v4  ;;  %v11497_v4 = vld [vmem:[#allocation136_spill] sm:$0xff] }
 0x473   : > { %v2501_v11 = vpop.f32.mrf.mxu1  ;;  %v11498_v5 = vperm.slane %v11497_v4, 0 }
 0x474   : > { %v2504_v14 = vadd.f32 %v2501_v11, %v2440_v7  ;;  %v11499_v7 = vperm.slane %v11497_v4, 3  ;;  %v11501_v11 = vperm.slane %v11500_v10, 0 }
 0x476   : > { %v2509_v16 = vadd.f32 %v10197_v8, %v2504_v14 }
 0x478   : > { %v2510_v17 = vmax.f32 %v2509_v16, 0.0 }
 0x47a   : > { %2591 = vmatmul.f32.vlgmr.msra.gmra.mxu0 %v2510_v17  ;;  %2611 = vmatmul.f32.vlgmr.msra.gmra.mxu2 %v2510_v17 }
 0x47b   : > { %2631 = vmatmul.f32.vlgmr.msra.gmra.mxu3 %v2510_v17  ;;  %2651 = vmatmul.f32.vlgmr.msra.gmra.mxu1 %v2510_v17  ;;  %v11503_v17 = vld [vmem:[#allocation141_spill] sm:$0xff] }
 0x47c   : > { %2808 = vmatpush.msra.mxu2 %v11466_v22  ;;  %2848 = vmatpush.msra.mxu1 %v11467_v23  ;;  %v11505_v23 = vperm.slane %v11497_v4, 1 }
 0x47e   : > { %2809 = vmatpush.msra.mxu2 %v11468_v24  ;;  %2849 = vmatpush.msra.mxu1 %v11469_v25  ;;  %v11506_v25 = vperm.slane %v11497_v4, 2 }
 0x480   : > { %2810 = vmatpush.msra.mxu2 %v11470_v26  ;;  %2850 = vmatpush.msra.mxu1 %v9831_v43  ;;  %v11495_v43 = vld [vmem:[#allocation139_spill] sm:$0xff] }
 0x482   : > { %2811 = vmatpush.msra.mxu2 %v11471_v27  ;;  %2851 = vmatpush.msra.mxu1 %v9840_v52  ;;  %v11507_v27 = vperm.slane %v11500_v10, 1 }
 0x484   : > { %2812 = vmatpush.msra.mxu2 %v11472_v28  ;;  %2852 = vmatpush.msra.mxu1 %v9849_v50  ;;  %v11486_v50 = vld [vmem:[#allocation190_spill] sm:$0xff] }
 0x486   : > { %2813 = vmatpush.msra.mxu2 %v11473_v29  ;;  %2853 = vmatpush.msra.mxu1 %v11474_v30  ;;  %v11508_v29 = vld [vmem:[#allocation198_spill] sm:$0xff]  ;;  %v11509_v30 = vperm.slane %v11500_v10, 2 }
 0x488   : > { %2814 = vmatpush.msra.mxu2 %v11475_v31  ;;  %2854 = vmatpush.msra.mxu1 %v11476_v32 }
 0x48a   : > { %2815 = vmatpush.msra.mxu2 %v11477_v33  ;;  %2855 = vmatpush.msra.mxu1 %v11478_v34  ;;  %v11510_v33 = vld [vmem:[#allocation202_spill] sm:$0xff] }
 0x48c   : > { %2816 = vmatpush.msra.mxu2 %v11479_v35  ;;  %2856 = vmatpush.msra.mxu1 %v11480_v37  ;;  %v11511_v35 = vld [vmem:[#allocation206_spill] sm:$0xff]  ;;  %v11512_v37 = vld [vmem:[#allocation197_spill] sm:$0xff] }
 0x48e   : > { %2817 = vmatpush.msra.mxu2 %v11481_v39  ;;  %2857 = vmatpush.msra.mxu1 %v11482_v40  ;;  %v11513_v39 = vld [vmem:[#allocation210_spill] sm:$0xff]  ;;  %v11514_v40 = vld [vmem:[#allocation201_spill] sm:$0xff] }
 0x490   : > { %2818 = vmatpush.msra.mxu2 %v11483_v41  ;;  %2858 = vmatpush.msra.mxu1 %v11484_v42  ;;  %v11515_v41 = vld [vmem:[#allocation214_spill] sm:$0xff]  ;;  %v11516_v42 = vld [vmem:[#allocation205_spill] sm:$0xff] }
 0x492   : > { %2819 = vmatpush.msra.mxu2 %v11485_v44  ;;  %2859 = vmatpush.msra.mxu1 %v11486_v50  ;;  %v11517_v44 = vld [vmem:[#allocation209_spill] sm:$0xff] }
 0x493   : > { %v11518_v50 = vld [vmem:[#allocation221_spill] sm:$0xff] }
 0x494   : > { %2820 = vmatpush.msra.mxu2 %v11487_v51  ;;  %2860 = vmatpush.msra.mxu1 %v11488_v53  ;;  %v11519_v51 = vld [vmem:[#allocation213_spill] sm:$0xff] }
 0x495   : > { %v11520_v53 = vld [vmem:[#allocation225_spill] sm:$0xff] }
 0x496   : > { %2821 = vmatpush.msra.mxu2 %v11489_v56  ;;  %2861 = vmatpush.msra.mxu1 %v11490_v57  ;;  %v11521_v56 = vld [vmem:[#allocation217_spill] sm:$0xff]  ;;  %v11522_v57 = vld [vmem:[#allocation220_spill] sm:$0xff] }
 0x498   : > { %2822 = vmatpush.msra.mxu2 %v11491_v58  ;;  %2862 = vmatpush.msra.mxu1 %v11492_v59  ;;  %v11523_v58 = vld [vmem:[#allocation224_spill] sm:$0xff]  ;;  %v11524_v59 = vld [vmem:[#allocation235_spill] sm:$0xff] }
 0x49a   : > { %2823 = vmatpush.msra.mxu2 %v11493_v63  ;;  %2863 = vmatpush.msra.mxu1 %v11494_v38  ;;  %v11526_v63 = vld [vmem:[#allocation239_spill] sm:$0xff] }
 0x49b   : > { %v11527_v38 = vld [vmem:[#allocation231_spill] sm:$0xff] }
 0x4f7   : > { %v2592_v52 = vpop.f32.mrf.mxu0 }
 0x4f8   : > { %v10253_v0 = vadd.f32 %v2592_v52, %v11495_v43  ;;  %v2652_v1 = vpop.f32.mrf.mxu1  ;;  %v11528_v52 = vld [vmem:[#allocation243_spill] sm:$0xff]  ;;  %v11529_v43 = vld [vmem:[#allocation234_spill] sm:$0xff] }
 0x4f9   : > { %v10256_v3 = vadd.f32 %v2652_v1, %v11496_v2  ;;  %v11530_v1 = vld [vmem:[#allocation247_spill] sm:$0xff]  ;;  %v11533_v2 = vld [vmem:[#allocation246_spill] sm:$0xff] }
 0x4fa   : > { %v2655_v6 = vmul.f32 %v10253_v0, %v11498_v5  ;;  %v11534_v5 = vld [vmem:[#allocation146_spill] sm:$0xff] }
 0x4fb   : > { %v2658_v9 = vmul.f32 %v10256_v3, %v11499_v7 }
 0x4fc   : > { %v2659_v12 = vadd.f32 %v2655_v6, %v11501_v11 }
 0x4fd   : > { %v2662_v14 = vadd.f32 %v2658_v9, %v11502_v13  ;;  %v2612_v15 = vpop.f32.mrf.mxu2 }
 0x4fe   : > { %v2663_v16 = vmax.f32 %v2659_v12, 0.0  ;;  %v10269_v18 = vadd.f32 %v2612_v15, %v11503_v17  ;;  %v2632_v19 = vpop.f32.mrf.mxu3  ;;  %v11539_v15 = vld [vmem:[#allocation199_spill] sm:$0xff] }
 0x4ff   : > { %v2666_v20 = vmax.f32 %v2662_v14, 0.0  ;;  %v10272_v22 = vadd.f32 %v2632_v19, %v11504_v21  ;;  %v11535_v14 = vld [vmem:[#allocation164_spill] sm:$0xff]  ;;  %v11541_v17 = vld [vmem:[#allocation203_spill] sm:$0xff] }
 0x500   : > { %v2656_v24 = vmul.f32 %v10269_v18, %v11505_v23  ;;  %2683 = vmatmul.f32.vlgmr.msrb.gmra.mxu0 %v2663_v16  ;;  %v11540_v16 = vld [vmem:[#allocation151_spill] sm:$0xff]  ;;  %v11542_v19 = vld [vmem:[#allocation152_spill] sm:$0xff] }
 0x501   : > { %v2657_v26 = vmul.f32 %v10272_v22, %v11506_v25  ;;  %2743 = vmatmul.f32.vlgmr.msrb.gmra.mxu1 %v2666_v20  ;;  %v11543_v20 = vld [vmem:[#allocation207_spill] sm:$0xff]  ;;  %v11547_v25 = vld [vmem:[#allocation158_spill] sm:$0xff] }
 0x502   : > { %v2660_v28 = vadd.f32 %v2656_v24, %v11507_v27  ;;  %2931 = vmatpush.msrb.mxu1 %v11508_v29  ;;  %v11544_v21 = vld [vmem:[#allocation175_spill] sm:$0xff]  ;;  %v11549_v27 = vld [vmem:[#allocation160_spill] sm:$0xff]  ;;  %v11551_v29 = vld [vmem:[#allocation162_spill] sm:$0xff] }
 0x503   : > { %v2661_v31 = vadd.f32 %v2657_v26, %v11509_v30  ;;  %v11545_v23 = vld [vmem:[#allocation155_spill] sm:$0xff]  ;;  %v11552_v30 = vld [vmem:[#allocation222_spill] sm:$0xff] }
 0x504   : > { %v2664_v32 = vmax.f32 %v2660_v28, 0.0  ;;  %2932 = vmatpush.msrb.mxu1 %v11510_v33  ;;  %v11546_v24 = vld [vmem:[#allocation211_spill] sm:$0xff]  ;;  %v11550_v28 = vld [vmem:[#allocation218_spill] sm:$0xff] }
 0x505   : > { %v2665_v34 = vmax.f32 %v2661_v31, 0.0  ;;  %v11548_v26 = vld [vmem:[#allocation215_spill] sm:$0xff]  ;;  %v11553_v31 = vld [vmem:[#allocation165_spill] sm:$0xff] }
 0x506   : > { %2703 = vmatmul.f32.vlgmr.msrb.gmra.mxu2 %v2664_v32  ;;  %2933 = vmatpush.msrb.mxu1 %v11511_v35  ;;  %v11554_v32 = vld [vmem:[#allocation226_spill] sm:$0xff]  ;;  %v11555_v33 = vld [vmem:[#allocation167_spill] sm:$0xff] }
 0x507   : > { %2723 = vmatmul.f32.vlgmr.msrb.gmra.mxu3 %v2665_v34  ;;  %2911 = vmatpush.msrb.mxu2 %v11512_v37  ;;  %v11556_v34 = vld [vmem:[#allocation229_spill] sm:$0xff]  ;;  %v11557_v35 = vld [vmem:[#allocation170_spill] sm:$0xff]  ;;  %v11558_v37 = vld [vmem:[#allocation232_spill] sm:$0xff] }
 0x508   : > { %2934 = vmatpush.msrb.mxu1 %v11513_v39  ;;  %v11559_v39 = vld [vmem:[#allocation173_spill] sm:$0xff] }
 0x509   : > { %2912 = vmatpush.msrb.mxu2 %v11514_v40  ;;  %v11560_v40 = vld [vmem:[#allocation236_spill] sm:$0xff] }
 0x50a   : > { %2935 = vmatpush.msrb.mxu1 %v11515_v41  ;;  %v11561_v41 = vld [vmem:[#allocation180_spill] sm:$0xff] }
 0x50b   : > { %2913 = vmatpush.msrb.mxu2 %v11516_v42  ;;  %v11562_v42 = vld [vmem:[#allocation240_spill] sm:$0xff] }
 0x50c   : > { %2936 = vmatpush.msrb.mxu1 %v10026_v62  ;;  %v11525_v62 = vld [vmem:[#allocation228_spill] sm:$0xff] }
 0x50d   : > { %2914 = vmatpush.msrb.mxu2 %v11517_v44  ;;  %v11563_v44 = vld [vmem:[#allocation183_spill] sm:$0xff] }
 0x50e   : > { %2937 = vmatpush.msrb.mxu1 %v11518_v50  ;;  %v11564_v50 = vld [vmem:[#allocation244_spill] sm:$0xff] }
 0x50f   : > { %2915 = vmatpush.msrb.mxu2 %v11519_v51  ;;  %v11565_v51 = vld [vmem:[#allocation185_spill] sm:$0xff] }
 0x510   : > { %2938 = vmatpush.msrb.mxu1 %v11520_v53  ;;  %v11566_v53 = vld [vmem:[#allocation187_spill] sm:$0xff] }
 0x511   : > { %2916 = vmatpush.msrb.mxu2 %v11521_v56  ;;  %v11567_v56 = vld [vmem:[#allocation189_spill] sm:$0xff] }
 0x512   : > { %2939 = vmatpush.msrb.mxu1 %v10063_v48  ;;  %v11531_v48 = vld [vmem:[#allocation238_spill] sm:$0xff] }
 0x513   : > { %2917 = vmatpush.msrb.mxu2 %v11522_v57  ;;  %v11568_v57 = vld [vmem:[#allocation196_spill] sm:$0xff] }
 0x514   : > { %2940 = vmatpush.msrb.mxu1 %v10073_v47  ;;  %v11532_v47 = vld [vmem:[#allocation242_spill] sm:$0xff] }
 0x515   : > { %2918 = vmatpush.msrb.mxu2 %v11523_v58  ;;  %v11569_v58 = vld [vmem:[#allocation200_spill] sm:$0xff] }
 0x516   : > { %2941 = vmatpush.msrb.mxu1 %v11524_v59  ;;  %v11571_v59 = vld [vmem:[#allocation204_spill] sm:$0xff] }
 0x517   : > { %2919 = vmatpush.msrb.mxu2 %v11525_v62  ;;  %v11572_v62 = vld [vmem:[#allocation208_spill] sm:$0xff] }
 0x518   : > { %2942 = vmatpush.msrb.mxu1 %v11526_v63  ;;  %v11573_v63 = vld [vmem:[#allocation212_spill] sm:$0xff] }
 0x519   : > { %2920 = vmatpush.msrb.mxu2 %v11527_v38  ;;  %v11575_v38 = vld [vmem:[#allocation219_spill] sm:$0xff] }
 0x51a   : > { %2943 = vmatpush.msrb.mxu1 %v11528_v52  ;;  %v11577_v52 = vld [vmem:[#allocation227_spill] sm:$0xff] }
 0x51b   : > { %2921 = vmatpush.msrb.mxu2 %v11529_v43  ;;  %v11578_v43 = vld [vmem:[#allocation230_spill] sm:$0xff] }
 0x51c   : > { %2944 = vmatpush.msrb.mxu1 %v11530_v1  ;;  %v11579_v1 = vld [vmem:[#allocation233_spill] sm:$0xff] }
 0x51d   : > { %2922 = vmatpush.msrb.mxu2 %v11531_v48  ;;  %v11580_v48 = vld [vmem:[#allocation237_spill] sm:$0xff] }
 0x51e   : > { %2945 = vmatpush.msrb.mxu1 %v10137_v55 }
 0x51f   : > { %2923 = vmatpush.msrb.mxu2 %v11532_v47  ;;  %v11581_v47 = vld [vmem:[#allocation241_spill] sm:$0xff] }
 0x520   : > { %2946 = vmatpush.msrb.mxu1 %v10147_v61  ;;  %v11536_v61 = vld [vmem:[#allocation179_spill] sm:$0xff] }
 0x521   : > { %2924 = vmatpush.msrb.mxu2 %v11533_v2  ;;  %v11582_v2 = vld [vmem:[#allocation245_spill] sm:$0xff] }
 0x523   : > { %2925 = vmatpush.msrb.mxu2 %v10133_v49  ;;  %v11537_v49 = vld [vmem:[#allocation195_spill] sm:$0xff] }
 0x525   : > { %2926 = vmatpush.msrb.mxu2 %v10145_v36  ;;  %v11538_v36 = vld [vmem:[#allocation149_spill] sm:$0xff] }
 0x57d   : > { %v2684_v4 = vpop.f32.mrf.mxu0 }
 0x57e   : > { %v2685_v6 = vadd.f32 %v11534_v5, %v2684_v4  ;;  %v2744_v12 = vpop.f32.mrf.mxu1  ;;  %v2998_v4 = vld [vmem:[%s11570_s15 + $0x78] sm:$0xff]  ;;  %v2997_v5 = vld [vmem:[%s11570_s15 + $0x70] sm:$0xff] }
 0x589   : > { %v2704_v7 = vpop.f32.mrf.mxu2 }
 0x58a   : > { %v2705_v9 = vadd.f32 %v2704_v7, %v2685_v6  ;;  %v2724_v10 = vpop.f32.mrf.mxu3  ;;  %v2996_v6 = vld [vmem:[%s11570_s15 + $0x68] sm:$0xff]  ;;  %v2995_v7 = vld [vmem:[%s11570_s15 + $0x60] sm:$0xff] }
 0x58c   : > { %v2725_v11 = vadd.f32 %v2724_v10, %v2705_v9  ;;  %v2994_v9 = vld [vmem:[%s11570_s15 + $0x58] sm:$0xff]  ;;  %v2993_v10 = vld [vmem:[%s11570_s15 + $0x50] sm:$0xff] }
 0x58e   : > { %v2745_v13 = vadd.f32 %v2744_v12, %v2725_v11  ;;  %v3028_v12 = vld [vmem:[%s11570_s15 + $0x168] sm:$0xff] }
 0x590   : > { %v2747_v55 = vmax.f32 %v2745_v13, 0.0  ;;  %v3027_v13 = vld [vmem:[%s11570_s15 + $0x160] sm:$0xff] }
 0x592   : > { %2763 = vmatpush.msra.mxu0 %v2747_v55  ;;  %2843 = vmatpush.msra.mxu3 %v2747_v55 }
 0x593   : > { %6964 = vmatmul.msk.f32.vlgmr.msra.gmra.mxu0 %vm2320_vm0, %v11535_v14  ;;  %6966 = vmatmul.msk.f32.vlgmr.msra.gmra.mxu3 %vm2320_vm0, %v11536_v61  ;;  %v3014_v14 = vld [vmem:[%s11570_s15 + $0xf8] sm:$0xff] }
 0x594   : > { %2783 = vmatpush.msrb.mxu0 %v2747_v55  ;;  %2871 = vmatpush.msrb.mxu3 %v11537_v49  ;;  %v3013_v49 = vld [vmem:[%s11570_s15 + $0xf0] sm:$0xff] }
 0x596   : > { %2788 = vmatpush.msra.mxu0 %v11538_v36  ;;  %2872 = vmatpush.msrb.mxu3 %v11539_v15  ;;  %v2992_v36 = vld [vmem:[%s11570_s15 + $0x48] sm:$0xff] }
 0x597   : > { %v3012_v15 = vld [vmem:[%s11570_s15 + $0xe8] sm:$0xff] }
 0x598   : > { %2789 = vmatpush.msra.mxu0 %v11540_v16  ;;  %2873 = vmatpush.msrb.mxu3 %v11541_v17  ;;  %v3026_v16 = vld [vmem:[%s11570_s15 + $0x158] sm:$0xff] }
 0x599   : > { %v3046_v17 = vld [vmem:[%s11570_s15 + $0x1f8] sm:$0xff] }
 0x59a   : > { %2790 = vmatpush.msra.mxu0 %v11542_v19  ;;  %2874 = vmatpush.msrb.mxu3 %v11543_v20  ;;  %v2991_v19 = vld [vmem:[%s11570_s15 + $0x40] sm:$0xff] }
 0x59b   : > { %6965 = vmatmul.msk.f32.vlgmr.msrb.gmra.mxu0 %vm2320_vm0, %v11544_v21  ;;  %v3011_v20 = vld [vmem:[%s11570_s15 + $0xe0] sm:$0xff]  ;;  %v3025_v21 = vld [vmem:[%s11570_s15 + $0x150] sm:$0xff] }
 0x59c   : > { %2791 = vmatpush.msra.mxu0 %v11545_v23  ;;  %2875 = vmatpush.msrb.mxu3 %v11546_v24  ;;  %v3045_v23 = vld [vmem:[%s11570_s15 + $0x1f0] sm:$0xff]  ;;  %v2990_v24 = vld [vmem:[%s11570_s15 + $0x38] sm:$0xff] }
 0x59e   : > { %2792 = vmatpush.msra.mxu0 %v11547_v25  ;;  %2876 = vmatpush.msrb.mxu3 %v11548_v26  ;;  %v3010_v25 = vld [vmem:[%s11570_s15 + $0xd8] sm:$0xff]  ;;  %v3024_v26 = vld [vmem:[%s11570_s15 + $0x148] sm:$0xff] }
 0x5a0   : > { %2793 = vmatpush.msra.mxu0 %v11549_v27  ;;  %2877 = vmatpush.msrb.mxu3 %v11550_v28  ;;  %v3044_v27 = vld [vmem:[%s11570_s15 + $0x1e8] sm:$0xff]  ;;  %v2989_v28 = vld [vmem:[%s11570_s15 + $0x30] sm:$0xff] }
 0x5a2   : > { %2794 = vmatpush.msra.mxu0 %v11551_v29  ;;  %2878 = vmatpush.msrb.mxu3 %v11552_v30  ;;  %v3009_v29 = vld [vmem:[%s11570_s15 + $0xd0] sm:$0xff]  ;;  %v3023_v30 = vld [vmem:[%s11570_s15 + $0x140] sm:$0xff] }
 0x5a4   : > { %2795 = vmatpush.msra.mxu0 %v11553_v31  ;;  %2879 = vmatpush.msrb.mxu3 %v11554_v32  ;;  %v3043_v31 = vld [vmem:[%s11570_s15 + $0x1e0] sm:$0xff]  ;;  %v2988_v32 = vld [vmem:[%s11570_s15 + $0x28] sm:$0xff] }
 0x5a6   : > { %2796 = vmatpush.msra.mxu0 %v11555_v33  ;;  %2880 = vmatpush.msrb.mxu3 %v11556_v34  ;;  %v3008_v33 = vld [vmem:[%s11570_s15 + $0xc8] sm:$0xff]  ;;  %v3022_v34 = vld [vmem:[%s11570_s15 + $0x138] sm:$0xff] }
 0x5a8   : > { %2797 = vmatpush.msra.mxu0 %v11557_v35  ;;  %2881 = vmatpush.msrb.mxu3 %v11558_v37  ;;  %v3042_v35 = vld [vmem:[%s11570_s15 + $0x1d8] sm:$0xff]  ;;  %v2987_v37 = vld [vmem:[%s11570_s15 + $0x20] sm:$0xff] }
 0x5aa   : > { %2798 = vmatpush.msra.mxu0 %v11559_v39  ;;  %2882 = vmatpush.msrb.mxu3 %v11560_v40  ;;  %v3007_v39 = vld [vmem:[%s11570_s15 + $0xc0] sm:$0xff]  ;;  %v3021_v40 = vld [vmem:[%s11570_s15 + $0x130] sm:$0xff] }
 0x5ac   : > { %2799 = vmatpush.msra.mxu0 %v11561_v41  ;;  %2883 = vmatpush.msrb.mxu3 %v11562_v42  ;;  %v3041_v41 = vld [vmem:[%s11570_s15 + $0x1d0] sm:$0xff]  ;;  %v2986_v42 = vld [vmem:[%s11570_s15 + $0x18] sm:$0xff] }
 0x5ae   : > { %2800 = vmatpush.msra.mxu0 %v11563_v44  ;;  %2884 = vmatpush.msrb.mxu3 %v11564_v50  ;;  %v3006_v44 = vld [vmem:[%s11570_s15 + $0xb8] sm:$0xff]  ;;  %v3020_v50 = vld [vmem:[%s11570_s15 + $0x128] sm:$0xff] }
 0x5b0   : > { %2801 = vmatpush.msra.mxu0 %v11565_v51  ;;  %2885 = vmatpush.msrb.mxu3 %v10129_v46  ;;  %v11574_v46 = vld [vmem:[#allocation216_spill] sm:$0xff]  ;;  %v3040_v51 = vld [vmem:[%s11570_s15 + $0x1c8] sm:$0xff] }
 0x5b2   : > { %2802 = vmatpush.msra.mxu0 %v11566_v53  ;;  %2886 = vmatpush.msrb.mxu3 %v10139_v45  ;;  %v11576_v45 = vld [vmem:[#allocation223_spill] sm:$0xff] }
 0x5b3   : > { %v2985_v53 = vld [vmem:[%s11570_s15 + $0x10] sm:$0xff] }
 0x5b4   : > { %2803 = vmatpush.msra.mxu0 %v11567_v56  ;;  %3051 = vmatpush.msra.mxu3 %v2998_v4  ;;  %v3005_v56 = vld [vmem:[%s11570_s15 + $0xb0] sm:$0xff]  ;;  %v3015_v4 = vld [vmem:[%s11570_s15 + $0x100] sm:$0xff] }
 0x5b6   : > { %2891 = vmatpush.msrb.mxu0 %v11568_v57  ;;  %3052 = vmatpush.msra.mxu3 %v2997_v5  ;;  %v3019_v57 = vld [vmem:[%s11570_s15 + $0x120] sm:$0xff] }
 0x5b7   : > { %v3035_v5 = vld [vmem:[%s11570_s15 + $0x1a0] sm:$0xff] }
 0x5b8   : > { %2892 = vmatpush.msrb.mxu0 %v11569_v58  ;;  %3053 = vmatpush.msra.mxu3 %v2996_v6  ;;  %v3039_v58 = vld [vmem:[%s11570_s15 + $0x1c0] sm:$0xff]  ;;  %v3000_v6 = vld [vmem:[%s11570_s15 + $0x88] sm:$0xff] }
 0x5ba   : > { %2893 = vmatpush.msrb.mxu0 %v11571_v59  ;;  %3054 = vmatpush.msra.mxu3 %v2995_v7  ;;  %v2984_v59 = vld [vmem:[%s11570_s15 + $0x8] sm:$0xff]  ;;  %v3034_v7 = vld [vmem:[%s11570_s15 + $0x198] sm:$0xff] }
 0x5bc   : > { %2894 = vmatpush.msrb.mxu0 %v11572_v62  ;;  %3055 = vmatpush.msra.mxu3 %v2994_v9  ;;  %v3004_v62 = vld [vmem:[%s11570_s15 + $0xa8] sm:$0xff]  ;;  %v2999_v9 = vld [vmem:[%s11570_s15 + $0x80] sm:$0xff] }
 0x5be   : > { %2895 = vmatpush.msrb.mxu0 %v11573_v63  ;;  %3056 = vmatpush.msra.mxu3 %v2993_v10  ;;  %v3018_v63 = vld [vmem:[%s11570_s15 + $0x118] sm:$0xff]  ;;  %v3033_v10 = vld [vmem:[%s11570_s15 + $0x190] sm:$0xff] }
 0x5c0   : > { %2896 = vmatpush.msrb.mxu0 %v11574_v46  ;;  %3057 = vmatpush.msra.mxu3 %v2992_v36  ;;  %v3038_v46 = vld [vmem:[%s11570_s15 + $0x1b8] sm:$0xff]  ;;  %v2965_v36 = vld [vmem:[#allocation7] sm:$0xf] }
 0x5c2   : > { %2897 = vmatpush.msrb.mxu0 %v11575_v38  ;;  %3058 = vmatpush.msra.mxu3 %v2991_v19  ;;  %v2983_v38 = vld [vmem:[%s11570_s15] sm:$0xff] }
 0x5c3   : > { %v10437_v19 = vld [vmem:[%s9677_s13] sm:$0xff] }
 0x5c4   : > { %2898 = vmatpush.msrb.mxu0 %v11576_v45  ;;  %3059 = vmatpush.msra.mxu3 %v2990_v24  ;;  %v3003_v45 = vld [vmem:[%s11570_s15 + $0xa0] sm:$0xff]  ;;  %v10442_v24 = vld [vmem:[%s9677_s13 + $0x8] sm:$0xff] }
 0x5c6   : > { %2899 = vmatpush.msrb.mxu0 %v11577_v52  ;;  %3060 = vmatpush.msra.mxu3 %v2989_v28  ;;  %v3017_v52 = vld [vmem:[%s11570_s15 + $0x110] sm:$0xff] }
 0x5c8   : > { %2900 = vmatpush.msrb.mxu0 %v11578_v43  ;;  %3061 = vmatpush.msra.mxu3 %v2988_v32  ;;  %v3037_v43 = vld [vmem:[%s11570_s15 + $0x1b0] sm:$0xff]  ;;  %v2970_v32 = vperm.slane %v2965_v36, 3 }
 0x5ca   : > { %2901 = vmatpush.msrb.mxu0 %v11579_v1  ;;  %3062 = vmatpush.msra.mxu3 %v2987_v37  ;;  %v3002_v1 = vld [vmem:[%s11570_s15 + $0x98] sm:$0xff] }
 0x5cc   : > { %2902 = vmatpush.msrb.mxu0 %v11580_v48  ;;  %3063 = vmatpush.msra.mxu3 %v2986_v42  ;;  %v3016_v48 = vld [vmem:[%s11570_s15 + $0x108] sm:$0xff] }
 0x5ce   : > { %2903 = vmatpush.msrb.mxu0 %v11581_v47  ;;  %3064 = vmatpush.msra.mxu3 %v2985_v53  ;;  %v3036_v47 = vld [vmem:[%s11570_s15 + $0x1a8] sm:$0xff] }
 0x5d0   : > { %2904 = vmatpush.msrb.mxu0 %v11582_v2  ;;  %3065 = vmatpush.msra.mxu3 %v2984_v59  ;;  %v3001_v2 = vld [vmem:[%s11570_s15 + $0x90] sm:$0xff] }
 0x5d2   : > { %2905 = vmatpush.msrb.mxu0 %v10131_v54  ;;  %v3030_v54 = vld [vmem:[%s11570_s15 + $0x178] sm:$0xff]  ;;  %3066 = vmatpush.msra.mxu3 %v2983_v38 }
 0x5d4   : > { %2906 = vmatpush.msrb.mxu0 %v10141_v60  ;;  %v3029_v60 = vld [vmem:[%s11570_s15 + $0x170] sm:$0xff] }
 0x610   : > { %v2765_v11 = vpop.f32.mrf.mxu0 }
 0x611   : > { %2824 = vmatmul.f32.vlgmr.msra.gmra.mxu2 %v2765_v11  ;;  %v3031_v11 = vld [vmem:[%s11570_s15 + $0x180] sm:$0xff] }
 0x612   : > { %3091 = vmatpush.msra.mxu2 %v3030_v54  ;;  %v3032_v54 = vld [vmem:[%s11570_s15 + $0x188] sm:$0xff] }
 0x614   : > { %3092 = vmatpush.msra.mxu2 %v3029_v60  ;;  %v2951_v60 = vld [vmem:[%s11583_s12] sm:$0xf] }
 0x616   : > { %v2845_v55 = vpop.f32.mrf.mxu3  ;;  %3093 = vmatpush.msra.mxu2 %v3028_v12 }
 0x617   : > { %2864 = vmatmul.f32.vlgmr.msra.gmra.mxu1 %v2845_v55 }
 0x618   : > { %v2785_v61 = vpop.f32.mrf.mxu0  ;;  %3094 = vmatpush.msra.mxu2 %v3027_v13  ;;  %3111 = vmatpush.msra.mxu1 %v3046_v17 }
 0x619   : > { %2804 = vmatmul.f32.vlgmr.msra.gmra.mxu0 %v2785_v61 }
 0x61a   : > { %3071 = vmatpush.msra.mxu0 %v3014_v14  ;;  %3095 = vmatpush.msra.mxu2 %v3026_v16  ;;  %v2953_v14 = vperm.slane %v2951_v60, 0  ;;  %v2956_v16 = vperm.slane %v2951_v60, 3 }
 0x61b   : > { %3112 = vmatpush.msra.mxu1 %v3045_v23  ;;  %v2967_v23 = vperm.slane %v2965_v36, 0 }
 0x61c   : > { %3072 = vmatpush.msra.mxu0 %v3013_v49  ;;  %3096 = vmatpush.msra.mxu2 %v3025_v21  ;;  %v2954_v49 = vperm.slane %v2951_v60, 1 }
 0x61d   : > { %3113 = vmatpush.msra.mxu1 %v3044_v27  ;;  %v10446_v27 = vld [vmem:[%s9677_s13 + $0x10] sm:$0xff] }
 0x61e   : > { %3073 = vmatpush.msra.mxu0 %v3012_v15  ;;  %3097 = vmatpush.msra.mxu2 %v3024_v26  ;;  %v2955_v15 = vperm.slane %v2951_v60, 2  ;;  %v2968_v26 = vperm.slane %v2965_v36, 1  ;;  %v3162_v60 = vld [vmem:[#allocation6 + $0x30] sm:$0xff] }
 0x61f   : > { %3114 = vmatpush.msra.mxu1 %v3043_v31 }
 0x620   : > { %3074 = vmatpush.msra.mxu0 %v3011_v20  ;;  %3098 = vmatpush.msra.mxu2 %v3023_v30  ;;  %v2961_v20 = vmul.f32 %v10437_v19, %v2953_v14  ;;  %v2963_v28 = vmul.f32 %v10446_v27, %v2955_v15  ;;  %v10450_v30 = vld [vmem:[%s9677_s13 + $0x18] sm:$0xff]  ;;  %s2133_s13 = scalar_lea.vmem %s8985_s14, %s6999_s11 }
 0x621   : > { %3115 = vmatpush.msra.mxu1 %v3042_v35  ;;  %v2964_v31 = vmul.f32 %v10450_v30, %v2956_v16  ;;  %v3213_v15 = vld [vmem:[#allocation6 + $0xf8] sm:$0xff] }
 0x622   : > { %3075 = vmatpush.msra.mxu0 %v3010_v25  ;;  %3099 = vmatpush.msra.mxu2 %v3022_v34  ;;  %v2962_v25 = vmul.f32 %v10442_v24, %v2954_v49  ;;  %v6970_v49 = vld [vmem:[%s11584_s7 + $0x10] sm:$0xff]  ;;  %v3159_v16 = vld [vmem:[#allocation6 + $0x18] sm:$0xff] }
 0x623   : > { %3116 = vmatpush.msra.mxu1 %v3041_v41  ;;  %v2978_v37 = vadd.f32 %v2970_v32, %v2964_v31  ;;  %v3207_v31 = vld [vmem:[#allocation6 + $0xc8] sm:$0xff]  ;;  %v3206_v32 = vld [vmem:[#allocation6 + $0xc0] sm:$0xff] }
 0x624   : > { %3076 = vmatpush.msra.mxu0 %v3009_v29  ;;  %3100 = vmatpush.msra.mxu2 %v3021_v40  ;;  %v2969_v29 = vperm.slane %v2965_v36, 2  ;;  %v2976_v34 = vadd.f32 %v2968_v26, %v2962_v25  ;;  %v3160_v36 = vld [vmem:[#allocation6 + $0x20] sm:$0xff] }
 0x625   : > { %3117 = vmatpush.msra.mxu1 %v3040_v51  ;;  %v2982_v42 = vmax.f32 %v2978_v37, 0.0  ;;  %v3169_v51 = vld [vmem:[#allocation6 + $0x68] sm:$0xff]  ;;  %v3210_v26 = vld [vmem:[#allocation6 + $0xe0] sm:$0xff] }
 0x626   : > { %3077 = vmatpush.msra.mxu0 %v3008_v33  ;;  %3101 = vmatpush.msra.mxu2 %v3020_v50  ;;  %v2977_v35 = vadd.f32 %v2969_v29, %v2963_v28  ;;  %v2980_v40 = vmax.f32 %v2976_v34, 0.0  ;;  %v3170_v50 = vld [vmem:[#allocation6 + $0x70] sm:$0xff]  ;;  %v6968_v25 = vld [vmem:[%s11584_s7 + $0x8] sm:$0xff]  ;;  %v3209_v28 = vld [vmem:[#allocation6 + $0xd8] sm:$0xff] }
 0x627   : > { %3118 = vmatpush.msra.mxu1 %v3039_v58  ;;  %v3295_v58 = vld [vmem:[#allocation6 + $0x178] sm:$0xff]  ;;  %v3208_v29 = vld [vmem:[#allocation6 + $0xd0] sm:$0xff]  ;;  %v3203_v34 = vld [vmem:[#allocation6 + $0xa8] sm:$0xff] }
 0x628   : > { %3078 = vmatpush.msra.mxu0 %v3007_v39  ;;  %3102 = vmatpush.msra.mxu2 %v3019_v57  ;;  %v2981_v41 = vmax.f32 %v2977_v35, 0.0  ;;  %v3168_v57 = vld [vmem:[#allocation6 + $0x60] sm:$0xff] }
 0x629   : > { %3119 = vmatpush.msra.mxu1 %v3038_v46  ;;  %v3293_v46 = vld [vmem:[#allocation6 + $0x168] sm:$0xff]  ;;  %v3202_v35 = vld [vmem:[#allocation6 + $0xa0] sm:$0xff] }
 0x62a   : > { %3079 = vmatpush.msra.mxu0 %v3006_v44  ;;  %3103 = vmatpush.msra.mxu2 %v3018_v63  ;;  %v3171_v44 = vld [vmem:[#allocation6 + $0x78] sm:$0xff]  ;;  %v3294_v63 = vld [vmem:[#allocation6 + $0x170] sm:$0xff]  ;;  %v3156_v37 = vld [vmem:[#allocation6] sm:$0xff] }
 0x62b   : > { %3120 = vmatpush.msra.mxu1 %v3037_v43  ;;  %v3292_v43 = vld [vmem:[#allocation6 + $0x160] sm:$0xff] }
 0x62c   : > { %3080 = vmatpush.msra.mxu0 %v3005_v56  ;;  %3104 = vmatpush.msra.mxu2 %v3017_v52  ;;  %v7377_v52 = vld [vmem:[#allocation2] ss:$0 sm:$0xff] }
 0x62d   : > { %3121 = vmatpush.msra.mxu1 %v3036_v47 }
 0x62e   : > { %3081 = vmatpush.msra.mxu0 %v3004_v62  ;;  %3105 = vmatpush.msra.mxu2 %v3016_v48  ;;  %v3167_v62 = vld [vmem:[#allocation6 + $0x58] sm:$0xff] }
 0x62f   : > { %3122 = vmatpush.msra.mxu1 %v3035_v5  ;;  %v3291_v48 = vld [vmem:[#allocation6 + $0x158] sm:$0xff] }
 0x630   : > { %3082 = vmatpush.msra.mxu0 %v3003_v45  ;;  %3106 = vmatpush.msra.mxu2 %v3015_v4  ;;  %v3166_v45 = vld [vmem:[#allocation6 + $0x50] sm:$0xff]  ;;  %v3164_v4 = vld [vmem:[#allocation6 + $0x40] sm:$0xff] }
 0x631   : > { %3123 = vmatpush.msra.mxu1 %v3034_v7 }
 0x632   : > { %3083 = vmatpush.msra.mxu0 %v3002_v1  ;;  %v3165_v1 = vld [vmem:[#allocation6 + $0x48] sm:$0xff] }
 0x633   : > { %3124 = vmatpush.msra.mxu1 %v3033_v10 }
 0x634   : > { %3084 = vmatpush.msra.mxu0 %v3001_v2 }
 0x635   : > { %3125 = vmatpush.msra.mxu1 %v3032_v54  ;;  %v3289_v54 = vld [vmem:[#allocation6 + $0x148] sm:$0xff] }
 0x636   : > { %3085 = vmatpush.msra.mxu0 %v3000_v6  ;;  %v3290_v6 = vld [vmem:[#allocation6 + $0x150] sm:$0xff] }
 0x637   : > { %3126 = vmatpush.msra.mxu1 %v3031_v11 }
 0x638   : > { %3086 = vmatpush.msra.mxu0 %v2999_v9  ;;  %v3163_v9 = vld [vmem:[#allocation6 + $0x38] sm:$0xff] }
 0x694   : > { %v2825_v12 = vpop.f32.mrf.mxu2  ;;  %v2865_v55 = vpop.f32.mrf.mxu1 }
 0x696   : > { %v2805_v13 = vpop.f32.mrf.mxu0 }
 0x697   : > { %v2826_v61 = vadd.f32 %v2825_v12, %v2805_v13  ;;  %v3161_v13 = vld [vmem:[#allocation6 + $0x28] sm:$0xff] }
 0x699   : > { %v2868_v17 = vadd.f32 %v2865_v55, %v2826_v61  ;;  %v3132_v61 = vld [vmem:[%s11584_s7] sm:$0xff] }
 0x69b   : > { %v2869_v21 = vadd.f32 %v10197_v8, %v2868_v17  ;;  %v2975_v8 = vadd.f32 %v2967_v23, %v2961_v20  ;;  %v3212_v17 = vld [vmem:[#allocation6 + $0xf0] sm:$0xff]  ;;  %v3157_v23 = vld [vmem:[#allocation6 + $0x8] sm:$0xff] }
 0x69c   : > { %v3158_v20 = vld [vmem:[#allocation6 + $0x10] sm:$0xff] }
 0x69d   : > { %v2870_v33 = vmax.f32 %v2869_v21, 0.0  ;;  %v2979_v39 = vmax.f32 %v2975_v8, 0.0  ;;  %v3211_v21 = vld [vmem:[#allocation6 + $0xe8] sm:$0xff]  ;;  %v3204_v8 = vld [vmem:[#allocation6 + $0xb0] sm:$0xff] }
 0x69f   : > { %2887 = vmatmul.f32.vlgmr.msrb.gmra.mxu3 %v2870_v33  ;;  %2907 = vmatmul.f32.vlgmr.msrb.gmra.mxu0 %v2870_v33 }
 0x6a0   : > { %2927 = vmatmul.f32.vlgmr.msrb.gmra.mxu2 %v2870_v33  ;;  %2947 = vmatmul.f32.vlgmr.msrb.gmra.mxu1 %v2870_v33  ;;  %v3205_v33 = vld [vmem:[#allocation6 + $0xb8] sm:$0xff] }
 0x6a1   : > { %3234 = vmatpush.msrb.mxu0 %v3171_v44  ;;  %3296 = vmatpush.msrb.mxu1 %v3295_v58  ;;  %v3286_v44 = vld [vmem:[#allocation6 + $0x130] sm:$0xff]  ;;  %v3284_v58 = vld [vmem:[#allocation6 + $0x120] sm:$0xff] }
 0x6a3   : > { %3235 = vmatpush.msrb.mxu0 %v3170_v50  ;;  %3297 = vmatpush.msrb.mxu1 %v3294_v63  ;;  %v3199_v50 = vld [vmem:[#allocation6 + $0x88] sm:$0xff]  ;;  %v3383_v63 = vld [vmem:[%s11585_s2 + $0x1e0] sm:$0xff] }
 0x6a5   : > { %3236 = vmatpush.msrb.mxu0 %v3169_v51  ;;  %3298 = vmatpush.msrb.mxu1 %v3293_v46  ;;  %v3285_v51 = vld [vmem:[#allocation6 + $0x128] sm:$0xff] }
 0x6a6   : > { %v3384_v46 = vld [vmem:[%s11585_s2 + $0x1e8] sm:$0xff] }
 0x6a7   : > { %3067 = vmatmul.f32.vlgmr.msra.gmra.mxu3 %v2979_v39  ;;  %3087 = vmatmul.f32.vlgmr.msra.gmra.mxu0 %v2980_v40  ;;  %v3288_v39 = vld [vmem:[#allocation6 + $0x140] sm:$0xff]  ;;  %v3201_v40 = vld [vmem:[#allocation6 + $0x98] sm:$0xff] }
 0x6a8   : > { %3107 = vmatmul.f32.vlgmr.msra.gmra.mxu2 %v2981_v41  ;;  %3127 = vmatmul.f32.vlgmr.msra.gmra.mxu1 %v2982_v42  ;;  %v3287_v41 = vld [vmem:[#allocation6 + $0x138] sm:$0xff]  ;;  %v3200_v42 = vld [vmem:[#allocation6 + $0x90] sm:$0xff] }
 0x6a9   : > { %3237 = vmatpush.msrb.mxu0 %v3168_v57  ;;  %3299 = vmatpush.msrb.mxu1 %v3292_v43  ;;  %v3198_v57 = vld [vmem:[#allocation6 + $0x80] sm:$0xff] }
 0x6aa   : > { %v3379_v43 = vld [vmem:[%s11585_s2 + $0x1c0] sm:$0xff] }
 0x6ab   : > { %3238 = vmatpush.msrb.mxu0 %v3167_v62  ;;  %3300 = vmatpush.msrb.mxu1 %v3291_v48  ;;  %v3283_v62 = vld [vmem:[#allocation6 + $0x118] sm:$0xff]  ;;  %v3380_v48 = vld [vmem:[%s11585_s2 + $0x1c8] sm:$0xff] }
 0x6ad   : > { %3239 = vmatpush.msrb.mxu0 %v3166_v45  ;;  %3301 = vmatpush.msrb.mxu1 %v3290_v6  ;;  %v3282_v45 = vld [vmem:[#allocation6 + $0x110] sm:$0xff]  ;;  %v3371_v6 = vld [vmem:[%s11585_s2 + $0x180] sm:$0xff] }
 0x6af   : > { %3240 = vmatpush.msrb.mxu0 %v3165_v1  ;;  %3302 = vmatpush.msrb.mxu1 %v3289_v54  ;;  %v3281_v1 = vld [vmem:[#allocation6 + $0x108] sm:$0xff]  ;;  %v3386_v54 = vld [vmem:[%s11585_s2 + $0x1f8] sm:$0xff] }
 0x6b1   : > { %3241 = vmatpush.msrb.mxu0 %v3164_v4  ;;  %3303 = vmatpush.msrb.mxu1 %v3288_v39  ;;  %v3376_v4 = vld [vmem:[%s11585_s2 + $0x1a8] sm:$0xff]  ;;  %v3347_v39 = vld [vmem:[%s11585_s2 + $0xc0] sm:$0xff] }
 0x6b3   : > { %3242 = vmatpush.msrb.mxu0 %v3163_v9  ;;  %3304 = vmatpush.msrb.mxu1 %v3287_v41  ;;  %v3280_v9 = vld [vmem:[#allocation6 + $0x100] sm:$0xff]  ;;  %v3349_v41 = vld [vmem:[%s11585_s2 + $0xd0] sm:$0xff] }
 0x6b5   : > { %3243 = vmatpush.msrb.mxu0 %v3162_v60  ;;  %3305 = vmatpush.msrb.mxu1 %v3286_v44  ;;  %v3378_v60 = vld [vmem:[%s11585_s2 + $0x1b8] sm:$0xff]  ;;  %v3343_v44 = vld [vmem:[%s11585_s2 + $0xa0] sm:$0xff] }
 0x6b7   : > { %3244 = vmatpush.msrb.mxu0 %v3161_v13  ;;  %3306 = vmatpush.msrb.mxu1 %v3285_v51  ;;  %v3345_v51 = vld [vmem:[%s11585_s2 + $0xb0] sm:$0xff] }
 0x6b9   : > { %3245 = vmatpush.msrb.mxu0 %v3160_v36  ;;  %3307 = vmatpush.msrb.mxu1 %v3284_v58  ;;  %v3369_v36 = vld [vmem:[%s11585_s2 + $0x170] sm:$0xff]  ;;  %v3339_v58 = vld [vmem:[%s11585_s2 + $0x80] sm:$0xff] }
 0x6bb   : > { %3246 = vmatpush.msrb.mxu0 %v3159_v16  ;;  %3308 = vmatpush.msrb.mxu1 %v3283_v62  ;;  %v3363_v16 = vld [vmem:[%s11585_s2 + $0x140] sm:$0xff]  ;;  %v3340_v62 = vld [vmem:[%s11585_s2 + $0x88] sm:$0xff] }
 0x6bd   : > { %3247 = vmatpush.msrb.mxu0 %v3158_v20  ;;  %3309 = vmatpush.msrb.mxu1 %v3282_v45  ;;  %v3365_v20 = vld [vmem:[%s11585_s2 + $0x150] sm:$0xff]  ;;  %v3335_v45 = vld [vmem:[%s11585_s2 + $0x60] sm:$0xff] }
 0x6bf   : > { %3248 = vmatpush.msrb.mxu0 %v3157_v23  ;;  %3310 = vmatpush.msrb.mxu1 %v3281_v1  ;;  %v3359_v23 = vld [vmem:[%s11585_s2 + $0x120] sm:$0xff]  ;;  %v3338_v1 = vld [vmem:[%s11585_s2 + $0x78] sm:$0xff] }
 0x6c1   : > { %3249 = vmatpush.msrb.mxu0 %v3156_v37  ;;  %3311 = vmatpush.msrb.mxu1 %v3280_v9  ;;  %v3354_v37 = vld [vmem:[%s11585_s2 + $0xf8] sm:$0xff] }
 0x6c2   : > { %v3330_v9 = vld [vmem:[%s11585_s2 + $0x38] sm:$0xff] }
 0x6c3   : > { %3447 = vmatpush.msra.mxu1 %v3386_v54  ;;  %v3324_v54 = vld [vmem:[%s11585_s2 + $0x8] sm:$0xff] }
 0x71c   : > { %v10453_v53 = vpop.f32.mrf.mxu0 }
 0x71d   : > { %v10459_v38 = vpop.f32.mrf.mxu1 }
 0x722   : > { %v10455_v56 = vpop.f32.mrf.mxu3 }
 0x723   : > { %v10457_v59 = vpop.f32.mrf.mxu2 }
 0x724   : > { %v3088_v2 = vpop.f32.mrf.mxu0 }
 0x725   : > { %v3128_v11 = vpop.f32.mrf.mxu1 }
 0x72a   : > { %v3068_v47 = vpop.f32.mrf.mxu3 }
 0x72b   : > { %v3069_v5 = vadd.f32 %v7377_v52, %v3068_v47  ;;  %v3108_v7 = vpop.f32.mrf.mxu2  ;;  %v3385_v52 = vld [vmem:[%s11585_s2 + $0x1f0] sm:$0xff] }
 0x72c   : > { %3427 = vmatpush.msra.mxu0 %v3385_v52  ;;  %v3381_v47 = vld [vmem:[%s11585_s2 + $0x1d0] sm:$0xff]  ;;  %v3336_v52 = vld [vmem:[%s11585_s2 + $0x68] sm:$0xff] }
 0x72d   : > { %v3089_v10 = vadd.f32 %v3088_v2, %v3069_v5  ;;  %v3375_v2 = vld [vmem:[%s11585_s2 + $0x1a0] sm:$0xff]  ;;  %v3377_v5 = vld [vmem:[%s11585_s2 + $0x1b0] sm:$0xff] }
 0x72e   : > { %3428 = vmatpush.msra.mxu0 %v3381_v47  ;;  %v3332_v47 = vld [vmem:[%s11585_s2 + $0x48] sm:$0xff] }
 0x72f   : > { %v3109_v12 = vadd.f32 %v3108_v7, %v3089_v10  ;;  %v3372_v7 = vld [vmem:[%s11585_s2 + $0x188] sm:$0xff]  ;;  %v3373_v10 = vld [vmem:[%s11585_s2 + $0x190] sm:$0xff] }
 0x730   : > { %3429 = vmatpush.msra.mxu0 %v3377_v5  ;;  %v3327_v5 = vld [vmem:[%s11585_s2 + $0x20] sm:$0xff] }
 0x731   : > { %v3129_v55 = vadd.f32 %v3128_v11, %v3109_v12  ;;  %v3382_v11 = vld [vmem:[%s11585_s2 + $0x1d8] sm:$0xff] }
 0x732   : > { %3430 = vmatpush.msra.mxu0 %v3373_v10  ;;  %3448 = vmatpush.msra.mxu1 %v3382_v11  ;;  %v3374_v12 = vld [vmem:[%s11585_s2 + $0x198] sm:$0xff]  ;;  %v3323_v10 = vld [vmem:[%s11585_s2] sm:$0xff]  ;;  %v3325_v11 = vld [vmem:[%s11585_s2 + $0x10] sm:$0xff] }
 0x733   : > { %v3131_v14 = vmax.f32 %v3129_v55, 0.0 }
 0x734   : > { %3449 = vmatpush.msra.mxu1 %v3378_v60  ;;  %3431 = vmatpush.msra.mxu0 %v3369_v36  ;;  %v3326_v60 = vld [vmem:[%s11585_s2 + $0x18] sm:$0xff] }
 0x735   : > { %3151 = vmatpush.msrb.mxu3 %v3131_v14  ;;  %3274 = vmatpush.msrb.mxu2 %v3131_v14 }
 0x736   : > { %6967 = vmatmul.msk.f32.vlgmr.msrb.gmra.mxu3 %vm2320_vm0, %v3132_v61  ;;  %6971 = vmatmul.msk.f32.vlgmr.msrb.gmra.mxu2 %vm2320_vm0, %v6970_v49  ;;  %v3367_v61 = vld [vmem:[%s11585_s2 + $0x160] sm:$0xff]  ;;  %v3368_v49 = vld [vmem:[%s11585_s2 + $0x168] sm:$0xff] }
 0x737   : > { %3192 = vmatpush.msra.mxu3 %v3131_v14  ;;  %3387 = vmatpush.msra.mxu2 %v3383_v63  ;;  %v3341_v63 = vld [vmem:[%s11585_s2 + $0x90] sm:$0xff] }
 0x738   : > { %3450 = vmatpush.msra.mxu1 %v3374_v12  ;;  %3432 = vmatpush.msra.mxu0 %v3365_v20 }
 0x739   : > { %3214 = vmatpush.msrb.mxu3 %v3213_v15  ;;  %3388 = vmatpush.msra.mxu2 %v3379_v43  ;;  %v3370_v15 = vld [vmem:[%s11585_s2 + $0x178] sm:$0xff]  ;;  %v3337_v43 = vld [vmem:[%s11585_s2 + $0x70] sm:$0xff] }
 0x73a   : > { %3451 = vmatpush.msra.mxu1 %v3370_v15 }
 0x73b   : > { %3215 = vmatpush.msrb.mxu3 %v3212_v17  ;;  %3389 = vmatpush.msra.mxu2 %v3375_v2  ;;  %v3364_v17 = vld [vmem:[%s11585_s2 + $0x148] sm:$0xff]  ;;  %v3333_v2 = vld [vmem:[%s11585_s2 + $0x50] sm:$0xff] }
 0x73d   : > { %3216 = vmatpush.msrb.mxu3 %v3211_v21  ;;  %3390 = vmatpush.msra.mxu2 %v3371_v6  ;;  %v3366_v21 = vld [vmem:[%s11585_s2 + $0x158] sm:$0xff]  ;;  %v3328_v6 = vld [vmem:[%s11585_s2 + $0x28] sm:$0xff] }
 0x73e   : > { %6969 = vmatmul.msk.f32.vlgmr.msra.gmra.mxu3 %vm2320_vm0, %v6968_v25  ;;  %v3360_v25 = vld [vmem:[%s11585_s2 + $0x128] sm:$0xff]  ;;  %3452 = vmatpush.msra.mxu1 %v3366_v21 }
 0x73f   : > { %3217 = vmatpush.msrb.mxu3 %v3210_v26  ;;  %3391 = vmatpush.msra.mxu2 %v3367_v61  ;;  %v3361_v26 = vld [vmem:[%s11585_s2 + $0x130] sm:$0xff]  ;;  %v7378_v61 = vld [vmem:[#allocation4] ss:$0 sm:$0xff] }
 0x740   : > { %3433 = vmatpush.msra.mxu0 %v3361_v26 }
 0x741   : > { %3218 = vmatpush.msrb.mxu3 %v3209_v28  ;;  %3392 = vmatpush.msra.mxu2 %v3363_v16  ;;  %v3362_v28 = vld [vmem:[%s11585_s2 + $0x138] sm:$0xff] }
 0x742   : > { %3453 = vmatpush.msra.mxu1 %v3362_v28 }
 0x743   : > { %3219 = vmatpush.msrb.mxu3 %v3208_v29  ;;  %v3355_v29 = vld [vmem:[%s11585_s2 + $0x100] sm:$0xff]  ;;  %3393 = vmatpush.msra.mxu2 %v3359_v23 }
 0x745   : > { %3220 = vmatpush.msrb.mxu3 %v3207_v31  ;;  %v3356_v31 = vld [vmem:[%s11585_s2 + $0x108] sm:$0xff]  ;;  %3394 = vmatpush.msra.mxu2 %v3355_v29 }
 0x747   : > { %3221 = vmatpush.msrb.mxu3 %v3206_v32  ;;  %v3357_v32 = vld [vmem:[%s11585_s2 + $0x110] sm:$0xff] }
 0x748   : > { %3434 = vmatpush.msra.mxu0 %v3357_v32 }
 0x749   : > { %3222 = vmatpush.msrb.mxu3 %v3205_v33  ;;  %v3358_v33 = vld [vmem:[%s11585_s2 + $0x118] sm:$0xff] }
 0x74a   : > { %3454 = vmatpush.msra.mxu1 %v3358_v33 }
 0x74b   : > { %3223 = vmatpush.msrb.mxu3 %v3204_v8  ;;  %v3351_v8 = vld [vmem:[%s11585_s2 + $0xe0] sm:$0xff] }
 0x74c   : > { %3395 = vmatpush.msra.mxu2 %v3351_v8  ;;  %3455 = vmatpush.msra.mxu1 %v3354_v37 }
 0x74d   : > { %3224 = vmatpush.msrb.mxu3 %v3203_v34  ;;  %v3352_v34 = vld [vmem:[%s11585_s2 + $0xe8] sm:$0xff] }
 0x74e   : > { %3396 = vmatpush.msra.mxu2 %v3347_v39 }
 0x74f   : > { %3225 = vmatpush.msrb.mxu3 %v3202_v35  ;;  %v3353_v35 = vld [vmem:[%s11585_s2 + $0xf0] sm:$0xff] }
 0x750   : > { %3435 = vmatpush.msra.mxu0 %v3353_v35  ;;  %3397 = vmatpush.msra.mxu2 %v3343_v44 }
 0x751   : > { %3226 = vmatpush.msrb.mxu3 %v3201_v40  ;;  %v3348_v40 = vld [vmem:[%s11585_s2 + $0xc8] sm:$0xff] }
 0x752   : > { %3436 = vmatpush.msra.mxu0 %v3349_v41  ;;  %3398 = vmatpush.msra.mxu2 %v3339_v58 }
 0x753   : > { %3227 = vmatpush.msrb.mxu3 %v3200_v42  ;;  %v3350_v42 = vld [vmem:[%s11585_s2 + $0xd8] sm:$0xff] }
 0x754   : > { %3456 = vmatpush.msra.mxu1 %v3350_v42  ;;  %3437 = vmatpush.msra.mxu0 %v3345_v51 }
 0x755   : > { %3228 = vmatpush.msrb.mxu3 %v3199_v50  ;;  %v3344_v50 = vld [vmem:[%s11585_s2 + $0xa8] sm:$0xff]  ;;  %3399 = vmatpush.msra.mxu2 %v3335_v45 }
 0x756   : > { %3438 = vmatpush.msra.mxu0 %v3341_v63 }
 0x757   : > { %3229 = vmatpush.msrb.mxu3 %v3198_v57  ;;  %v3346_v57 = vld [vmem:[%s11585_s2 + $0xb8] sm:$0xff] }
 0x758   : > { %3457 = vmatpush.msra.mxu1 %v3346_v57  ;;  %3439 = vmatpush.msra.mxu0 %v3337_v43 }
 0x759   : > { %3407 = vmatpush.msra.mxu3 %v3384_v46  ;;  %v3342_v46 = vld [vmem:[%s11585_s2 + $0x98] sm:$0xff] }
 0x75a   : > { %3458 = vmatpush.msra.mxu1 %v3342_v46  ;;  %3440 = vmatpush.msra.mxu0 %v3333_v2 }
 0x75b   : > { %3408 = vmatpush.msra.mxu3 %v3380_v48  ;;  %v3331_v48 = vld [vmem:[%s11585_s2 + $0x40] sm:$0xff] }
 0x75c   : > { %3459 = vmatpush.msra.mxu1 %v3338_v1  ;;  %3400 = vmatpush.msra.mxu2 %v3331_v48 }
 0x75d   : > { %3409 = vmatpush.msra.mxu3 %v3376_v4  ;;  %v3334_v4 = vld [vmem:[%s11585_s2 + $0x58] sm:$0xff] }
 0x75e   : > { %3460 = vmatpush.msra.mxu1 %v3334_v4  ;;  %3401 = vmatpush.msra.mxu2 %v3327_v5  ;;  %v3735_v4 = vld [vmem:[#allocation46 + $0x58] sm:$0xff] }
 0x75f   : > { %3410 = vmatpush.msra.mxu3 %v3372_v7  ;;  %v3329_v7 = vld [vmem:[%s11585_s2 + $0x30] sm:$0xff] }
 0x760   : > { %3441 = vmatpush.msra.mxu0 %v3329_v7  ;;  %3461 = vmatpush.msra.mxu1 %v3330_v9 }
 0x761   : > { %3411 = vmatpush.msra.mxu3 %v3368_v49  ;;  %3402 = vmatpush.msra.mxu2 %v3323_v10 }
 0x762   : > { %3442 = vmatpush.msra.mxu0 %v3325_v11  ;;  %3462 = vmatpush.msra.mxu1 %v3326_v60 }
 0x763   : > { %3412 = vmatpush.msra.mxu3 %v3364_v17 }
 0x765   : > { %3413 = vmatpush.msra.mxu3 %v3360_v25 }
 0x767   : > { %3414 = vmatpush.msra.mxu3 %v3356_v31 }
 0x769   : > { %3415 = vmatpush.msra.mxu3 %v3352_v34 }
 0x76b   : > { %3416 = vmatpush.msra.mxu3 %v3348_v40 }
 0x76d   : > { %3417 = vmatpush.msra.mxu3 %v3344_v50 }
 0x76f   : > { %3418 = vmatpush.msra.mxu3 %v3340_v62 }
 0x771   : > { %3419 = vmatpush.msra.mxu3 %v3336_v52 }
 0x773   : > { %3420 = vmatpush.msra.mxu3 %v3332_v47 }
 0x775   : > { %3421 = vmatpush.msra.mxu3 %v3328_v6 }
 0x777   : > { %3422 = vmatpush.msra.mxu3 %v3324_v54 }
 0x7b9   : > { %v3153_v13 = vpop.f32.mrf.mxu3  ;;  %v3276_v55 = vpop.f32.mrf.mxu2 }
 0x7ba   : > { %3250 = vmatmul.f32.vlgmr.msrb.gmra.mxu0 %v3153_v13  ;;  %3312 = vmatmul.f32.vlgmr.msrb.gmra.mxu1 %v3276_v55 }
 0x7c1   : > { %v3194_v14 = vpop.f32.mrf.mxu3 }
 0x7c2   : > { %3230 = vmatmul.f32.vlgmr.msrb.gmra.mxu3 %v3194_v14 }
 0x837   : > { %v3251_v12 = vpop.f32.mrf.mxu0  ;;  %v3313_v55 = vpop.f32.mrf.mxu1 }
 0x845   : > { %v3231_v13 = vpop.f32.mrf.mxu3 }
 0x846   : > { %v3252_v14 = vadd.f32 %v3251_v12, %v3231_v13 }
 0x848   : > { %v3316_v49 = vadd.f32 %v3313_v55, %v3252_v14 }
 0x84a   : > { %v3321_v36 = vadd.f32 %v7378_v61, %v3316_v49 }
 0x84c   : > { %v3322_v15 = vmax.f32 %v3321_v36, 0.0 }
 0x84e   : > { %3403 = vmatmul.f32.vlgmr.msra.gmra.mxu2 %v3322_v15  ;;  %3423 = vmatmul.f32.vlgmr.msra.gmra.mxu3 %v3322_v15 }
 0x84f   : > { %3443 = vmatmul.f32.vlgmr.msra.gmra.mxu0 %v3322_v15  ;;  %3463 = vmatmul.f32.vlgmr.msra.gmra.mxu1 %v3322_v15 }
 0x8cc   : > { %v3464_v16 = vpop.f32.mrf.mxu1  ;;  %v3444_v29 = vpop.f32.mrf.mxu0 }
 0x8cd   : > { %v3465_v21 = vadd.f32 %v10450_v30, %v3464_v16  ;;  %v3445_v31 = vadd.f32 %v10446_v27, %v3444_v29  ;;  %v3468_v30 = vld [vmem:[#allocation49] sm:$0xf] }
 0x8ce   : > { %vm3469_vm1 = vcmp.eq.s32.totalorder %v3468_v30, 0  ;;  %vm3504_vm2 = vcmp.eq.s32.totalorder %v3468_v30, 7 }
 0x8cf   : > { %v7365_v32 = vpack.i.bf16 %v3445_v31, %v3465_v21 }
 0x8d1   : > { %v3404_v17 = vpop.f32.mrf.mxu2  ;;  %v3424_v20 = vpop.f32.mrf.mxu3 }
 0x8d2   : > { %v3405_v23 = vadd.f32 %v10437_v19, %v3404_v17  ;;  %v10534_v25 = vadd.f32 %v10442_v24, %v3424_v20  ;;  %v8720_v19 = vmov 0  }
 0x8d3   : > { %v3491_v24 = vsel %vm3469_vm1, 1, %v8720_v19  ;;  %v3523_v40 = vsel %vm3504_vm2, 1, %v8720_v19  ;;  %vm3614_vm2 = vcmask 1040384  }
 0x8d4   : > { %v7360_v26 = vpack.i.bf16 %v10534_v25, %v3405_v23  ;;  %v7350_v28 = vpack.i.bf16 %v3405_v23, %v3465_v21  ;;  %v7355_v33 = vpack.i.bf16 %v10534_v25, %v3445_v31  ;;  %v3492_v39 = vperm.slane %v3491_v24, 0 }
 0x8d5   : > { %v3494_v42 = vperm.slane %v3491_v24, 2  ;;  %v3495_v44 = vperm.slane %v3491_v24, 3  ;;  %v3524_v50 = vperm.slane %v3523_v40, 0  ;;  %v3526_v58 = vperm.slane %v3523_v40, 2 }
 0x8d6   : > { %7361 = vrot.lane.b32.xlu1 %v7360_v26, %s8718_s16  ;;  %7351 = vrot.lane.b32.xlu0 %v7350_v28, %s8719_s10  ;;  %vm10542_vm3 = vcmp.eq.s32.totalorder %v3492_v39, 1  ;;  %v3527_v62 = vperm.slane %v3523_v40, 3  ;;  %v3493_v2 = vperm.slane %v3491_v24, 1 }
 0x8d7   : > { %vm3498_vm5 = vcmp.eq.s32.totalorder %v3494_v42, 1  ;;  %vm3499_vm6 = vcmp.eq.s32.totalorder %v3495_v44, 1  ;;  %vm10548_vm7 = vcmp.eq.s32.totalorder %v3524_v50, 1  ;;  %vm10552_vm8 = vcmp.eq.s32.totalorder %v3526_v58, 1 }
 0x8d8   : > { %vm10557_vm9 = vcmp.eq.s32.totalorder %v3527_v62, 1  ;;  %vm10565_vm10 = vcmp.eq.s32.totalorder %v3493_v2, 1 }
 0x8de   : > { %7366 = vrot.lane.b32.xlu1 %v7365_v32, %s8718_s16  ;;  %7356 = vrot.lane.b32.xlu0 %v7355_v33, %s8719_s10  ;;  %v3467_v33 = vld [vmem:[#allocation45] sm:$0xf] }
 0x8df   : > { %vm3544_vm12 = vcmp.eq.s32.totalorder %v3467_v33, 0  ;;  %vm3580_vm13 = vcmp.eq.s32.totalorder %v3467_v33, 7  ;;  %v3731_v33 = vld [vmem:[#allocation46 + $0x38] sm:$0xff] }
 0x8e0   : > { %v3567_v30 = vsel %vm3544_vm12, 1, %v8720_v19 }
 0x8e1   : > { %v3568_v24 = vperm.slane %v3567_v30, 0  ;;  %v3569_v58 = vperm.slane %v3567_v30, 1  ;;  %v3571_v47 = vperm.slane %v3567_v30, 3 }
 0x8e3   : > { %vm3572_vm15 = vcmp.eq.s32.totalorder %v3568_v24, 1 }
 0x948   : > { %v7362_v8 = vpop.permute.xlu1 %7361  ;;  %v7352_v34 = vpop.permute.xlu0 %7351 }
 0x949   : > { %v7354_v35 = vunpack.i.h.bf16 %v7352_v34  ;;  %v7353_v37 = vunpack.i.l.bf16 %v7352_v34  ;;  %v7364_v51 = vunpack.i.h.bf16 %v7362_v8  ;;  %v7363_v57 = vunpack.i.l.bf16 %v7362_v8 }
 0x94b   : > { %v3490_v27 = vsel %vm2320_vm0, %v7353_v37, %v7354_v35  ;;  %v3514_v5 = vsel %vm3513_vm4, %v7363_v57, %v7364_v51 }
 0x94c   : > { %v3500_v45 = vsel %vm10542_vm3, -3.4028235e+38, %v3490_v27  ;;  %v3532_v49 = vsel %vm10548_vm7, -3.4028235e+38, %v3514_v5  ;;  %vm3627_vm3 = vcmask 1046528  }
 0x94d   : > { %v3536_v7 = vmax.f32 %v3500_v45, %v3405_v23  ;;  %v3525_v23 = vperm.slane %v3523_v40, 1  ;;  %v3736_v45 = vld [vmem:[#allocation46 + $0x60] sm:$0xff] }
 0x94f   : > { %v3540_v17 = vmax.f32 %v3536_v7, %v3532_v49  ;;  %vm3529_vm11 = vcmp.eq.s32.totalorder %v3525_v23, 1  ;;  %v10599_v7 = vld [vmem:[#allocation48] sm:$0xf] }
 0x950   : > { %v7367_v63 = vpop.permute.xlu1 %7366  ;;  %v7357_v46 = vpop.permute.xlu0 %7356 }
 0x951   : > { %v7369_v52 = vunpack.i.h.bf16 %v7367_v63  ;;  %v7368_v43 = vunpack.i.l.bf16 %v7367_v63  ;;  %v7359_v1 = vunpack.i.h.bf16 %v7357_v46  ;;  %v7358_v48 = vunpack.i.l.bf16 %v7357_v46  ;;  %v3737_v63 = vld [vmem:[#allocation46 + $0x68] sm:$0xff] }
 0x953   : > { %v3516_v9 = vsel %vm3513_vm4, %v7369_v52, %v7368_v43  ;;  %v3522_v10 = vsel %vm3513_vm4, %v7368_v43, %v7363_v57  ;;  %v3484_v54 = vsel %vm2320_vm0, %v7359_v1, %v7358_v48  ;;  %v3485_v11 = vsel %vm2320_vm0, %v7358_v48, %v7353_v37  ;;  %v3738_v57 = vld [vmem:[#allocation46 + $0x70] sm:$0xff] }
 0x954   : > { %v3502_v60 = vsel %vm3498_vm5, -3.4028235e+38, %v3484_v54  ;;  %v3503_v12 = vsel %vm3499_vm6, -3.4028235e+38, %v3485_v11  ;;  %v3534_v61 = vsel %vm10552_vm8, -3.4028235e+38, %v3516_v9  ;;  %v3483_v15 = vsel %vm2320_vm0, %v7354_v35, %v7359_v1 }
 0x955   : > { %v3538_v13 = vmax.f32 %v3502_v60, %v3445_v31  ;;  %v3539_v55 = vmax.f32 %v3503_v12, %v3465_v21  ;;  %v3535_v36 = vsel %vm10557_vm9, -3.4028235e+38, %v3522_v10  ;;  %v3501_v26 = vsel %vm10565_vm10, -3.4028235e+38, %v3483_v15  ;;  %v3734_v10 = vld [vmem:[#allocation46 + $0x50] sm:$0xff]  ;;  %v3752_v11 = vld [vmem:[#allocation46 + $0xe0] sm:$0xff] }
 0x956   : > { %v3515_v28 = vsel %vm3513_vm4, %v7364_v51, %v7369_v52  ;;  %v3537_v29 = vmax.f32 %v3501_v26, %v10534_v25  ;;  %v3581_v37 = vsel %vm3580_vm13, 1, %v8720_v19  ;;  %v3739_v51 = vld [vmem:[#allocation46 + $0x78] sm:$0xff]  ;;  %vm10594_vm4 = vcmp.eq.s32.totalorder %v3569_v58, 1  ;;  %v3768_v60 = vld [vmem:[#allocation46 + $0x160] sm:$0xff] }
 0x957   : > { %v10576_v16 = vmax.f32 %v3538_v13, %v3534_v61  ;;  %v10578_v20 = vmax.f32 %v3539_v55, %v3535_v36  ;;  %v3533_v31 = vsel %vm3529_vm11, -3.4028235e+38, %v3515_v28  ;;  %v3582_v39 = vperm.slane %v3581_v37, 0  ;;  %3788 = vmatpush.msrb.mxu0 %v3739_v51  ;;  %v3733_v13 = vld [vmem:[#allocation46 + $0x48] sm:$0xff]  ;;  %v3787_v61 = vld [vmem:[#allocation46 + $0x1f8] sm:$0xff]  ;;  %v3750_v55 = vld [vmem:[#allocation46 + $0xd0] sm:$0xff] }
 0x958   : > { %v3541_v32 = vmax.f32 %v3537_v29, %v3533_v31  ;;  %v3570_v48 = vperm.slane %v3567_v30, 2  ;;  %v3583_v2 = vperm.slane %v3581_v37, 1  ;;  %v3585_v6 = vperm.slane %v3581_v37, 3  ;;  %3848 = vmatpush.msrb.mxu1 %v3787_v61  ;;  %v3786_v30 = vld [vmem:[#allocation46 + $0x1f0] sm:$0xff]  ;;  %v3751_v12 = vld [vmem:[#allocation46 + $0xd8] sm:$0xff]  ;;  %v3749_v61 = vld [vmem:[#allocation46 + $0xc8] sm:$0xff] }
 0x959   : > { %3556 = vrot.lane.b32.xlu0 %v10576_v16, %s8721_s3  ;;  %v7370_v21 = vpack.i.bf16 %v3540_v17, %v10578_v20  ;;  %vm3586_vm1 = vcmp.eq.s32.totalorder %v3582_v39, 1  ;;  %3789 = vmatpush.msrb.mxu0 %v3738_v57  ;;  %v3584_v9 = vperm.slane %v3581_v37, 2  ;;  %vm10607_vm6 = vcmp.eq.s32.totalorder %v3571_v47, 1  ;;  %v3771_v47 = vld [vmem:[#allocation46 + $0x178] sm:$0xff]  ;;  %v3748_v36 = vld [vmem:[#allocation46 + $0xc0] sm:$0xff] }
 0x95a   : > { %vm10603_vm5 = vcmp.eq.s32.totalorder %v3570_v48, 1  ;;  %vm10611_vm7 = vcmp.eq.s32.totalorder %v3583_v2, 1  ;;  %vm10617_vm8 = vcmp.eq.s32.totalorder %v3585_v6, 1  ;;  %3849 = vmatpush.msrb.mxu1 %v3786_v30  ;;  %v3755_v48 = vld [vmem:[#allocation46 + $0xf8] sm:$0xff]  ;;  %v3726_v6 = vld [vmem:[#allocation46 + $0x10] sm:$0xff]  ;;  %vm3925_vm10 = vcmask 1043456  }
 0x95b   : > { %7371 = vrot.lane.b32.xlu2 %v7370_v21, %s8721_s3  ;;  %3790 = vmatpush.msrb.mxu0 %v3737_v63  ;;  %vm10621_vm9 = vcmp.eq.s32.totalorder %v3584_v9, 1  ;;  %v3732_v21 = vld [vmem:[#allocation46 + $0x40] sm:$0xff]  ;;  %v3727_v2 = vld [vmem:[#allocation46 + $0x18] sm:$0xff]  ;;  %v3753_v9 = vld [vmem:[#allocation46 + $0xe8] sm:$0xff]  ;;  %vm3921_vm11 = vcmask 31744  }
 0x95c   : > { %v3762_v30 = vld [vmem:[#allocation46 + $0x130] sm:$0xff] }
 0x95d   : > { %3791 = vmatpush.msrb.mxu0 %v3736_v45 }
 0x95f   : > { %3792 = vmatpush.msrb.mxu0 %v3735_v4  ;;  %v3754_v4 = vld [vmem:[#allocation46 + $0xf0] sm:$0xff] }
 0x961   : > { %3793 = vmatpush.msrb.mxu0 %v3734_v10  ;;  %v3769_v10 = vld [vmem:[#allocation46 + $0x168] sm:$0xff] }
 0x963   : > { %3554 = vrot.lane.b32.xlu2 %v3541_v32, %s8721_s3  ;;  %3794 = vmatpush.msrb.mxu0 %v3733_v13  ;;  %v3767_v13 = vld [vmem:[#allocation46 + $0x158] sm:$0xff] }
 0x965   : > { %3795 = vmatpush.msrb.mxu0 %v3732_v21  ;;  %v3724_v21 = vld [vmem:[#allocation46] sm:$0xff] }
 0x967   : > { %3796 = vmatpush.msrb.mxu0 %v3731_v33  ;;  %v3742_v33 = vld [vmem:[#allocation46 + $0x90] sm:$0xff] }
 0x9b5   : > { %v7372_v8 = vpop.permute.xlu2 %7371 }
 0x9b6   : > { %v7374_v34 = vunpack.i.h.bf16 %v7372_v8  ;;  %v7373_v35 = vunpack.i.l.bf16 %v7372_v8 }
 0x9b8   : > { %v10589_v40 = vsel %vm3558_vm14, %v7373_v35, %v7374_v34 }
 0x9b9   : > { %v3576_v25 = vsel %vm3572_vm15, -3.4028235e+38, %v10589_v40  ;;  %v3593_v8 = vsel %vm10617_vm8, -3.4028235e+38, %v10589_v40  ;;  %v3728_v40 = vld [vmem:[#allocation46 + $0x20] sm:$0xff] }
 0x9ba   : > { %v3594_v42 = vmax.f32 %v3576_v25, %v3540_v17 }
 0x9bd   : > { %v3555_v27 = vpop.permute.xlu2 %3554 }
 0x9be   : > { %v3559_v41 = vsel %vm3558_vm14, %v7374_v34, %v3555_v27  ;;  %v3785_v34 = vld [vmem:[#allocation46 + $0x1e8] sm:$0xff] }
 0x9bf   : > { %v3590_v44 = vsel %vm3586_vm1, -3.4028235e+38, %v3559_v41  ;;  %v3577_v54 = vsel %vm10594_vm4, -3.4028235e+38, %v3559_v41  ;;  %3850 = vmatpush.msrb.mxu1 %v3785_v34  ;;  %v3761_v34 = vld [vmem:[#allocation46 + $0x128] sm:$0xff] }
 0x9c0   : > { %v3598_v50 = vmax.f32 %v3594_v42, %v3590_v44  ;;  %v3595_v49 = vmax.f32 %v3577_v54, %v3541_v32  ;;  %v3729_v44 = vld [vmem:[#allocation46 + $0x28] sm:$0xff] }
 0x9c1   : > { %v3725_v54 = vld [vmem:[#allocation46 + $0x8] sm:$0xff] }
 0x9c2   : > { %v3606_v19 = vrot.slane %v3598_v50, 7  ;;  %v3619_v62 = vrot.slane %v3598_v50, 1 }
 0x9c4   : > { %v3615_v46 = vsel %vm3614_vm2, -3.4028235e+38, %v3606_v19  ;;  %v3628_v1 = vsel %vm3627_vm3, %v3619_v62, -3.4028235e+38 }
 0x9c5   : > { %v3632_v43 = vmax.f32 %v3615_v46, %v3598_v50 }
 0x9c7   : > { %v3636_v5 = vmax.f32 %v3632_v43, %v3628_v1 }
 0x9c9   : > { %3659 = vmatpush.msrb.mxu2 %v3636_v5  ;;  %v3770_v5 = vld [vmem:[#allocation46 + $0x170] sm:$0xff] }
 0x9ca   : > { %6972 = vmatmul.msk.f32.vlgmr.msrb.gmra.mxu2 %vm2320_vm0, %v10599_v7 }
 0x9cb   : > { %v3557_v14 = vpop.permute.xlu0 %3556 }
 0x9cc   : > { %v3560_v15 = vsel %vm3558_vm14, %v3555_v27, %v3557_v14  ;;  %v3561_v17 = vsel %vm3558_vm14, %v3557_v14, %v7373_v35  ;;  %v3766_v14 = vld [vmem:[#allocation46 + $0x150] sm:$0xff] }
 0x9cd   : > { %v3578_v23 = vsel %vm10603_vm5, -3.4028235e+38, %v3560_v15  ;;  %v3579_v26 = vsel %vm10607_vm6, -3.4028235e+38, %v3561_v17  ;;  %v3591_v28 = vsel %vm10611_vm7, -3.4028235e+38, %v3560_v15 }
 0x9ce   : > { %v3596_v29 = vmax.f32 %v3578_v23, %v10576_v16  ;;  %v3597_v31 = vmax.f32 %v3579_v26, %v10578_v20  ;;  %v3599_v32 = vmax.f32 %v3595_v49, %v3591_v28  ;;  %v3592_v24 = vsel %vm10621_vm9, -3.4028235e+38, %v3561_v17  ;;  %v3730_v16 = vld [vmem:[#allocation46 + $0x30] sm:$0xff]  ;;  %v3765_v49 = vld [vmem:[#allocation46 + $0x148] sm:$0xff]  ;;  %v3747_v15 = vld [vmem:[#allocation46 + $0xb8] sm:$0xff] }
 0x9cf   : > { %3797 = vmatpush.msrb.mxu0 %v3730_v16  ;;  %v3746_v17 = vld [vmem:[#allocation46 + $0xb0] sm:$0xff]  ;;  %v3744_v23 = vld [vmem:[#allocation46 + $0xa0] sm:$0xff]  ;;  %v3759_v16 = vld [vmem:[#allocation46 + $0x118] sm:$0xff] }
 0x9d0   : > { %v3600_v35 = vmax.f32 %v3596_v29, %v3592_v24  ;;  %v3601_v37 = vmax.f32 %v3597_v31, %v3593_v8  ;;  %v3607_v39 = vrot.slane %v3599_v32, 7  ;;  %v3620_v25 = vrot.slane %v3599_v32, 1  ;;  %v3764_v26 = vld [vmem:[#allocation46 + $0x140] sm:$0xff]  ;;  %v3743_v29 = vld [vmem:[#allocation46 + $0x98] sm:$0xff]  ;;  %v3782_v24 = vld [vmem:[#allocation46 + $0x1d0] sm:$0xff] }
 0x9d1   : > { %3798 = vmatpush.msrb.mxu0 %v3729_v44  ;;  %v3784_v28 = vld [vmem:[#allocation46 + $0x1e0] sm:$0xff]  ;;  %v3763_v31 = vld [vmem:[#allocation46 + $0x138] sm:$0xff]  ;;  %v3741_v8 = vld [vmem:[#allocation46 + $0x88] sm:$0xff] }
 0x9d2   : > { %v3608_v20 = vrot.slane %v3600_v35, 7  ;;  %v3609_v27 = vrot.slane %v3601_v37, 7  ;;  %v3616_v41 = vsel %vm3614_vm2, -3.4028235e+38, %v3607_v39  ;;  %v3621_v42 = vrot.slane %v3600_v35, 1  ;;  %3851 = vmatpush.msrb.mxu1 %v3784_v28  ;;  %v3760_v39 = vld [vmem:[#allocation46 + $0x120] sm:$0xff] }
 0x9d3   : > { %v3622_v50 = vrot.slane %v3601_v37, 1  ;;  %v3633_v51 = vmax.f32 %v3616_v41, %v3599_v32  ;;  %v3629_v58 = vsel %vm3627_vm3, %v3620_v25, -3.4028235e+38  ;;  %3799 = vmatpush.msrb.mxu0 %v3728_v40  ;;  %v3783_v32 = vld [vmem:[#allocation46 + $0x1d8] sm:$0xff]  ;;  %v3780_v25 = vld [vmem:[#allocation46 + $0x1c0] sm:$0xff]  ;;  %v3778_v41 = vld [vmem:[#allocation46 + $0x1b0] sm:$0xff] }
 0x9d4   : > { %v3617_v57 = vsel %vm3614_vm2, -3.4028235e+38, %v3608_v20  ;;  %v3618_v19 = vsel %vm3614_vm2, -3.4028235e+38, %v3609_v27  ;;  %v3630_v45 = vsel %vm3627_vm3, %v3621_v42, -3.4028235e+38  ;;  %3852 = vmatpush.msrb.mxu1 %v3783_v32 }
 0x9d5   : > { %v3634_v62 = vmax.f32 %v3617_v57, %v3600_v35  ;;  %v3637_v63 = vmax.f32 %v3633_v51, %v3629_v58  ;;  %v3635_v46 = vmax.f32 %v3618_v19, %v3601_v37  ;;  %v3631_v52 = vsel %vm3627_vm3, %v3622_v50, -3.4028235e+38  ;;  %3800 = vmatpush.msrb.mxu0 %v3727_v2  ;;  %v3781_v35 = vld [vmem:[#allocation46 + $0x1c8] sm:$0xff]  ;;  %v3740_v37 = vld [vmem:[#allocation46 + $0x80] sm:$0xff]  ;;  %v3779_v20 = vld [vmem:[#allocation46 + $0x1b8] sm:$0xff] }
 0x9d6   : > { %3853 = vmatpush.msrb.mxu1 %v3782_v24  ;;  %v3758_v27 = vld [vmem:[#allocation46 + $0x110] sm:$0xff]  ;;  %v3757_v42 = vld [vmem:[#allocation46 + $0x108] sm:$0xff]  ;;  %v3756_v50 = vld [vmem:[#allocation46 + $0x100] sm:$0xff] }
 0x9d7   : > { %3679 = vmatpush.msra.mxu2 %v3637_v63  ;;  %v3638_v43 = vmax.f32 %v3634_v62, %v3630_v45  ;;  %v3639_v1 = vmax.f32 %v3635_v46, %v3631_v52  ;;  %3801 = vmatpush.msrb.mxu0 %v3726_v6  ;;  %v3777_v44 = vld [vmem:[#allocation46 + $0x1a8] sm:$0xff]  ;;  %v3776_v51 = vld [vmem:[#allocation46 + $0x1a0] sm:$0xff]  ;;  %v3775_v40 = vld [vmem:[#allocation46 + $0x198] sm:$0xff] }
 0x9d8   : > { %6973 = vmatmul.msk.f32.vlgmr.msra.gmra.mxu2 %vm2320_vm0, %v10599_v7  ;;  %3854 = vmatpush.msrb.mxu1 %v3781_v35  ;;  %v3774_v57 = vld [vmem:[#allocation46 + $0x190] sm:$0xff]  ;;  %v3773_v58 = vld [vmem:[#allocation46 + $0x188] sm:$0xff]  ;;  %v3772_v19 = vld [vmem:[#allocation46 + $0x180] sm:$0xff] }
 0x9d9   : > { %3699 = vmatpush.msrb.mxu2 %v3638_v43  ;;  %3719 = vmatpush.msrb.mxu3 %v3639_v1  ;;  %v3894_v52 = vld [vmem:[#allocation18 + $0x78] sm:$0xff]  ;;  %v3893_v43 = vld [vmem:[#allocation18 + $0x70] sm:$0xff]  ;;  %v3892_v1 = vld [vmem:[#allocation18 + $0x68] sm:$0xff] }
 0x9da   : > { %6975 = vmatmul.msk.f32.vlgmr.msrb.gmra.mxu3 %vm2320_vm0, %v10599_v7  ;;  %3802 = vmatpush.msrb.mxu0 %v3725_v54  ;;  %v3889_v2 = vld [vmem:[#allocation18 + $0x50] sm:$0xff]  ;;  %v3886_v6 = vld [vmem:[#allocation18 + $0x38] sm:$0xff]  ;;  %v3883_v54 = vld [vmem:[#allocation18 + $0x20] sm:$0xff] }
 0x9db   : > { %3808 = vmatpush.msra.mxu2 %v3755_v48  ;;  %3828 = vmatpush.msra.mxu3 %v3771_v47  ;;  %v3891_v48 = vld [vmem:[#allocation18 + $0x60] sm:$0xff]  ;;  %v3890_v47 = vld [vmem:[#allocation18 + $0x58] sm:$0xff]  ;;  %v3998_v35 = vld [vmem:[#allocation12 + $0xb8] sm:$0xff] }
 0x9dc   : > { %3803 = vmatpush.msrb.mxu0 %v3724_v21  ;;  %3855 = vmatpush.msrb.mxu1 %v3780_v25  ;;  %v7380_v21 = vld [vmem:[#allocation16] ss:$0 sm:$0xff]  ;;  %v4001_v24 = vld [vmem:[#allocation12 + $0xd0] sm:$0xff] }
 0x9dd   : > { %3809 = vmatpush.msra.mxu2 %v3754_v4  ;;  %3829 = vmatpush.msra.mxu3 %v3770_v5  ;;  %v3888_v4 = vld [vmem:[#allocation18 + $0x48] sm:$0xff]  ;;  %v3887_v5 = vld [vmem:[#allocation18 + $0x40] sm:$0xff]  ;;  %v4004_v32 = vld [vmem:[#allocation12 + $0xe8] sm:$0xff] }
 0x9de   : > { %3856 = vmatpush.msrb.mxu1 %v3779_v20  ;;  %3899 = vmatpush.msra.mxu0 %v3894_v52  ;;  %v3992_v52 = vld [vmem:[#allocation12 + $0x88] sm:$0xff] }
 0x9df   : > { %3810 = vmatpush.msra.mxu2 %v3753_v9  ;;  %3830 = vmatpush.msra.mxu3 %v3769_v10  ;;  %v3885_v9 = vld [vmem:[#allocation18 + $0x30] sm:$0xff]  ;;  %v3884_v10 = vld [vmem:[#allocation18 + $0x28] sm:$0xff] }
 0x9e0   : > { %6974 = vmatmul.msk.f32.vlgmr.msrb.gmra.mxu2 %vm2320_vm0, %v10599_v7  ;;  %v3745_v7 = vld [vmem:[#allocation46 + $0xa8] sm:$0xff]  ;;  %3857 = vmatpush.msrb.mxu1 %v3778_v41  ;;  %v3920_v41 = vld [vmem:[#allocation15] sm:$0xf] }
 0x9e1   : > { %3811 = vmatpush.msra.mxu2 %v3752_v11  ;;  %3831 = vmatpush.msra.mxu3 %v3768_v60  ;;  %v3882_v11 = vld [vmem:[#allocation18 + $0x18] sm:$0xff]  ;;  %v3881_v60 = vld [vmem:[#allocation18 + $0x10] sm:$0xff] }
 0x9e2   : > { %3858 = vmatpush.msrb.mxu1 %v3777_v44  ;;  %3900 = vmatpush.msra.mxu0 %v3893_v43  ;;  %v3964_v44 = vld [vmem:[#allocation12 + $0x78] sm:$0xff] }
 0x9e3   : > { %3812 = vmatpush.msra.mxu2 %v3751_v12  ;;  %3832 = vmatpush.msra.mxu3 %v3767_v13  ;;  %v3880_v12 = vld [vmem:[#allocation18 + $0x8] sm:$0xff]  ;;  %v3879_v13 = vld [vmem:[#allocation18] sm:$0xff] }
 0x9e4   : > { %3859 = vmatpush.msrb.mxu1 %v3776_v51  ;;  %3901 = vmatpush.msra.mxu0 %v3892_v1  ;;  %v3995_v51 = vld [vmem:[#allocation12 + $0xa0] sm:$0xff]  ;;  %v3960_v43 = vld [vmem:[#allocation12 + $0x58] sm:$0xff] }
 0x9e5   : > { %3813 = vmatpush.msra.mxu2 %v3750_v55  ;;  %3833 = vmatpush.msra.mxu3 %v3766_v14  ;;  %v4085_v1 = vld [vmem:[#allocation12 + $0x160] sm:$0xff] }
 0x9e6   : > { %3860 = vmatpush.msrb.mxu1 %v3775_v40  ;;  %3902 = vmatpush.msra.mxu0 %v3891_v48  ;;  %v3963_v40 = vld [vmem:[#allocation12 + $0x70] sm:$0xff] }
 0x9e7   : > { %3814 = vmatpush.msra.mxu2 %v3749_v61  ;;  %3834 = vmatpush.msra.mxu3 %v3765_v49  ;;  %v3959_v48 = vld [vmem:[#allocation12 + $0x50] sm:$0xff] }
 0x9e8   : > { %3861 = vmatpush.msrb.mxu1 %v3774_v57  ;;  %3903 = vmatpush.msra.mxu0 %v3890_v47  ;;  %v4087_v57 = vld [vmem:[#allocation12 + $0x170] sm:$0xff]  ;;  %v4084_v47 = vld [vmem:[#allocation12 + $0x158] sm:$0xff] }
 0x9e9   : > { %3815 = vmatpush.msra.mxu2 %v3748_v36  ;;  %3835 = vmatpush.msra.mxu3 %v3764_v26 }
 0x9ea   : > { %3862 = vmatpush.msrb.mxu1 %v3773_v58  ;;  %3904 = vmatpush.msra.mxu0 %v3889_v2  ;;  %v3994_v58 = vld [vmem:[#allocation12 + $0x98] sm:$0xff]  ;;  %v3958_v2 = vld [vmem:[#allocation12 + $0x48] sm:$0xff] }
 0x9eb   : > { %3816 = vmatpush.msra.mxu2 %v3747_v15  ;;  %3836 = vmatpush.msra.mxu3 %v3763_v31  ;;  %v4005_v31 = vld [vmem:[#allocation12 + $0xf0] sm:$0xff] }
 0x9ec   : > { %3863 = vmatpush.msrb.mxu1 %v3772_v19  ;;  %3905 = vmatpush.msra.mxu0 %v3888_v4  ;;  %v3962_v19 = vld [vmem:[#allocation12 + $0x68] sm:$0xff]  ;;  %v4083_v4 = vld [vmem:[#allocation12 + $0x150] sm:$0xff] }
 0x9ed   : > { %3817 = vmatpush.msra.mxu2 %v3746_v17  ;;  %3837 = vmatpush.msra.mxu3 %v3762_v30  ;;  %v7379_v17 = vld [vmem:[#allocation13] ss:$0 sm:$0xff]  ;;  %v4002_v30 = vld [vmem:[#allocation12 + $0xd8] sm:$0xff] }
 0x9ee   : > { %3906 = vmatpush.msra.mxu0 %v3887_v5  ;;  %v3957_v5 = vld [vmem:[#allocation12 + $0x40] sm:$0xff] }
 0x9ef   : > { %3818 = vmatpush.msra.mxu2 %v3745_v7  ;;  %3838 = vmatpush.msra.mxu3 %v3761_v34  ;;  %v3999_v34 = vld [vmem:[#allocation12 + $0xc0] sm:$0xff] }
 0x9f0   : > { %3907 = vmatpush.msra.mxu0 %v3886_v6  ;;  %v4082_v6 = vld [vmem:[#allocation12 + $0x148] sm:$0xff] }
 0x9f1   : > { %3819 = vmatpush.msra.mxu2 %v3744_v23  ;;  %3839 = vmatpush.msra.mxu3 %v3760_v39  ;;  %v3997_v39 = vld [vmem:[#allocation12 + $0xb0] sm:$0xff] }
 0x9f2   : > { %3908 = vmatpush.msra.mxu0 %v3885_v9  ;;  %v3956_v9 = vld [vmem:[#allocation12 + $0x38] sm:$0xff] }
 0x9f3   : > { %3820 = vmatpush.msra.mxu2 %v3743_v29  ;;  %3840 = vmatpush.msra.mxu3 %v3759_v16  ;;  %v4006_v29 = vld [vmem:[#allocation12 + $0xf8] sm:$0xff]  ;;  %v3996_v16 = vld [vmem:[#allocation12 + $0xa8] sm:$0xff] }
 0x9f4   : > { %3909 = vmatpush.msra.mxu0 %v3884_v10  ;;  %4007 = vmatpush.msra.mxu1 %v4006_v29  ;;  %v4081_v10 = vld [vmem:[#allocation12 + $0x140] sm:$0xff]  ;;  %v4131_v29 = vld [vmem:[#allocation19 + $0x78] sm:$0xff] }
 0x9f5   : > { %3821 = vmatpush.msra.mxu2 %v3742_v33  ;;  %3841 = vmatpush.msra.mxu3 %v3758_v27  ;;  %v4003_v33 = vld [vmem:[#allocation12 + $0xe0] sm:$0xff] }
 0x9f6   : > { %3910 = vmatpush.msra.mxu0 %v3883_v54  ;;  %4008 = vmatpush.msra.mxu1 %v4005_v31  ;;  %v3955_v54 = vld [vmem:[#allocation12 + $0x30] sm:$0xff]  ;;  %v4130_v31 = vld [vmem:[#allocation19 + $0x70] sm:$0xff] }
 0x9f7   : > { %3822 = vmatpush.msra.mxu2 %v3741_v8  ;;  %3842 = vmatpush.msra.mxu3 %v3757_v42  ;;  %v4000_v8 = vld [vmem:[#allocation12 + $0xc8] sm:$0xff] }
 0x9f8   : > { %3911 = vmatpush.msra.mxu0 %v3882_v11  ;;  %4009 = vmatpush.msra.mxu1 %v4004_v32  ;;  %v3966_v42 = vld [vmem:[#allocation15 + $0x4] sm:$0xf]  ;;  %v4080_v11 = vld [vmem:[#allocation12 + $0x138] sm:$0xff] }
 0x9f9   : > { %3823 = vmatpush.msra.mxu2 %v3740_v37  ;;  %3843 = vmatpush.msra.mxu3 %v3756_v50  ;;  %v7381_v37 = vld [vmem:[#allocation9] ss:$0 sm:$0xff] }
 0x9fa   : > { %3912 = vmatpush.msra.mxu0 %v3881_v60  ;;  %4010 = vmatpush.msra.mxu1 %v4003_v33  ;;  %v4088_v50 = vld [vmem:[#allocation12 + $0x178] sm:$0xff]  ;;  %v3954_v60 = vld [vmem:[#allocation12 + $0x28] sm:$0xff]  ;;  %v4128_v33 = vld [vmem:[#allocation19 + $0x60] sm:$0xff] }
 0x9fb   : > { %v4129_v32 = vld [vmem:[#allocation19 + $0x68] sm:$0xff] }
 0x9fc   : > { %3913 = vmatpush.msra.mxu0 %v3880_v12  ;;  %4011 = vmatpush.msra.mxu1 %v4002_v30  ;;  %v4079_v12 = vld [vmem:[#allocation12 + $0x130] sm:$0xff]  ;;  %v4127_v30 = vld [vmem:[#allocation19 + $0x58] sm:$0xff] }
 0x9fe   : > { %3914 = vmatpush.msra.mxu0 %v3879_v13  ;;  %4012 = vmatpush.msra.mxu1 %v4001_v24  ;;  %v3953_v13 = vld [vmem:[#allocation12 + $0x20] sm:$0xff] }
 0xa00   : > { %4013 = vmatpush.msra.mxu1 %v4000_v8 }
 0xa02   : > { %4014 = vmatpush.msra.mxu1 %v3999_v34 }
 0xa04   : > { %4015 = vmatpush.msra.mxu1 %v3998_v35  ;;  %v4126_v35 = vld [vmem:[#allocation19 + $0x50] sm:$0xff] }
 0xa06   : > { %4016 = vmatpush.msra.mxu1 %v3997_v39  ;;  %v4124_v39 = vld [vmem:[#allocation19 + $0x40] sm:$0xff] }
 0xa08   : > { %4017 = vmatpush.msra.mxu1 %v3996_v16  ;;  %v4122_v16 = vld [vmem:[#allocation19 + $0x30] sm:$0xff] }
 0xa0a   : > { %4018 = vmatpush.msra.mxu1 %v3995_v51  ;;  %v4178_v51 = vld [vmem:[#allocation42 + $0x78] sm:$0xff] }
 0xa0c   : > { %4019 = vmatpush.msra.mxu1 %v3994_v58  ;;  %v4175_v58 = vld [vmem:[#allocation42 + $0x60] sm:$0xff] }
 0xa4d   : > { %v3661_v62 = vpop.f32.mrf.mxu2 }
 0xa4e   : > { %3804 = vmatmul.f32.vlgmr.msrb.gmra.mxu0 %v3661_v62  ;;  %v4086_v62 = vld [vmem:[#allocation12 + $0x168] sm:$0xff] }
 0xa4f   : > { %4132 = vmatpush.msrb.mxu0 %v4131_v29  ;;  %v4282_v29 = vld [vmem:[#allocation37 + $0xc8] sm:$0xff] }
 0xa51   : > { %4133 = vmatpush.msrb.mxu0 %v4130_v31  ;;  %v7385_v31 = vld [vmem:[#allocation34] ss:$0 sm:$0xff] }
 0xa53   : > { %4134 = vmatpush.msrb.mxu0 %v4129_v32  ;;  %v4281_v32 = vld [vmem:[#allocation37 + $0xc0] sm:$0xff] }
 0xa55   : > { %4135 = vmatpush.msrb.mxu0 %v4128_v33  ;;  %v4280_v33 = vld [vmem:[#allocation37 + $0xb8] sm:$0xff] }
 0xa57   : > { %4136 = vmatpush.msrb.mxu0 %v4127_v30 }
 0xa59   : > { %4137 = vmatpush.msrb.mxu0 %v4126_v35  ;;  %v4204_v35 = vld [vmem:[%s11608_s4] sm:$0xf] }
 0xa5b   : > { %v3681_v63 = vpop.f32.mrf.mxu2 }
 0xa5c   : > { %3824 = vmatmul.f32.vlgmr.msra.gmra.mxu2 %v3681_v63  ;;  %v3993_v63 = vld [vmem:[#allocation12 + $0x90] sm:$0xff] }
 0xa5d   : > { %v3721_v46 = vpop.f32.mrf.mxu3  ;;  %4020 = vmatpush.msra.mxu1 %v3993_v63  ;;  %v4172_v63 = vld [vmem:[#allocation42 + $0x48] sm:$0xff] }
 0xa5e   : > { %3864 = vmatmul.f32.vlgmr.msrb.gmra.mxu1 %v3721_v46  ;;  %v3961_v46 = vld [vmem:[#allocation12 + $0x60] sm:$0xff] }
 0xa5f   : > { %4021 = vmatpush.msra.mxu1 %v3992_v52  ;;  %v4169_v52 = vld [vmem:[#allocation42 + $0x30] sm:$0xff] }
 0xa63   : > { %v3701_v45 = vpop.f32.mrf.mxu2 }
 0xa64   : > { %3844 = vmatmul.f32.vlgmr.msra.gmra.mxu3 %v3701_v45  ;;  %v4048_v45 = vld [vmem:[#allocation15 + $0x8] sm:$0xf] }
 0xacb   : > { %v3805_v14 = vpop.f32.mrf.mxu0 }
 0xadb   : > { %v3865_v36 = vpop.f32.mrf.mxu1 }
 0xadf   : > { %v3825_v55 = vpop.f32.mrf.mxu2 }
 0xae0   : > { %v3826_v61 = vadd.f32 %v3825_v55, %v3805_v14  ;;  %v4078_v55 = vld [vmem:[#allocation12 + $0x128] sm:$0xff]  ;;  %v3952_v14 = vld [vmem:[#allocation12 + $0x18] sm:$0xff] }
 0xae7   : > { %v3845_v49 = vpop.f32.mrf.mxu3 }
 0xae8   : > { %v3846_v15 = vadd.f32 %v3845_v49, %v3826_v61  ;;  %v3951_v61 = vld [vmem:[#allocation12 + $0x10] sm:$0xff]  ;;  %v3950_v49 = vld [vmem:[#allocation12 + $0x8] sm:$0xff] }
 0xaea   : > { %v10652_v7 = vadd.f32 %v3865_v36, %v3846_v15  ;;  %v3991_v36 = vld [vmem:[#allocation12 + $0x80] sm:$0xff] }
 0xaeb   : > { %v3949_v15 = vld [vmem:[#allocation12] sm:$0xff]  ;;  %4022 = vmatpush.msra.mxu1 %v3991_v36 }
 0xaec   : > { %v3872_v23 = vmul.f32 %v7379_v17, %v10652_v7  ;;  %v4077_v17 = vld [vmem:[#allocation12 + $0x120] sm:$0xff] }
 0xaed   : > { %4183 = vmatpush.msrb.mxu1 %v4178_v51  ;;  %v4243_v51 = vld [vmem:[#allocation37 + $0x60] sm:$0xff] }
 0xaee   : > { %v3877_v26 = vadd.f32 %v7380_v21, %v3872_v23  ;;  %v4076_v21 = vld [vmem:[#allocation12 + $0x118] sm:$0xff]  ;;  %v4075_v23 = vld [vmem:[#allocation12 + $0x110] sm:$0xff] }
 0xaf0   : > { %v3878_v28 = vmax.f32 %v3877_v26, 0.0  ;;  %v4074_v26 = vld [vmem:[#allocation12 + $0x108] sm:$0xff] }
 0xaf2   : > { %3915 = vmatmul.f32.vlgmr.msra.gmra.mxu0 %v3878_v28  ;;  %v4073_v28 = vld [vmem:[#allocation12 + $0x100] sm:$0xff] }
 0xb6f   : > { %v3916_v25 = vpop.f32.mrf.mxu0 }
 0xb70   : > { %v3917_v20 = vadd.f32 %v7381_v37, %v3916_v25  ;;  %v4125_v37 = vld [vmem:[#allocation19 + $0x48] sm:$0xff]  ;;  %v4123_v25 = vld [vmem:[#allocation19 + $0x38] sm:$0xff] }
 0xb71   : > { %4138 = vmatpush.msrb.mxu0 %v4125_v37  ;;  %v6987_v37 = vld [vmem:[%s11608_s4 + $0x8] sm:$0xf] }
 0xb72   : > { %v3919_v27 = vmax.f32 %v3917_v20, 0.0  ;;  %v4121_v20 = vld [vmem:[#allocation19 + $0x28] sm:$0xff] }
 0xb73   : > { %4139 = vmatpush.msrb.mxu0 %v4124_v39  ;;  %v4278_v39 = vld [vmem:[#allocation37 + $0xa8] sm:$0xff] }
 0xb74   : > { %6976 = vmatpush.msk.msrb.mxu2 %vm3925_vm10, %v3919_v27  ;;  %6978 = vmatpush.msk.msrb.mxu3 %vm3925_vm10, %v3919_v27 }
 0xb75   : > { %6977 = vmatmul.msk.f32.vlgmr.msrb.gmra.mxu2 %vm3921_vm11, %v3920_v41  ;;  %6979 = vmatmul.msk.f32.vlgmr.msrb.gmra.mxu3 %vm3921_vm11, %v3966_v42  ;;  %v4119_v41 = vld [vmem:[#allocation19 + $0x18] sm:$0xff]  ;;  %v4118_v42 = vld [vmem:[#allocation19 + $0x10] sm:$0xff] }
 0xb76   : > { %6980 = vmatpush.msk.msra.mxu3 %vm3925_vm10, %v3919_v27  ;;  %4027 = vmatpush.msra.mxu2 %v3964_v44  ;;  %v4120_v27 = vld [vmem:[#allocation19 + $0x20] sm:$0xff]  ;;  %v4117_v44 = vld [vmem:[#allocation19 + $0x8] sm:$0xff] }
 0xb77   : > { %4140 = vmatpush.msrb.mxu0 %v4123_v25  ;;  %v4370_v25 = vld [vmem:[#allocation37 + $0x178] sm:$0xff] }
 0xb78   : > { %4089 = vmatpush.msrb.mxu3 %v4088_v50  ;;  %4028 = vmatpush.msra.mxu2 %v3963_v40  ;;  %v4116_v50 = vld [vmem:[#allocation19] sm:$0xff]  ;;  %v4177_v40 = vld [vmem:[#allocation42 + $0x70] sm:$0xff] }
 0xb79   : > { %4141 = vmatpush.msrb.mxu0 %v4122_v16  ;;  %4184 = vmatpush.msrb.mxu1 %v4177_v40  ;;  %v4246_v16 = vld [vmem:[#allocation37 + $0x78] sm:$0xff] }
 0xb7a   : > { %4090 = vmatpush.msrb.mxu3 %v4087_v57  ;;  %4029 = vmatpush.msra.mxu2 %v3962_v19  ;;  %v4176_v57 = vld [vmem:[#allocation42 + $0x68] sm:$0xff]  ;;  %v4174_v19 = vld [vmem:[#allocation42 + $0x58] sm:$0xff] }
 0xb7b   : > { %4142 = vmatpush.msrb.mxu0 %v4121_v20  ;;  %4185 = vmatpush.msrb.mxu1 %v4176_v57  ;;  %v4369_v20 = vld [vmem:[#allocation37 + $0x170] sm:$0xff]  ;;  %v4366_v40 = vld [vmem:[#allocation37 + $0x158] sm:$0xff] }
 0xb7c   : > { %4091 = vmatpush.msrb.mxu3 %v4086_v62  ;;  %4030 = vmatpush.msra.mxu2 %v3961_v46  ;;  %v4173_v62 = vld [vmem:[#allocation42 + $0x50] sm:$0xff]  ;;  %v4171_v46 = vld [vmem:[#allocation42 + $0x40] sm:$0xff] }
 0xb7d   : > { %6981 = vmatmul.msk.f32.vlgmr.msra.gmra.mxu3 %vm3921_vm11, %v4048_v45  ;;  %4143 = vmatpush.msrb.mxu0 %v4120_v27  ;;  %v4170_v45 = vld [vmem:[#allocation42 + $0x38] sm:$0xff]  ;;  %v4245_v27 = vld [vmem:[#allocation37 + $0x70] sm:$0xff] }
 0xb7e   : > { %4031 = vmatpush.msra.mxu2 %v3960_v43  ;;  %4092 = vmatpush.msrb.mxu3 %v4085_v1  ;;  %v4168_v43 = vld [vmem:[#allocation42 + $0x28] sm:$0xff]  ;;  %v4242_v57 = vld [vmem:[#allocation37 + $0x58] sm:$0xff] }
 0xb7f   : > { %4144 = vmatpush.msrb.mxu0 %v4119_v41  ;;  %4186 = vmatpush.msrb.mxu1 %v4175_v58  ;;  %v4368_v41 = vld [vmem:[#allocation37 + $0x168] sm:$0xff]  ;;  %v4365_v58 = vld [vmem:[#allocation37 + $0x150] sm:$0xff] }
 0xb80   : > { %4032 = vmatpush.msra.mxu2 %v3959_v48  ;;  %4093 = vmatpush.msrb.mxu3 %v4084_v47 }
 0xb81   : > { %4145 = vmatpush.msrb.mxu0 %v4118_v42  ;;  %4187 = vmatpush.msrb.mxu1 %v4174_v19  ;;  %v4244_v42 = vld [vmem:[#allocation37 + $0x68] sm:$0xff]  ;;  %v4241_v19 = vld [vmem:[#allocation37 + $0x50] sm:$0xff] }
 0xb82   : > { %4033 = vmatpush.msra.mxu2 %v3958_v2  ;;  %4094 = vmatpush.msrb.mxu3 %v4083_v4  ;;  %v7382_v2 = vld [vmem:[#allocation10] ss:$0 sm:$0xff] }
 0xb83   : > { %4146 = vmatpush.msrb.mxu0 %v4117_v44  ;;  %4188 = vmatpush.msrb.mxu1 %v4173_v62  ;;  %v4367_v44 = vld [vmem:[#allocation37 + $0x160] sm:$0xff]  ;;  %v4364_v62 = vld [vmem:[#allocation37 + $0x148] sm:$0xff] }
 0xb84   : > { %4034 = vmatpush.msra.mxu2 %v3957_v5  ;;  %4095 = vmatpush.msrb.mxu3 %v4082_v6 }
 0xb85   : > { %4147 = vmatpush.msrb.mxu0 %v4116_v50  ;;  %4189 = vmatpush.msrb.mxu1 %v4172_v63  ;;  %v6984_v50 = vld [vmem:[%s11608_s4 + $0x4] sm:$0xf]  ;;  %v4240_v63 = vld [vmem:[#allocation37 + $0x48] sm:$0xff] }
 0xb86   : > { %4035 = vmatpush.msra.mxu2 %v3956_v9  ;;  %4096 = vmatpush.msrb.mxu3 %v4081_v10  ;;  %v4167_v10 = vld [vmem:[#allocation42 + $0x20] sm:$0xff] }
 0xb87   : > { %4190 = vmatpush.msrb.mxu1 %v4171_v46  ;;  %v4239_v46 = vld [vmem:[#allocation37 + $0x40] sm:$0xff] }
 0xb88   : > { %4036 = vmatpush.msra.mxu2 %v3955_v54  ;;  %4097 = vmatpush.msrb.mxu3 %v4080_v11  ;;  %v4166_v54 = vld [vmem:[#allocation42 + $0x18] sm:$0xff]  ;;  %v4165_v11 = vld [vmem:[#allocation42 + $0x10] sm:$0xff] }
 0xb89   : > { %4191 = vmatpush.msrb.mxu1 %v4170_v45  ;;  %v4238_v45 = vld [vmem:[#allocation37 + $0x38] sm:$0xff] }
 0xb8a   : > { %4037 = vmatpush.msra.mxu2 %v3954_v60  ;;  %4098 = vmatpush.msrb.mxu3 %v4079_v12  ;;  %v4164_v60 = vld [vmem:[#allocation42 + $0x8] sm:$0xff]  ;;  %v4163_v12 = vld [vmem:[#allocation42] sm:$0xff] }
 0xb8b   : > { %4192 = vmatpush.msrb.mxu1 %v4169_v52  ;;  %v4237_v52 = vld [vmem:[#allocation37 + $0x30] sm:$0xff] }
 0xb8c   : > { %4038 = vmatpush.msra.mxu2 %v3953_v13  ;;  %4099 = vmatpush.msrb.mxu3 %v4078_v55  ;;  %v7383_v13 = vld [vmem:[#allocation39] ss:$0 sm:$0xff] }
 0xb8d   : > { %4193 = vmatpush.msrb.mxu1 %v4168_v43  ;;  %v4236_v43 = vld [vmem:[#allocation37 + $0x28] sm:$0xff] }
 0xb8e   : > { %4039 = vmatpush.msra.mxu2 %v3952_v14  ;;  %4100 = vmatpush.msrb.mxu3 %v4077_v17  ;;  %v4288_v17 = vld [vmem:[#allocation37 + $0xf8] sm:$0xff] }
 0xb8f   : > { %4194 = vmatpush.msrb.mxu1 %v4167_v10  ;;  %v4362_v10 = vld [vmem:[#allocation37 + $0x138] sm:$0xff] }
 0xb90   : > { %4040 = vmatpush.msra.mxu2 %v3951_v61  ;;  %4101 = vmatpush.msrb.mxu3 %v4076_v21  ;;  %v7384_v61 = vld [vmem:[#allocation40] ss:$0 sm:$0xff]  ;;  %v4287_v21 = vld [vmem:[#allocation37 + $0xf0] sm:$0xff] }
 0xb91   : > { %4195 = vmatpush.msrb.mxu1 %v4166_v54  ;;  %v4275_v54 = vld [vmem:[#allocation37 + $0x90] sm:$0xff] }
 0xb92   : > { %4041 = vmatpush.msra.mxu2 %v3950_v49  ;;  %4102 = vmatpush.msrb.mxu3 %v4075_v23  ;;  %v4286_v23 = vld [vmem:[#allocation37 + $0xe8] sm:$0xff] }
 0xb93   : > { %4196 = vmatpush.msrb.mxu1 %v4165_v11  ;;  %v4361_v11 = vld [vmem:[#allocation37 + $0x130] sm:$0xff] }
 0xb94   : > { %4042 = vmatpush.msra.mxu2 %v3949_v15  ;;  %4103 = vmatpush.msrb.mxu3 %v4074_v26  ;;  %v4285_v26 = vld [vmem:[#allocation37 + $0xe0] sm:$0xff] }
 0xb95   : > { %4197 = vmatpush.msrb.mxu1 %v4164_v60  ;;  %v4274_v60 = vld [vmem:[#allocation37 + $0x88] sm:$0xff] }
 0xb96   : > { %4104 = vmatpush.msrb.mxu3 %v4073_v28  ;;  %v4284_v28 = vld [vmem:[#allocation37 + $0xd8] sm:$0xff] }
 0xb97   : > { %4198 = vmatpush.msrb.mxu1 %v4163_v12  ;;  %v4360_v12 = vld [vmem:[#allocation37 + $0x128] sm:$0xff] }
 0xb98   : > { %4289 = vmatpush.msra.mxu3 %v4288_v17  ;;  %v4411_v17 = vld [vmem:[#allocation43 + $0x68] sm:$0xff] }
 0xb9a   : > { %4290 = vmatpush.msra.mxu3 %v4287_v21  ;;  %v4356_v21 = vld [vmem:[#allocation37 + $0x108] sm:$0xff] }
 0xb9c   : > { %4291 = vmatpush.msra.mxu3 %v4286_v23  ;;  %v4410_v23 = vld [vmem:[#allocation43 + $0x60] sm:$0xff] }
 0xb9e   : > { %4292 = vmatpush.msra.mxu3 %v4285_v26  ;;  %v4355_v26 = vld [vmem:[#allocation37 + $0x100] sm:$0xff] }
 0xba0   : > { %4293 = vmatpush.msra.mxu3 %v4284_v28  ;;  %v4409_v28 = vld [vmem:[#allocation43 + $0x58] sm:$0xff] }
 0xbf8   : > { %v3946_v24 = vpop.f32.mrf.mxu2  ;;  %v3987_v8 = vpop.f32.mrf.mxu3 }
 0xbf9   : > { %4023 = vmatmul.f32.vlgmr.msra.gmra.mxu1 %v3987_v8  ;;  %4043 = vmatmul.f32.vlgmr.msra.gmra.mxu2 %v3946_v24  ;;  %v4279_v8 = vld [vmem:[#allocation37 + $0xb0] sm:$0xff] }
 0xc00   : > { %v4069_v34 = vpop.f32.mrf.mxu3 }
 0xc01   : > { %4105 = vmatmul.f32.vlgmr.msrb.gmra.mxu3 %v4069_v34 }
 0xc76   : > { %v4024_v48 = vpop.f32.mrf.mxu1 }
 0xc7c   : > { %v4044_v1 = vpop.f32.mrf.mxu2 }
 0xc7d   : > { %v4045_v47 = vadd.f32 %v4044_v1, %v4024_v48  ;;  %v4235_v1 = vld [vmem:[#allocation37 + $0x20] sm:$0xff]  ;;  %v4234_v48 = vld [vmem:[#allocation37 + $0x18] sm:$0xff] }
 0xc84   : > { %v4106_v4 = vpop.f32.mrf.mxu3 }
 0xc85   : > { %v4109_v5 = vadd.f32 %v4106_v4, %v4045_v47  ;;  %v4233_v47 = vld [vmem:[#allocation37 + $0x10] sm:$0xff]  ;;  %v4277_v4 = vld [vmem:[#allocation37 + $0xa0] sm:$0xff] }
 0xc87   : > { %v4114_v6 = vadd.f32 %v7382_v2, %v4109_v5  ;;  %v4232_v2 = vld [vmem:[#allocation37 + $0x8] sm:$0xff]  ;;  %v4231_v5 = vld [vmem:[#allocation37] sm:$0xff] }
 0xc89   : > { %v4115_v9 = vmax.f32 %v4114_v6, 0.0  ;;  %v4363_v6 = vld [vmem:[#allocation37 + $0x140] sm:$0xff] }
 0xc8b   : > { %4148 = vmatmul.f32.vlgmr.msrb.gmra.mxu0 %v4115_v9  ;;  %v4276_v9 = vld [vmem:[#allocation37 + $0x98] sm:$0xff] }
 0xd08   : > { %v4149_v55 = vpop.f32.mrf.mxu0 }
 0xd09   : > { %v10662_v14 = vadd.f32 %v4149_v55, %v10652_v7  ;;  %v4283_v7 = vld [vmem:[#allocation37 + $0xd0] sm:$0xff]  ;;  %v4359_v55 = vld [vmem:[#allocation37 + $0x120] sm:$0xff] }
 0xd0a   : > { %4294 = vmatpush.msra.mxu3 %v4283_v7  ;;  %v4408_v7 = vld [vmem:[#allocation43 + $0x50] sm:$0xff] }
 0xd0b   : > { %v4156_v49 = vmul.f32 %v7383_v13, %v10662_v14  ;;  %v4273_v13 = vld [vmem:[#allocation37 + $0x80] sm:$0xff] }
 0xd0c   : > { %4295 = vmatpush.msra.mxu3 %v4282_v29  ;;  %v4407_v29 = vld [vmem:[#allocation43 + $0x48] sm:$0xff] }
 0xd0d   : > { %v4161_v36 = vadd.f32 %v7384_v61, %v4156_v49  ;;  %v4358_v61 = vld [vmem:[#allocation37 + $0x118] sm:$0xff] }
 0xd0e   : > { %4296 = vmatpush.msra.mxu3 %v4281_v32  ;;  %v4413_v49 = vld [vmem:[#allocation43 + $0x78] sm:$0xff] }
 0xd0f   : > { %v4162_v15 = vmax.f32 %v4161_v36, 0.0  ;;  %v4412_v36 = vld [vmem:[#allocation43 + $0x70] sm:$0xff]  ;;  %4414 = vmatpush.msra.mxu1 %v4413_v49  ;;  %v4491_v49 = vld [vmem:[#allocation61 + $0xf0] sm:$0xff] }
 0xd10   : > { %4297 = vmatpush.msra.mxu3 %v4280_v33 }
 0xd11   : > { %4199 = vmatmul.f32.vlgmr.msrb.gmra.mxu1 %v4162_v15  ;;  %v4357_v15 = vld [vmem:[#allocation37 + $0x110] sm:$0xff] }
 0xd12   : > { %4298 = vmatpush.msra.mxu3 %v4279_v8  ;;  %4415 = vmatpush.msra.mxu1 %v4412_v36  ;;  %v4404_v8 = vld [vmem:[#allocation43 + $0x30] sm:$0xff] }
 0xd13   : > { %v4492_v36 = vld [vmem:[#allocation61 + $0xf8] sm:$0xff] }
 0xd14   : > { %4299 = vmatpush.msra.mxu3 %v4278_v39  ;;  %4416 = vmatpush.msra.mxu1 %v4411_v17  ;;  %v4400_v39 = vld [vmem:[#allocation43 + $0x10] sm:$0xff]  ;;  %v4487_v17 = vld [vmem:[#allocation61 + $0xd0] sm:$0xff] }
 0xd16   : > { %4300 = vmatpush.msra.mxu3 %v4277_v4  ;;  %4417 = vmatpush.msra.mxu1 %v4410_v23  ;;  %v4507_v4 = vld [vmem:[#allocation61 + $0x170] sm:$0xff]  ;;  %v4481_v23 = vld [vmem:[#allocation61 + $0xa0] sm:$0xff] }
 0xd18   : > { %4301 = vmatpush.msra.mxu3 %v4276_v9  ;;  %4418 = vmatpush.msra.mxu1 %v4409_v28  ;;  %v4503_v9 = vld [vmem:[#allocation61 + $0x150] sm:$0xff]  ;;  %v4484_v28 = vld [vmem:[#allocation61 + $0xb8] sm:$0xff] }
 0xd1a   : > { %4302 = vmatpush.msra.mxu3 %v4275_v54  ;;  %4419 = vmatpush.msra.mxu1 %v4408_v7  ;;  %v4497_v54 = vld [vmem:[#allocation61 + $0x120] sm:$0xff] }
 0xd1b   : > { %v4477_v7 = vld [vmem:[#allocation61 + $0x80] sm:$0xff] }
 0xd1c   : > { %4303 = vmatpush.msra.mxu3 %v4274_v60  ;;  %4420 = vmatpush.msra.mxu1 %v4407_v29  ;;  %v4500_v60 = vld [vmem:[#allocation61 + $0x138] sm:$0xff]  ;;  %v4479_v29 = vld [vmem:[#allocation61 + $0x90] sm:$0xff] }
 0xd1e   : > { %4304 = vmatpush.msra.mxu3 %v4273_v13  ;;  %v4495_v13 = vld [vmem:[#allocation61 + $0x110] sm:$0xff] }
 0xd8e   : > { %v4200_v30 = vpop.f32.mrf.mxu1 }
 0xd8f   : > { %v4201_v24 = vadd.f32 %v7385_v31, %v4200_v30  ;;  %v4406_v30 = vld [vmem:[#allocation43 + $0x40] sm:$0xff] }
 0xd90   : > { %4421 = vmatpush.msra.mxu1 %v4406_v30  ;;  %v4476_v30 = vld [vmem:[#allocation61 + $0x78] sm:$0xff] }
 0xd91   : > { %v4203_v34 = vmax.f32 %v4201_v24, 0.0  ;;  %v4405_v24 = vld [vmem:[#allocation43 + $0x38] sm:$0xff] }
 0xd92   : > { %4422 = vmatpush.msra.mxu1 %v4405_v24  ;;  %v4469_v24 = vld [vmem:[#allocation61 + $0x40] sm:$0xff] }
 0xd93   : > { %6982 = vmatpush.msk.msrb.mxu2 %vm3925_vm10, %v4203_v34  ;;  %6988 = vmatpush.msk.msra.mxu0 %vm3925_vm10, %v4203_v34 }
 0xd94   : > { %6983 = vmatmul.msk.f32.vlgmr.msrb.gmra.mxu2 %vm3921_vm11, %v4204_v35  ;;  %6989 = vmatmul.msk.f32.vlgmr.msra.gmra.mxu0 %vm3921_vm11, %v6987_v37  ;;  %v4402_v35 = vld [vmem:[#allocation43 + $0x20] sm:$0xff]  ;;  %v4401_v37 = vld [vmem:[#allocation43 + $0x18] sm:$0xff] }
 0xd95   : > { %6985 = vmatpush.msk.msra.mxu2 %vm3925_vm10, %v4203_v34  ;;  %4371 = vmatpush.msrb.mxu0 %v4370_v25  ;;  %v4403_v34 = vld [vmem:[#allocation43 + $0x28] sm:$0xff] }
 0xd96   : > { %4423 = vmatpush.msra.mxu1 %v4404_v8  ;;  %v4399_v25 = vld [vmem:[#allocation43 + $0x8] sm:$0xff] }
 0xd97   : > { %4309 = vmatpush.msrb.mxu2 %v4246_v16  ;;  %4372 = vmatpush.msrb.mxu0 %v4369_v20  ;;  %v4398_v16 = vld [vmem:[#allocation43] sm:$0xff]  ;;  %v4471_v8 = vld [vmem:[#allocation61 + $0x50] sm:$0xff] }
 0xd98   : > { %4424 = vmatpush.msra.mxu1 %v4403_v34  ;;  %v4472_v34 = vld [vmem:[#allocation61 + $0x58] sm:$0xff] }
 0xd99   : > { %4310 = vmatpush.msrb.mxu2 %v4245_v27  ;;  %4373 = vmatpush.msrb.mxu0 %v4368_v41 }
 0xd9a   : > { %4425 = vmatpush.msra.mxu1 %v4402_v35  ;;  %v4465_v35 = vld [vmem:[#allocation61 + $0x20] sm:$0xff] }
 0xd9b   : > { %4311 = vmatpush.msrb.mxu2 %v4244_v42  ;;  %4374 = vmatpush.msrb.mxu0 %v4367_v44  ;;  %v7386_v44 = vld [vmem:[#allocation36] ss:$0 sm:$0xff] }
 0xd9c   : > { %6986 = vmatmul.msk.f32.vlgmr.msra.gmra.mxu2 %vm3921_vm11, %v6984_v50  ;;  %4426 = vmatpush.msra.mxu1 %v4401_v37 }
 0xd9d   : > { %4312 = vmatpush.msrb.mxu2 %v4243_v51  ;;  %4375 = vmatpush.msrb.mxu0 %v4366_v40 }
 0xd9e   : > { %4427 = vmatpush.msra.mxu1 %v4400_v39 }
 0xd9f   : > { %4313 = vmatpush.msrb.mxu2 %v4242_v57  ;;  %4376 = vmatpush.msrb.mxu0 %v4365_v58  ;;  %v4521_v57 = vld [vmem:[#allocation61 + $0x1e0] sm:$0xff]  ;;  %v4523_v58 = vld [vmem:[#allocation61 + $0x1f0] sm:$0xff] }
 0xda0   : > { %4428 = vmatpush.msra.mxu1 %v4399_v25  ;;  %v4434_v25 = vld [vmem:[%s8980_s17] sm:$0xff] }
 0xda1   : > { %4314 = vmatpush.msrb.mxu2 %v4241_v19  ;;  %4377 = vmatpush.msrb.mxu0 %v4364_v62  ;;  %v4524_v19 = vld [vmem:[#allocation61 + $0x1f8] sm:$0xff]  ;;  %v4517_v62 = vld [vmem:[#allocation61 + $0x1c0] sm:$0xff] }
 0xda2   : > { %4429 = vmatpush.msra.mxu1 %v4398_v16  ;;  %v4467_v16 = vld [vmem:[#allocation61 + $0x30] sm:$0xff] }
 0xda3   : > { %4315 = vmatpush.msrb.mxu2 %v4240_v63  ;;  %4378 = vmatpush.msrb.mxu0 %v4363_v6  ;;  %v4519_v63 = vld [vmem:[#allocation61 + $0x1d0] sm:$0xff]  ;;  %v4501_v6 = vld [vmem:[#allocation61 + $0x140] sm:$0xff] }
 0xda4   : > { %4585 = vmatpush.msrb.mxu1 %v4524_v19  ;;  %v4482_v19 = vld [vmem:[#allocation61 + $0xa8] sm:$0xff] }
 0xda5   : > { %4316 = vmatpush.msrb.mxu2 %v4239_v46  ;;  %4379 = vmatpush.msrb.mxu0 %v4362_v10  ;;  %v4520_v46 = vld [vmem:[#allocation61 + $0x1d8] sm:$0xff] }
 0xda6   : > { %4586 = vmatpush.msrb.mxu1 %v4520_v46  ;;  %v4504_v10 = vld [vmem:[#allocation61 + $0x158] sm:$0xff]  ;;  %v4470_v46 = vld [vmem:[#allocation61 + $0x48] sm:$0xff] }
 0xda7   : > { %4317 = vmatpush.msrb.mxu2 %v4238_v45  ;;  %4380 = vmatpush.msrb.mxu0 %v4361_v11  ;;  %v4513_v45 = vld [vmem:[#allocation61 + $0x1a0] sm:$0xff]  ;;  %v4499_v11 = vld [vmem:[#allocation61 + $0x130] sm:$0xff] }
 0xda9   : > { %4318 = vmatpush.msrb.mxu2 %v4237_v52  ;;  %4381 = vmatpush.msrb.mxu0 %v4360_v12  ;;  %v4515_v52 = vld [vmem:[#allocation61 + $0x1b0] sm:$0xff]  ;;  %v4493_v12 = vld [vmem:[#allocation61 + $0x100] sm:$0xff] }
 0xdab   : > { %4319 = vmatpush.msrb.mxu2 %v4236_v43  ;;  %4382 = vmatpush.msrb.mxu0 %v4359_v55  ;;  %v4516_v43 = vld [vmem:[#allocation61 + $0x1b8] sm:$0xff] }
 0xdac   : > { %4587 = vmatpush.msrb.mxu1 %v4516_v43  ;;  %v4496_v55 = vld [vmem:[#allocation61 + $0x118] sm:$0xff]  ;;  %v4462_v43 = vld [vmem:[#allocation61 + $0x8] sm:$0xff] }
 0xdad   : > { %4320 = vmatpush.msrb.mxu2 %v4235_v1  ;;  %4383 = vmatpush.msrb.mxu0 %v4358_v61  ;;  %v4509_v1 = vld [vmem:[#allocation61 + $0x180] sm:$0xff] }
 0xdae   : > { %v4489_v61 = vld [vmem:[#allocation61 + $0xe0] sm:$0xff] }
 0xdaf   : > { %4321 = vmatpush.msrb.mxu2 %v4234_v48  ;;  %4384 = vmatpush.msrb.mxu0 %v4357_v15  ;;  %v4511_v48 = vld [vmem:[#allocation61 + $0x190] sm:$0xff]  ;;  %v4485_v15 = vld [vmem:[#allocation61 + $0xc0] sm:$0xff] }
 0xdb1   : > { %4322 = vmatpush.msrb.mxu2 %v4233_v47  ;;  %4385 = vmatpush.msrb.mxu0 %v4356_v21  ;;  %v4512_v47 = vld [vmem:[#allocation61 + $0x198] sm:$0xff] }
 0xdb2   : > { %4588 = vmatpush.msrb.mxu1 %v4512_v47  ;;  %v4488_v21 = vld [vmem:[#allocation61 + $0xd8] sm:$0xff] }
 0xdb3   : > { %4323 = vmatpush.msrb.mxu2 %v4232_v2  ;;  %4386 = vmatpush.msrb.mxu0 %v4355_v26  ;;  %v4505_v2 = vld [vmem:[#allocation61 + $0x160] sm:$0xff]  ;;  %v4483_v26 = vld [vmem:[#allocation61 + $0xb0] sm:$0xff] }
 0xdb4   : > { %v4793_v47 = vld [vmem:[%s11609_s1 + $0x5e0] sm:$0xff] }
 0xdb5   : > { %4324 = vmatpush.msrb.mxu2 %v4231_v5  ;;  %4565 = vmatpush.msra.mxu0 %v4523_v58  ;;  %v4508_v5 = vld [vmem:[#allocation61 + $0x178] sm:$0xff]  ;;  %v4486_v58 = vld [vmem:[#allocation61 + $0xc8] sm:$0xff] }
 0xdb6   : > { %4589 = vmatpush.msrb.mxu1 %v4508_v5  ;;  %v4853_v5 = vld [vmem:[%s11609_s1 + $0x7c0] sm:$0xff] }
 0xdb7   : > { %4525 = vmatpush.msra.mxu2 %v4521_v57  ;;  %4566 = vmatpush.msra.mxu0 %v4519_v63  ;;  %v4490_v57 = vld [vmem:[#allocation61 + $0xe8] sm:$0xff] }
 0xdb8   : > { %4590 = vmatpush.msrb.mxu1 %v4504_v10  ;;  %v4474_v63 = vld [vmem:[#allocation61 + $0x68] sm:$0xff]  ;;  %v4665_v10 = vld [vmem:[%s11609_s1 + $0x1e0] sm:$0xff] }
 0xdb9   : > { %4526 = vmatpush.msra.mxu2 %v4517_v62  ;;  %4567 = vmatpush.msra.mxu0 %v4515_v52  ;;  %v4478_v62 = vld [vmem:[#allocation61 + $0x88] sm:$0xff]  ;;  %v4461_v52 = vld [vmem:[#allocation61] sm:$0xff] }
 0xdba   : > { %4591 = vmatpush.msrb.mxu1 %v4500_v60  ;;  %v4725_v60 = vld [vmem:[%s11609_s1 + $0x3c0] sm:$0xff] }
 0xdbb   : > { %4527 = vmatpush.msra.mxu2 %v4513_v45  ;;  %4568 = vmatpush.msra.mxu0 %v4511_v48  ;;  %v4466_v45 = vld [vmem:[#allocation61 + $0x28] sm:$0xff]  ;;  %v4464_v48 = vld [vmem:[#allocation61 + $0x18] sm:$0xff] }
 0xdbc   : > { %4592 = vmatpush.msrb.mxu1 %v4496_v55  ;;  %v4657_v55 = vld [vmem:[%s11609_s1 + $0x1a0] sm:$0xff] }
 0xdbd   : > { %4528 = vmatpush.msra.mxu2 %v4509_v1  ;;  %4569 = vmatpush.msra.mxu0 %v4507_v4  ;;  %v4463_v1 = vld [vmem:[#allocation61 + $0x10] sm:$0xff] }
 0xdbe   : > { %4593 = vmatpush.msrb.mxu1 %v4492_v36  ;;  %v4789_v4 = vld [vmem:[%s11609_s1 + $0x5c0] sm:$0xff] }
 0xdbf   : > { %4529 = vmatpush.msra.mxu2 %v4505_v2  ;;  %4570 = vmatpush.msra.mxu0 %v4503_v9  ;;  %v4857_v2 = vld [vmem:[%s11609_s1 + $0x7e0] sm:$0xff] }
 0xdc0   : > { %4594 = vmatpush.msrb.mxu1 %v4488_v21  ;;  %v4849_v9 = vld [vmem:[%s11609_s1 + $0x7a0] sm:$0xff] }
 0xdc1   : > { %4530 = vmatpush.msra.mxu2 %v4501_v6  ;;  %4571 = vmatpush.msra.mxu0 %v4499_v11  ;;  %v4785_v6 = vld [vmem:[%s11609_s1 + $0x5a0] sm:$0xff] }
 0xdc2   : > { %4595 = vmatpush.msrb.mxu1 %v4484_v28  ;;  %v4661_v11 = vld [vmem:[%s11609_s1 + $0x1c0] sm:$0xff] }
 0xdc3   : > { %4531 = vmatpush.msra.mxu2 %v4497_v54  ;;  %4572 = vmatpush.msra.mxu0 %v4495_v13  ;;  %v4729_v54 = vld [vmem:[%s11609_s1 + $0x3e0] sm:$0xff] }
 0xdc4   : > { %v4845_v13 = vld [vmem:[%s11609_s1 + $0x780] sm:$0xff] }
 0xdc5   : > { %4532 = vmatpush.msra.mxu2 %v4493_v12  ;;  %4573 = vmatpush.msra.mxu0 %v4491_v49  ;;  %v4781_v12 = vld [vmem:[%s11609_s1 + $0x580] sm:$0xff] }
 0xdc6   : > { %v4777_v49 = vld [vmem:[%s11609_s1 + $0x560] sm:$0xff] }
 0xdc7   : > { %4533 = vmatpush.msra.mxu2 %v4489_v61  ;;  %4574 = vmatpush.msra.mxu0 %v4487_v17  ;;  %v4721_v61 = vld [vmem:[%s11609_s1 + $0x3a0] sm:$0xff] }
 0xdc8   : > { %v4841_v36 = vld [vmem:[%s11609_s1 + $0x760] sm:$0xff] }
 0xdc9   : > { %4534 = vmatpush.msra.mxu2 %v4485_v15  ;;  %4575 = vmatpush.msra.mxu0 %v4483_v26  ;;  %v4653_v15 = vld [vmem:[%s11609_s1 + $0x180] sm:$0xff] }
 0xdca   : > { %v4717_v17 = vld [vmem:[%s11609_s1 + $0x380] sm:$0xff] }
 0xdcb   : > { %4535 = vmatpush.msra.mxu2 %v4481_v23  ;;  %4576 = vmatpush.msra.mxu0 %v4479_v29  ;;  %v4773_v21 = vld [vmem:[%s11609_s1 + $0x540] sm:$0xff] }
 0xdcc   : > { %v4837_v23 = vld [vmem:[%s11609_s1 + $0x740] sm:$0xff] }
 0xdcd   : > { %4536 = vmatpush.msra.mxu2 %v4477_v7  ;;  %v4649_v26 = vld [vmem:[%s11609_s1 + $0x160] sm:$0xff] }
 0xdce   : > { %v4713_v28 = vld [vmem:[%s11609_s1 + $0x360] sm:$0xff] }
 0xdcf   : > { %v4769_v7 = vld [vmem:[%s11609_s1 + $0x520] sm:$0xff] }
 0xdd0   : > { %v4833_v29 = vld [vmem:[%s11609_s1 + $0x720] sm:$0xff] }
 0xe11   : > { %v4351_v31 = vpop.f32.mrf.mxu0 }
 0xe12   : > { %4387 = vmatmul.f32.vlgmr.msrb.gmra.mxu0 %v4351_v31  ;;  %v4480_v31 = vld [vmem:[#allocation61 + $0x98] sm:$0xff] }
 0xe13   : > { %4596 = vmatpush.msrb.mxu1 %v4480_v31  ;;  %v4645_v31 = vld [vmem:[%s11609_s1 + $0x140] sm:$0xff] }
 0xe15   : > { %4597 = vmatpush.msrb.mxu1 %v4476_v30  ;;  %v4829_v30 = vld [vmem:[%s11609_s1 + $0x700] sm:$0xff] }
 0xe17   : > { %v4228_v32 = vpop.f32.mrf.mxu2  ;;  %4598 = vmatpush.msrb.mxu1 %v4472_v34  ;;  %v4761_v34 = vld [vmem:[%s11609_s1 + $0x4e0] sm:$0xff] }
 0xe18   : > { %4325 = vmatmul.f32.vlgmr.msrb.gmra.mxu2 %v4228_v32  ;;  %v4473_v32 = vld [vmem:[#allocation61 + $0x60] sm:$0xff] }
 0xe19   : > { %4537 = vmatpush.msra.mxu2 %v4473_v32  ;;  %v4709_v32 = vld [vmem:[%s11609_s1 + $0x340] sm:$0xff] }
 0xe1b   : > { %4538 = vmatpush.msra.mxu2 %v4469_v24  ;;  %v4641_v24 = vld [vmem:[%s11609_s1 + $0x120] sm:$0xff] }
 0xe1d   : > { %4539 = vmatpush.msra.mxu2 %v4465_v35  ;;  %v4825_v35 = vld [vmem:[%s11609_s1 + $0x6e0] sm:$0xff] }
 0xe1f   : > { %v4269_v33 = vpop.f32.mrf.mxu2  ;;  %4540 = vmatpush.msra.mxu2 %v4461_v52  ;;  %v4617_v52 = vld [vmem:[%s11609_s1 + $0x60] sm:$0xff] }
 0xe20   : > { %4305 = vmatmul.f32.vlgmr.msra.gmra.mxu3 %v4269_v33  ;;  %v4475_v33 = vld [vmem:[#allocation61 + $0x70] sm:$0xff] }
 0xe21   : > { %4577 = vmatpush.msra.mxu0 %v4475_v33  ;;  %4871 = vmatpush.msrb.mxu2 %v4665_v10  ;;  %v4765_v33 = vld [vmem:[%s11609_s1 + $0x500] sm:$0xff]  ;;  %v4858_v10 = vld [vmem:[%s11609_s1 + $0x7e8] sm:$0xff] }
 0xe23   : > { %4578 = vmatpush.msra.mxu0 %v4471_v8  ;;  %4872 = vmatpush.msrb.mxu2 %v4661_v11  ;;  %v4705_v8 = vld [vmem:[%s11609_s1 + $0x320] sm:$0xff] }
 0xe24   : > { %v4673_v11 = vld [vmem:[%s11609_s1 + $0x220] sm:$0xff] }
 0xe25   : > { %4579 = vmatpush.msra.mxu0 %v4467_v16  ;;  %4873 = vmatpush.msrb.mxu2 %v4657_v55  ;;  %v4821_v16 = vld [vmem:[%s11609_s1 + $0x6c0] sm:$0xff] }
 0xe26   : > { %v4669_v55 = vld [vmem:[%s11609_s1 + $0x200] sm:$0xff] }
 0xe27   : > { %4580 = vmatpush.msra.mxu0 %v4463_v1  ;;  %4874 = vmatpush.msrb.mxu2 %v4653_v15  ;;  %v4737_v1 = vld [vmem:[%s11609_s1 + $0x420] sm:$0xff]  ;;  %v4730_v15 = vld [vmem:[%s11609_s1 + $0x3e8] sm:$0xff] }
 0xe29   : > { %4911 = vmatpush.msrb.mxu0 %v4793_v47  ;;  %4875 = vmatpush.msrb.mxu2 %v4649_v26  ;;  %v4613_v47 = vld [vmem:[%s11609_s1 + $0x40] sm:$0xff]  ;;  %v4726_v26 = vld [vmem:[%s11609_s1 + $0x3c8] sm:$0xff] }
 0xe2b   : > { %4912 = vmatpush.msrb.mxu0 %v4789_v4  ;;  %4876 = vmatpush.msrb.mxu2 %v4645_v31  ;;  %v4722_v31 = vld [vmem:[%s11609_s1 + $0x3a8] sm:$0xff] }
 0xe2d   : > { %4913 = vmatpush.msrb.mxu0 %v4785_v6  ;;  %4877 = vmatpush.msrb.mxu2 %v4641_v24  ;;  %v4797_v6 = vld [vmem:[%s11609_s1 + $0x600] sm:$0xff]  ;;  %v4718_v24 = vld [vmem:[%s11609_s1 + $0x388] sm:$0xff] }
 0xe2f   : > { %4914 = vmatpush.msrb.mxu0 %v4781_v12  ;;  %v4854_v12 = vld [vmem:[%s11609_s1 + $0x7c8] sm:$0xff] }
 0xe31   : > { %4915 = vmatpush.msrb.mxu0 %v4777_v49  ;;  %v4850_v49 = vld [vmem:[%s11609_s1 + $0x7a8] sm:$0xff] }
 0xe33   : > { %4916 = vmatpush.msrb.mxu0 %v4773_v21  ;;  %v4846_v21 = vld [vmem:[%s11609_s1 + $0x788] sm:$0xff] }
 0xe35   : > { %4917 = vmatpush.msrb.mxu0 %v4769_v7  ;;  %v4842_v7 = vld [vmem:[%s11609_s1 + $0x768] sm:$0xff] }
 0xe37   : > { %4918 = vmatpush.msrb.mxu0 %v4765_v33  ;;  %v4838_v33 = vld [vmem:[%s11609_s1 + $0x748] sm:$0xff] }
 0xe39   : > { %4919 = vmatpush.msrb.mxu0 %v4761_v34  ;;  %v4834_v34 = vld [vmem:[%s11609_s1 + $0x728] sm:$0xff] }
 0xe8f   : > { %v4388_v20 = vpop.f32.mrf.mxu0 }
 0xe9b   : > { %v4326_v27 = vpop.f32.mrf.mxu2 }
 0xea3   : > { %v4306_v41 = vpop.f32.mrf.mxu3 }
 0xea4   : > { %v4327_v42 = vadd.f32 %v4326_v27, %v4306_v41  ;;  %v4522_v27 = vld [vmem:[#allocation61 + $0x1e8] sm:$0xff] }
 0xea5   : > { %v4518_v41 = vld [vmem:[#allocation61 + $0x1c8] sm:$0xff] }
 0xea6   : > { %v4391_v50 = vadd.f32 %v4388_v20, %v4327_v42  ;;  %v4468_v20 = vld [vmem:[#allocation61 + $0x38] sm:$0xff]  ;;  %v4514_v42 = vld [vmem:[#allocation61 + $0x1a8] sm:$0xff] }
 0xea7   : > { %4599 = vmatpush.msrb.mxu1 %v4468_v20  ;;  %v4633_v20 = vld [vmem:[%s11609_s1 + $0xe0] sm:$0xff] }
 0xea8   : > { %v4396_v51 = vadd.f32 %v7386_v44, %v4391_v50  ;;  %v4510_v44 = vld [vmem:[#allocation61 + $0x188] sm:$0xff] }
 0xea9   : > { %v4506_v50 = vld [vmem:[#allocation61 + $0x168] sm:$0xff]  ;;  %4600 = vmatpush.msrb.mxu1 %v4464_v48  ;;  %v4801_v48 = vld [vmem:[%s11609_s1 + $0x620] sm:$0xff] }
 0xeaa   : > { %v4397_v40 = vmax.f32 %v4396_v51, 0.0  ;;  %v4498_v51 = vld [vmem:[#allocation61 + $0x128] sm:$0xff] }
 0xeac   : > { %4430 = vmatmul.f32.vlgmr.msra.gmra.mxu1 %v4397_v40  ;;  %v4494_v40 = vld [vmem:[#allocation61 + $0x108] sm:$0xff] }
 0xead   : > { %4931 = vmatpush.msra.mxu1 %v4857_v2  ;;  %v4677_v2 = vld [vmem:[%s11609_s1 + $0x240] sm:$0xff] }
 0xeaf   : > { %4932 = vmatpush.msra.mxu1 %v4853_v5  ;;  %v4733_v5 = vld [vmem:[%s11609_s1 + $0x400] sm:$0xff] }
 0xeb1   : > { %4933 = vmatpush.msra.mxu1 %v4849_v9  ;;  %v4794_v9 = vld [vmem:[%s11609_s1 + $0x5e8] sm:$0xff] }
 0xeb3   : > { %4934 = vmatpush.msra.mxu1 %v4845_v13  ;;  %v4605_v13 = vld [vmem:[%s11609_s1] sm:$0xff] }
 0xeb5   : > { %4935 = vmatpush.msra.mxu1 %v4841_v36  ;;  %v4666_v36 = vld [vmem:[%s11609_s1 + $0x1e8] sm:$0xff] }
 0xeb7   : > { %4936 = vmatpush.msra.mxu1 %v4837_v23  ;;  %v4662_v23 = vld [vmem:[%s11609_s1 + $0x1c8] sm:$0xff] }
 0xeb9   : > { %4937 = vmatpush.msra.mxu1 %v4833_v29  ;;  %v4658_v29 = vld [vmem:[%s11609_s1 + $0x1a8] sm:$0xff] }
 0xebb   : > { %4938 = vmatpush.msra.mxu1 %v4829_v30  ;;  %v4654_v30 = vld [vmem:[%s11609_s1 + $0x188] sm:$0xff] }
 0xebd   : > { %4939 = vmatpush.msra.mxu1 %v4825_v35  ;;  %v4650_v35 = vld [vmem:[%s11609_s1 + $0x168] sm:$0xff] }
 0xebf   : > { %4940 = vmatpush.msra.mxu1 %v4821_v16  ;;  %v4646_v16 = vld [vmem:[%s11609_s1 + $0x148] sm:$0xff] }
 0xf29   : > { %v4431_v37 = vpop.f32.mrf.mxu1 }
 0xf2a   : > { %v4432_v39 = vadd.f32 %v4431_v37, %v10662_v14  ;;  %v4502_v14 = vld [vmem:[#allocation61 + $0x148] sm:$0xff]  ;;  %v4637_v37 = vld [vmem:[%s11609_s1 + $0x100] sm:$0xff] }
 0xf2b   : > { %4878 = vmatpush.msrb.mxu2 %v4637_v37  ;;  %v4714_v37 = vld [vmem:[%s11609_s1 + $0x368] sm:$0xff] }
 0xf2c   : > { %6990 = vmatpush.msk.msrb.mxu3 %vm3925_vm10, %v4432_v39  ;;  %v4701_v39 = vld [vmem:[%s11609_s1 + $0x300] sm:$0xff] }
 0xf2d   : > { %6991 = vmatmul.msk.f32.vlgmr.msrb.gmra.mxu3 %vm3921_vm11, %v4434_v25  ;;  %v4757_v25 = vld [vmem:[%s11609_s1 + $0x4c0] sm:$0xff]  ;;  %4879 = vmatpush.msrb.mxu2 %v4633_v20  ;;  %v4710_v20 = vld [vmem:[%s11609_s1 + $0x348] sm:$0xff] }
 0xf2e   : > { %4545 = vmatpush.msra.mxu3 %v4522_v27  ;;  %v4697_v27 = vld [vmem:[%s11609_s1 + $0x2e0] sm:$0xff]  ;;  %4920 = vmatpush.msrb.mxu0 %v4757_v25  ;;  %v4830_v25 = vld [vmem:[%s11609_s1 + $0x708] sm:$0xff] }
 0xf30   : > { %4546 = vmatpush.msra.mxu3 %v4518_v41  ;;  %v4753_v41 = vld [vmem:[%s11609_s1 + $0x4a0] sm:$0xff] }
 0xf31   : > { %4921 = vmatpush.msrb.mxu0 %v4753_v41  ;;  %v4826_v41 = vld [vmem:[%s11609_s1 + $0x6e8] sm:$0xff] }
 0xf32   : > { %4547 = vmatpush.msra.mxu3 %v4514_v42  ;;  %v4817_v42 = vld [vmem:[%s11609_s1 + $0x6a0] sm:$0xff] }
 0xf33   : > { %4941 = vmatpush.msra.mxu1 %v4817_v42  ;;  %v4642_v42 = vld [vmem:[%s11609_s1 + $0x128] sm:$0xff] }
 0xf34   : > { %4548 = vmatpush.msra.mxu3 %v4510_v44  ;;  %v4629_v44 = vld [vmem:[%s11609_s1 + $0xc0] sm:$0xff] }
 0xf35   : > { %4880 = vmatpush.msrb.mxu2 %v4629_v44  ;;  %v4706_v44 = vld [vmem:[%s11609_s1 + $0x328] sm:$0xff] }
 0xf36   : > { %4549 = vmatpush.msra.mxu3 %v4506_v50  ;;  %v4693_v50 = vld [vmem:[%s11609_s1 + $0x2c0] sm:$0xff] }
 0xf38   : > { %4550 = vmatpush.msra.mxu3 %v4502_v14  ;;  %v4749_v14 = vld [vmem:[%s11609_s1 + $0x480] sm:$0xff] }
 0xf39   : > { %4922 = vmatpush.msrb.mxu0 %v4749_v14  ;;  %v4822_v14 = vld [vmem:[%s11609_s1 + $0x6c8] sm:$0xff] }
 0xf3a   : > { %4551 = vmatpush.msra.mxu3 %v4498_v51  ;;  %v4813_v51 = vld [vmem:[%s11609_s1 + $0x680] sm:$0xff] }
 0xf3b   : > { %4942 = vmatpush.msra.mxu1 %v4813_v51  ;;  %v4638_v51 = vld [vmem:[%s11609_s1 + $0x108] sm:$0xff] }
 0xf3c   : > { %4552 = vmatpush.msra.mxu3 %v4494_v40  ;;  %v4625_v40 = vld [vmem:[%s11609_s1 + $0xa0] sm:$0xff] }
 0xf3d   : > { %4881 = vmatpush.msrb.mxu2 %v4625_v40  ;;  %v4702_v40 = vld [vmem:[%s11609_s1 + $0x308] sm:$0xff] }
 0xf3e   : > { %4553 = vmatpush.msra.mxu3 %v4490_v57  ;;  %v4689_v57 = vld [vmem:[%s11609_s1 + $0x2a0] sm:$0xff] }
 0xf40   : > { %4554 = vmatpush.msra.mxu3 %v4486_v58  ;;  %v4745_v58 = vld [vmem:[%s11609_s1 + $0x460] sm:$0xff] }
 0xf41   : > { %4923 = vmatpush.msrb.mxu0 %v4745_v58  ;;  %v4818_v58 = vld [vmem:[%s11609_s1 + $0x6a8] sm:$0xff] }
 0xf42   : > { %4555 = vmatpush.msra.mxu3 %v4482_v19  ;;  %v4809_v19 = vld [vmem:[%s11609_s1 + $0x660] sm:$0xff] }
 0xf43   : > { %4943 = vmatpush.msra.mxu1 %v4809_v19  ;;  %v4634_v19 = vld [vmem:[%s11609_s1 + $0xe8] sm:$0xff] }
 0xf44   : > { %4556 = vmatpush.msra.mxu3 %v4478_v62  ;;  %v4621_v62 = vld [vmem:[%s11609_s1 + $0x80] sm:$0xff] }
 0xf45   : > { %4882 = vmatpush.msrb.mxu2 %v4621_v62  ;;  %v4698_v62 = vld [vmem:[%s11609_s1 + $0x2e8] sm:$0xff] }
 0xf46   : > { %4557 = vmatpush.msra.mxu3 %v4474_v63  ;;  %v4685_v63 = vld [vmem:[%s11609_s1 + $0x280] sm:$0xff] }
 0xf47   : > { %4883 = vmatpush.msrb.mxu2 %v4617_v52  ;;  %v4694_v52 = vld [vmem:[%s11609_s1 + $0x2c8] sm:$0xff] }
 0xf48   : > { %4558 = vmatpush.msra.mxu3 %v4470_v46  ;;  %v4741_v46 = vld [vmem:[%s11609_s1 + $0x440] sm:$0xff] }
 0xf49   : > { %4924 = vmatpush.msrb.mxu0 %v4741_v46  ;;  %4884 = vmatpush.msrb.mxu2 %v4613_v47  ;;  %v4814_v46 = vld [vmem:[%s11609_s1 + $0x688] sm:$0xff] }
 0xf4a   : > { %4559 = vmatpush.msra.mxu3 %v4466_v45  ;;  %v4805_v45 = vld [vmem:[%s11609_s1 + $0x640] sm:$0xff]  ;;  %v4690_v47 = vld [vmem:[%s11609_s1 + $0x2a8] sm:$0xff] }
 0xf4b   : > { %4944 = vmatpush.msra.mxu1 %v4805_v45  ;;  %4925 = vmatpush.msrb.mxu0 %v4737_v1  ;;  %v4630_v45 = vld [vmem:[%s11609_s1 + $0xc8] sm:$0xff] }
 0xf4c   : > { %4560 = vmatpush.msra.mxu3 %v4462_v43  ;;  %v4681_v43 = vld [vmem:[%s11609_s1 + $0x260] sm:$0xff]  ;;  %v4810_v1 = vld [vmem:[%s11609_s1 + $0x668] sm:$0xff] }
 0xf4d   : > { %4945 = vmatpush.msra.mxu1 %v4801_v48  ;;  %4926 = vmatpush.msrb.mxu0 %v4733_v5  ;;  %v4626_v48 = vld [vmem:[%s11609_s1 + $0xa8] sm:$0xff] }
 0xf4e   : > { %4891 = vmatpush.msrb.mxu3 %v4729_v54  ;;  %v4609_v54 = vld [vmem:[%s11609_s1 + $0x20] sm:$0xff]  ;;  %v4622_v5 = vld [vmem:[%s11609_s1 + $0x88] sm:$0xff] }
 0xf4f   : > { %4946 = vmatpush.msra.mxu1 %v4797_v6  ;;  %4885 = vmatpush.msrb.mxu2 %v4609_v54  ;;  %v4686_v6 = vld [vmem:[%s11609_s1 + $0x288] sm:$0xff] }
 0xf50   : > { %4892 = vmatpush.msrb.mxu3 %v4725_v60  ;;  %v4790_v60 = vld [vmem:[%s11609_s1 + $0x5c8] sm:$0xff] }
 0xf51   : > { %4886 = vmatpush.msrb.mxu2 %v4605_v13  ;;  %v4618_v54 = vld [vmem:[%s11609_s1 + $0x68] sm:$0xff] }
 0xf52   : > { %4893 = vmatpush.msrb.mxu3 %v4721_v61  ;;  %v4786_v61 = vld [vmem:[%s11609_s1 + $0x5a8] sm:$0xff] }
 0xf53   : > { %v4614_v13 = vld [vmem:[%s11609_s1 + $0x48] sm:$0xff] }
 0xf54   : > { %4894 = vmatpush.msrb.mxu3 %v4717_v17  ;;  %v4782_v17 = vld [vmem:[%s11609_s1 + $0x588] sm:$0xff] }
 0xf56   : > { %4895 = vmatpush.msrb.mxu3 %v4713_v28  ;;  %v4778_v28 = vld [vmem:[%s11609_s1 + $0x568] sm:$0xff] }
 0xf58   : > { %4896 = vmatpush.msrb.mxu3 %v4709_v32  ;;  %v4774_v32 = vld [vmem:[%s11609_s1 + $0x548] sm:$0xff] }
 0xf5a   : > { %4897 = vmatpush.msrb.mxu3 %v4705_v8  ;;  %v4770_v8 = vld [vmem:[%s11609_s1 + $0x528] sm:$0xff] }
 0xf5c   : > { %4898 = vmatpush.msrb.mxu3 %v4701_v39  ;;  %v4766_v39 = vld [vmem:[%s11609_s1 + $0x508] sm:$0xff] }
 0xf5e   : > { %4899 = vmatpush.msrb.mxu3 %v4697_v27  ;;  %v4762_v27 = vld [vmem:[%s11609_s1 + $0x4e8] sm:$0xff] }
 0xf60   : > { %4900 = vmatpush.msrb.mxu3 %v4693_v50  ;;  %v4758_v50 = vld [vmem:[%s11609_s1 + $0x4c8] sm:$0xff] }
 0xf62   : > { %4901 = vmatpush.msrb.mxu3 %v4689_v57  ;;  %v4754_v57 = vld [vmem:[%s11609_s1 + $0x4a8] sm:$0xff] }
 0xf64   : > { %4902 = vmatpush.msrb.mxu3 %v4685_v63  ;;  %v4750_v63 = vld [vmem:[%s11609_s1 + $0x488] sm:$0xff] }
 0xf66   : > { %4903 = vmatpush.msrb.mxu3 %v4681_v43  ;;  %v4746_v43 = vld [vmem:[%s11609_s1 + $0x468] sm:$0xff] }
 0xf68   : > { %4904 = vmatpush.msrb.mxu3 %v4677_v2  ;;  %v4742_v2 = vld [vmem:[%s11609_s1 + $0x448] sm:$0xff] }
 0xf6a   : > { %4905 = vmatpush.msrb.mxu3 %v4673_v11  ;;  %v4682_v11 = vld [vmem:[%s11609_s1 + $0x268] sm:$0xff] }
 0xf6c   : > { %4906 = vmatpush.msrb.mxu3 %v4669_v55  ;;  %v4678_v55 = vld [vmem:[%s11609_s1 + $0x248] sm:$0xff] }
 0xfb0   : > { %v4458_v4 = vpop.f32.mrf.mxu3 }
 0xfb1   : > { %4541 = vmatmul.f32.vlgmr.msra.gmra.mxu2 %v4458_v4  ;;  %4561 = vmatmul.f32.vlgmr.msra.gmra.mxu3 %v4458_v4 }
 0xfb2   : > { %4581 = vmatmul.f32.vlgmr.msra.gmra.mxu0 %v4458_v4  ;;  %4601 = vmatmul.f32.vlgmr.msrb.gmra.mxu1 %v4458_v4  ;;  %v4806_v4 = vld [vmem:[%s11609_s1 + $0x648] sm:$0xff] }
 0xfb3   : > { %4991 = vmatpush.msra.mxu0 %v4794_v9  ;;  %5011 = vmatpush.msrb.mxu1 %v4858_v10  ;;  %v4738_v9 = vld [vmem:[%s11609_s1 + $0x428] sm:$0xff] }
 0xfb4   : > { %4951 = vmatpush.msra.mxu2 %v4666_v36  ;;  %4971 = vmatpush.msra.mxu3 %v4730_v15  ;;  %v4802_v10 = vld [vmem:[%s11609_s1 + $0x628] sm:$0xff] }
 0xfb5   : > { %4992 = vmatpush.msra.mxu0 %v4790_v60  ;;  %5012 = vmatpush.msrb.mxu1 %v4854_v12  ;;  %v4734_v60 = vld [vmem:[%s11609_s1 + $0x408] sm:$0xff] }
 0xfb6   : > { %4952 = vmatpush.msra.mxu2 %v4662_v23  ;;  %4972 = vmatpush.msra.mxu3 %v4726_v26  ;;  %v4798_v12 = vld [vmem:[%s11609_s1 + $0x608] sm:$0xff] }
 0xfb7   : > { %4993 = vmatpush.msra.mxu0 %v4786_v61  ;;  %5013 = vmatpush.msrb.mxu1 %v4850_v49  ;;  %v4610_v61 = vld [vmem:[%s11609_s1 + $0x28] sm:$0xff] }
 0xfb8   : > { %4953 = vmatpush.msra.mxu2 %v4658_v29  ;;  %4973 = vmatpush.msra.mxu3 %v4722_v31  ;;  %v4674_v49 = vld [vmem:[%s11609_s1 + $0x228] sm:$0xff]  ;;  %v4787_v29 = vld [vmem:[%s11609_s1 + $0x5b0] sm:$0xff] }
 0xfb9   : > { %4994 = vmatpush.msra.mxu0 %v4782_v17  ;;  %5014 = vmatpush.msrb.mxu1 %v4846_v21  ;;  %v4606_v36 = vld [vmem:[%s11609_s1 + $0x8] sm:$0xff]  ;;  %v4795_v17 = vld [vmem:[%s11609_s1 + $0x5f0] sm:$0xff] }
 0xfba   : > { %4954 = vmatpush.msra.mxu2 %v4654_v30  ;;  %4974 = vmatpush.msra.mxu3 %v4718_v24  ;;  %v4670_v15 = vld [vmem:[%s11609_s1 + $0x208] sm:$0xff]  ;;  %v4859_v21 = vld [vmem:[%s11609_s1 + $0x7f0] sm:$0xff] }
 0xfbb   : > { %4995 = vmatpush.msra.mxu0 %v4778_v28  ;;  %5015 = vmatpush.msrb.mxu1 %v4842_v7  ;;  %v4791_v28 = vld [vmem:[%s11609_s1 + $0x5d0] sm:$0xff] }
 0xfbc   : > { %4955 = vmatpush.msra.mxu2 %v4650_v35  ;;  %4975 = vmatpush.msra.mxu3 %v4714_v37  ;;  %v4855_v7 = vld [vmem:[%s11609_s1 + $0x7d0] sm:$0xff] }
 0xfbd   : > { %4996 = vmatpush.msra.mxu0 %v4774_v32  ;;  %5016 = vmatpush.msrb.mxu1 %v4838_v33  ;;  %v4851_v31 = vld [vmem:[%s11609_s1 + $0x7b0] sm:$0xff] }
 0xfbe   : > { %4956 = vmatpush.msra.mxu2 %v4646_v16  ;;  %4976 = vmatpush.msra.mxu3 %v4710_v20  ;;  %v4667_v30 = vld [vmem:[%s11609_s1 + $0x1f0] sm:$0xff] }
 0xfbf   : > { %4997 = vmatpush.msra.mxu0 %v4770_v8  ;;  %5017 = vmatpush.msrb.mxu1 %v4834_v34  ;;  %v4731_v24 = vld [vmem:[%s11609_s1 + $0x3f0] sm:$0xff] }
 0xfc0   : > { %4957 = vmatpush.msra.mxu2 %v4642_v42  ;;  %4977 = vmatpush.msra.mxu3 %v4706_v44  ;;  %v4783_v8 = vld [vmem:[%s11609_s1 + $0x590] sm:$0xff] }
 0xfc1   : > { %4998 = vmatpush.msra.mxu0 %v4766_v39  ;;  %5018 = vmatpush.msrb.mxu1 %v4830_v25  ;;  %v4847_v34 = vld [vmem:[%s11609_s1 + $0x790] sm:$0xff] }
 0xfc2   : > { %4958 = vmatpush.msra.mxu2 %v4638_v51  ;;  %4978 = vmatpush.msra.mxu3 %v4702_v40  ;;  %v4663_v35 = vld [vmem:[%s11609_s1 + $0x1d0] sm:$0xff] }
 0xfc3   : > { %4999 = vmatpush.msra.mxu0 %v4762_v27  ;;  %5019 = vmatpush.msrb.mxu1 %v4826_v41  ;;  %v4727_v37 = vld [vmem:[%s11609_s1 + $0x3d0] sm:$0xff] }
 0xfc4   : > { %4959 = vmatpush.msra.mxu2 %v4634_v19  ;;  %4979 = vmatpush.msra.mxu3 %v4698_v62  ;;  %v4779_v39 = vld [vmem:[%s11609_s1 + $0x570] sm:$0xff] }
 0xfc5   : > { %5000 = vmatpush.msra.mxu0 %v4758_v50  ;;  %5020 = vmatpush.msrb.mxu1 %v4822_v14  ;;  %v4843_v25 = vld [vmem:[%s11609_s1 + $0x770] sm:$0xff] }
 0xfc6   : > { %4960 = vmatpush.msra.mxu2 %v4630_v45  ;;  %4980 = vmatpush.msra.mxu3 %v4694_v52  ;;  %v4659_v16 = vld [vmem:[%s11609_s1 + $0x1b0] sm:$0xff] }
 0xfc7   : > { %5001 = vmatpush.msra.mxu0 %v4754_v57  ;;  %5021 = vmatpush.msrb.mxu1 %v4818_v58  ;;  %v4723_v20 = vld [vmem:[%s11609_s1 + $0x3b0] sm:$0xff] }
 0xfc8   : > { %4961 = vmatpush.msra.mxu2 %v4626_v48  ;;  %4981 = vmatpush.msra.mxu3 %v4690_v47  ;;  %v4775_v27 = vld [vmem:[%s11609_s1 + $0x550] sm:$0xff] }
 0xfc9   : > { %5002 = vmatpush.msra.mxu0 %v4750_v63  ;;  %5022 = vmatpush.msrb.mxu1 %v4814_v46  ;;  %v4839_v41 = vld [vmem:[%s11609_s1 + $0x750] sm:$0xff] }
 0xfca   : > { %4962 = vmatpush.msra.mxu2 %v4622_v5  ;;  %4982 = vmatpush.msra.mxu3 %v4686_v6  ;;  %v4655_v42 = vld [vmem:[%s11609_s1 + $0x190] sm:$0xff] }
 0xfcb   : > { %5003 = vmatpush.msra.mxu0 %v4746_v43  ;;  %5023 = vmatpush.msrb.mxu1 %v4810_v1  ;;  %v4719_v44 = vld [vmem:[%s11609_s1 + $0x390] sm:$0xff] }
 0xfcc   : > { %4963 = vmatpush.msra.mxu2 %v4618_v54  ;;  %4983 = vmatpush.msra.mxu3 %v4682_v11  ;;  %v4771_v50 = vld [vmem:[%s11609_s1 + $0x530] sm:$0xff] }
 0xfcd   : > { %5004 = vmatpush.msra.mxu0 %v4742_v2  ;;  %5024 = vmatpush.msrb.mxu1 %v4806_v4  ;;  %v4835_v14 = vld [vmem:[%s11609_s1 + $0x730] sm:$0xff] }
 0xfce   : > { %4964 = vmatpush.msra.mxu2 %v4614_v13  ;;  %4984 = vmatpush.msra.mxu3 %v4678_v55  ;;  %v4651_v51 = vld [vmem:[%s11609_s1 + $0x170] sm:$0xff] }
 0xfcf   : > { %5005 = vmatpush.msra.mxu0 %v4738_v9  ;;  %5025 = vmatpush.msrb.mxu1 %v4802_v10  ;;  %v4715_v40 = vld [vmem:[%s11609_s1 + $0x370] sm:$0xff] }
 0xfd0   : > { %4965 = vmatpush.msra.mxu2 %v4610_v61  ;;  %4985 = vmatpush.msra.mxu3 %v4674_v49  ;;  %v4767_v57 = vld [vmem:[%s11609_s1 + $0x510] sm:$0xff] }
 0xfd1   : > { %5006 = vmatpush.msra.mxu0 %v4734_v60  ;;  %5026 = vmatpush.msrb.mxu1 %v4798_v12  ;;  %v4831_v58 = vld [vmem:[%s11609_s1 + $0x710] sm:$0xff] }
 0xfd2   : > { %4966 = vmatpush.msra.mxu2 %v4606_v36  ;;  %4986 = vmatpush.msra.mxu3 %v4670_v15  ;;  %v4647_v19 = vld [vmem:[%s11609_s1 + $0x150] sm:$0xff] }
 0xfd3   : > { %v4711_v62 = vld [vmem:[%s11609_s1 + $0x350] sm:$0xff] }
 0xfd4   : > { %v4763_v63 = vld [vmem:[%s11609_s1 + $0x4f0] sm:$0xff] }
 0xfd5   : > { %v4827_v46 = vld [vmem:[%s11609_s1 + $0x6f0] sm:$0xff] }
 0xfd6   : > { %v4643_v45 = vld [vmem:[%s11609_s1 + $0x130] sm:$0xff] }
 0xfd7   : > { %v4707_v52 = vld [vmem:[%s11609_s1 + $0x330] sm:$0xff] }
 0xfd8   : > { %v4759_v43 = vld [vmem:[%s11609_s1 + $0x4d0] sm:$0xff] }
 0xfd9   : > { %v4823_v1 = vld [vmem:[%s11609_s1 + $0x6d0] sm:$0xff] }
 0xfda   : > { %v4639_v48 = vld [vmem:[%s11609_s1 + $0x110] sm:$0xff] }
 0xfdb   : > { %v4703_v47 = vld [vmem:[%s11609_s1 + $0x310] sm:$0xff] }
 0xfdc   : > { %v4755_v2 = vld [vmem:[%s11609_s1 + $0x4b0] sm:$0xff] }
 0xfdd   : > { %v4819_v4 = vld [vmem:[%s11609_s1 + $0x6b0] sm:$0xff] }
 0xfde   : > { %v4635_v5 = vld [vmem:[%s11609_s1 + $0xf0] sm:$0xff] }
 0xfdf   : > { %v4699_v6 = vld [vmem:[%s11609_s1 + $0x2f0] sm:$0xff] }
 0xfe0   : > { %v4751_v9 = vld [vmem:[%s11609_s1 + $0x490] sm:$0xff] }
 0xfe1   : > { %v4815_v10 = vld [vmem:[%s11609_s1 + $0x690] sm:$0xff] }
 0xfe2   : > { %v4631_v54 = vld [vmem:[%s11609_s1 + $0xd0] sm:$0xff] }
 0xfe3   : > { %v4695_v11 = vld [vmem:[%s11609_s1 + $0x2d0] sm:$0xff] }
 0xfe4   : > { %v4747_v60 = vld [vmem:[%s11609_s1 + $0x470] sm:$0xff] }
 0xfe5   : > { %v4811_v12 = vld [vmem:[%s11609_s1 + $0x670] sm:$0xff] }
 0xfe6   : > { %v4627_v13 = vld [vmem:[%s11609_s1 + $0xb0] sm:$0xff] }
 0xfe7   : > { %v4691_v55 = vld [vmem:[%s11609_s1 + $0x2b0] sm:$0xff] }
 0xfe8   : > { %v4743_v61 = vld [vmem:[%s11609_s1 + $0x450] sm:$0xff] }
 0xfe9   : > { %v4807_v49 = vld [vmem:[%s11609_s1 + $0x650] sm:$0xff] }
 0xfea   : > { %v4623_v36 = vld [vmem:[%s11609_s1 + $0x90] sm:$0xff] }
 0xfeb   : > { %v4687_v15 = vld [vmem:[%s11609_s1 + $0x290] sm:$0xff] }
0x102f   : > { %v10808_v23 = vpop.f32.mrf.mxu0  ;;  %v10810_v26 = vpop.f32.mrf.mxu1 }
0x1030   : > { %4927 = vmatmul.f32.vlgmr.msrb.gmra.mxu0 %v10808_v23  ;;  %4947 = vmatmul.f32.vlgmr.msra.gmra.mxu1 %v10810_v26 }
0x1031   : > { %5071 = vmatpush.msrb.mxu0 %v4795_v17  ;;  %5091 = vmatpush.msra.mxu1 %v4859_v21  ;;  %v4739_v17 = vld [vmem:[%s11609_s1 + $0x430] sm:$0xff] }
0x1032   : > { %v4803_v21 = vld [vmem:[%s11609_s1 + $0x630] sm:$0xff] }
0x1033   : > { %5072 = vmatpush.msrb.mxu0 %v4791_v28  ;;  %5092 = vmatpush.msra.mxu1 %v4855_v7  ;;  %v4619_v28 = vld [vmem:[%s11609_s1 + $0x70] sm:$0xff] }
0x1034   : > { %v10818_v32 = vpop.f32.mrf.mxu2  ;;  %v10820_v33 = vpop.f32.mrf.mxu3  ;;  %v4683_v7 = vld [vmem:[%s11609_s1 + $0x270] sm:$0xff] }
0x1035   : > { %5073 = vmatpush.msrb.mxu0 %v4787_v29  ;;  %5093 = vmatpush.msra.mxu1 %v4851_v31  ;;  %v4735_v29 = vld [vmem:[%s11609_s1 + $0x410] sm:$0xff] }
0x1036   : > { %4887 = vmatmul.f32.vlgmr.msrb.gmra.mxu2 %v10818_v32  ;;  %4907 = vmatmul.f32.vlgmr.msrb.gmra.mxu3 %v10820_v33  ;;  %v4799_v31 = vld [vmem:[%s11609_s1 + $0x610] sm:$0xff] }
0x1037   : > { %5031 = vmatpush.msrb.mxu2 %v4667_v30  ;;  %5051 = vmatpush.msrb.mxu3 %v4731_v24  ;;  %v4796_v30 = vld [vmem:[%s11609_s1 + $0x5f8] sm:$0xff] }
0x1038   : > { %5074 = vmatpush.msrb.mxu0 %v4783_v8  ;;  %5094 = vmatpush.msra.mxu1 %v4847_v34  ;;  %v4860_v24 = vld [vmem:[%s11609_s1 + $0x7f8] sm:$0xff]  ;;  %v4615_v8 = vld [vmem:[%s11609_s1 + $0x50] sm:$0xff] }
0x1039   : > { %5007 = vmatmul.f32.vlgmr.msra.gmra.mxu0 %v10808_v23  ;;  %5027 = vmatmul.f32.vlgmr.msrb.gmra.mxu1 %v10810_v26  ;;  %v4679_v34 = vld [vmem:[%s11609_s1 + $0x250] sm:$0xff] }
0x103a   : > { %5032 = vmatpush.msrb.mxu2 %v4663_v35  ;;  %5052 = vmatpush.msrb.mxu3 %v4727_v37  ;;  %v4792_v35 = vld [vmem:[%s11609_s1 + $0x5d8] sm:$0xff] }
0x103b   : > { %5075 = vmatpush.msrb.mxu0 %v4779_v39  ;;  %5095 = vmatpush.msra.mxu1 %v4843_v25  ;;  %v4856_v37 = vld [vmem:[%s11609_s1 + $0x7d8] sm:$0xff]  ;;  %v4611_v39 = vld [vmem:[%s11609_s1 + $0x30] sm:$0xff] }
0x103c   : > { %5033 = vmatpush.msrb.mxu2 %v4659_v16  ;;  %5053 = vmatpush.msrb.mxu3 %v4723_v20  ;;  %v4675_v25 = vld [vmem:[%s11609_s1 + $0x230] sm:$0xff]  ;;  %v4788_v16 = vld [vmem:[%s11609_s1 + $0x5b8] sm:$0xff] }
0x103d   : > { %5076 = vmatpush.msrb.mxu0 %v4775_v27  ;;  %5096 = vmatpush.msra.mxu1 %v4839_v41  ;;  %v4852_v20 = vld [vmem:[%s11609_s1 + $0x7b8] sm:$0xff]  ;;  %v4607_v27 = vld [vmem:[%s11609_s1 + $0x10] sm:$0xff] }
0x103e   : > { %5034 = vmatpush.msrb.mxu2 %v4655_v42  ;;  %5054 = vmatpush.msrb.mxu3 %v4719_v44  ;;  %v4671_v41 = vld [vmem:[%s11609_s1 + $0x210] sm:$0xff]  ;;  %v4668_v42 = vld [vmem:[%s11609_s1 + $0x1f8] sm:$0xff] }
0x103f   : > { %5077 = vmatpush.msrb.mxu0 %v4771_v50  ;;  %5097 = vmatpush.msra.mxu1 %v4835_v14  ;;  %v4732_v44 = vld [vmem:[%s11609_s1 + $0x3f8] sm:$0xff] }
0x1040   : > { %4967 = vmatmul.f32.vlgmr.msra.gmra.mxu2 %v10818_v32  ;;  %4987 = vmatmul.f32.vlgmr.msra.gmra.mxu3 %v10820_v33  ;;  %v4784_v50 = vld [vmem:[%s11609_s1 + $0x598] sm:$0xff] }
0x1041   : > { %5035 = vmatpush.msrb.mxu2 %v4651_v51  ;;  %5055 = vmatpush.msrb.mxu3 %v4715_v40  ;;  %v4848_v14 = vld [vmem:[%s11609_s1 + $0x798] sm:$0xff] }
0x1042   : > { %5078 = vmatpush.msrb.mxu0 %v4767_v57  ;;  %5098 = vmatpush.msra.mxu1 %v4831_v58  ;;  %v4664_v51 = vld [vmem:[%s11609_s1 + $0x1d8] sm:$0xff] }
0x1043   : > { %5036 = vmatpush.msrb.mxu2 %v4647_v19  ;;  %5056 = vmatpush.msrb.mxu3 %v4711_v62  ;;  %v4728_v40 = vld [vmem:[%s11609_s1 + $0x3d8] sm:$0xff] }
0x1044   : > { %5079 = vmatpush.msrb.mxu0 %v4763_v63  ;;  %5099 = vmatpush.msra.mxu1 %v4827_v46  ;;  %v4780_v57 = vld [vmem:[%s11609_s1 + $0x578] sm:$0xff] }
0x1045   : > { %5037 = vmatpush.msrb.mxu2 %v4643_v45  ;;  %5057 = vmatpush.msrb.mxu3 %v4707_v52  ;;  %v4844_v58 = vld [vmem:[%s11609_s1 + $0x778] sm:$0xff] }
0x1046   : > { %5080 = vmatpush.msrb.mxu0 %v4759_v43  ;;  %5100 = vmatpush.msra.mxu1 %v4823_v1  ;;  %v4660_v19 = vld [vmem:[%s11609_s1 + $0x1b8] sm:$0xff] }
0x1047   : > { %5038 = vmatpush.msrb.mxu2 %v4639_v48  ;;  %5058 = vmatpush.msrb.mxu3 %v4703_v47  ;;  %v4724_v62 = vld [vmem:[%s11609_s1 + $0x3b8] sm:$0xff] }
0x1048   : > { %5081 = vmatpush.msrb.mxu0 %v4755_v2  ;;  %5101 = vmatpush.msra.mxu1 %v4819_v4  ;;  %v4776_v63 = vld [vmem:[%s11609_s1 + $0x558] sm:$0xff] }
0x1049   : > { %5039 = vmatpush.msrb.mxu2 %v4635_v5  ;;  %5059 = vmatpush.msrb.mxu3 %v4699_v6  ;;  %v4840_v46 = vld [vmem:[%s11609_s1 + $0x758] sm:$0xff] }
0x104a   : > { %5082 = vmatpush.msrb.mxu0 %v4751_v9  ;;  %5102 = vmatpush.msra.mxu1 %v4815_v10  ;;  %v4656_v45 = vld [vmem:[%s11609_s1 + $0x198] sm:$0xff] }
0x104b   : > { %5040 = vmatpush.msrb.mxu2 %v4631_v54  ;;  %5060 = vmatpush.msrb.mxu3 %v4695_v11  ;;  %v4720_v52 = vld [vmem:[%s11609_s1 + $0x398] sm:$0xff] }
0x104c   : > { %5083 = vmatpush.msrb.mxu0 %v4747_v60  ;;  %5103 = vmatpush.msra.mxu1 %v4811_v12  ;;  %v4772_v43 = vld [vmem:[%s11609_s1 + $0x538] sm:$0xff] }
0x104d   : > { %5041 = vmatpush.msrb.mxu2 %v4627_v13  ;;  %5061 = vmatpush.msrb.mxu3 %v4691_v55  ;;  %v4836_v1 = vld [vmem:[%s11609_s1 + $0x738] sm:$0xff] }
0x104e   : > { %5084 = vmatpush.msrb.mxu0 %v4743_v61  ;;  %5104 = vmatpush.msra.mxu1 %v4807_v49  ;;  %v4652_v48 = vld [vmem:[%s11609_s1 + $0x178] sm:$0xff] }
0x104f   : > { %5042 = vmatpush.msrb.mxu2 %v4623_v36  ;;  %5062 = vmatpush.msrb.mxu3 %v4687_v15  ;;  %v4716_v47 = vld [vmem:[%s11609_s1 + $0x378] sm:$0xff] }
0x1050   : > { %5085 = vmatpush.msrb.mxu0 %v4739_v17  ;;  %5105 = vmatpush.msra.mxu1 %v4803_v21  ;;  %v4768_v2 = vld [vmem:[%s11609_s1 + $0x518] sm:$0xff] }
0x1051   : > { %5043 = vmatpush.msrb.mxu2 %v4619_v28  ;;  %5063 = vmatpush.msrb.mxu3 %v4683_v7  ;;  %v4832_v4 = vld [vmem:[%s11609_s1 + $0x718] sm:$0xff] }
0x1052   : > { %5086 = vmatpush.msrb.mxu0 %v4735_v29  ;;  %5106 = vmatpush.msra.mxu1 %v4799_v31  ;;  %v4648_v5 = vld [vmem:[%s11609_s1 + $0x158] sm:$0xff] }
0x1053   : > { %5087 = vmatmul.f32.vlgmr.msrb.gmra.mxu0 %v10808_v23  ;;  %5107 = vmatmul.f32.vlgmr.msra.gmra.mxu1 %v10810_v26  ;;  %v4712_v6 = vld [vmem:[%s11609_s1 + $0x358] sm:$0xff] }
0x1054   : > { %5151 = vmatpush.msra.mxu0 %v4796_v30  ;;  %5171 = vmatpush.msrb.mxu1 %v4860_v24  ;;  %v4764_v9 = vld [vmem:[%s11609_s1 + $0x4f8] sm:$0xff] }
0x1055   : > { %5044 = vmatpush.msrb.mxu2 %v4615_v8  ;;  %5064 = vmatpush.msrb.mxu3 %v4679_v34  ;;  %v4828_v10 = vld [vmem:[%s11609_s1 + $0x6f8] sm:$0xff] }
0x1056   : > { %5152 = vmatpush.msra.mxu0 %v4792_v35  ;;  %5172 = vmatpush.msrb.mxu1 %v4856_v37  ;;  %v4644_v54 = vld [vmem:[%s11609_s1 + $0x138] sm:$0xff] }
0x1057   : > { %5045 = vmatpush.msrb.mxu2 %v4611_v39  ;;  %5065 = vmatpush.msrb.mxu3 %v4675_v25  ;;  %v4708_v11 = vld [vmem:[%s11609_s1 + $0x338] sm:$0xff] }
0x1058   : > { %5153 = vmatpush.msra.mxu0 %v4788_v16  ;;  %5173 = vmatpush.msrb.mxu1 %v4852_v20  ;;  %v4760_v60 = vld [vmem:[%s11609_s1 + $0x4d8] sm:$0xff] }
0x1059   : > { %5046 = vmatpush.msrb.mxu2 %v4607_v27  ;;  %5066 = vmatpush.msrb.mxu3 %v4671_v41  ;;  %v4824_v12 = vld [vmem:[%s11609_s1 + $0x6d8] sm:$0xff] }
0x105a   : > { %5047 = vmatmul.f32.vlgmr.msrb.gmra.mxu2 %v10818_v32  ;;  %5067 = vmatmul.f32.vlgmr.msrb.gmra.mxu3 %v10820_v33  ;;  %v4640_v13 = vld [vmem:[%s11609_s1 + $0x118] sm:$0xff] }
0x105b   : > { %5111 = vmatpush.msra.mxu2 %v4668_v42  ;;  %5131 = vmatpush.msra.mxu3 %v4732_v44  ;;  %v4704_v55 = vld [vmem:[%s11609_s1 + $0x318] sm:$0xff] }
0x105c   : > { %5154 = vmatpush.msra.mxu0 %v4784_v50  ;;  %5174 = vmatpush.msrb.mxu1 %v4848_v14  ;;  %v4756_v61 = vld [vmem:[%s11609_s1 + $0x4b8] sm:$0xff] }
0x105d   : > { %5112 = vmatpush.msra.mxu2 %v4664_v51  ;;  %5132 = vmatpush.msra.mxu3 %v4728_v40  ;;  %v4820_v49 = vld [vmem:[%s11609_s1 + $0x6b8] sm:$0xff] }
0x105e   : > { %5155 = vmatpush.msra.mxu0 %v4780_v57  ;;  %5175 = vmatpush.msrb.mxu1 %v4844_v58  ;;  %v4636_v36 = vld [vmem:[%s11609_s1 + $0xf8] sm:$0xff]  ;;  %v5251_v57 = vld [vmem:[#allocation24 + $0x1e0] sm:$0xff] }
0x105f   : > { %5113 = vmatpush.msra.mxu2 %v4660_v19  ;;  %5133 = vmatpush.msra.mxu3 %v4724_v62  ;;  %v4700_v15 = vld [vmem:[%s11609_s1 + $0x2f8] sm:$0xff]  ;;  %v5315_v58 = vld [vmem:[#allocation24 + $0x3e0] sm:$0xff] }
0x1060   : > { %5156 = vmatpush.msra.mxu0 %v4776_v63  ;;  %5176 = vmatpush.msrb.mxu1 %v4840_v46  ;;  %v4752_v17 = vld [vmem:[%s11609_s1 + $0x498] sm:$0xff]  ;;  %v5379_v19 = vld [vmem:[#allocation24 + $0x5e0] sm:$0xff] }
0x1061   : > { %5114 = vmatpush.msra.mxu2 %v4656_v45  ;;  %5134 = vmatpush.msra.mxu3 %v4720_v52  ;;  %v4816_v21 = vld [vmem:[%s11609_s1 + $0x698] sm:$0xff]  ;;  %v5311_v62 = vld [vmem:[#allocation24 + $0x3c0] sm:$0xff] }
0x1062   : > { %5157 = vmatpush.msra.mxu0 %v4772_v43  ;;  %5177 = vmatpush.msrb.mxu1 %v4836_v1  ;;  %v4632_v28 = vld [vmem:[%s11609_s1 + $0xd8] sm:$0xff]  ;;  %v5243_v63 = vld [vmem:[#allocation24 + $0x1a0] sm:$0xff] }
0x1063   : > { %5115 = vmatpush.msra.mxu2 %v4652_v48  ;;  %5135 = vmatpush.msra.mxu3 %v4716_v47  ;;  %v4696_v7 = vld [vmem:[%s11609_s1 + $0x2d8] sm:$0xff]  ;;  %v5307_v46 = vld [vmem:[#allocation24 + $0x3a0] sm:$0xff] }
0x1064   : > { %5158 = vmatpush.msra.mxu0 %v4768_v2  ;;  %5178 = vmatpush.msrb.mxu1 %v4832_v4  ;;  %v4748_v29 = vld [vmem:[%s11609_s1 + $0x478] sm:$0xff]  ;;  %v5371_v45 = vld [vmem:[#allocation24 + $0x5a0] sm:$0xff] }
0x1065   : > { %5116 = vmatpush.msra.mxu2 %v4648_v5  ;;  %5136 = vmatpush.msra.mxu3 %v4712_v6  ;;  %v4812_v31 = vld [vmem:[%s11609_s1 + $0x678] sm:$0xff]  ;;  %v5239_v52 = vld [vmem:[#allocation24 + $0x180] sm:$0xff] }
0x1066   : > { %5159 = vmatpush.msra.mxu0 %v4764_v9  ;;  %5179 = vmatpush.msrb.mxu1 %v4828_v10  ;;  %v4628_v30 = vld [vmem:[%s11609_s1 + $0xb8] sm:$0xff]  ;;  %v5303_v43 = vld [vmem:[#allocation24 + $0x380] sm:$0xff] }
0x1067   : > { %5117 = vmatpush.msra.mxu2 %v4644_v54  ;;  %5137 = vmatpush.msra.mxu3 %v4708_v11  ;;  %v4692_v24 = vld [vmem:[%s11609_s1 + $0x2b8] sm:$0xff]  ;;  %v5367_v1 = vld [vmem:[#allocation24 + $0x580] sm:$0xff] }
0x1068   : > { %5160 = vmatpush.msra.mxu0 %v4760_v60  ;;  %5180 = vmatpush.msrb.mxu1 %v4824_v12  ;;  %v4744_v8 = vld [vmem:[%s11609_s1 + $0x458] sm:$0xff]  ;;  %v5299_v48 = vld [vmem:[#allocation24 + $0x360] sm:$0xff] }
0x1069   : > { %5118 = vmatpush.msra.mxu2 %v4640_v13  ;;  %5138 = vmatpush.msra.mxu3 %v4704_v55  ;;  %v4808_v34 = vld [vmem:[%s11609_s1 + $0x658] sm:$0xff]  ;;  %v5231_v47 = vld [vmem:[#allocation24 + $0x140] sm:$0xff] }
0x106a   : > { %5161 = vmatpush.msra.mxu0 %v4756_v61  ;;  %5181 = vmatpush.msrb.mxu1 %v4820_v49  ;;  %v4624_v35 = vld [vmem:[%s11609_s1 + $0x98] sm:$0xff]  ;;  %v5295_v2 = vld [vmem:[#allocation24 + $0x340] sm:$0xff] }
0x106b   : > { %5119 = vmatpush.msra.mxu2 %v4636_v36  ;;  %5139 = vmatpush.msra.mxu3 %v4700_v15  ;;  %v4688_v37 = vld [vmem:[%s11609_s1 + $0x298] sm:$0xff]  ;;  %v5227_v4 = vld [vmem:[#allocation24 + $0x120] sm:$0xff] }
0x106c   : > { %5162 = vmatpush.msra.mxu0 %v4752_v17  ;;  %5182 = vmatpush.msrb.mxu1 %v4816_v21  ;;  %v4740_v39 = vld [vmem:[%s11609_s1 + $0x438] sm:$0xff]  ;;  %v5291_v5 = vld [vmem:[#allocation24 + $0x320] sm:$0xff] }
0x106d   : > { %5120 = vmatpush.msra.mxu2 %v4632_v28  ;;  %5140 = vmatpush.msra.mxu3 %v4696_v7  ;;  %v4804_v25 = vld [vmem:[%s11609_s1 + $0x638] sm:$0xff]  ;;  %v5223_v6 = vld [vmem:[#allocation24 + $0x100] sm:$0xff] }
0x106e   : > { %5163 = vmatpush.msra.mxu0 %v4748_v29  ;;  %5183 = vmatpush.msrb.mxu1 %v4812_v31  ;;  %v4620_v16 = vld [vmem:[%s11609_s1 + $0x78] sm:$0xff]  ;;  %v5287_v9 = vld [vmem:[#allocation24 + $0x300] sm:$0xff] }
0x106f   : > { %5121 = vmatpush.msra.mxu2 %v4628_v30  ;;  %5141 = vmatpush.msra.mxu3 %v4692_v24  ;;  %v4684_v20 = vld [vmem:[%s11609_s1 + $0x278] sm:$0xff]  ;;  %v5219_v10 = vld [vmem:[#allocation24 + $0xe0] sm:$0xff] }
0x1070   : > { %5164 = vmatpush.msra.mxu0 %v4744_v8  ;;  %5184 = vmatpush.msrb.mxu1 %v4808_v34  ;;  %v4736_v27 = vld [vmem:[%s11609_s1 + $0x418] sm:$0xff]  ;;  %v5283_v54 = vld [vmem:[#allocation24 + $0x2e0] sm:$0xff] }
0x1071   : > { %5122 = vmatpush.msra.mxu2 %v4624_v35  ;;  %5142 = vmatpush.msra.mxu3 %v4688_v37  ;;  %v4800_v41 = vld [vmem:[%s11609_s1 + $0x618] sm:$0xff]  ;;  %v5215_v11 = vld [vmem:[#allocation24 + $0xc0] sm:$0xff]  ;;  %v5252_v37 = vld [vmem:[#allocation24 + $0x1e8] sm:$0xff] }
0x1072   : > { %5165 = vmatpush.msra.mxu0 %v4740_v39  ;;  %5185 = vmatpush.msrb.mxu1 %v4804_v25  ;;  %v4616_v42 = vld [vmem:[%s11609_s1 + $0x58] sm:$0xff]  ;;  %v5279_v60 = vld [vmem:[#allocation24 + $0x2c0] sm:$0xff]  ;;  %v5316_v39 = vld [vmem:[#allocation24 + $0x3e8] sm:$0xff] }
0x1073   : > { %5123 = vmatpush.msra.mxu2 %v4620_v16  ;;  %5143 = vmatpush.msra.mxu3 %v4684_v20  ;;  %v4680_v44 = vld [vmem:[%s11609_s1 + $0x258] sm:$0xff]  ;;  %v5211_v12 = vld [vmem:[#allocation24 + $0xa0] sm:$0xff]  ;;  %v5248_v25 = vld [vmem:[#allocation24 + $0x1c8] sm:$0xff] }
0x1074   : > { %5166 = vmatpush.msra.mxu0 %v4736_v27  ;;  %5186 = vmatpush.msrb.mxu1 %v4800_v41  ;;  %v4612_v50 = vld [vmem:[%s11609_s1 + $0x38] sm:$0xff]  ;;  %v5275_v13 = vld [vmem:[#allocation24 + $0x2a0] sm:$0xff]  ;;  %v5312_v16 = vld [vmem:[#allocation24 + $0x3c8] sm:$0xff] }
0x1075   : > { %5167 = vmatmul.f32.vlgmr.msra.gmra.mxu0 %v10808_v23  ;;  %5187 = vmatmul.f32.vlgmr.msrb.gmra.mxu1 %v10810_v26  ;;  %v4676_v14 = vld [vmem:[%s11609_s1 + $0x238] sm:$0xff]  ;;  %v5247_v23 = vld [vmem:[#allocation24 + $0x1c0] sm:$0xff]  ;;  %v5244_v20 = vld [vmem:[#allocation24 + $0x1a8] sm:$0xff] }
0x1076   : > { %5124 = vmatpush.msra.mxu2 %v4616_v42  ;;  %5144 = vmatpush.msra.mxu3 %v4680_v44  ;;  %v4608_v51 = vld [vmem:[%s11609_s1 + $0x18] sm:$0xff]  ;;  %v5375_v26 = vld [vmem:[#allocation24 + $0x5c0] sm:$0xff]  ;;  %v5308_v27 = vld [vmem:[#allocation24 + $0x3a8] sm:$0xff] }
0x1077   : > { %v4672_v40 = vld [vmem:[%s11609_s1 + $0x218] sm:$0xff]  ;;  %5497 = vmatpush.msrb.mxu0 %v5379_v19  ;;  %v5359_v55 = vld [vmem:[#allocation24 + $0x540] sm:$0xff]  ;;  %v5240_v41 = vld [vmem:[#allocation24 + $0x188] sm:$0xff] }
0x1078   : > { %5125 = vmatpush.msra.mxu2 %v4612_v50  ;;  %5145 = vmatpush.msra.mxu3 %v4676_v14  ;;  %v5355_v61 = vld [vmem:[#allocation24 + $0x520] sm:$0xff]  ;;  %v5304_v42 = vld [vmem:[#allocation24 + $0x388] sm:$0xff] }
0x1079   : > { %5498 = vmatpush.msrb.mxu0 %v5375_v26  ;;  %v5207_v49 = vld [vmem:[#allocation24 + $0x80] sm:$0xff]  ;;  %v5236_v50 = vld [vmem:[#allocation24 + $0x168] sm:$0xff] }
0x107a   : > { %5126 = vmatpush.msra.mxu2 %v4608_v51  ;;  %5146 = vmatpush.msra.mxu3 %v4672_v40  ;;  %v5271_v36 = vld [vmem:[#allocation24 + $0x280] sm:$0xff]  ;;  %v5300_v14 = vld [vmem:[#allocation24 + $0x368] sm:$0xff] }
0x107b   : > { %5127 = vmatmul.f32.vlgmr.msra.gmra.mxu2 %v10818_v32  ;;  %5147 = vmatmul.f32.vlgmr.msra.gmra.mxu3 %v10820_v33  ;;  %v5235_v32 = vld [vmem:[#allocation24 + $0x160] sm:$0xff]  ;;  %v5224_v26 = vld [vmem:[#allocation24 + $0x108] sm:$0xff] }
0x107c   : > { %5457 = vmatpush.msrb.mxu2 %v5251_v57  ;;  %5477 = vmatpush.msrb.mxu3 %v5315_v58  ;;  %v5363_v33 = vld [vmem:[#allocation24 + $0x560] sm:$0xff]  ;;  %v5232_v57 = vld [vmem:[#allocation24 + $0x148] sm:$0xff] }
0x107d   : > { %5499 = vmatpush.msrb.mxu0 %v5371_v45  ;;  %v5351_v15 = vld [vmem:[#allocation24 + $0x500] sm:$0xff]  ;;  %v5296_v58 = vld [vmem:[#allocation24 + $0x348] sm:$0xff] }
0x107e   : > { %5458 = vmatpush.msrb.mxu2 %v5247_v23  ;;  %5478 = vmatpush.msrb.mxu3 %v5311_v62  ;;  %v5203_v17 = vld [vmem:[#allocation24 + $0x60] sm:$0xff]  ;;  %v5228_v23 = vld [vmem:[#allocation24 + $0x128] sm:$0xff] }
0x107f   : > { %5500 = vmatpush.msrb.mxu0 %v5367_v1  ;;  %v5267_v21 = vld [vmem:[#allocation24 + $0x260] sm:$0xff]  ;;  %v5292_v62 = vld [vmem:[#allocation24 + $0x328] sm:$0xff] }
0x1080   : > { %5459 = vmatpush.msrb.mxu2 %v5243_v63  ;;  %5479 = vmatpush.msrb.mxu3 %v5307_v46  ;;  %v5347_v28 = vld [vmem:[#allocation24 + $0x4e0] sm:$0xff]  ;;  %v5288_v63 = vld [vmem:[#allocation24 + $0x308] sm:$0xff] }
0x1081   : > { %5501 = vmatpush.msrb.mxu0 %v5363_v33  ;;  %v5199_v7 = vld [vmem:[#allocation24 + $0x40] sm:$0xff]  ;;  %v5220_v46 = vld [vmem:[#allocation24 + $0xe8] sm:$0xff] }
0x1082   : > { %5460 = vmatpush.msrb.mxu2 %v5239_v52  ;;  %5480 = vmatpush.msrb.mxu3 %v5303_v43  ;;  %v5263_v29 = vld [vmem:[#allocation24 + $0x240] sm:$0xff]  ;;  %v5284_v52 = vld [vmem:[#allocation24 + $0x2e8] sm:$0xff] }
0x1083   : > { %5502 = vmatpush.msrb.mxu0 %v5359_v55  ;;  %v5195_v31 = vld [vmem:[#allocation24 + $0x20] sm:$0xff]  ;;  %v5380_v1 = vld [vmem:[#allocation24 + $0x5e8] sm:$0xff] }
0x1084   : > { %5461 = vmatpush.msrb.mxu2 %v5235_v32  ;;  %5481 = vmatpush.msrb.mxu3 %v5299_v48  ;;  %v5259_v30 = vld [vmem:[#allocation24 + $0x220] sm:$0xff]  ;;  %v5216_v32 = vld [vmem:[#allocation24 + $0xc8] sm:$0xff] }
0x1085   : > { %5503 = vmatpush.msrb.mxu0 %v5355_v61  ;;  %v5343_v24 = vld [vmem:[#allocation24 + $0x4c0] sm:$0xff]  ;;  %v5280_v48 = vld [vmem:[#allocation24 + $0x2c8] sm:$0xff] }
0x1086   : > { %5462 = vmatpush.msrb.mxu2 %v5231_v47  ;;  %5482 = vmatpush.msrb.mxu3 %v5295_v2  ;;  %v5191_v8 = vld [vmem:[#allocation24] sm:$0xff]  ;;  %v5376_v47 = vld [vmem:[#allocation24 + $0x5c8] sm:$0xff] }
0x1087   : > { %5504 = vmatpush.msrb.mxu0 %v5351_v15  ;;  %v5255_v34 = vld [vmem:[#allocation24 + $0x200] sm:$0xff]  ;;  %v5268_v55 = vld [vmem:[#allocation24 + $0x268] sm:$0xff] }
0x1088   : > { %5463 = vmatpush.msrb.mxu2 %v5227_v4  ;;  %5483 = vmatpush.msrb.mxu3 %v5291_v5  ;;  %v5339_v35 = vld [vmem:[#allocation24 + $0x4a0] sm:$0xff]  ;;  %v5372_v4 = vld [vmem:[#allocation24 + $0x5a8] sm:$0xff] }
0x1089   : > { %5505 = vmatpush.msrb.mxu0 %v5347_v28  ;;  %v5335_v44 = vld [vmem:[#allocation24 + $0x480] sm:$0xff]  ;;  %v5212_v5 = vld [vmem:[#allocation24 + $0xa8] sm:$0xff] }
0x108a   : > { %5464 = vmatpush.msrb.mxu2 %v5223_v6  ;;  %5484 = vmatpush.msrb.mxu3 %v5287_v9  ;;  %v5331_v51 = vld [vmem:[#allocation24 + $0x460] sm:$0xff]  ;;  %v5276_v6 = vld [vmem:[#allocation24 + $0x2a8] sm:$0xff] }
0x108b   : > { %5506 = vmatpush.msrb.mxu0 %v5343_v24  ;;  %v5327_v40 = vld [vmem:[#allocation24 + $0x440] sm:$0xff]  ;;  %v5264_v15 = vld [vmem:[#allocation24 + $0x248] sm:$0xff] }
0x108c   : > { %5465 = vmatpush.msrb.mxu2 %v5219_v10  ;;  %5485 = vmatpush.msrb.mxu3 %v5283_v54  ;;  %v5323_v19 = vld [vmem:[#allocation24 + $0x420] sm:$0xff]  ;;  %v5368_v10 = vld [vmem:[#allocation24 + $0x588] sm:$0xff] }
0x108d   : > { %5507 = vmatpush.msrb.mxu0 %v5339_v35  ;;  %v5319_v45 = vld [vmem:[#allocation24 + $0x400] sm:$0xff]  ;;  %v5208_v54 = vld [vmem:[#allocation24 + $0x88] sm:$0xff] }
0x108e   : > { %5466 = vmatpush.msrb.mxu2 %v5215_v11  ;;  %5486 = vmatpush.msrb.mxu3 %v5279_v60  ;;  %v5443_v43 = vld [vmem:[#allocation24 + $0x7e0] sm:$0xff]  ;;  %v5272_v11 = vld [vmem:[#allocation24 + $0x288] sm:$0xff] }
0x108f   : > { %5508 = vmatpush.msrb.mxu0 %v5335_v44  ;;  %5517 = vmatpush.msra.mxu1 %v5443_v43  ;;  %v5439_v33 = vld [vmem:[#allocation24 + $0x7c0] sm:$0xff]  ;;  %v5356_v28 = vld [vmem:[#allocation24 + $0x528] sm:$0xff] }
0x1090   : > { %5467 = vmatpush.msrb.mxu2 %v5211_v12  ;;  %5487 = vmatpush.msrb.mxu3 %v5275_v13  ;;  %v5435_v2 = vld [vmem:[#allocation24 + $0x7a0] sm:$0xff]  ;;  %v5364_v12 = vld [vmem:[#allocation24 + $0x568] sm:$0xff] }
0x1091   : > { %5509 = vmatpush.msrb.mxu0 %v5331_v51  ;;  %5518 = vmatpush.msra.mxu1 %v5439_v33  ;;  %v5431_v9 = vld [vmem:[#allocation24 + $0x780] sm:$0xff]  ;;  %v5204_v13 = vld [vmem:[#allocation24 + $0x68] sm:$0xff] }
0x1092   : > { %5468 = vmatpush.msrb.mxu2 %v5207_v49  ;;  %5488 = vmatpush.msrb.mxu3 %v5271_v36  ;;  %v5427_v60 = vld [vmem:[#allocation24 + $0x760] sm:$0xff]  ;;  %v5360_v49 = vld [vmem:[#allocation24 + $0x548] sm:$0xff] }
0x1093   : > { %5510 = vmatpush.msrb.mxu0 %v5327_v40  ;;  %5519 = vmatpush.msra.mxu1 %v5435_v2  ;;  %v5423_v61 = vld [vmem:[#allocation24 + $0x740] sm:$0xff]  ;;  %v5200_v36 = vld [vmem:[#allocation24 + $0x48] sm:$0xff] }
0x1094   : > { %5469 = vmatpush.msrb.mxu2 %v5203_v17  ;;  %5489 = vmatpush.msrb.mxu3 %v5267_v21  ;;  %v10958_v17 = vld [vmem:[#allocation21] sm:$0xf]  ;;  %v5419_v21 = vld [vmem:[#allocation24 + $0x720] sm:$0xff]  ;;  %v5336_v40 = vld [vmem:[#allocation24 + $0x488] sm:$0xff] }
0x1095   : > { %5511 = vmatpush.msrb.mxu0 %v5323_v19  ;;  %5520 = vmatpush.msra.mxu1 %v5431_v9  ;;  %v4863_v24 = vperm.slane %v10958_v17, 0  ;;  %v5411_v35 = vld [vmem:[#allocation24 + $0x6e0] sm:$0xff]  ;;  %v4864_v19 = vperm.slane %v10958_v17, 1  ;;  %v5444_v9 = vld [vmem:[#allocation24 + $0x7e8] sm:$0xff] }
0x1096   : > { %5470 = vmatpush.msrb.mxu2 %v5199_v7  ;;  %5490 = vmatpush.msrb.mxu3 %v5263_v29  ;;  %v5196_v7 = vld [vmem:[#allocation24 + $0x28] sm:$0xff]  ;;  %v5399_v51 = vld [vmem:[#allocation24 + $0x680] sm:$0xff] }
0x1097   : > { %5512 = vmatpush.msrb.mxu0 %v5319_v45  ;;  %5521 = vmatpush.msra.mxu1 %v5427_v60  ;;  %v5260_v29 = vld [vmem:[#allocation24 + $0x228] sm:$0xff] }
0x1098   : > { %5471 = vmatpush.msrb.mxu2 %v5195_v31  ;;  %5491 = vmatpush.msrb.mxu3 %v5259_v30  ;;  %v5415_v31 = vld [vmem:[#allocation24 + $0x700] sm:$0xff]  ;;  %v5352_v30 = vld [vmem:[#allocation24 + $0x508] sm:$0xff] }
0x1099   : > { %5577 = vmatpush.msra.mxu0 %v5380_v1  ;;  %5522 = vmatpush.msra.mxu1 %v5423_v61  ;;  %v5328_v45 = vld [vmem:[#allocation24 + $0x448] sm:$0xff]  ;;  %v5245_v1 = vld [vmem:[#allocation24 + $0x1b0] sm:$0xff] }
0x109a   : > { %5472 = vmatpush.msrb.mxu2 %v5191_v8  ;;  %5492 = vmatpush.msrb.mxu3 %v5255_v34  ;;  %v5192_v8 = vld [vmem:[#allocation24 + $0x8] sm:$0xff] }
0x109b   : > { %5578 = vmatpush.msra.mxu0 %v5376_v47  ;;  %v5256_v34 = vld [vmem:[#allocation24 + $0x208] sm:$0xff]  ;;  %5523 = vmatpush.msra.mxu1 %v5419_v21  ;;  %v5383_v47 = vld [vmem:[#allocation24 + $0x600] sm:$0xff]  ;;  %v5309_v21 = vld [vmem:[#allocation24 + $0x3b0] sm:$0xff] }
0x109c   : > { %5537 = vmatpush.msra.mxu2 %v5252_v37  ;;  %5557 = vmatpush.msra.mxu3 %v5316_v39  ;;  %v5348_v37 = vld [vmem:[#allocation24 + $0x4e8] sm:$0xff] }
0x109d   : > { %5579 = vmatpush.msra.mxu0 %v5372_v4  ;;  %5524 = vmatpush.msra.mxu1 %v5415_v31  ;;  %v5241_v4 = vld [vmem:[#allocation24 + $0x190] sm:$0xff]  ;;  %v5440_v60 = vld [vmem:[#allocation24 + $0x7c8] sm:$0xff] }
0x109e   : > { %5538 = vmatpush.msra.mxu2 %v5248_v25  ;;  %5558 = vmatpush.msra.mxu3 %v5312_v16  ;;  %v5407_v25 = vld [vmem:[#allocation24 + $0x6c0] sm:$0xff]  ;;  %v5344_v16 = vld [vmem:[#allocation24 + $0x4c8] sm:$0xff]  ;;  %v5221_v31 = vld [vmem:[#allocation24 + $0xf0] sm:$0xff] }
0x109f   : > { %5580 = vmatpush.msra.mxu0 %v5368_v10  ;;  %5525 = vmatpush.msra.mxu1 %v5411_v35  ;;  %v5436_v61 = vld [vmem:[#allocation24 + $0x7a8] sm:$0xff]  ;;  %v5297_v35 = vld [vmem:[#allocation24 + $0x350] sm:$0xff] }
0x10a0   : > { %5539 = vmatpush.msra.mxu2 %v5244_v20  ;;  %5559 = vmatpush.msra.mxu3 %v5308_v27 }
0x10a1   : > { %5581 = vmatpush.msra.mxu0 %v5364_v12  ;;  %5526 = vmatpush.msra.mxu1 %v5407_v25  ;;  %v5293_v25 = vld [vmem:[#allocation24 + $0x330] sm:$0xff] }
0x10a2   : > { %5540 = vmatpush.msra.mxu2 %v5240_v41  ;;  %5560 = vmatpush.msra.mxu3 %v5304_v42  ;;  %v5403_v41 = vld [vmem:[#allocation24 + $0x6a0] sm:$0xff]  ;;  %v5340_v42 = vld [vmem:[#allocation24 + $0x4a8] sm:$0xff] }
0x10a3   : > { %5582 = vmatpush.msra.mxu0 %v5360_v49  ;;  %5527 = vmatpush.msra.mxu1 %v5403_v41  ;;  %v5313_v49 = vld [vmem:[#allocation24 + $0x3d0] sm:$0xff] }
0x10a4   : > { %5541 = vmatpush.msra.mxu2 %v5236_v50  ;;  %5561 = vmatpush.msra.mxu3 %v5300_v14  ;;  %v5205_v41 = vld [vmem:[#allocation24 + $0x70] sm:$0xff] }
0x10a5   : > { %5583 = vmatpush.msra.mxu0 %v5356_v28  ;;  %5528 = vmatpush.msra.mxu1 %v5399_v51  ;;  %v5225_v28 = vld [vmem:[#allocation24 + $0x110] sm:$0xff]  ;;  %v5404_v51 = vld [vmem:[#allocation24 + $0x6a8] sm:$0xff] }
0x10a6   : > { %5542 = vmatpush.msra.mxu2 %v5232_v57  ;;  %5562 = vmatpush.msra.mxu3 %v5296_v58 }
0x10a7   : > { %5584 = vmatpush.msra.mxu0 %v5352_v30  ;;  %v5424_v30 = vld [vmem:[#allocation24 + $0x748] sm:$0xff] }
0x10a8   : > { %5543 = vmatpush.msra.mxu2 %v5228_v23  ;;  %5563 = vmatpush.msra.mxu3 %v5292_v62  ;;  %v5253_v23 = vld [vmem:[#allocation24 + $0x1f0] sm:$0xff]  ;;  %v5395_v62 = vld [vmem:[#allocation24 + $0x660] sm:$0xff] }
0x10a9   : > { %5585 = vmatpush.msra.mxu0 %v5348_v37  ;;  %5529 = vmatpush.msra.mxu1 %v5395_v62  ;;  %v5213_v37 = vld [vmem:[#allocation24 + $0xb0] sm:$0xff] }
0x10aa   : > { %5544 = vmatpush.msra.mxu2 %v5224_v26  ;;  %5564 = vmatpush.msra.mxu3 %v5288_v63  ;;  %v5332_v26 = vld [vmem:[#allocation24 + $0x468] sm:$0xff]  ;;  %v5249_v63 = vld [vmem:[#allocation24 + $0x1d0] sm:$0xff] }
0x10ab   : > { %5586 = vmatpush.msra.mxu0 %v5344_v16  ;;  %v5209_v16 = vld [vmem:[#allocation24 + $0x90] sm:$0xff] }
0x10ac   : > { %5545 = vmatpush.msra.mxu2 %v5220_v46  ;;  %5565 = vmatpush.msra.mxu3 %v5284_v52  ;;  %v5391_v46 = vld [vmem:[#allocation24 + $0x640] sm:$0xff] }
0x10ad   : > { %v4928_v50 = vpop.f32.mrf.mxu0  ;;  %5587 = vmatpush.msra.mxu0 %v5340_v42  ;;  %v4948_v57 = vpop.f32.mrf.mxu1  ;;  %5530 = vmatpush.msra.mxu1 %v5391_v46  ;;  %v5408_v42 = vld [vmem:[#allocation24 + $0x6c8] sm:$0xff] }
0x10ae   : > { %5546 = vmatpush.msra.mxu2 %v5216_v32  ;;  %5566 = vmatpush.msra.mxu3 %v5280_v48  ;;  %v5387_v32 = vld [vmem:[#allocation24 + $0x620] sm:$0xff]  ;;  %v5324_v48 = vld [vmem:[#allocation24 + $0x428] sm:$0xff] }
0x10af   : > { %5588 = vmatpush.msra.mxu0 %v5336_v40  ;;  %5531 = vmatpush.msra.mxu1 %v5387_v32  ;;  %v5281_v40 = vld [vmem:[#allocation24 + $0x2d0] sm:$0xff] }
0x10b0   : > { %5547 = vmatpush.msra.mxu2 %v5212_v5  ;;  %5567 = vmatpush.msra.mxu3 %v5276_v6  ;;  %v5320_v5 = vld [vmem:[#allocation24 + $0x408] sm:$0xff] }
0x10b1   : > { %5589 = vmatpush.msra.mxu0 %v5332_v26  ;;  %5532 = vmatpush.msra.mxu1 %v5383_v47  ;;  %v5277_v26 = vld [vmem:[#allocation24 + $0x2b0] sm:$0xff] }
0x10b2   : > { %5548 = vmatpush.msra.mxu2 %v5208_v54  ;;  %5568 = vmatpush.msra.mxu3 %v5272_v11  ;;  %v5237_v54 = vld [vmem:[#allocation24 + $0x170] sm:$0xff] }
0x10b3   : > { %5590 = vmatpush.msra.mxu0 %v5328_v45  ;;  %5597 = vmatpush.msrb.mxu1 %v5444_v9  ;;  %v5396_v45 = vld [vmem:[#allocation24 + $0x668] sm:$0xff]  ;;  %v5269_v47 = vld [vmem:[#allocation24 + $0x270] sm:$0xff] }
0x10b4   : > { %5549 = vmatpush.msra.mxu2 %v5204_v13  ;;  %5569 = vmatpush.msra.mxu3 %v5268_v55  ;;  %v5317_v13 = vld [vmem:[#allocation24 + $0x3f0] sm:$0xff] }
0x10b5   : > { %5591 = vmatpush.msra.mxu0 %v5324_v48  ;;  %v5233_v55 = vld [vmem:[#allocation24 + $0x150] sm:$0xff]  ;;  %5598 = vmatpush.msrb.mxu1 %v5440_v60  ;;  %v5392_v48 = vld [vmem:[#allocation24 + $0x648] sm:$0xff] }
0x10b6   : > { %5550 = vmatpush.msra.mxu2 %v5200_v36  ;;  %5570 = vmatpush.msra.mxu3 %v5264_v15  ;;  %v5008_v6 = vpop.f32.mrf.mxu0  ;;  %v5028_v11 = vpop.f32.mrf.mxu1  ;;  %v5229_v36 = vld [vmem:[#allocation24 + $0x130] sm:$0xff]  ;;  %v5432_v15 = vld [vmem:[#allocation24 + $0x788] sm:$0xff] }
0x10b7   : > { %5592 = vmatpush.msra.mxu0 %v5320_v5  ;;  %5599 = vmatpush.msrb.mxu1 %v5436_v61  ;;  %v5388_v5 = vld [vmem:[#allocation24 + $0x628] sm:$0xff]  ;;  %v5381_v9 = vld [vmem:[#allocation24 + $0x5f0] sm:$0xff] }
0x10b8   : > { %5551 = vmatpush.msra.mxu2 %v5196_v7  ;;  %5571 = vmatpush.msra.mxu3 %v5260_v29  ;;  %v5428_v7 = vld [vmem:[#allocation24 + $0x768] sm:$0xff]  ;;  %v5305_v29 = vld [vmem:[#allocation24 + $0x390] sm:$0xff] }
0x10b9   : > { %v4888_v39 = vpop.f32.mrf.mxu2  ;;  %v4908_v27 = vpop.f32.mrf.mxu3  ;;  %5600 = vmatpush.msrb.mxu1 %v5432_v15  ;;  %v5377_v60 = vld [vmem:[#allocation24 + $0x5d0] sm:$0xff] }
0x10ba   : > { %5552 = vmatpush.msra.mxu2 %v5192_v8  ;;  %5572 = vmatpush.msra.mxu3 %v5256_v34  ;;  %v4889_v20 = vadd.f32 %v4888_v39, %v4863_v24  ;;  %v5301_v24 = vld [vmem:[#allocation24 + $0x370] sm:$0xff]  ;;  %v5420_v34 = vld [vmem:[#allocation24 + $0x728] sm:$0xff] }
0x10bb   : > { %v5217_v8 = vld [vmem:[#allocation24 + $0xd0] sm:$0xff]  ;;  %5601 = vmatpush.msrb.mxu1 %v5428_v7  ;;  %v5416_v39 = vld [vmem:[#allocation24 + $0x708] sm:$0xff] }
0x10bc   : > { %v4909_v44 = vadd.f32 %v4908_v27, %v4889_v20  ;;  %v5412_v20 = vld [vmem:[#allocation24 + $0x6e8] sm:$0xff]  ;;  %v5289_v27 = vld [vmem:[#allocation24 + $0x310] sm:$0xff] }
0x10bd   : > { %5602 = vmatpush.msrb.mxu1 %v5424_v30  ;;  %v5373_v61 = vld [vmem:[#allocation24 + $0x5b0] sm:$0xff] }
0x10be   : > { %v4929_v14 = vadd.f32 %v4928_v50, %v4909_v44  ;;  %v4865_v44 = vperm.slane %v10958_v17, 2  ;;  %v5285_v50 = vld [vmem:[#allocation24 + $0x2f0] sm:$0xff] }
0x10bf   : > { %5603 = vmatpush.msrb.mxu1 %v5420_v34  ;;  %v5369_v15 = vld [vmem:[#allocation24 + $0x590] sm:$0xff] }
0x10c0   : > { %v10961_v58 = vadd.f32 %v4948_v57, %v4929_v14  ;;  %v5201_v14 = vld [vmem:[#allocation24 + $0x50] sm:$0xff] }
0x10c1   : > { %5604 = vmatpush.msrb.mxu1 %v5416_v39  ;;  %v5197_v57 = vld [vmem:[#allocation24 + $0x30] sm:$0xff] }
0x10c2   : > { %5473 = vmatmul.f32.vlgmr.msrb.gmra.mxu2 %v10961_v58  ;;  %v5365_v7 = vld [vmem:[#allocation24 + $0x570] sm:$0xff] }
0x10c3   : > { %v4968_v52 = vpop.f32.mrf.mxu2  ;;  %5617 = vmatpush.msrb.mxu2 %v5253_v23  ;;  %v4988_v33 = vpop.f32.mrf.mxu3  ;;  %5605 = vmatpush.msrb.mxu1 %v5412_v20  ;;  %v5400_v23 = vld [vmem:[#allocation24 + $0x688] sm:$0xff]  ;;  %v5361_v30 = vld [vmem:[#allocation24 + $0x550] sm:$0xff] }
0x10c4   : > { %v4969_v43 = vadd.f32 %v4968_v52, %v4864_v19  ;;  %v5357_v34 = vld [vmem:[#allocation24 + $0x530] sm:$0xff] }
0x10c5   : > { %5618 = vmatpush.msrb.mxu2 %v5249_v63  ;;  %5606 = vmatpush.msrb.mxu1 %v5408_v42  ;;  %v5193_v63 = vld [vmem:[#allocation24 + $0x10] sm:$0xff] }
0x10c6   : > { %v4989_v2 = vadd.f32 %v4988_v33, %v4969_v43  ;;  %v5273_v43 = vld [vmem:[#allocation24 + $0x290] sm:$0xff] }
0x10c7   : > { %5619 = vmatpush.msrb.mxu2 %v5245_v1  ;;  %5607 = vmatpush.msrb.mxu1 %v5404_v51  ;;  %v5254_v1 = vld [vmem:[#allocation24 + $0x1f8] sm:$0xff]  ;;  %v5353_v39 = vld [vmem:[#allocation24 + $0x510] sm:$0xff] }
0x10c8   : > { %v5009_v10 = vadd.f32 %v5008_v6, %v4989_v2  ;;  %v5250_v2 = vld [vmem:[#allocation24 + $0x1d8] sm:$0xff]  ;;  %v5349_v20 = vld [vmem:[#allocation24 + $0x4f0] sm:$0xff] }
0x10c9   : > { %5620 = vmatpush.msrb.mxu2 %v5241_v4  ;;  %5608 = vmatpush.msrb.mxu1 %v5400_v23  ;;  %v5345_v42 = vld [vmem:[#allocation24 + $0x4d0] sm:$0xff]  ;;  %v5290_v51 = vld [vmem:[#allocation24 + $0x318] sm:$0xff]  ;;  %v4866_v23 = vperm.slane %v10958_v17, 3 }
0x10ca   : > { %v10965_v12 = vadd.f32 %v5028_v11, %v5009_v10  ;;  %5553 = vmatmul.f32.vlgmr.msra.gmra.mxu2 %v10961_v58  ;;  %v5265_v10 = vld [vmem:[#allocation24 + $0x250] sm:$0xff]  ;;  %v5384_v11 = vld [vmem:[#allocation24 + $0x608] sm:$0xff]  ;;  %v5274_v17 = vld [vmem:[#allocation24 + $0x298] sm:$0xff] }
0x10cb   : > { %5621 = vmatpush.msrb.mxu2 %v5237_v54  ;;  %5609 = vmatpush.msrb.mxu1 %v5396_v45  ;;  %v5246_v54 = vld [vmem:[#allocation24 + $0x1b8] sm:$0xff] }
0x10cc   : > { %5493 = vmatmul.f32.vlgmr.msrb.gmra.mxu3 %v10965_v12 }
0x10cd   : > { %5637 = vmatpush.msrb.mxu3 %v5317_v13  ;;  %5622 = vmatpush.msrb.mxu2 %v5233_v55  ;;  %v5261_v13 = vld [vmem:[#allocation24 + $0x230] sm:$0xff]  ;;  %v5242_v55 = vld [vmem:[#allocation24 + $0x198] sm:$0xff] }
0x10ce   : > { %5610 = vmatpush.msrb.mxu1 %v5392_v48 }
0x10cf   : > { %5638 = vmatpush.msrb.mxu3 %v5313_v49  ;;  %5623 = vmatpush.msrb.mxu2 %v5229_v36  ;;  %v5257_v49 = vld [vmem:[#allocation24 + $0x210] sm:$0xff]  ;;  %v5238_v36 = vld [vmem:[#allocation24 + $0x178] sm:$0xff] }
0x10d0   : > { %v5088_v32 = vpop.f32.mrf.mxu0  ;;  %v5108_v4 = vpop.f32.mrf.mxu1  ;;  %5611 = vmatpush.msrb.mxu1 %v5388_v5  ;;  %v5270_v5 = vld [vmem:[#allocation24 + $0x278] sm:$0xff] }
0x10d1   : > { %5639 = vmatpush.msrb.mxu3 %v5309_v21  ;;  %5624 = vmatpush.msrb.mxu2 %v5225_v28  ;;  %v5318_v21 = vld [vmem:[#allocation24 + $0x3f8] sm:$0xff] }
0x10d2   : > { %5612 = vmatpush.msrb.mxu1 %v5384_v11  ;;  %v5234_v28 = vld [vmem:[#allocation24 + $0x158] sm:$0xff] }
0x10d3   : > { %5640 = vmatpush.msrb.mxu3 %v5305_v29  ;;  %5625 = vmatpush.msrb.mxu2 %v5221_v31  ;;  %v5314_v29 = vld [vmem:[#allocation24 + $0x3d8] sm:$0xff] }
0x10d4   : > { %5573 = vmatmul.f32.vlgmr.msra.gmra.mxu3 %v10965_v12  ;;  %v5230_v31 = vld [vmem:[#allocation24 + $0x138] sm:$0xff] }
0x10d5   : > { %5641 = vmatpush.msrb.mxu3 %v5301_v24  ;;  %5626 = vmatpush.msrb.mxu2 %v5217_v8  ;;  %v5310_v24 = vld [vmem:[#allocation24 + $0x3b8] sm:$0xff] }
0x10d6   : > { %v5226_v8 = vld [vmem:[#allocation24 + $0x118] sm:$0xff] }
0x10d7   : > { %5642 = vmatpush.msrb.mxu3 %v5297_v35  ;;  %5627 = vmatpush.msrb.mxu2 %v5213_v37  ;;  %v5306_v35 = vld [vmem:[#allocation24 + $0x398] sm:$0xff] }
0x10d8   : > { %v5222_v37 = vld [vmem:[#allocation24 + $0xf8] sm:$0xff] }
0x10d9   : > { %5643 = vmatpush.msrb.mxu3 %v5293_v25  ;;  %5628 = vmatpush.msrb.mxu2 %v5209_v16  ;;  %v5302_v25 = vld [vmem:[#allocation24 + $0x378] sm:$0xff] }
0x10da   : > { %v5218_v16 = vld [vmem:[#allocation24 + $0xd8] sm:$0xff] }
0x10db   : > { %5644 = vmatpush.msrb.mxu3 %v5289_v27  ;;  %5629 = vmatpush.msrb.mxu2 %v5205_v41  ;;  %v5298_v27 = vld [vmem:[#allocation24 + $0x358] sm:$0xff] }
0x10dc   : > { %v5214_v41 = vld [vmem:[#allocation24 + $0xb8] sm:$0xff] }
0x10dd   : > { %v5048_v19 = vpop.f32.mrf.mxu2  ;;  %5645 = vmatpush.msrb.mxu3 %v5285_v50  ;;  %5630 = vmatpush.msrb.mxu2 %v5201_v14  ;;  %v5068_v46 = vpop.f32.mrf.mxu3  ;;  %v5210_v50 = vld [vmem:[#allocation24 + $0x98] sm:$0xff]  ;;  %v5341_v14 = vld [vmem:[#allocation24 + $0x4b0] sm:$0xff] }
0x10de   : > { %v5049_v62 = vadd.f32 %v5048_v19, %v4865_v44  ;;  %v5294_v44 = vld [vmem:[#allocation24 + $0x338] sm:$0xff] }
0x10df   : > { %5646 = vmatpush.msrb.mxu3 %v5281_v40  ;;  %5631 = vmatpush.msrb.mxu2 %v5197_v57  ;;  %v5206_v40 = vld [vmem:[#allocation24 + $0x78] sm:$0xff]  ;;  %v5337_v57 = vld [vmem:[#allocation24 + $0x490] sm:$0xff] }
0x10e0   : > { %v5069_v52 = vadd.f32 %v5068_v46, %v5049_v62  ;;  %v5286_v19 = vld [vmem:[#allocation24 + $0x2f8] sm:$0xff] }
0x10e1   : > { %5647 = vmatpush.msrb.mxu3 %v5277_v26  ;;  %5632 = vmatpush.msrb.mxu2 %v5193_v63  ;;  %v5202_v62 = vld [vmem:[#allocation24 + $0x58] sm:$0xff]  ;;  %v5333_v26 = vld [vmem:[#allocation24 + $0x470] sm:$0xff] }
0x10e2   : > { %v5089_v33 = vadd.f32 %v5088_v32, %v5069_v52  ;;  %5633 = vmatmul.f32.vlgmr.msrb.gmra.mxu2 %v10961_v58  ;;  %v5282_v63 = vld [vmem:[#allocation24 + $0x2d8] sm:$0xff]  ;;  %v5329_v52 = vld [vmem:[#allocation24 + $0x450] sm:$0xff] }
0x10e3   : > { %5648 = vmatpush.msrb.mxu3 %v5273_v43  ;;  %5697 = vmatpush.msra.mxu2 %v5254_v1  ;;  %v5198_v46 = vld [vmem:[#allocation24 + $0x38] sm:$0xff] }
0x10e4   : > { %v10972_v6 = vadd.f32 %v5108_v4, %v5089_v33  ;;  %v5278_v43 = vld [vmem:[#allocation24 + $0x2b8] sm:$0xff]  ;;  %v5325_v33 = vld [vmem:[#allocation24 + $0x430] sm:$0xff] }
0x10e5   : > { %5649 = vmatpush.msrb.mxu3 %v5269_v47  ;;  %5698 = vmatpush.msra.mxu2 %v5250_v2  ;;  %v5194_v32 = vld [vmem:[#allocation24 + $0x18] sm:$0xff]  ;;  %v5321_v4 = vld [vmem:[#allocation24 + $0x410] sm:$0xff] }
0x10e6   : > { %5513 = vmatmul.f32.vlgmr.msrb.gmra.mxu0 %v10972_v6 }
0x10e7   : > { %5657 = vmatpush.msrb.mxu0 %v5381_v9  ;;  %5650 = vmatpush.msrb.mxu3 %v5265_v10 }
0x10e8   : > { %5699 = vmatpush.msra.mxu2 %v5246_v54  ;;  %v5382_v54 = vld [vmem:[#allocation24 + $0x5f8] sm:$0xff] }
0x10e9   : > { %5658 = vmatpush.msrb.mxu0 %v5377_v60  ;;  %5651 = vmatpush.msrb.mxu3 %v5261_v13  ;;  %v5445_v60 = vld [vmem:[#allocation24 + $0x7f0] sm:$0xff]  ;;  %v5266_v13 = vld [vmem:[#allocation24 + $0x258] sm:$0xff] }
0x10ea   : > { %5700 = vmatpush.msra.mxu2 %v5242_v55  ;;  %v5378_v55 = vld [vmem:[#allocation24 + $0x5d8] sm:$0xff] }
0x10eb   : > { %5659 = vmatpush.msrb.mxu0 %v5373_v61  ;;  %5652 = vmatpush.msrb.mxu3 %v5257_v49  ;;  %v5441_v61 = vld [vmem:[#allocation24 + $0x7d0] sm:$0xff]  ;;  %v5262_v49 = vld [vmem:[#allocation24 + $0x238] sm:$0xff] }
0x10ec   : > { %5653 = vmatmul.f32.vlgmr.msrb.gmra.mxu3 %v10965_v12  ;;  %5701 = vmatpush.msra.mxu2 %v5238_v36  ;;  %v5374_v36 = vld [vmem:[#allocation24 + $0x5b8] sm:$0xff] }
0x10ed   : > { %5660 = vmatpush.msrb.mxu0 %v5369_v15  ;;  %5717 = vmatpush.msra.mxu3 %v5318_v21  ;;  %v5258_v15 = vld [vmem:[#allocation24 + $0x218] sm:$0xff] }
0x10ee   : > { %5593 = vmatmul.f32.vlgmr.msra.gmra.mxu0 %v10972_v6  ;;  %5702 = vmatpush.msra.mxu2 %v5234_v28  ;;  %v5370_v21 = vld [vmem:[#allocation24 + $0x598] sm:$0xff]  ;;  %v5433_v28 = vld [vmem:[#allocation24 + $0x790] sm:$0xff] }
0x10ef   : > { %5661 = vmatpush.msrb.mxu0 %v5365_v7  ;;  %5718 = vmatpush.msra.mxu3 %v5314_v29  ;;  %v5366_v7 = vld [vmem:[#allocation24 + $0x578] sm:$0xff]  ;;  %v5429_v29 = vld [vmem:[#allocation24 + $0x770] sm:$0xff] }
0x10f0   : > { %5703 = vmatpush.msra.mxu2 %v5230_v31  ;;  %v5362_v31 = vld [vmem:[#allocation24 + $0x558] sm:$0xff] }
0x10f1   : > { %5662 = vmatpush.msrb.mxu0 %v5361_v30  ;;  %5719 = vmatpush.msra.mxu3 %v5310_v24  ;;  %v5425_v30 = vld [vmem:[#allocation24 + $0x750] sm:$0xff]  ;;  %v5358_v24 = vld [vmem:[#allocation24 + $0x538] sm:$0xff] }
0x10f2   : > { %5704 = vmatpush.msra.mxu2 %v5226_v8  ;;  %v5168_v2 = vpop.f32.mrf.mxu0  ;;  %v5188_v10 = vpop.f32.mrf.mxu1  ;;  %v5421_v8 = vld [vmem:[#allocation24 + $0x730] sm:$0xff] }
0x10f3   : > { %5663 = vmatpush.msrb.mxu0 %v5357_v34  ;;  %5720 = vmatpush.msra.mxu3 %v5306_v35  ;;  %v5354_v34 = vld [vmem:[#allocation24 + $0x518] sm:$0xff]  ;;  %v5417_v35 = vld [vmem:[#allocation24 + $0x710] sm:$0xff] }
0x10f4   : > { %5705 = vmatpush.msra.mxu2 %v5222_v37  ;;  %v5350_v37 = vld [vmem:[#allocation24 + $0x4f8] sm:$0xff] }
0x10f5   : > { %5664 = vmatpush.msrb.mxu0 %v5353_v39  ;;  %5721 = vmatpush.msra.mxu3 %v5302_v25  ;;  %v5413_v39 = vld [vmem:[#allocation24 + $0x6f0] sm:$0xff] }
0x10f6   : > { %5706 = vmatpush.msra.mxu2 %v5218_v16  ;;  %v5409_v25 = vld [vmem:[#allocation24 + $0x6d0] sm:$0xff]  ;;  %v5342_v16 = vld [vmem:[#allocation24 + $0x4b8] sm:$0xff] }
0x10f7   : > { %5665 = vmatpush.msrb.mxu0 %v5349_v20  ;;  %5722 = vmatpush.msra.mxu3 %v5298_v27  ;;  %v5405_v20 = vld [vmem:[#allocation24 + $0x6b0] sm:$0xff]  ;;  %v5338_v27 = vld [vmem:[#allocation24 + $0x498] sm:$0xff] }
0x10f8   : > { %5707 = vmatpush.msra.mxu2 %v5214_v41  ;;  %v5401_v41 = vld [vmem:[#allocation24 + $0x690] sm:$0xff] }
0x10f9   : > { %5666 = vmatpush.msrb.mxu0 %v5345_v42  ;;  %5723 = vmatpush.msra.mxu3 %v5294_v44  ;;  %v5334_v42 = vld [vmem:[#allocation24 + $0x478] sm:$0xff]  ;;  %v5397_v44 = vld [vmem:[#allocation24 + $0x670] sm:$0xff] }
0x10fa   : > { %5708 = vmatpush.msra.mxu2 %v5210_v50  ;;  %v5330_v50 = vld [vmem:[#allocation24 + $0x458] sm:$0xff] }
0x10fb   : > { %5667 = vmatpush.msrb.mxu0 %v5341_v14  ;;  %5724 = vmatpush.msra.mxu3 %v5290_v51  ;;  %v5393_v14 = vld [vmem:[#allocation24 + $0x650] sm:$0xff]  ;;  %v5326_v51 = vld [vmem:[#allocation24 + $0x438] sm:$0xff] }
0x10fc   : > { %5709 = vmatpush.msra.mxu2 %v5206_v40  ;;  %v5389_v40 = vld [vmem:[#allocation24 + $0x630] sm:$0xff] }
0x10fd   : > { %5668 = vmatpush.msrb.mxu0 %v5337_v57  ;;  %5725 = vmatpush.msra.mxu3 %v5286_v19  ;;  %v5322_v57 = vld [vmem:[#allocation24 + $0x418] sm:$0xff]  ;;  %v5385_v19 = vld [vmem:[#allocation24 + $0x610] sm:$0xff] }
0x10fe   : > { %v5128_v45 = vpop.f32.mrf.mxu2  ;;  %5710 = vmatpush.msra.mxu2 %v5202_v62  ;;  %v5148_v48 = vpop.f32.mrf.mxu3  ;;  %v5442_v62 = vld [vmem:[#allocation24 + $0x7d8] sm:$0xff] }
0x10ff   : > { %v5129_v1 = vadd.f32 %v5128_v45, %v4866_v23  ;;  %5669 = vmatpush.msrb.mxu0 %v5333_v26  ;;  %5726 = vmatpush.msra.mxu3 %v5282_v63  ;;  %v5446_v23 = vld [vmem:[#allocation24 + $0x7f8] sm:$0xff] }
0x1100   : > { %5711 = vmatpush.msra.mxu2 %v5198_v46  ;;  %v5438_v26 = vld [vmem:[#allocation24 + $0x7b8] sm:$0xff] }
0x1101   : > { %v5149_v47 = vadd.f32 %v5148_v48, %v5129_v1  ;;  %5670 = vmatpush.msrb.mxu0 %v5329_v52  ;;  %5727 = vmatpush.msra.mxu3 %v5278_v43  ;;  %v5434_v63 = vld [vmem:[#allocation24 + $0x798] sm:$0xff] }
0x1102   : > { %5712 = vmatpush.msra.mxu2 %v5194_v32  ;;  %v5430_v46 = vld [vmem:[#allocation24 + $0x778] sm:$0xff] }
0x1103   : > { %v5169_v9 = vadd.f32 %v5168_v2, %v5149_v47  ;;  %5671 = vmatpush.msrb.mxu0 %v5325_v33  ;;  %5728 = vmatpush.msra.mxu3 %v5274_v17  ;;  %v5426_v45 = vld [vmem:[#allocation24 + $0x758] sm:$0xff] }
0x1104   : > { %5713 = vmatmul.f32.vlgmr.msra.gmra.mxu2 %v10961_v58  ;;  %v5437_v58 = vld [vmem:[#allocation24 + $0x7b0] sm:$0xff]  ;;  %v5422_v52 = vld [vmem:[#allocation24 + $0x738] sm:$0xff] }
0x1105   : > { %v10979_v11 = vadd.f32 %v5188_v10, %v5169_v9  ;;  %5672 = vmatpush.msrb.mxu0 %v5321_v4  ;;  %5729 = vmatpush.msra.mxu3 %v5270_v5  ;;  %v5418_v43 = vld [vmem:[#allocation24 + $0x718] sm:$0xff]  ;;  %v5908_v4 = vld [vmem:[#allocation31 + $0x78] sm:$0xff]  ;;  %v5906_v9 = vld [vmem:[#allocation31 + $0x68] sm:$0xff] }
0x1106   : > { %5673 = vmatmul.f32.vlgmr.msrb.gmra.mxu0 %v10972_v6  ;;  %v5414_v1 = vld [vmem:[#allocation24 + $0x6f8] sm:$0xff]  ;;  %5961 = vmatpush.msrb.mxu2 %v5908_v4  ;;  %v5905_v10 = vld [vmem:[#allocation31 + $0x60] sm:$0xff] }
0x1107   : > { %5533 = vmatmul.f32.vlgmr.msra.gmra.mxu1 %v10979_v11  ;;  %5737 = vmatpush.msra.mxu0 %v5382_v54  ;;  %v5410_v32 = vld [vmem:[#allocation24 + $0x6d8] sm:$0xff] }
0x1108   : > { %5677 = vmatpush.msra.mxu1 %v5445_v60  ;;  %5730 = vmatpush.msra.mxu3 %v5266_v13  ;;  %v5402_v48 = vld [vmem:[#allocation24 + $0x698] sm:$0xff]  ;;  %v5904_v60 = vld [vmem:[#allocation31 + $0x58] sm:$0xff] }
0x1109   : > { %5738 = vmatpush.msra.mxu0 %v5378_v55  ;;  %v5398_v33 = vld [vmem:[#allocation24 + $0x678] sm:$0xff]  ;;  %v5924_v13 = vld [vmem:[#allocation31 + $0xf8] sm:$0xff] }
0x110a   : > { %5678 = vmatpush.msra.mxu1 %v5441_v61  ;;  %5731 = vmatpush.msra.mxu3 %v5262_v49  ;;  %v5394_v17 = vld [vmem:[#allocation24 + $0x658] sm:$0xff] }
0x110b   : > { %5739 = vmatpush.msra.mxu0 %v5374_v36  ;;  %v5390_v47 = vld [vmem:[#allocation24 + $0x638] sm:$0xff] }
0x110c   : > { %5679 = vmatpush.msra.mxu1 %v5437_v58  ;;  %5732 = vmatpush.msra.mxu3 %v5258_v15  ;;  %v5386_v2 = vld [vmem:[#allocation24 + $0x618] sm:$0xff]  ;;  %v5902_v58 = vld [vmem:[#allocation31 + $0x48] sm:$0xff] }
0x110d   : > { %5740 = vmatpush.msra.mxu0 %v5370_v21  ;;  %5733 = vmatmul.f32.vlgmr.msra.gmra.mxu3 %v10965_v12  ;;  %v5346_v12 = vld [vmem:[#allocation24 + $0x4d8] sm:$0xff]  ;;  %v5922_v15 = vld [vmem:[#allocation31 + $0xe8] sm:$0xff] }
0x110e   : > { %5680 = vmatpush.msra.mxu1 %v5433_v28  ;;  %v5907_v5 = vld [vmem:[#allocation31 + $0x70] sm:$0xff]  ;;  %5981 = vmatpush.msrb.mxu3 %v5924_v13  ;;  %v5936_v13 = vld [vmem:[#allocation31 + $0x158] sm:$0xff] }
0x110f   : > { %5613 = vmatmul.f32.vlgmr.msrb.gmra.mxu1 %v10979_v11  ;;  %5741 = vmatpush.msra.mxu0 %v5366_v7  ;;  %v10988_v54 = vld [vmem:[#allocation22] sm:$0xf]  ;;  %v5901_v7 = vld [vmem:[#allocation31 + $0x40] sm:$0xff] }
0x1110   : > { %5681 = vmatpush.msra.mxu1 %v5429_v29  ;;  %5962 = vmatpush.msrb.mxu2 %v5907_v5  ;;  %v5449_v61 = vperm.slane %v10988_v54, 0  ;;  %v5903_v49 = vld [vmem:[#allocation31 + $0x50] sm:$0xff]  ;;  %v5921_v29 = vld [vmem:[#allocation31 + $0xe0] sm:$0xff]  ;;  %v5938_v5 = vld [vmem:[#allocation31 + $0x168] sm:$0xff] }
0x1111   : > { %5742 = vmatpush.msra.mxu0 %v5362_v31  ;;  %v5923_v36 = vld [vmem:[#allocation31 + $0xf0] sm:$0xff] }
0x1112   : > { %5682 = vmatpush.msra.mxu1 %v5425_v30  ;;  %5963 = vmatpush.msrb.mxu2 %v5906_v9  ;;  %v5900_v30 = vld [vmem:[#allocation31 + $0x38] sm:$0xff]  ;;  %v5911_v4 = vld [vmem:[#allocation31 + $0x90] sm:$0xff]  ;;  %v5910_v9 = vld [vmem:[#allocation31 + $0x88] sm:$0xff] }
0x1113   : > { %5743 = vmatpush.msra.mxu0 %v5358_v24  ;;  %5982 = vmatpush.msrb.mxu3 %v5923_v36  ;;  %v5920_v24 = vld [vmem:[#allocation31 + $0xd8] sm:$0xff]  ;;  %v5935_v36 = vld [vmem:[#allocation31 + $0x150] sm:$0xff] }
0x1114   : > { %5683 = vmatpush.msra.mxu1 %v5421_v8  ;;  %5964 = vmatpush.msrb.mxu2 %v5905_v10  ;;  %v5450_v8 = vperm.slane %v10988_v54, 1  ;;  %v5937_v10 = vld [vmem:[#allocation31 + $0x160] sm:$0xff] }
0x1115   : > { %5744 = vmatpush.msra.mxu0 %v5354_v34  ;;  %5983 = vmatpush.msrb.mxu3 %v5922_v15 }
0x1116   : > { %5684 = vmatpush.msra.mxu1 %v5417_v35  ;;  %5965 = vmatpush.msrb.mxu2 %v5904_v60  ;;  %v5899_v35 = vld [vmem:[#allocation31 + $0x30] sm:$0xff]  ;;  %v5909_v60 = vld [vmem:[#allocation31 + $0x80] sm:$0xff] }
0x1117   : > { %5745 = vmatpush.msra.mxu0 %v5350_v37  ;;  %5984 = vmatpush.msrb.mxu3 %v5921_v29  ;;  %v5919_v37 = vld [vmem:[#allocation31 + $0xd0] sm:$0xff] }
0x1118   : > { %5685 = vmatpush.msra.mxu1 %v5413_v39  ;;  %5966 = vmatpush.msrb.mxu2 %v5903_v49 }
0x1119   : > { %5746 = vmatpush.msra.mxu0 %v5346_v12  ;;  %5985 = vmatpush.msrb.mxu3 %v5920_v24 }
0x111a   : > { %5686 = vmatpush.msra.mxu1 %v5409_v25  ;;  %5967 = vmatpush.msrb.mxu2 %v5902_v58 }
0x111b   : > { %5747 = vmatpush.msra.mxu0 %v5342_v16  ;;  %5986 = vmatpush.msrb.mxu3 %v5919_v37  ;;  %v5898_v16 = vld [vmem:[#allocation31 + $0x28] sm:$0xff] }
0x111c   : > { %5687 = vmatpush.msra.mxu1 %v5405_v20  ;;  %5968 = vmatpush.msrb.mxu2 %v5901_v7  ;;  %v5918_v20 = vld [vmem:[#allocation31 + $0xc8] sm:$0xff] }
0x111d   : > { %5748 = vmatpush.msra.mxu0 %v5338_v27  ;;  %5987 = vmatpush.msrb.mxu3 %v5918_v20  ;;  %v5931_v20 = vld [vmem:[#allocation31 + $0x130] sm:$0xff] }
0x111e   : > { %5688 = vmatpush.msra.mxu1 %v5401_v41  ;;  %5969 = vmatpush.msrb.mxu2 %v5900_v30 }
0x111f   : > { %5749 = vmatpush.msra.mxu0 %v5334_v42 }
0x1120   : > { %5689 = vmatpush.msra.mxu1 %v5397_v44  ;;  %5970 = vmatpush.msrb.mxu2 %v5899_v35  ;;  %v5897_v44 = vld [vmem:[#allocation31 + $0x20] sm:$0xff]  ;;  %v5932_v35 = vld [vmem:[#allocation31 + $0x138] sm:$0xff] }
0x1121   : > { %5750 = vmatpush.msra.mxu0 %v5330_v50  ;;  %v5917_v50 = vld [vmem:[#allocation31 + $0xc0] sm:$0xff] }
0x1122   : > { %5690 = vmatpush.msra.mxu1 %v5393_v14  ;;  %5971 = vmatpush.msrb.mxu2 %v5898_v16  ;;  %v10997_v16 = vld [vmem:[%s11610_s18] sm:$0xf] }
0x1123   : > { %5751 = vmatpush.msra.mxu0 %v5326_v51  ;;  %5988 = vmatpush.msrb.mxu3 %v5917_v50  ;;  %v2889_v50 = vadd.f32 %v10455_v56, %v10253_v0  ;;  %v5928_v56 = vld [vmem:[#allocation31 + $0x118] sm:$0xff] }
0x1124   : > { %5691 = vmatpush.msra.mxu1 %v5389_v40  ;;  %5972 = vmatpush.msrb.mxu2 %v5897_v44  ;;  %v11000_v44 = vld [vmem:[#allocation30] sm:$0xf] }
0x1125   : > { %5752 = vmatpush.msra.mxu0 %v5322_v57  ;;  %v5896_v57 = vld [vmem:[#allocation31 + $0x18] sm:$0xff] }
0x1126   : > { %5692 = vmatpush.msra.mxu1 %v5385_v19  ;;  %5753 = vmatmul.f32.vlgmr.msra.gmra.mxu0 %v10972_v6  ;;  %v5406_v6 = vld [vmem:[#allocation24 + $0x6b8] sm:$0xff]  ;;  %v5916_v19 = vld [vmem:[#allocation31 + $0xb8] sm:$0xff] }
0x1127   : > { %5693 = vmatmul.f32.vlgmr.msra.gmra.mxu1 %v10979_v11  ;;  %5973 = vmatpush.msrb.mxu2 %v5896_v57 }
0x1128   : > { %5757 = vmatpush.msrb.mxu1 %v5446_v23  ;;  %5989 = vmatpush.msrb.mxu3 %v5916_v19 }
0x112a   : > { %5758 = vmatpush.msrb.mxu1 %v5442_v62  ;;  %v5895_v62 = vld [vmem:[#allocation31 + $0x10] sm:$0xff] }
0x112b   : > { %5974 = vmatpush.msrb.mxu2 %v5895_v62  ;;  %v5863_v62 = vperm.slane %v10997_v16, 0 }
0x112c   : > { %5759 = vmatpush.msrb.mxu1 %v5438_v26  ;;  %v5915_v26 = vld [vmem:[#allocation31 + $0xb0] sm:$0xff] }
0x112d   : > { %5990 = vmatpush.msrb.mxu3 %v5915_v26 }
0x112e   : > { %5760 = vmatpush.msrb.mxu1 %v5434_v63 }
0x1130   : > { %5761 = vmatpush.msrb.mxu1 %v5430_v46 }
0x1132   : > { %5762 = vmatpush.msrb.mxu1 %v5426_v45  ;;  %v5894_v45 = vld [vmem:[#allocation31 + $0x8] sm:$0xff] }
0x1133   : > { %5975 = vmatpush.msrb.mxu2 %v5894_v45  ;;  %v5929_v45 = vld [vmem:[#allocation31 + $0x120] sm:$0xff] }
0x1134   : > { %5763 = vmatpush.msrb.mxu1 %v5422_v52  ;;  %v5914_v52 = vld [vmem:[#allocation31 + $0xa8] sm:$0xff] }
0x1135   : > { %5991 = vmatpush.msrb.mxu3 %v5914_v52 }
0x1136   : > { %5764 = vmatpush.msrb.mxu1 %v5418_v43 }
0x1138   : > { %5765 = vmatpush.msrb.mxu1 %v5414_v1  ;;  %v5893_v1 = vld [vmem:[#allocation31] sm:$0xff] }
0x1139   : > { %5976 = vmatpush.msrb.mxu2 %v5893_v1 }
0x113a   : > { %5766 = vmatpush.msrb.mxu1 %v5410_v32  ;;  %v5913_v32 = vld [vmem:[#allocation31 + $0xa0] sm:$0xff] }
0x113b   : > { %5992 = vmatpush.msrb.mxu3 %v5913_v32 }
0x113c   : > { %5767 = vmatpush.msrb.mxu1 %v5406_v6  ;;  %v5940_v6 = vld [vmem:[#allocation31 + $0x178] sm:$0xff] }
0x113d   : > { %6001 = vmatpush.msrb.mxu0 %v5940_v6 }
0x113e   : > { %5768 = vmatpush.msrb.mxu1 %v5402_v48 }
0x1140   : > { %5769 = vmatpush.msrb.mxu1 %v5398_v33 }
0x1142   : > { %5770 = vmatpush.msrb.mxu1 %v5394_v17  ;;  %v5912_v17 = vld [vmem:[#allocation31 + $0x98] sm:$0xff] }
0x1143   : > { %5993 = vmatpush.msrb.mxu3 %v5912_v17 }
0x1144   : > { %5771 = vmatpush.msrb.mxu1 %v5390_v47 }
0x1145   : > { %v5474_v55 = vpop.f32.mrf.mxu2  ;;  %5994 = vmatpush.msrb.mxu3 %v5911_v4  ;;  %v5926_v4 = vld [vmem:[#allocation31 + $0x108] sm:$0xff] }
0x1146   : > { %5772 = vmatpush.msrb.mxu1 %v5386_v2  ;;  %v5475_v28 = vadd.f32 %v5474_v55, %v5449_v61  ;;  %v5939_v2 = vld [vmem:[#allocation31 + $0x170] sm:$0xff] }
0x1147   : > { %5773 = vmatmul.f32.vlgmr.msrb.gmra.mxu1 %v10979_v11  ;;  %6002 = vmatpush.msrb.mxu0 %v5939_v2 }
0x1148   : > { %5995 = vmatpush.msrb.mxu3 %v5910_v9 }
0x1149   : > { %6003 = vmatpush.msrb.mxu0 %v5938_v5  ;;  %v2909_v5 = vadd.f32 %v10453_v53, %v10269_v18  ;;  %v5954_v53 = vld [vmem:[#allocation31 + $0x1e8] sm:$0xff] }
0x114a   : > { %5996 = vmatpush.msrb.mxu3 %v5909_v60  ;;  %v5864_v60 = vperm.slane %v10997_v16, 1 }
0x114b   : > { %6004 = vmatpush.msrb.mxu0 %v5937_v10 }
0x114d   : > { %v5554_v39 = vpop.f32.mrf.mxu2  ;;  %6005 = vmatpush.msrb.mxu0 %v5936_v13  ;;  %v5925_v13 = vld [vmem:[#allocation31 + $0x100] sm:$0xff] }
0x114e   : > { %v5555_v41 = vadd.f32 %v5554_v39, %v5450_v8 }
0x114f   : > { %v5494_v11 = vpop.f32.mrf.mxu3  ;;  %6006 = vmatpush.msrb.mxu0 %v5935_v36 }
0x1150   : > { %v5495_v31 = vadd.f32 %v5494_v11, %v5475_v28  ;;  %v5451_v11 = vperm.slane %v10988_v54, 2 }
0x1157   : > { %v5574_v27 = vpop.f32.mrf.mxu3 }
0x1158   : > { %v5575_v51 = vadd.f32 %v5574_v27, %v5555_v41 }
0x1163   : > { %v5514_v21 = vpop.f32.mrf.mxu0 }
0x1164   : > { %v5515_v34 = vadd.f32 %v5514_v21, %v5495_v31  ;;  %v5934_v21 = vld [vmem:[#allocation31 + $0x148] sm:$0xff]  ;;  %v5933_v31 = vld [vmem:[#allocation31 + $0x140] sm:$0xff] }
0x1165   : > { %v5634_v15 = vpop.f32.mrf.mxu2  ;;  %6007 = vmatpush.msrb.mxu0 %v5934_v21 }
0x1166   : > { %v5635_v30 = vadd.f32 %v5634_v15, %v5451_v11 }
0x1167   : > { %6008 = vmatpush.msrb.mxu0 %v5933_v31 }
0x1169   : > { %6009 = vmatpush.msrb.mxu0 %v5932_v35 }
0x116b   : > { %v5594_v14 = vpop.f32.mrf.mxu0  ;;  %6010 = vmatpush.msrb.mxu0 %v5931_v20 }
0x116c   : > { %v5595_v23 = vadd.f32 %v5594_v14, %v5575_v51 }
0x116f   : > { %v5654_v7 = vpop.f32.mrf.mxu3 }
0x1170   : > { %v5655_v37 = vadd.f32 %v5654_v7, %v5635_v30  ;;  %v5952_v7 = vld [vmem:[#allocation31 + $0x1d8] sm:$0xff]  ;;  %v5452_v30 = vperm.slane %v10988_v54, 3  ;;  %v5947_v54 = vld [vmem:[#allocation31 + $0x1b0] sm:$0xff] }
0x1184   : > { %v5534_v12 = vpop.f32.mrf.mxu1 }
0x1185   : > { %v5535_v25 = vadd.f32 %v5534_v12, %v5515_v34  ;;  %v5674_v34 = vpop.f32.mrf.mxu0 }
0x1186   : > { %v5675_v41 = vadd.f32 %v5674_v34, %v5655_v37  ;;  %v5949_v37 = vld [vmem:[#allocation31 + $0x1c0] sm:$0xff] }
0x1187   : > { %v5777_v42 = vsub.f32 0.0, %v5535_v25  ;;  %v5714_v34 = vpop.f32.mrf.mxu2 }
0x1189   : > { %v5781_v40 = vmul.f32 1.442695, %v5777_v42 }
0x118b   : > { %7389 = vpow2.f32 %v5781_v40  ;;  %v5930_v40 = vld [vmem:[#allocation31 + $0x128] sm:$0xff] }
0x118c   : > { %v5614_v63 = vpop.f32.mrf.mxu1  ;;  %6011 = vmatpush.msrb.mxu0 %v5930_v40 }
0x118d   : > { %v5615_v46 = vadd.f32 %v5614_v63, %v5595_v23 }
0x118e   : > { %6012 = vmatpush.msrb.mxu0 %v5929_v45 }
0x118f   : > { %v5778_v43 = vsub.f32 0.0, %v5615_v46  ;;  %v5877_v46 = vperm.slane %v11000_v44, 0 }
0x1190   : > { %6013 = vmatpush.msrb.mxu0 %v5928_v56 }
0x1191   : > { %v7390_v48 = vpop.eup %7389  ;;  %v5783_v33 = vmul.f32 1.442695, %v5778_v43 }
0x1192   : > { %v5789_v47 = vadd.f32 1.0, %v7390_v48 }
0x1193   : > { %7391 = vpow2.f32 %v5783_v33  ;;  %v5927_v33 = vld [vmem:[#allocation31 + $0x110] sm:$0xff] }
0x1194   : > { %7393 = vrcp.f32 %v5789_v47  ;;  %v5804_v29 = vand.u32 2147483648, %v5789_v47  ;;  %v5802_v8 = vand.u32 2147483647, %v5789_v47  ;;  %vm5798_vm13 = vweird.f32 %v5789_v47  ;;  %6014 = vmatpush.msrb.mxu0 %v5927_v33 }
0x1196   : > { %v5805_v25 = vor.u32 1.1754944e-38, %v5804_v29  ;;  %vm5803_vm15 = vcmp.eq.f32.partialorder %v5802_v8, 8.507059e+37  ;;  %6015 = vmatpush.msrb.mxu0 %v5926_v4  ;;  %v5951_v29 = vld [vmem:[#allocation31 + $0x1d0] sm:$0xff]  ;;  %v5950_v8 = vld [vmem:[#allocation31 + $0x1c8] sm:$0xff] }
0x1198   : > { %6016 = vmatpush.msrb.mxu0 %v5925_v13 }
0x1199   : > { %v7392_v55 = vpop.eup %7391 }
0x119a   : > { %v7394_v61 = vpop.eup %7393  ;;  %v10992_v49 = vadd.f32 1.0, %v7392_v55 }
0x119b   : > { %v5794_v58 = vmul.f32 %v7394_v61, %v5789_v47  ;;  %vm5799_vm12 = vweird.f32 %v7394_v61 }
0x119c   : > { %7395 = vrcp.f32 %v10992_v49  ;;  %vm5800_vm14 = vmor %vm5798_vm13, %vm5799_vm12  ;;  %v5817_v26 = vand.u32 2147483647, %v10992_v49  ;;  %v5819_v63 = vand.u32 2147483648, %v10992_v49  ;;  %vm5813_vm2 = vweird.f32 %v10992_v49 }
0x119d   : > { %v5795_v28 = vsub.f32 1.0, %v5794_v58  ;;  %v5955_v58 = vld [vmem:[#allocation31 + $0x1f0] sm:$0xff] }
0x119e   : > { %v5820_v48 = vor.u32 1.1754944e-38, %v5819_v63  ;;  %vm5818_vm4 = vcmp.eq.f32.partialorder %v5817_v26, 8.507059e+37  ;;  %v2929_v63 = vadd.f32 %v10457_v59, %v10272_v22  ;;  %v5941_v59 = vld [vmem:[#allocation31 + $0x180] sm:$0xff] }
0x119f   : > { %v5796_v24 = vmul.f32 %v7394_v61, %v5795_v28  ;;  %v5953_v28 = vld [vmem:[#allocation31 + $0x1e0] sm:$0xff] }
0x11a1   : > { %v5797_v39 = vadd.f32 %v7394_v61, %v5796_v24 }
0x11a2   : > { %v7396_v12 = vpop.eup %7395 }
0x11a3   : > { %v5801_v27 = vsel %vm5800_vm14, %v7394_v61, %v5797_v39  ;;  %v5809_v42 = vmul.f32 %v7396_v12, %v10992_v49  ;;  %vm5814_vm1 = vweird.f32 %v7396_v12  ;;  %v5878_v61 = vperm.slane %v11000_v44, 1  ;;  %v5956_v49 = vld [vmem:[#allocation31 + $0x1f8] sm:$0xff]  ;;  %v5734_v39 = vpop.f32.mrf.mxu3 }
0x11a4   : > { %v5694_v14 = vpop.f32.mrf.mxu1  ;;  %v5806_v51 = vsel %vm5803_vm15, %v5805_v25, %v5801_v27  ;;  %vm5815_vm3 = vmor %vm5813_vm2, %vm5814_vm1  ;;  %6021 = vmatpush.msra.mxu1 %v5956_v49  ;;  %v5715_v25 = vadd.f32 %v5714_v34, %v5452_v30  ;;  %v6205_v30 = vld [vmem:[#allocation28 + $0x178] sm:$0xff]  ;;  %v6202_v34 = vld [vmem:[#allocation28 + $0x160] sm:$0xff] }
0x11a5   : > { %v5810_v57 = vsub.f32 1.0, %v5809_v42  ;;  %v5695_v19 = vadd.f32 %v5694_v14, %v5675_v41  ;;  %v5853_v23 = vadd.f32 1.0, %v5806_v51  ;;  %v5948_v41 = vld [vmem:[#allocation31 + $0x1b8] sm:$0xff]  ;;  %v5754_v42 = vpop.f32.mrf.mxu0  ;;  %v5946_v51 = vld [vmem:[#allocation31 + $0x1a8] sm:$0xff] }
0x11a6   : > { %6022 = vmatpush.msra.mxu1 %v5955_v58 }
0x11a7   : > { %v5811_v52 = vmul.f32 %v7396_v12, %v5810_v57  ;;  %v5779_v43 = vsub.f32 0.0, %v5695_v19  ;;  %v11008_v0 = vmul.f32 %v5853_v23, %v2889_v50  ;;  %v5735_v50 = vadd.f32 %v5734_v39, %v5715_v25  ;;  %v5945_v23 = vld [vmem:[#allocation31 + $0x1a0] sm:$0xff] }
0x11a8   : > { %6023 = vmatpush.msra.mxu1 %v5954_v53  ;;  %v5866_v53 = vperm.slane %v10997_v16, 3 }
0x11a9   : > { %v5812_v1 = vadd.f32 %v7396_v12, %v5811_v52  ;;  %v5785_v32 = vmul.f32 1.442695, %v5779_v43  ;;  %v5871_v6 = vmul.f32 %v5863_v62, %v11008_v0  ;;  %v5755_v19 = vadd.f32 %v5754_v42, %v5735_v50  ;;  %v5944_v43 = vld [vmem:[#allocation31 + $0x198] sm:$0xff] }
0x11aa   : > { %6024 = vmatpush.msra.mxu1 %v5953_v28  ;;  %v5865_v52 = vperm.slane %v10997_v16, 2  ;;  %v5880_v28 = vperm.slane %v11000_v44, 3  ;;  %v6201_v16 = vld [vmem:[#allocation28 + $0x158] sm:$0xff] }
0x11ab   : > { %v5816_v17 = vsel %vm5815_vm3, %v7396_v12, %v5812_v1  ;;  %7397 = vpow2.f32 %v5785_v32  ;;  %v5885_v47 = vadd.f32 %v5877_v46, %v5871_v6  ;;  %v5879_v32 = vperm.slane %v11000_v44, 2  ;;  %v5943_v6 = vld [vmem:[#allocation31 + $0x190] sm:$0xff] }
0x11ac   : > { %v5821_v2 = vsel %vm5818_vm4, %v5820_v48, %v5816_v17  ;;  %6025 = vmatpush.msra.mxu1 %v5952_v7  ;;  %v5942_v17 = vld [vmem:[#allocation31 + $0x188] sm:$0xff]  ;;  %v6197_v42 = vld [vmem:[#allocation28 + $0x138] sm:$0xff] }
0x11ad   : > { %v5889_v9 = vmax.f32 %v5885_v47, 0.0  ;;  %v5854_v10 = vadd.f32 1.0, %v5821_v2 }
0x11ae   : > { %6026 = vmatpush.msra.mxu1 %v5951_v29 }
0x11af   : > { %5977 = vmatmul.f32.vlgmr.msrb.gmra.mxu2 %v5889_v9  ;;  %v11015_v55 = vmul.f32 %v5854_v10, %v2909_v5 }
0x11b0   : > { %6027 = vmatpush.msra.mxu1 %v5950_v8  ;;  %v6203_v8 = vld [vmem:[#allocation28 + $0x168] sm:$0xff] }
0x11b1   : > { %v7398_v36 = vpop.eup %7397  ;;  %v5872_v11 = vmul.f32 %v5864_v60, %v11015_v55 }
0x11b2   : > { %v5791_v15 = vadd.f32 1.0, %v7398_v36  ;;  %6028 = vmatpush.msra.mxu1 %v5949_v37  ;;  %v6200_v37 = vld [vmem:[#allocation28 + $0x150] sm:$0xff] }
0x11b3   : > { %v5886_v18 = vadd.f32 %v5878_v61, %v5872_v11 }
0x11b4   : > { %7399 = vrcp.f32 %v5791_v15  ;;  %v5834_v12 = vand.u32 2147483648, %v5791_v15  ;;  %v5832_v27 = vand.u32 2147483647, %v5791_v15  ;;  %6029 = vmatpush.msra.mxu1 %v5948_v41  ;;  %vm5828_vm6 = vweird.f32 %v5791_v15 }
0x11b5   : > { %v5890_v21 = vmax.f32 %v5886_v18, 0.0 }
0x11b6   : > { %v5835_v40 = vor.u32 1.1754944e-38, %v5834_v12  ;;  %6030 = vmatpush.msra.mxu1 %v5947_v54  ;;  %vm5833_vm8 = vcmp.eq.f32.partialorder %v5832_v27, 8.507059e+37  ;;  %v6199_v12 = vld [vmem:[#allocation28 + $0x148] sm:$0xff] }
0x11b7   : > { %5997 = vmatmul.f32.vlgmr.msrb.gmra.mxu3 %v5890_v21 }
0x11b8   : > { %6031 = vmatpush.msra.mxu1 %v5946_v51  ;;  %v6042_v51 = vld [vmem:[%s11611_s23] sm:$0xff] }
0x11ba   : > { %v7400_v31 = vpop.eup %7399  ;;  %6032 = vmatpush.msra.mxu1 %v5945_v23  ;;  %v6081_v23 = vld [vmem:[#allocation28 + $0x78] sm:$0xff] }
0x11bb   : > { %v5824_v24 = vmul.f32 %v7400_v31, %v5791_v15  ;;  %vm5829_vm5 = vweird.f32 %v7400_v31  ;;  %v2949_v15 = vadd.f32 %v10459_v38, %v10256_v3  ;;  %v7387_v3 = vld [vmem:[#allocation25] ss:$0 sm:$0xff] }
0x11bc   : > { %vm5830_vm7 = vmor %vm5828_vm6, %vm5829_vm5  ;;  %6033 = vmatpush.msra.mxu1 %v5944_v43  ;;  %v6078_v43 = vld [vmem:[#allocation28 + $0x60] sm:$0xff] }
0x11bd   : > { %v5825_v35 = vsub.f32 1.0, %v5824_v24  ;;  %v6204_v24 = vld [vmem:[#allocation28 + $0x170] sm:$0xff] }
0x11be   : > { %6034 = vmatpush.msra.mxu1 %v5943_v6  ;;  %v6118_v6 = vld [vmem:[#allocation28 + $0xd0] sm:$0xff] }
0x11bf   : > { %v5826_v20 = vmul.f32 %v7400_v31, %v5825_v35 }
0x11c0   : > { %6035 = vmatpush.msra.mxu1 %v5942_v17  ;;  %v6075_v17 = vld [vmem:[#allocation28 + $0x48] sm:$0xff] }
0x11c1   : > { %v5827_v14 = vadd.f32 %v7400_v31, %v5826_v20  ;;  %v6198_v20 = vld [vmem:[#allocation28 + $0x140] sm:$0xff] }
0x11c2   : > { %6036 = vmatpush.msra.mxu1 %v5941_v59  ;;  %v6074_v59 = vld [vmem:[#allocation28 + $0x40] sm:$0xff] }
0x11c3   : > { %v5831_v57 = vsel %vm5830_vm7, %v7400_v31, %v5827_v14  ;;  %v6196_v14 = vld [vmem:[#allocation28 + $0x130] sm:$0xff] }
0x11c4   : > { %v5774_v62 = vpop.f32.mrf.mxu1  ;;  %v5836_v26 = vsel %vm5833_vm8, %v5835_v40, %v5831_v57  ;;  %6206 = vmatpush.msrb.mxu1 %v6205_v30  ;;  %v6993_v40 = vld [vmem:[%s11611_s23 + $0x8] sm:$0xff]  ;;  %v6995_v57 = vld [vmem:[%s11611_s23 + $0x10] sm:$0xff] }
0x11c5   : > { %v5775_v46 = vadd.f32 %v5774_v62, %v5755_v19  ;;  %v5855_v45 = vadd.f32 1.0, %v5836_v26  ;;  %v6123_v19 = vld [vmem:[#allocation28 + $0xf8] sm:$0xff]  ;;  %v6195_v62 = vld [vmem:[#allocation28 + $0x128] sm:$0xff]  ;;  %v6122_v26 = vld [vmem:[#allocation28 + $0xf0] sm:$0xff] }
0x11c6   : > { %6207 = vmatpush.msrb.mxu1 %v6204_v24  ;;  %v6294_v30 = vld [vmem:[#allocation33 + $0x1e8] sm:$0xff]  ;;  %v6295_v24 = vld [vmem:[#allocation33 + $0x1f0] sm:$0xff] }
0x11c7   : > { %v5780_v56 = vsub.f32 0.0, %v5775_v46  ;;  %v11023_v1 = vmul.f32 %v5855_v45, %v2929_v63  ;;  %v6080_v63 = vld [vmem:[#allocation28 + $0x70] sm:$0xff]  ;;  %v6121_v46 = vld [vmem:[#allocation28 + $0xe8] sm:$0xff] }
0x11c8   : > { %6208 = vmatpush.msrb.mxu1 %v6203_v8  ;;  %v6079_v45 = vld [vmem:[#allocation28 + $0x68] sm:$0xff] }
0x11c9   : > { %v5787_v48 = vmul.f32 1.442695, %v5780_v56  ;;  %v5873_v33 = vmul.f32 %v5865_v52, %v11023_v1  ;;  %v6120_v52 = vld [vmem:[#allocation28 + $0xe0] sm:$0xff]  ;;  %v6119_v56 = vld [vmem:[#allocation28 + $0xd8] sm:$0xff] }
0x11ca   : > { %6209 = vmatpush.msrb.mxu1 %v6202_v34  ;;  %v6289_v8 = vld [vmem:[#allocation33 + $0x1c0] sm:$0xff] }
0x11cb   : > { %7401 = vpow2.f32 %v5787_v48  ;;  %v5887_v22 = vadd.f32 %v5879_v32, %v5873_v33  ;;  %v6077_v32 = vld [vmem:[#allocation28 + $0x58] sm:$0xff]  ;;  %v6076_v48 = vld [vmem:[#allocation28 + $0x50] sm:$0xff]  ;;  %v6117_v33 = vld [vmem:[#allocation28 + $0xc8] sm:$0xff] }
0x11cc   : > { %6210 = vmatpush.msrb.mxu1 %v6201_v16  ;;  %v6191_v34 = vld [vmem:[#allocation28 + $0x108] sm:$0xff] }
0x11cd   : > { %v5891_v47 = vmax.f32 %v5887_v22, 0.0  ;;  %v6116_v22 = vld [vmem:[#allocation28 + $0xc0] sm:$0xff] }
0x11ce   : > { %6211 = vmatpush.msrb.mxu1 %v6200_v37  ;;  %v6285_v16 = vld [vmem:[#allocation33 + $0x1a0] sm:$0xff]  ;;  %v6287_v37 = vld [vmem:[#allocation33 + $0x1b0] sm:$0xff] }
0x11cf   : > { %6017 = vmatmul.f32.vlgmr.msrb.gmra.mxu0 %v5891_v47  ;;  %v6115_v47 = vld [vmem:[#allocation28 + $0xb8] sm:$0xff] }
0x11d0   : > { %6212 = vmatpush.msrb.mxu1 %v6199_v12  ;;  %v6296_v12 = vld [vmem:[#allocation33 + $0x1f8] sm:$0xff] }
0x11d1   : > { %v7402_v2 = vpop.eup %7401 }
0x11d2   : > { %v5792_v4 = vadd.f32 1.0, %v7402_v2  ;;  %6213 = vmatpush.msrb.mxu1 %v6198_v20  ;;  %v6073_v2 = vld [vmem:[#allocation28 + $0x38] sm:$0xff] }
0x11d3   : > { %v6283_v20 = vld [vmem:[#allocation33 + $0x190] sm:$0xff] }
0x11d4   : > { %7403 = vrcp.f32 %v5792_v4  ;;  %v5849_v60 = vand.u32 2147483648, %v5792_v4  ;;  %v5847_v61 = vand.u32 2147483647, %v5792_v4  ;;  %vm5843_vm10 = vweird.f32 %v5792_v4  ;;  %6214 = vmatpush.msrb.mxu1 %v6197_v42  ;;  %v6278_v42 = vld [vmem:[#allocation33 + $0x168] sm:$0xff] }
0x11d6   : > { %v5850_v36 = vor.u32 1.1754944e-38, %v5849_v60  ;;  %vm5848_vm12 = vcmp.eq.f32.partialorder %v5847_v61, 8.507059e+37  ;;  %6215 = vmatpush.msrb.mxu1 %v6196_v14  ;;  %v6112_v60 = vld [vmem:[#allocation28 + $0xa0] sm:$0xff]  ;;  %v6111_v61 = vld [vmem:[#allocation28 + $0x98] sm:$0xff] }
0x11d7   : > { %v6273_v14 = vld [vmem:[#allocation33 + $0x140] sm:$0xff] }
0x11d8   : > { %6216 = vmatpush.msrb.mxu1 %v6195_v62  ;;  %v6271_v62 = vld [vmem:[#allocation33 + $0x130] sm:$0xff] }
0x11da   : > { %v7404_v5 = vpop.eup %7403 }
0x11db   : > { %v5839_v9 = vmul.f32 %v7404_v5, %v5792_v4  ;;  %vm5844_vm9 = vweird.f32 %v7404_v5  ;;  %v6114_v4 = vld [vmem:[#allocation28 + $0xb0] sm:$0xff] }
0x11dc   : > { %vm5845_vm11 = vmor %vm5843_vm10, %vm5844_vm9 }
0x11dd   : > { %v5840_v10 = vsub.f32 1.0, %v5839_v9  ;;  %v6113_v9 = vld [vmem:[#allocation28 + $0xa8] sm:$0xff] }
0x11df   : > { %v5841_v13 = vmul.f32 %v7404_v5, %v5840_v10  ;;  %v6071_v10 = vld [vmem:[#allocation28 + $0x28] sm:$0xff] }
0x11e1   : > { %v5842_v49 = vadd.f32 %v7404_v5, %v5841_v13  ;;  %v6070_v13 = vld [vmem:[#allocation28 + $0x20] sm:$0xff] }
0x11e3   : > { %v5846_v11 = vsel %vm5845_vm11, %v7404_v5, %v5842_v49  ;;  %v6072_v5 = vld [vmem:[#allocation28 + $0x30] sm:$0xff]  ;;  %v6069_v49 = vld [vmem:[#allocation28 + $0x18] sm:$0xff] }
0x11e4   : > { %v5851_v58 = vsel %vm5848_vm12, %v5850_v36, %v5846_v11  ;;  %v6110_v36 = vld [vmem:[#allocation28 + $0x90] sm:$0xff] }
0x11e5   : > { %v5856_v18 = vadd.f32 1.0, %v5851_v58  ;;  %v6068_v11 = vld [vmem:[#allocation28 + $0x10] sm:$0xff]  ;;  %v6109_v58 = vld [vmem:[#allocation28 + $0x88] sm:$0xff] }
0x11e7   : > { %v11030_v21 = vmul.f32 %v5856_v18, %v2949_v15  ;;  %v6067_v15 = vld [vmem:[#allocation28 + $0x8] sm:$0xff]  ;;  %v6108_v18 = vld [vmem:[#allocation28 + $0x80] sm:$0xff] }
0x11e9   : > { %v5874_v7 = vmul.f32 %v5866_v53, %v11030_v21  ;;  %v6066_v53 = vld [vmem:[#allocation28] sm:$0xff] }
0x11eb   : > { %v5888_v29 = vadd.f32 %v5880_v28, %v5874_v7  ;;  %v6194_v28 = vld [vmem:[#allocation28 + $0x120] sm:$0xff]  ;;  %v6193_v7 = vld [vmem:[#allocation28 + $0x118] sm:$0xff] }
0x11ec   : > { %6217 = vmatpush.msrb.mxu1 %v6194_v28  ;;  %v6241_v28 = vld [vmem:[#allocation33 + $0x40] sm:$0xff] }
0x11ed   : > { %v5892_v31 = vmax.f32 %v5888_v29, 0.0  ;;  %v6192_v29 = vld [vmem:[#allocation28 + $0x110] sm:$0xff] }
0x11ee   : > { %6218 = vmatpush.msrb.mxu1 %v6193_v7  ;;  %v6242_v7 = vld [vmem:[#allocation33 + $0x48] sm:$0xff] }
0x11ef   : > { %6037 = vmatmul.f32.vlgmr.msra.gmra.mxu1 %v5892_v31  ;;  %v6293_v31 = vld [vmem:[#allocation33 + $0x1e0] sm:$0xff] }
0x11f0   : > { %6219 = vmatpush.msrb.mxu1 %v6192_v29  ;;  %v6243_v29 = vld [vmem:[#allocation33 + $0x50] sm:$0xff] }
0x11f2   : > { %6220 = vmatpush.msrb.mxu1 %v6191_v34  ;;  %v6240_v34 = vld [vmem:[#allocation33 + $0x38] sm:$0xff] }
0x1232   : > { %v5978_v38 = vpop.f32.mrf.mxu2 }
0x1233   : > { %v5979_v44 = vadd.f32 %v7387_v3, %v5978_v38  ;;  %v6290_v3 = vld [vmem:[#allocation33 + $0x1c8] sm:$0xff]  ;;  %v6291_v38 = vld [vmem:[#allocation33 + $0x1d0] sm:$0xff] }
0x123a   : > { %v5998_v35 = vpop.f32.mrf.mxu3 }
0x123b   : > { %v5999_v25 = vadd.f32 %v5998_v35, %v5979_v44  ;;  %v6286_v35 = vld [vmem:[#allocation33 + $0x1a8] sm:$0xff]  ;;  %v6190_v44 = vld [vmem:[#allocation28 + $0x100] sm:$0xff] }
0x123c   : > { %6221 = vmatpush.msrb.mxu1 %v6190_v44 }
0x123e   : > { %6357 = vmatpush.msra.mxu1 %v6296_v12 }
0x124c   : > { %v6018_v39 = vpop.f32.mrf.mxu0 }
0x124d   : > { %v6019_v27 = vadd.f32 %v6018_v39, %v5999_v25  ;;  %v6281_v39 = vld [vmem:[#allocation33 + $0x180] sm:$0xff]  ;;  %v6282_v25 = vld [vmem:[#allocation33 + $0x188] sm:$0xff] }
0x126c   : > { %v6038_v41 = vpop.f32.mrf.mxu1 }
0x126d   : > { %v6039_v50 = vadd.f32 %v6038_v41, %v6019_v27  ;;  %v6277_v27 = vld [vmem:[#allocation33 + $0x160] sm:$0xff]  ;;  %v6292_v41 = vld [vmem:[#allocation33 + $0x1d8] sm:$0xff] }
0x126e   : > { %6358 = vmatpush.msra.mxu1 %v6292_v41 }
0x126f   : > { %v6041_v54 = vmax.f32 %v6039_v50, 0.0  ;;  %v6279_v50 = vld [vmem:[#allocation33 + $0x170] sm:$0xff] }
0x1271   : > { %6061 = vmatpush.msra.mxu2 %v6041_v54  ;;  %6102 = vmatpush.msra.mxu3 %v6041_v54 }
0x1272   : > { %6184 = vmatpush.msra.mxu0 %v6041_v54  ;;  %6992 = vmatmul.msk.f32.vlgmr.msra.gmra.mxu2 %vm2320_vm0, %v6042_v51  ;;  %v6288_v54 = vld [vmem:[#allocation33 + $0x1b8] sm:$0xff]  ;;  %v6274_v51 = vld [vmem:[#allocation33 + $0x148] sm:$0xff] }
0x1273   : > { %6994 = vmatmul.msk.f32.vlgmr.msra.gmra.mxu3 %vm2320_vm0, %v6993_v40  ;;  %6996 = vmatmul.msk.f32.vlgmr.msra.gmra.mxu0 %vm2320_vm0, %v6995_v57  ;;  %v6275_v40 = vld [vmem:[#allocation33 + $0x150] sm:$0xff]  ;;  %v6269_v57 = vld [vmem:[#allocation33 + $0x120] sm:$0xff] }
0x1274   : > { %6124 = vmatpush.msrb.mxu2 %v6123_v19  ;;  %6144 = vmatpush.msrb.mxu3 %v6081_v23  ;;  %v6284_v19 = vld [vmem:[#allocation33 + $0x198] sm:$0xff]  ;;  %v6270_v23 = vld [vmem:[#allocation33 + $0x128] sm:$0xff] }
0x1275   : > { %6297 = vmatpush.msrb.mxu0 %v6293_v31  ;;  %6359 = vmatpush.msra.mxu1 %v6288_v54  ;;  %v6244_v31 = vld [vmem:[#allocation33 + $0x58] sm:$0xff] }
0x1276   : > { %6125 = vmatpush.msrb.mxu2 %v6122_v26  ;;  %6145 = vmatpush.msrb.mxu3 %v6080_v63  ;;  %v6265_v26 = vld [vmem:[#allocation33 + $0x100] sm:$0xff]  ;;  %v6280_v63 = vld [vmem:[#allocation33 + $0x178] sm:$0xff] }
0x1277   : > { %6298 = vmatpush.msrb.mxu0 %v6289_v8  ;;  %6360 = vmatpush.msra.mxu1 %v6284_v19  ;;  %v6239_v8 = vld [vmem:[#allocation33 + $0x30] sm:$0xff] }
0x1278   : > { %6126 = vmatpush.msrb.mxu2 %v6121_v46  ;;  %6146 = vmatpush.msrb.mxu3 %v6079_v45  ;;  %v6266_v46 = vld [vmem:[#allocation33 + $0x108] sm:$0xff]  ;;  %v6267_v45 = vld [vmem:[#allocation33 + $0x110] sm:$0xff] }
0x1279   : > { %6299 = vmatpush.msrb.mxu0 %v6285_v16  ;;  %6361 = vmatpush.msra.mxu1 %v6280_v63  ;;  %v6235_v16 = vld [vmem:[#allocation33 + $0x10] sm:$0xff] }
0x127a   : > { %6127 = vmatpush.msrb.mxu2 %v6120_v52  ;;  %6147 = vmatpush.msrb.mxu3 %v6078_v43  ;;  %v6261_v52 = vld [vmem:[#allocation33 + $0xe0] sm:$0xff]  ;;  %v6276_v43 = vld [vmem:[#allocation33 + $0x158] sm:$0xff] }
0x127b   : > { %6300 = vmatpush.msrb.mxu0 %v6281_v39  ;;  %6362 = vmatpush.msra.mxu1 %v6276_v43 }
0x127c   : > { %6128 = vmatpush.msrb.mxu2 %v6119_v56  ;;  %6148 = vmatpush.msrb.mxu3 %v6077_v32  ;;  %v6262_v56 = vld [vmem:[#allocation33 + $0xe8] sm:$0xff]  ;;  %v6263_v32 = vld [vmem:[#allocation33 + $0xf0] sm:$0xff] }
0x127d   : > { %6301 = vmatpush.msrb.mxu0 %v6277_v27 }
0x127e   : > { %6129 = vmatpush.msrb.mxu2 %v6118_v6  ;;  %6149 = vmatpush.msrb.mxu3 %v6076_v48  ;;  %v6257_v6 = vld [vmem:[#allocation33 + $0xc0] sm:$0xff]  ;;  %v6272_v48 = vld [vmem:[#allocation33 + $0x138] sm:$0xff] }
0x127f   : > { %6302 = vmatpush.msrb.mxu0 %v6273_v14  ;;  %6363 = vmatpush.msra.mxu1 %v6272_v48 }
0x1280   : > { %6130 = vmatpush.msrb.mxu2 %v6117_v33  ;;  %6150 = vmatpush.msrb.mxu3 %v6075_v17  ;;  %v6258_v33 = vld [vmem:[#allocation33 + $0xc8] sm:$0xff]  ;;  %v6259_v17 = vld [vmem:[#allocation33 + $0xd0] sm:$0xff] }
0x1281   : > { %6303 = vmatpush.msrb.mxu0 %v6269_v57 }
0x1282   : > { %6131 = vmatpush.msrb.mxu2 %v6116_v22  ;;  %6151 = vmatpush.msrb.mxu3 %v6074_v59  ;;  %v6253_v22 = vld [vmem:[#allocation33 + $0xa0] sm:$0xff]  ;;  %v6268_v59 = vld [vmem:[#allocation33 + $0x118] sm:$0xff] }
0x1283   : > { %6304 = vmatpush.msrb.mxu0 %v6265_v26  ;;  %6364 = vmatpush.msra.mxu1 %v6268_v59 }
0x1284   : > { %6132 = vmatpush.msrb.mxu2 %v6115_v47  ;;  %6152 = vmatpush.msrb.mxu3 %v6073_v2  ;;  %v6254_v47 = vld [vmem:[#allocation33 + $0xa8] sm:$0xff]  ;;  %v6255_v2 = vld [vmem:[#allocation33 + $0xb0] sm:$0xff] }
0x1285   : > { %6305 = vmatpush.msrb.mxu0 %v6261_v52 }
0x1286   : > { %6133 = vmatpush.msrb.mxu2 %v6114_v4  ;;  %6153 = vmatpush.msrb.mxu3 %v6072_v5  ;;  %v6264_v4 = vld [vmem:[#allocation33 + $0xf8] sm:$0xff] }
0x1287   : > { %6306 = vmatpush.msrb.mxu0 %v6257_v6  ;;  %v6260_v5 = vld [vmem:[#allocation33 + $0xd8] sm:$0xff]  ;;  %6365 = vmatpush.msra.mxu1 %v6264_v4 }
0x1288   : > { %6134 = vmatpush.msrb.mxu2 %v6113_v9  ;;  %6154 = vmatpush.msrb.mxu3 %v6071_v10  ;;  %v6256_v10 = vld [vmem:[#allocation33 + $0xb8] sm:$0xff] }
0x1289   : > { %6307 = vmatpush.msrb.mxu0 %v6253_v22  ;;  %6366 = vmatpush.msra.mxu1 %v6260_v5 }
0x128a   : > { %6135 = vmatpush.msrb.mxu2 %v6112_v60  ;;  %6155 = vmatpush.msrb.mxu3 %v6070_v13 }
0x128b   : > { %6367 = vmatpush.msra.mxu1 %v6256_v10 }
0x128c   : > { %6136 = vmatpush.msrb.mxu2 %v6111_v61  ;;  %6156 = vmatpush.msrb.mxu3 %v6069_v49  ;;  %v6249_v61 = vld [vmem:[#allocation33 + $0x80] sm:$0xff]  ;;  %v6250_v49 = vld [vmem:[#allocation33 + $0x88] sm:$0xff] }
0x128d   : > { %6308 = vmatpush.msrb.mxu0 %v6249_v61 }
0x128e   : > { %6137 = vmatpush.msrb.mxu2 %v6110_v36  ;;  %6157 = vmatpush.msrb.mxu3 %v6068_v11  ;;  %v6251_v36 = vld [vmem:[#allocation33 + $0x90] sm:$0xff]  ;;  %v6252_v11 = vld [vmem:[#allocation33 + $0x98] sm:$0xff] }
0x128f   : > { %6368 = vmatpush.msra.mxu1 %v6252_v11 }
0x1290   : > { %6138 = vmatpush.msrb.mxu2 %v6109_v58  ;;  %6158 = vmatpush.msrb.mxu3 %v6067_v15  ;;  %v6245_v58 = vld [vmem:[#allocation33 + $0x60] sm:$0xff]  ;;  %v6246_v15 = vld [vmem:[#allocation33 + $0x68] sm:$0xff] }
0x1291   : > { %6309 = vmatpush.msrb.mxu0 %v6245_v58 }
0x1292   : > { %6139 = vmatpush.msrb.mxu2 %v6108_v18  ;;  %6159 = vmatpush.msrb.mxu3 %v6066_v53  ;;  %v6247_v18 = vld [vmem:[#allocation33 + $0x70] sm:$0xff]  ;;  %v6248_v53 = vld [vmem:[#allocation33 + $0x78] sm:$0xff] }
0x1293   : > { %6369 = vmatpush.msra.mxu1 %v6248_v53  ;;  %6310 = vmatpush.msrb.mxu0 %v6241_v28 }
0x1294   : > { %6317 = vmatpush.msra.mxu2 %v6294_v30  ;;  %6337 = vmatpush.msra.mxu3 %v6295_v24  ;;  %v6237_v30 = vld [vmem:[#allocation33 + $0x20] sm:$0xff]  ;;  %v6238_v24 = vld [vmem:[#allocation33 + $0x28] sm:$0xff] }
0x1295   : > { %6370 = vmatpush.msra.mxu1 %v6244_v31  ;;  %6311 = vmatpush.msrb.mxu0 %v6237_v30 }
0x1296   : > { %6318 = vmatpush.msra.mxu2 %v6290_v3  ;;  %6338 = vmatpush.msra.mxu3 %v6291_v38  ;;  %v6233_v3 = vld [vmem:[#allocation33] sm:$0xff]  ;;  %v6234_v38 = vld [vmem:[#allocation33 + $0x8] sm:$0xff] }
0x1297   : > { %6371 = vmatpush.msra.mxu1 %v6240_v34  ;;  %6312 = vmatpush.msrb.mxu0 %v6233_v3 }
0x1298   : > { %6319 = vmatpush.msra.mxu2 %v6286_v35  ;;  %6339 = vmatpush.msra.mxu3 %v6287_v37  ;;  %v6236_v35 = vld [vmem:[#allocation33 + $0x18] sm:$0xff] }
0x1299   : > { %6372 = vmatpush.msra.mxu1 %v6236_v35 }
0x129a   : > { %6320 = vmatpush.msra.mxu2 %v6282_v25  ;;  %6340 = vmatpush.msra.mxu3 %v6283_v20  ;;  %v7388_v25 = vld [vmem:[#allocation27] ss:$0 sm:$0xff] }
0x129c   : > { %6321 = vmatpush.msra.mxu2 %v6278_v42  ;;  %6341 = vmatpush.msra.mxu3 %v6279_v50 }
0x129e   : > { %6322 = vmatpush.msra.mxu2 %v6274_v51  ;;  %6342 = vmatpush.msra.mxu3 %v6275_v40 }
0x12a0   : > { %6323 = vmatpush.msra.mxu2 %v6270_v23  ;;  %6343 = vmatpush.msra.mxu3 %v6271_v62 }
0x12a2   : > { %6324 = vmatpush.msra.mxu2 %v6266_v46  ;;  %6344 = vmatpush.msra.mxu3 %v6267_v45 }
0x12a4   : > { %6325 = vmatpush.msra.mxu2 %v6262_v56  ;;  %6345 = vmatpush.msra.mxu3 %v6263_v32 }
0x12a6   : > { %6326 = vmatpush.msra.mxu2 %v6258_v33  ;;  %6346 = vmatpush.msra.mxu3 %v6259_v17 }
0x12a8   : > { %6327 = vmatpush.msra.mxu2 %v6254_v47  ;;  %6347 = vmatpush.msra.mxu3 %v6255_v2 }
0x12aa   : > { %6328 = vmatpush.msra.mxu2 %v6250_v49  ;;  %6348 = vmatpush.msra.mxu3 %v6251_v36 }
0x12ac   : > { %6329 = vmatpush.msra.mxu2 %v6246_v15  ;;  %6349 = vmatpush.msra.mxu3 %v6247_v18 }
0x12ae   : > { %6330 = vmatpush.msra.mxu2 %v6242_v7  ;;  %6350 = vmatpush.msra.mxu3 %v6243_v29 }
0x12b0   : > { %6331 = vmatpush.msra.mxu2 %v6238_v24  ;;  %6351 = vmatpush.msra.mxu3 %v6239_v8 }
0x12b2   : > { %6332 = vmatpush.msra.mxu2 %v6234_v38  ;;  %6352 = vmatpush.msra.mxu3 %v6235_v16 }
0x12f0   : > { %v6186_v9 = vpop.f32.mrf.mxu0 }
0x12f1   : > { %6222 = vmatmul.f32.vlgmr.msrb.gmra.mxu1 %v6186_v9 }
0x12f5   : > { %v6063_v60 = vpop.f32.mrf.mxu2 }
0x12f6   : > { %v6104_v13 = vpop.f32.mrf.mxu3  ;;  %6160 = vmatmul.f32.vlgmr.msrb.gmra.mxu3 %v6063_v60 }
0x12f7   : > { %6140 = vmatmul.f32.vlgmr.msrb.gmra.mxu2 %v6104_v13 }
0x136e   : > { %v6223_v39 = vpop.f32.mrf.mxu1 }
0x1379   : > { %v6161_v37 = vpop.f32.mrf.mxu3 }
0x137a   : > { %v6141_v44 = vpop.f32.mrf.mxu2 }
0x137b   : > { %v6162_v12 = vadd.f32 %v6161_v37, %v6141_v44 }
0x137d   : > { %v6226_v20 = vadd.f32 %v6223_v39, %v6162_v12 }
0x137f   : > { %v6231_v27 = vadd.f32 %v7388_v25, %v6226_v20 }
0x1381   : > { %v6232_v41 = vmax.f32 %v6231_v27, 0.0 }
0x1383   : > { %6313 = vmatmul.f32.vlgmr.msrb.gmra.mxu0 %v6232_v41  ;;  %6333 = vmatmul.f32.vlgmr.msra.gmra.mxu2 %v6232_v41 }
0x1384   : > { %6353 = vmatmul.f32.vlgmr.msra.gmra.mxu3 %v6232_v41  ;;  %6373 = vmatmul.f32.vlgmr.msra.gmra.mxu1 %v6232_v41 }
0x1400   : > { %v6314_v42 = vpop.f32.mrf.mxu0 }
0x1401   : > { %v6315_v50 = vadd.f32 %v6314_v42, %v11008_v0  ;;  %v6374_v14 = vpop.f32.mrf.mxu1 }
0x1402   : > { %v6375_v54 = vadd.f32 %v6374_v14, %v11030_v21 }
0x1403   : > { %6377 = vst [vmem:[%s2133_s13] sm:$0xff] %v6315_v50 }
0x1404   : > { %6380 = vst [vmem:[%s2133_s13 + $0x18] sm:$0xff] %v6375_v54 }
0x1406   : > { %v6334_v51 = vpop.f32.mrf.mxu2 }
0x1407   : > { %v6335_v40 = vadd.f32 %v6334_v51, %v11015_v55  ;;  %v6354_v57 = vpop.f32.mrf.mxu3 }
0x1408   : > { %v6355_v19 = vadd.f32 %v6354_v57, %v11023_v1 }
0x1409   : > { %6378 = vst [vmem:[%s2133_s13 + $0x8] sm:$0xff] %v6335_v40 }
0x140a   : > { %6379 = vst [vmem:[%s2133_s13 + $0x10] sm:$0xff] %v6355_v19 }
0x140b PF: > { %s134_s0 = sadd.s32 1, %s8619_s0  }
0x140c   : > { %p131_p3 = scmp.ge.s32.totalorder %s134_s0, 4  }
0x140e   :  { %133 = sbr.rel (!%p131_p3) target bundleno = 118 (0x76), region = 486 }
0x1413   :  { %6402 = vsyncpa [#allocation3], 1 }
0x1414   :  { %6404 = vsyncpa [#allocation3 + $0x1], 1 }
0x1415   :  { %6405 = vsyncpa [#allocation5], 1 }
0x1416   :  { %6406 = vsyncpa [#allocation8], 1 }
0x1417   :  { %6407 = vsyncpa [#allocation11], 1 }
0x1418   :  { %6408 = vsyncpa [#allocation14], 1 }
0x1419   :  { %6409 = vsyncpa [#allocation17], 1 }
0x141a   :  { %6410 = vsyncpa [#allocation20], 1 }
0x141b   :  { %6411 = vsyncpa [#allocation23], 1 }
0x141c   :  { %6412 = vsyncpa [#allocation26], 1 }
0x141d   :  { %6413 = vsyncpa [#allocation29], 1 }
0x141e   :  { %6414 = vsyncpa [#allocation32], 1 }
0x141f   :  { %6415 = vsyncpa [#allocation35], 1 }
0x1420   :  { %6416 = vsyncpa [#allocation38], 1 }
0x1421   :  { %6417 = vsyncpa [#allocation41], 1 }
0x1422   :  { %6418 = vsyncpa [#allocation44], 1 }
0x1423   :  { %6419 = vsyncpa [#allocation47], 1 }
0x1424   :  { %6420 = vsyncpa [#allocation50], 1 }
0x1425   :  { %6421 = vsyncpa [#allocation53], 1 }
0x1426   :  { %6422 = vsyncpa [#allocation56], 1 }
0x1427   :  { %6423 = vsyncpa [#allocation59], 1 }
0x1428   :  { %6424 = vsyncpa [#allocation62], 1 }

</bundles_post_ra>
